<compile_context>
chip_gen: v7x
topology: tpu7x:2x2x1
jax: 0.10.0
libtpu: 0.0.40
codegen_flags: <defaults>
</compile_context>

<pallas_src>
import functools

import numpy as np

import jax
import jax.numpy as jnp
from jax import lax
from jax.experimental import pallas as pl
from jax.experimental.pallas import tpu as pltpu

KK = 16  # 4x4 kernel -> 16 tap positions


# ---------------------------------------------------------------------------
# Trace-time helpers (run once in prepare_params, NOT per forward call)
# ---------------------------------------------------------------------------
def _batched_gather_matrix(h, w, batch, k=4, s=2, p=1):
    """0/1 selection matrix for Conv2d(k,s,p) window extraction, batched.

    Row (pos*B*OH*OW + n*OH*OW + oh*OW + ow) has a single 1 at column
    (n*H*W + ih*W + iw) where (ih, iw) = (oh*s - p + kh, ow*s - p + kw);
    out-of-range taps give an all-zero row (== zero padding).
    """
    oh = (h + 2 * p - k) // s + 1
    ow = (w + 2 * p - k) // s + 1
    g = np.zeros((k * k, batch, oh * ow, batch, h * w), np.float32)
    for kh in range(k):
        for kw in range(k):
            pos = kh * k + kw
            for i in range(oh):
                for j in range(ow):
                    ih = i * s - p + kh
                    iw = j * s - p + kw
                    if 0 <= ih < h and 0 <= iw < w:
                        for n in range(batch):
                            g[pos, n, i * ow + j, n, ih * w + iw] = 1.0
    return g.reshape(k * k * batch * oh * ow, batch * h * w), oh, ow


def _block_diag(a, b):
    za = jnp.zeros((a.shape[0], b.shape[1]), a.dtype)
    zb = jnp.zeros((b.shape[0], a.shape[1]), b.dtype)
    top = jnp.concatenate([a, za], axis=1)
    bot = jnp.concatenate([zb, b], axis=1)
    return jnp.concatenate([top, bot], axis=0)


def prepare_params(params, img_shape, batch_size):
    """One-time preprocessing of torch-layout params into kernel-ready arrays."""
    cin, h, w = img_shape
    cin_pad = max(8, ((cin + 7) // 8) * 8)  # pad 3 -> 8 so KK*cin_pad == 128

    conv_args = []
    cur_h, cur_w, cur_cin, cur_pad = h, w, cin, cin_pad
    for li, (wt, bi) in enumerate(params["convs"]):
        cout = wt.shape[0]
        g, oh, ow = _batched_gather_matrix(cur_h, cur_w, batch_size)
        # torch OIHW -> (kh*kw, cin, cout); fold /255.0 into the first layer.
        wmat = jnp.transpose(wt, (2, 3, 1, 0)).reshape(KK, cur_cin, cout)
        if li == 0:
            wmat = wmat * (1.0 / 255.0)
        if cur_pad > cur_cin:
            wmat = jnp.pad(wmat, ((0, 0), (0, cur_pad - cur_cin), (0, 0)))
        conv_args += [
            jnp.asarray(g),                       # [KK*B*OH*OW, B*H*W]
            wmat.reshape(KK * cur_pad, cout),     # [KK*Cin_pad, Cout]
            bi.reshape(1, cout),                  # [1, Cout]
        ]
        cur_h, cur_w, cur_cin, cur_pad = oh, ow, cout, cout

    # encoder.mu: torch flattens NCHW; reorder rows to the kernel's NHWC flatten
    # (identity when the final feature map is 1x1, as it is for 16x16 inputs).
    wmu, bmu = params["mu"]
    zdim = wmu.shape[1]
    wmu_nhwc = (
        wmu.reshape(cur_cin, cur_h, cur_w, zdim)
        .transpose(1, 2, 0, 3)
        .reshape(cur_h * cur_w * cur_cin, zdim)
    )

    # Merge policy and value heads: level 0 both read extractor_out (concat
    # weights), deeper levels are independent (block-diagonal weights).
    pol, val = params["policy"], params["value"]
    assert len(pol) == len(val), "merged-head path assumes equal policy/value depth"
    head_args = []
    for d, ((wp, bp), (wv, bv)) in enumerate(zip(pol, val)):
        if d == 0:
            wm = jnp.concatenate([wp, wv], axis=1)
        else:
            wm = _block_diag(wp, wv)
        bm = jnp.concatenate([bp, bv]).reshape(1, -1)
        head_args += [wm, bm]

    return dict(
        conv_args=conv_args,
        wmu=wmu_nhwc,
        bmu=bmu.reshape(1, zdim),
        head_args=head_args,
        cin=cin,
        cin_pad=cin_pad,
        n_layers=len(params["convs"]),
        head_depth=len(pol),
        n_pol=pol[-1][0].shape[1],
        n_val=val[-1][0].shape[1],
        batch_size=batch_size,
    )


# ---------------------------------------------------------------------------
# The fused Pallas kernel: conv trunk + encoder.mu + ReLU + merged heads
# ---------------------------------------------------------------------------
def fused_policy_kernel(*refs, n_batch, n_layers, head_depth, n_pol):
    o_ref = refs[-1]
    x_ref = refs[0]                                   # [B*H*W, Cin_pad] f32
    conv_refs = refs[1:1 + 3 * n_layers]
    wmu_ref = refs[1 + 3 * n_layers]
    bmu_ref = refs[2 + 3 * n_layers]
    head_refs = refs[3 + 3 * n_layers:-1]

    x = x_ref[...]                                    # rows ordered (n, h*W+w)
    for l in range(n_layers):
        g_ref, w_ref, b_ref = conv_refs[3 * l:3 * l + 3]
        bo = g_ref.shape[0] // KK                     # = B * OH*OW
        # batched window gather as one MXU matmul: [KK*B*OHW, B*HW] @ [B*HW, C]
        xg = jnp.dot(g_ref[...], x, preferred_element_type=jnp.float32)
        # re-arrange the KK row blocks into im2col columns: [B*OHW, KK*C]
        cols = jnp.concatenate(
            [xg[p * bo:(p + 1) * bo, :] for p in range(KK)], axis=1)
        # conv matmul + bias + ReLU for the whole batch (stays in VMEM/vregs)
        x = jnp.dot(cols, w_ref[...], preferred_element_type=jnp.float32)
        x = jnp.maximum(x + b_ref[...], 0.0)          # [B*OHW, Cout]

    # NHWC flatten of the final feature map (no-op for a 1x1 map).
    ohw_last = x.shape[0] // n_batch
    if ohw_last == 1:
        feat = x                                      # [B, C_last]
    else:
        feat = jnp.concatenate(
            [jnp.concatenate(
                [x[n * ohw_last + o: n * ohw_last + o + 1, :]
                 for o in range(ohw_last)], axis=1)
             for n in range(n_batch)], axis=0)        # [B, OHW*C_last]

    # encoder.mu followed by the shared_extractor ReLU.
    # TODO(synk): Encoder also returns z = eps*exp(logsd)+mu with eps~N(0,1);
    # BaselinePolicy only consumes mu, so z/logsd are not materialized here.
    h = jnp.dot(feat, wmu_ref[...], preferred_element_type=jnp.float32)
    h = jnp.maximum(h + bmu_ref[...], 0.0)            # [B, zdim]

    # merged policy/value heads (ReLU between levels, none after the last)
    for d in range(head_depth):
        w_ref, b_ref = head_refs[2 * d:2 * d + 2]
        h = jnp.dot(h, w_ref[...], preferred_element_type=jnp.float32) + b_ref[...]
        if d < head_depth - 1:
            h = jnp.maximum(h, 0.0)

    # softmax over the policy logits; value column passes through untouched.
    # (exact division kept so the sum-to-1 check holds to 1e-5; pl.reciprocal
    #  approx=True would loosen it.)
    logits = h[:, :n_pol]
    m = jnp.max(logits, axis=-1, keepdims=True)
    e = jnp.exp(logits - m)
    probs = e / jnp.sum(e, axis=-1, keepdims=True)
    o_ref[...] = jnp.concatenate([probs, h[:, n_pol:]], axis=1)


# ---------------------------------------------------------------------------
# Forward wrapper: one pallas_call, whole-array VMEM operands (no grid needed)
# ---------------------------------------------------------------------------
def baseline_policy_forward(prepped, observation, prev_action=None, prev_reward=None):
    # observation: [B, H, W, C] uint8 (lead_dim=1 -> T=1, B=batch)
    # TODO(synk): salt_and_pepper noise (noise_prob>0) is not implemented; the
    #             module default noise_prob=0 skips it.
    b, h, w, c = observation.shape
    assert b == prepped["batch_size"], "prepare_params was built for a different batch"
    x = observation.astype(jnp.float32).reshape(b * h * w, c)   # /255 folded into W1
    if prepped["cin_pad"] > c:
        x = jnp.pad(x, ((0, 0), (0, prepped["cin_pad"] - c)))

    n_pol, n_val = prepped["n_pol"], prepped["n_val"]
    kernel = functools.partial(
        fused_policy_kernel,
        n_batch=b,
        n_layers=prepped["n_layers"],
        head_depth=prepped["head_depth"],
        n_pol=n_pol,
    )
    args = (
        [x]
        + list(prepped["conv_args"])
        + [prepped["wmu"], prepped["bmu"]]
        + list(prepped["head_args"])
    )
    out = pl.pallas_call(
        kernel,
        out_shape=jax.ShapeDtypeStruct((b, n_pol + n_val), jnp.float32),
        # single invocation, every operand mapped whole into VMEM (no grid/specs)
        compiler_params=pltpu.CompilerParams(
            vmem_limit_bytes=32 * 1024 * 1024),
    )(*args)

    act_dist = out[:, :n_pol]
    value = out[:, n_pol:].squeeze(-1)
    # restore_leading_dims with lead_dim=1 -> shapes [B, n_act], [B]
    return act_dist, value


# ---------------------------------------------------------------------------
# Deterministic parameter construction (shapes mirror BaselinePolicy.__init__)
# ---------------------------------------------------------------------------
def init_params(key, img_shape, zdim, encoder_layers, policy_layers, value_layers):
    keys = iter(jax.random.split(key, 64))
    params = {}
    cin, h, _ = img_shape

    convs = []
    c = cin
    for hdim in encoder_layers:
        wk, bk = next(keys), next(keys)
        wgt = jax.random.normal(wk, (hdim, c, 4, 4), jnp.float32) / jnp.sqrt(c * 16.0)
        b = 0.01 * jax.random.normal(bk, (hdim,), jnp.float32)
        convs.append((wgt, b))
        c = hdim
    params["convs"] = convs

    C = (h // 2 ** len(encoder_layers)) ** 2
    flat = encoder_layers[-1] * C

    def lin(kin, kout):
        wk, bk = next(keys), next(keys)
        wgt = jax.random.normal(wk, (kin, kout), jnp.float32) / jnp.sqrt(float(kin))
        b = 0.01 * jax.random.normal(bk, (kout,), jnp.float32)
        return (wgt, b)

    params["mu"] = lin(flat, zdim)
    params["logsd"] = lin(flat, zdim)  # present in the module; unused by the output path

    pol, last = [], zdim
    for l in policy_layers:
        pol.append(lin(last, l)); last = l
    params["policy"] = pol

    val, last = [], zdim
    for l in value_layers:
        val.append(lin(last, l)); last = l
    params["value"] = val
    return params


# ---------------------------------------------------------------------------
# Pure-JAX reference (independent of the Pallas path) for validation
# ---------------------------------------------------------------------------
def reference_forward(params, observation):
    B = observation.shape[0]
    obs = observation.astype(jnp.float32) / 255.0
    x = obs.transpose(0, 3, 1, 2)
    for wgt, b in params["convs"]:
        x = lax.conv_general_dilated(
            x, wgt, window_strides=(2, 2), padding=((1, 1), (1, 1)),
            dimension_numbers=("NCHW", "OIHW", "NCHW"))
        x = jnp.maximum(x + b[None, :, None, None], 0.0)
    feat = x.reshape(B, -1)
    h = jnp.maximum(feat @ params["mu"][0] + params["mu"][1], 0.0)
    p = h
    for i, (wgt, b) in enumerate(params["policy"]):
        p = p @ wgt + b
        if i < len(params["policy"]) - 1:
            p = jnp.maximum(p, 0.0)
    act_dist = jax.nn.softmax(p, axis=-1)
    v = h
    for i, (wgt, b) in enumerate(params["value"]):
        v = v @ wgt + b
        if i < len(params["value"]) - 1:
            v = jnp.maximum(v, 0.0)
    return act_dist, v.squeeze(-1)


if __name__ == "__main__":
    # Small config consistent with the module: 16x16 RGB frames, default widths.
    IMG_SHAPE = (3, 16, 16)            # (C, H, W) as in the torch module
    ZDIM = 128
    ENC = (32, 64, 128, 256)
    POL = (64, 64, 15)
    VAL = (64, 64, 1)
    B = 2

    root = jax.random.PRNGKey(0)
    k_obs, k_par = jax.random.split(root)
    observation = jax.random.randint(
        k_obs, (B, IMG_SHAPE[1], IMG_SHAPE[2], IMG_SHAPE[0]), 0, 256, jnp.int32
    ).astype(jnp.uint8)
    prev_action = jnp.zeros((B,), jnp.int32)
    prev_reward = jnp.zeros((B,), jnp.float32)

    params = init_params(k_par, IMG_SHAPE, ZDIM, ENC, POL, VAL)
    prepped = prepare_params(params, IMG_SHAPE, B)   # one-time weight prep, off the hot path

    fwd = jax.jit(lambda obs: baseline_policy_forward(prepped, obs, prev_action, prev_reward))
    act_dist, value = fwd(observation)
    act_dist = jax.block_until_ready(act_dist)
    value = jax.block_until_ready(value)

    assert act_dist.shape == (B, POL[-1]) and value.shape == (B,)

    ref_act, ref_val = reference_forward(params, observation)
    assert jnp.allclose(act_dist, ref_act, atol=1e-4, rtol=5e-4), "policy mismatch"
    assert jnp.allclose(value, ref_val, atol=1e-4, rtol=5e-4), "value mismatch"
    assert jnp.allclose(jnp.sum(act_dist, axis=-1), 1.0, atol=1e-5), "softmax not normalized"

    print("KERNEL_OK")
</pallas_src>

<mosaic_0001>
module attributes {stable_mosaic.version = 11 : i64} {
  func.func @fused_policy_kernel(%arg0: memref<512x8xf32, #tpu.memory_space<vmem>>, %arg1: memref<2048x512xf32, #tpu.memory_space<vmem>>, %arg2: memref<128x32xf32, #tpu.memory_space<vmem>>, %arg3: memref<1x32xf32, #tpu.memory_space<vmem>>, %arg4: memref<512x128xf32, #tpu.memory_space<vmem>>, %arg5: memref<512x64xf32, #tpu.memory_space<vmem>>, %arg6: memref<1x64xf32, #tpu.memory_space<vmem>>, %arg7: memref<128x32xf32, #tpu.memory_space<vmem>>, %arg8: memref<1024x128xf32, #tpu.memory_space<vmem>>, %arg9: memref<1x128xf32, #tpu.memory_space<vmem>>, %arg10: memref<32x8xf32, #tpu.memory_space<vmem>>, %arg11: memref<2048x256xf32, #tpu.memory_space<vmem>>, %arg12: memref<1x256xf32, #tpu.memory_space<vmem>>, %arg13: memref<256x128xf32, #tpu.memory_space<vmem>>, %arg14: memref<1x128xf32, #tpu.memory_space<vmem>>, %arg15: memref<128x128xf32, #tpu.memory_space<vmem>>, %arg16: memref<1x128xf32, #tpu.memory_space<vmem>>, %arg17: memref<128x128xf32, #tpu.memory_space<vmem>>, %arg18: memref<1x128xf32, #tpu.memory_space<vmem>>, %arg19: memref<128x16xf32, #tpu.memory_space<vmem>>, %arg20: memref<1x16xf32, #tpu.memory_space<vmem>>, %arg21: memref<2x16xf32, #tpu.memory_space<vmem>>) attributes {dimension_semantics = [], scalar_prefetch = 0 : i64, scratch_operands = 0 : i64, tpu.core_type = #tpu.core_type<tc>} {
    %c0 = arith.constant 0 : index
    %c0_0 = arith.constant 0 : index
    %0 = vector.load %arg0[%c0, %c0_0] : memref<512x8xf32, #tpu.memory_space<vmem>>, vector<512x8xf32>
    %c0_1 = arith.constant 0 : index
    %c0_2 = arith.constant 0 : index
    %1 = vector.load %arg1[%c0_1, %c0_2] : memref<2048x512xf32, #tpu.memory_space<vmem>>, vector<2048x512xf32>
    %cst = arith.constant dense<0.000000e+00> : vector<2048x8xf32>
    %2 = tpu.matmul %1, %0, %cst {dimension_numbers = #tpu.dot_dimension_numbers<[1], [0], [0], [1], [0, 0, 1, 1], [], []>} : vector<2048x512xf32>, vector<512x8xf32>, vector<2048x8xf32> -> vector<2048x8xf32>
    %3 = vector.extract_strided_slice %2 {offsets = [0, 0], sizes = [128, 8], strides = [1, 1]} : vector<2048x8xf32> to vector<128x8xf32>
    %4 = vector.extract_strided_slice %2 {offsets = [128, 0], sizes = [128, 8], strides = [1, 1]} : vector<2048x8xf32> to vector<128x8xf32>
    %5 = vector.extract_strided_slice %2 {offsets = [256, 0], sizes = [128, 8], strides = [1, 1]} : vector<2048x8xf32> to vector<128x8xf32>
    %6 = vector.extract_strided_slice %2 {offsets = [384, 0], sizes = [128, 8], strides = [1, 1]} : vector<2048x8xf32> to vector<128x8xf32>
    %7 = vector.extract_strided_slice %2 {offsets = [512, 0], sizes = [128, 8], strides = [1, 1]} : vector<2048x8xf32> to vector<128x8xf32>
    %8 = vector.extract_strided_slice %2 {offsets = [640, 0], sizes = [128, 8], strides = [1, 1]} : vector<2048x8xf32> to vector<128x8xf32>
    %9 = vector.extract_strided_slice %2 {offsets = [768, 0], sizes = [128, 8], strides = [1, 1]} : vector<2048x8xf32> to vector<128x8xf32>
    %10 = vector.extract_strided_slice %2 {offsets = [896, 0], sizes = [128, 8], strides = [1, 1]} : vector<2048x8xf32> to vector<128x8xf32>
    %11 = vector.extract_strided_slice %2 {offsets = [1024, 0], sizes = [128, 8], strides = [1, 1]} : vector<2048x8xf32> to vector<128x8xf32>
    %12 = vector.extract_strided_slice %2 {offsets = [1152, 0], sizes = [128, 8], strides = [1, 1]} : vector<2048x8xf32> to vector<128x8xf32>
    %13 = vector.extract_strided_slice %2 {offsets = [1280, 0], sizes = [128, 8], strides = [1, 1]} : vector<2048x8xf32> to vector<128x8xf32>
    %14 = vector.extract_strided_slice %2 {offsets = [1408, 0], sizes = [128, 8], strides = [1, 1]} : vector<2048x8xf32> to vector<128x8xf32>
    %15 = vector.extract_strided_slice %2 {offsets = [1536, 0], sizes = [128, 8], strides = [1, 1]} : vector<2048x8xf32> to vector<128x8xf32>
    %16 = vector.extract_strided_slice %2 {offsets = [1664, 0], sizes = [128, 8], strides = [1, 1]} : vector<2048x8xf32> to vector<128x8xf32>
    %17 = vector.extract_strided_slice %2 {offsets = [1792, 0], sizes = [128, 8], strides = [1, 1]} : vector<2048x8xf32> to vector<128x8xf32>
    %18 = vector.extract_strided_slice %2 {offsets = [1920, 0], sizes = [128, 8], strides = [1, 1]} : vector<2048x8xf32> to vector<128x8xf32>
    %19 = tpu.concatenate %3, %4, %5, %6, %7, %8, %9, %10, %11, %12, %13, %14, %15, %16, %17, %18 in 1 : vector<128x8xf32>, vector<128x8xf32>, vector<128x8xf32>, vector<128x8xf32>, vector<128x8xf32>, vector<128x8xf32>, vector<128x8xf32>, vector<128x8xf32>, vector<128x8xf32>, vector<128x8xf32>, vector<128x8xf32>, vector<128x8xf32>, vector<128x8xf32>, vector<128x8xf32>, vector<128x8xf32>, vector<128x8xf32> -> vector<128x128xf32>
    %c0_3 = arith.constant 0 : index
    %c0_4 = arith.constant 0 : index
    %20 = vector.load %arg2[%c0_3, %c0_4] : memref<128x32xf32, #tpu.memory_space<vmem>>, vector<128x32xf32>
    %cst_5 = arith.constant dense<0.000000e+00> : vector<128x32xf32>
    %21 = tpu.matmul %19, %20, %cst_5 {dimension_numbers = #tpu.dot_dimension_numbers<[1], [0], [0], [1], [0, 0, 1, 1], [], []>} : vector<128x128xf32>, vector<128x32xf32>, vector<128x32xf32> -> vector<128x32xf32>
    %c0_6 = arith.constant 0 : index
    %c0_7 = arith.constant 0 : index
    %22 = vector.load %arg3[%c0_6, %c0_7] : memref<1x32xf32, #tpu.memory_space<vmem>>, vector<1x32xf32>
    %23 = vector.broadcast %22 : vector<1x32xf32> to vector<128x32xf32>
    %24 = arith.addf %21, %23 : vector<128x32xf32>
    %cst_8 = arith.constant 0.000000e+00 : f32
    %25 = vector.broadcast %cst_8 : f32 to vector<128x32xf32>
    %26 = arith.maximumf %24, %25 : vector<128x32xf32>
    %c0_9 = arith.constant 0 : index
    %c0_10 = arith.constant 0 : index
    %27 = vector.load %arg4[%c0_9, %c0_10] : memref<512x128xf32, #tpu.memory_space<vmem>>, vector<512x128xf32>
    %cst_11 = arith.constant dense<0.000000e+00> : vector<512x32xf32>
    %28 = tpu.matmul %27, %26, %cst_11 {dimension_numbers = #tpu.dot_dimension_numbers<[1], [0], [0], [1], [0, 0, 1, 1], [], []>} : vector<512x128xf32>, vector<128x32xf32>, vector<512x32xf32> -> vector<512x32xf32>
    %29 = vector.extract_strided_slice %28 {offsets = [0, 0], sizes = [32, 32], strides = [1, 1]} : vector<512x32xf32> to vector<32x32xf32>
    %30 = vector.extract_strided_slice %28 {offsets = [32, 0], sizes = [32, 32], strides = [1, 1]} : vector<512x32xf32> to vector<32x32xf32>
    %31 = vector.extract_strided_slice %28 {offsets = [64, 0], sizes = [32, 32], strides = [1, 1]} : vector<512x32xf32> to vector<32x32xf32>
    %32 = vector.extract_strided_slice %28 {offsets = [96, 0], sizes = [32, 32], strides = [1, 1]} : vector<512x32xf32> to vector<32x32xf32>
    %33 = vector.extract_strided_slice %28 {offsets = [128, 0], sizes = [32, 32], strides = [1, 1]} : vector<512x32xf32> to vector<32x32xf32>
    %34 = vector.extract_strided_slice %28 {offsets = [160, 0], sizes = [32, 32], strides = [1, 1]} : vector<512x32xf32> to vector<32x32xf32>
    %35 = vector.extract_strided_slice %28 {offsets = [192, 0], sizes = [32, 32], strides = [1, 1]} : vector<512x32xf32> to vector<32x32xf32>
    %36 = vector.extract_strided_slice %28 {offsets = [224, 0], sizes = [32, 32], strides = [1, 1]} : vector<512x32xf32> to vector<32x32xf32>
    %37 = vector.extract_strided_slice %28 {offsets = [256, 0], sizes = [32, 32], strides = [1, 1]} : vector<512x32xf32> to vector<32x32xf32>
    %38 = vector.extract_strided_slice %28 {offsets = [288, 0], sizes = [32, 32], strides = [1, 1]} : vector<512x32xf32> to vector<32x32xf32>
    %39 = vector.extract_strided_slice %28 {offsets = [320, 0], sizes = [32, 32], strides = [1, 1]} : vector<512x32xf32> to vector<32x32xf32>
    %40 = vector.extract_strided_slice %28 {offsets = [352, 0], sizes = [32, 32], strides = [1, 1]} : vector<512x32xf32> to vector<32x32xf32>
    %41 = vector.extract_strided_slice %28 {offsets = [384, 0], sizes = [32, 32], strides = [1, 1]} : vector<512x32xf32> to vector<32x32xf32>
    %42 = vector.extract_strided_slice %28 {offsets = [416, 0], sizes = [32, 32], strides = [1, 1]} : vector<512x32xf32> to vector<32x32xf32>
    %43 = vector.extract_strided_slice %28 {offsets = [448, 0], sizes = [32, 32], strides = [1, 1]} : vector<512x32xf32> to vector<32x32xf32>
    %44 = vector.extract_strided_slice %28 {offsets = [480, 0], sizes = [32, 32], strides = [1, 1]} : vector<512x32xf32> to vector<32x32xf32>
    %45 = tpu.concatenate %29, %30, %31, %32, %33, %34, %35, %36, %37, %38, %39, %40, %41, %42, %43, %44 in 1 : vector<32x32xf32>, vector<32x32xf32>, vector<32x32xf32>, vector<32x32xf32>, vector<32x32xf32>, vector<32x32xf32>, vector<32x32xf32>, vector<32x32xf32>, vector<32x32xf32>, vector<32x32xf32>, vector<32x32xf32>, vector<32x32xf32>, vector<32x32xf32>, vector<32x32xf32>, vector<32x32xf32>, vector<32x32xf32> -> vector<32x512xf32>
    %c0_12 = arith.constant 0 : index
    %c0_13 = arith.constant 0 : index
    %46 = vector.load %arg5[%c0_12, %c0_13] : memref<512x64xf32, #tpu.memory_space<vmem>>, vector<512x64xf32>
    %cst_14 = arith.constant dense<0.000000e+00> : vector<32x64xf32>
    %47 = tpu.matmul %45, %46, %cst_14 {dimension_numbers = #tpu.dot_dimension_numbers<[1], [0], [0], [1], [0, 0, 1, 1], [], []>} : vector<32x512xf32>, vector<512x64xf32>, vector<32x64xf32> -> vector<32x64xf32>
    %c0_15 = arith.constant 0 : index
    %c0_16 = arith.constant 0 : index
    %48 = vector.load %arg6[%c0_15, %c0_16] : memref<1x64xf32, #tpu.memory_space<vmem>>, vector<1x64xf32>
    %49 = vector.broadcast %48 : vector<1x64xf32> to vector<32x64xf32>
    %50 = arith.addf %47, %49 : vector<32x64xf32>
    %cst_17 = arith.constant 0.000000e+00 : f32
    %51 = vector.broadcast %cst_17 : f32 to vector<32x64xf32>
    %52 = arith.maximumf %50, %51 : vector<32x64xf32>
    %c0_18 = arith.constant 0 : index
    %c0_19 = arith.constant 0 : index
    %53 = vector.load %arg7[%c0_18, %c0_19] : memref<128x32xf32, #tpu.memory_space<vmem>>, vector<128x32xf32>
    %cst_20 = arith.constant dense<0.000000e+00> : vector<128x64xf32>
    %54 = tpu.matmul %53, %52, %cst_20 {dimension_numbers = #tpu.dot_dimension_numbers<[1], [0], [0], [1], [0, 0, 1, 1], [], []>} : vector<128x32xf32>, vector<32x64xf32>, vector<128x64xf32> -> vector<128x64xf32>
    %55 = vector.extract_strided_slice %54 {offsets = [0, 0], sizes = [8, 64], strides = [1, 1]} : vector<128x64xf32> to vector<8x64xf32>
    %56 = vector.extract_strided_slice %54 {offsets = [8, 0], sizes = [8, 64], strides = [1, 1]} : vector<128x64xf32> to vector<8x64xf32>
    %57 = vector.extract_strided_slice %54 {offsets = [16, 0], sizes = [8, 64], strides = [1, 1]} : vector<128x64xf32> to vector<8x64xf32>
    %58 = vector.extract_strided_slice %54 {offsets = [24, 0], sizes = [8, 64], strides = [1, 1]} : vector<128x64xf32> to vector<8x64xf32>
    %59 = vector.extract_strided_slice %54 {offsets = [32, 0], sizes = [8, 64], strides = [1, 1]} : vector<128x64xf32> to vector<8x64xf32>
    %60 = vector.extract_strided_slice %54 {offsets = [40, 0], sizes = [8, 64], strides = [1, 1]} : vector<128x64xf32> to vector<8x64xf32>
    %61 = vector.extract_strided_slice %54 {offsets = [48, 0], sizes = [8, 64], strides = [1, 1]} : vector<128x64xf32> to vector<8x64xf32>
    %62 = vector.extract_strided_slice %54 {offsets = [56, 0], sizes = [8, 64], strides = [1, 1]} : vector<128x64xf32> to vector<8x64xf32>
    %63 = vector.extract_strided_slice %54 {offsets = [64, 0], sizes = [8, 64], strides = [1, 1]} : vector<128x64xf32> to vector<8x64xf32>
    %64 = vector.extract_strided_slice %54 {offsets = [72, 0], sizes = [8, 64], strides = [1, 1]} : vector<128x64xf32> to vector<8x64xf32>
    %65 = vector.extract_strided_slice %54 {offsets = [80, 0], sizes = [8, 64], strides = [1, 1]} : vector<128x64xf32> to vector<8x64xf32>
    %66 = vector.extract_strided_slice %54 {offsets = [88, 0], sizes = [8, 64], strides = [1, 1]} : vector<128x64xf32> to vector<8x64xf32>
    %67 = vector.extract_strided_slice %54 {offsets = [96, 0], sizes = [8, 64], strides = [1, 1]} : vector<128x64xf32> to vector<8x64xf32>
    %68 = vector.extract_strided_slice %54 {offsets = [104, 0], sizes = [8, 64], strides = [1, 1]} : vector<128x64xf32> to vector<8x64xf32>
    %69 = vector.extract_strided_slice %54 {offsets = [112, 0], sizes = [8, 64], strides = [1, 1]} : vector<128x64xf32> to vector<8x64xf32>
    %70 = vector.extract_strided_slice %54 {offsets = [120, 0], sizes = [8, 64], strides = [1, 1]} : vector<128x64xf32> to vector<8x64xf32>
    %71 = tpu.concatenate %55, %56, %57, %58, %59, %60, %61, %62, %63, %64, %65, %66, %67, %68, %69, %70 in 1 : vector<8x64xf32>, vector<8x64xf32>, vector<8x64xf32>, vector<8x64xf32>, vector<8x64xf32>, vector<8x64xf32>, vector<8x64xf32>, vector<8x64xf32>, vector<8x64xf32>, vector<8x64xf32>, vector<8x64xf32>, vector<8x64xf32>, vector<8x64xf32>, vector<8x64xf32>, vector<8x64xf32>, vector<8x64xf32> -> vector<8x1024xf32>
    %c0_21 = arith.constant 0 : index
    %c0_22 = arith.constant 0 : index
    %72 = vector.load %arg8[%c0_21, %c0_22] : memref<1024x128xf32, #tpu.memory_space<vmem>>, vector<1024x128xf32>
    %cst_23 = arith.constant dense<0.000000e+00> : vector<8x128xf32>
    %73 = tpu.matmul %71, %72, %cst_23 {dimension_numbers = #tpu.dot_dimension_numbers<[1], [0], [0], [1], [0, 0, 1, 1], [], []>} : vector<8x1024xf32>, vector<1024x128xf32>, vector<8x128xf32> -> vector<8x128xf32>
    %c0_24 = arith.constant 0 : index
    %c0_25 = arith.constant 0 : index
    %74 = vector.load %arg9[%c0_24, %c0_25] : memref<1x128xf32, #tpu.memory_space<vmem>>, vector<1x128xf32>
    %75 = vector.broadcast %74 : vector<1x128xf32> to vector<8x128xf32>
    %76 = arith.addf %73, %75 : vector<8x128xf32>
    %cst_26 = arith.constant 0.000000e+00 : f32
    %77 = vector.broadcast %cst_26 : f32 to vector<8x128xf32>
    %78 = arith.maximumf %76, %77 : vector<8x128xf32>
    %c0_27 = arith.constant 0 : index
    %c0_28 = arith.constant 0 : index
    %79 = vector.load %arg10[%c0_27, %c0_28] : memref<32x8xf32, #tpu.memory_space<vmem>>, vector<32x8xf32>
    %cst_29 = arith.constant dense<0.000000e+00> : vector<32x128xf32>
    %80 = tpu.matmul %79, %78, %cst_29 {dimension_numbers = #tpu.dot_dimension_numbers<[1], [0], [0], [1], [0, 0, 1, 1], [], []>} : vector<32x8xf32>, vector<8x128xf32>, vector<32x128xf32> -> vector<32x128xf32>
    %81 = vector.extract_strided_slice %80 {offsets = [0, 0], sizes = [2, 128], strides = [1, 1]} : vector<32x128xf32> to vector<2x128xf32>
    %82 = vector.extract_strided_slice %80 {offsets = [2, 0], sizes = [2, 128], strides = [1, 1]} : vector<32x128xf32> to vector<2x128xf32>
    %83 = vector.extract_strided_slice %80 {offsets = [4, 0], sizes = [2, 128], strides = [1, 1]} : vector<32x128xf32> to vector<2x128xf32>
    %84 = vector.extract_strided_slice %80 {offsets = [6, 0], sizes = [2, 128], strides = [1, 1]} : vector<32x128xf32> to vector<2x128xf32>
    %85 = vector.extract_strided_slice %80 {offsets = [8, 0], sizes = [2, 128], strides = [1, 1]} : vector<32x128xf32> to vector<2x128xf32>
    %86 = vector.extract_strided_slice %80 {offsets = [10, 0], sizes = [2, 128], strides = [1, 1]} : vector<32x128xf32> to vector<2x128xf32>
    %87 = vector.extract_strided_slice %80 {offsets = [12, 0], sizes = [2, 128], strides = [1, 1]} : vector<32x128xf32> to vector<2x128xf32>
    %88 = vector.extract_strided_slice %80 {offsets = [14, 0], sizes = [2, 128], strides = [1, 1]} : vector<32x128xf32> to vector<2x128xf32>
    %89 = vector.extract_strided_slice %80 {offsets = [16, 0], sizes = [2, 128], strides = [1, 1]} : vector<32x128xf32> to vector<2x128xf32>
    %90 = vector.extract_strided_slice %80 {offsets = [18, 0], sizes = [2, 128], strides = [1, 1]} : vector<32x128xf32> to vector<2x128xf32>
    %91 = vector.extract_strided_slice %80 {offsets = [20, 0], sizes = [2, 128], strides = [1, 1]} : vector<32x128xf32> to vector<2x128xf32>
    %92 = vector.extract_strided_slice %80 {offsets = [22, 0], sizes = [2, 128], strides = [1, 1]} : vector<32x128xf32> to vector<2x128xf32>
    %93 = vector.extract_strided_slice %80 {offsets = [24, 0], sizes = [2, 128], strides = [1, 1]} : vector<32x128xf32> to vector<2x128xf32>
    %94 = vector.extract_strided_slice %80 {offsets = [26, 0], sizes = [2, 128], strides = [1, 1]} : vector<32x128xf32> to vector<2x128xf32>
    %95 = vector.extract_strided_slice %80 {offsets = [28, 0], sizes = [2, 128], strides = [1, 1]} : vector<32x128xf32> to vector<2x128xf32>
    %96 = vector.extract_strided_slice %80 {offsets = [30, 0], sizes = [2, 128], strides = [1, 1]} : vector<32x128xf32> to vector<2x128xf32>
    %97 = tpu.concatenate %81, %82, %83, %84, %85, %86, %87, %88, %89, %90, %91, %92, %93, %94, %95, %96 in 1 : vector<2x128xf32>, vector<2x128xf32>, vector<2x128xf32>, vector<2x128xf32>, vector<2x128xf32>, vector<2x128xf32>, vector<2x128xf32>, vector<2x128xf32>, vector<2x128xf32>, vector<2x128xf32>, vector<2x128xf32>, vector<2x128xf32>, vector<2x128xf32>, vector<2x128xf32>, vector<2x128xf32>, vector<2x128xf32> -> vector<2x2048xf32>
    %c0_30 = arith.constant 0 : index
    %c0_31 = arith.constant 0 : index
    %98 = vector.load %arg11[%c0_30, %c0_31] : memref<2048x256xf32, #tpu.memory_space<vmem>>, vector<2048x256xf32>
    %cst_32 = arith.constant dense<0.000000e+00> : vector<2x256xf32>
    %99 = tpu.matmul %97, %98, %cst_32 {dimension_numbers = #tpu.dot_dimension_numbers<[1], [0], [0], [1], [0, 0, 1, 1], [], []>} : vector<2x2048xf32>, vector<2048x256xf32>, vector<2x256xf32> -> vector<2x256xf32>
    %c0_33 = arith.constant 0 : index
    %c0_34 = arith.constant 0 : index
    %100 = vector.load %arg12[%c0_33, %c0_34] : memref<1x256xf32, #tpu.memory_space<vmem>>, vector<1x256xf32>
    %101 = vector.broadcast %100 : vector<1x256xf32> to vector<2x256xf32>
    %102 = arith.addf %99, %101 : vector<2x256xf32>
    %cst_35 = arith.constant 0.000000e+00 : f32
    %103 = vector.broadcast %cst_35 : f32 to vector<2x256xf32>
    %104 = arith.maximumf %102, %103 : vector<2x256xf32>
    %c0_36 = arith.constant 0 : index
    %c0_37 = arith.constant 0 : index
    %105 = vector.load %arg13[%c0_36, %c0_37] : memref<256x128xf32, #tpu.memory_space<vmem>>, vector<256x128xf32>
    %cst_38 = arith.constant dense<0.000000e+00> : vector<2x128xf32>
    %106 = tpu.matmul %104, %105, %cst_38 {dimension_numbers = #tpu.dot_dimension_numbers<[1], [0], [0], [1], [0, 0, 1, 1], [], []>} : vector<2x256xf32>, vector<256x128xf32>, vector<2x128xf32> -> vector<2x128xf32>
    %c0_39 = arith.constant 0 : index
    %c0_40 = arith.constant 0 : index
    %107 = vector.load %arg14[%c0_39, %c0_40] : memref<1x128xf32, #tpu.memory_space<vmem>>, vector<1x128xf32>
    %108 = vector.broadcast %107 : vector<1x128xf32> to vector<2x128xf32>
    %109 = arith.addf %106, %108 : vector<2x128xf32>
    %cst_41 = arith.constant 0.000000e+00 : f32
    %110 = vector.broadcast %cst_41 : f32 to vector<2x128xf32>
    %111 = arith.maximumf %109, %110 : vector<2x128xf32>
    %c0_42 = arith.constant 0 : index
    %c0_43 = arith.constant 0 : index
    %112 = vector.load %arg15[%c0_42, %c0_43] : memref<128x128xf32, #tpu.memory_space<vmem>>, vector<128x128xf32>
    %cst_44 = arith.constant dense<0.000000e+00> : vector<2x128xf32>
    %113 = tpu.matmul %111, %112, %cst_44 {dimension_numbers = #tpu.dot_dimension_numbers<[1], [0], [0], [1], [0, 0, 1, 1], [], []>} : vector<2x128xf32>, vector<128x128xf32>, vector<2x128xf32> -> vector<2x128xf32>
    %c0_45 = arith.constant 0 : index
    %c0_46 = arith.constant 0 : index
    %114 = vector.load %arg16[%c0_45, %c0_46] : memref<1x128xf32, #tpu.memory_space<vmem>>, vector<1x128xf32>
    %115 = vector.broadcast %114 : vector<1x128xf32> to vector<2x128xf32>
    %116 = arith.addf %113, %115 : vector<2x128xf32>
    %cst_47 = arith.constant 0.000000e+00 : f32
    %117 = vector.broadcast %cst_47 : f32 to vector<2x128xf32>
    %118 = arith.maximumf %116, %117 : vector<2x128xf32>
    %c0_48 = arith.constant 0 : index
    %c0_49 = arith.constant 0 : index
    %119 = vector.load %arg17[%c0_48, %c0_49] : memref<128x128xf32, #tpu.memory_space<vmem>>, vector<128x128xf32>
    %cst_50 = arith.constant dense<0.000000e+00> : vector<2x128xf32>
    %120 = tpu.matmul %118, %119, %cst_50 {dimension_numbers = #tpu.dot_dimension_numbers<[1], [0], [0], [1], [0, 0, 1, 1], [], []>} : vector<2x128xf32>, vector<128x128xf32>, vector<2x128xf32> -> vector<2x128xf32>
    %c0_51 = arith.constant 0 : index
    %c0_52 = arith.constant 0 : index
    %121 = vector.load %arg18[%c0_51, %c0_52] : memref<1x128xf32, #tpu.memory_space<vmem>>, vector<1x128xf32>
    %122 = vector.broadcast %121 : vector<1x128xf32> to vector<2x128xf32>
    %123 = arith.addf %120, %122 : vector<2x128xf32>
    %cst_53 = arith.constant 0.000000e+00 : f32
    %124 = vector.broadcast %cst_53 : f32 to vector<2x128xf32>
    %125 = arith.maximumf %123, %124 : vector<2x128xf32>
    %c0_54 = arith.constant 0 : index
    %c0_55 = arith.constant 0 : index
    %126 = vector.load %arg19[%c0_54, %c0_55] : memref<128x16xf32, #tpu.memory_space<vmem>>, vector<128x16xf32>
    %cst_56 = arith.constant dense<0.000000e+00> : vector<2x16xf32>
    %127 = tpu.matmul %125, %126, %cst_56 {dimension_numbers = #tpu.dot_dimension_numbers<[1], [0], [0], [1], [0, 0, 1, 1], [], []>} : vector<2x128xf32>, vector<128x16xf32>, vector<2x16xf32> -> vector<2x16xf32>
    %c0_57 = arith.constant 0 : index
    %c0_58 = arith.constant 0 : index
    %128 = vector.load %arg20[%c0_57, %c0_58] : memref<1x16xf32, #tpu.memory_space<vmem>>, vector<1x16xf32>
    %129 = vector.broadcast %128 : vector<1x16xf32> to vector<2x16xf32>
    %130 = arith.addf %127, %129 : vector<2x16xf32>
    %131 = vector.extract_strided_slice %130 {offsets = [0, 0], sizes = [2, 15], strides = [1, 1]} : vector<2x16xf32> to vector<2x15xf32>
    %cst_59 = arith.constant dense<0xFF800000> : vector<2xf32>
    %132 = vector.multi_reduction <maximumf>, %131, %cst_59 [1] : vector<2x15xf32> to vector<2xf32>
    %133 = vector.shape_cast %132 : vector<2xf32> to vector<2x1xf32>
    %134 = vector.broadcast %133 : vector<2x1xf32> to vector<2x15xf32>
    %135 = arith.subf %131, %134 : vector<2x15xf32>
    %136 = math.exp %135 : vector<2x15xf32>
    %cst_60 = arith.constant dense<0.000000e+00> : vector<2xf32>
    %137 = vector.multi_reduction <add>, %136, %cst_60 [1] : vector<2x15xf32> to vector<2xf32>
    %138 = vector.shape_cast %137 : vector<2xf32> to vector<2x1xf32>
    %139 = vector.broadcast %138 : vector<2x1xf32> to vector<2x15xf32>
    %140 = arith.divf %136, %139 : vector<2x15xf32>
    %141 = vector.extract_strided_slice %130 {offsets = [0, 15], sizes = [2, 1], strides = [1, 1]} : vector<2x16xf32> to vector<2x1xf32>
    %142 = tpu.concatenate %140, %141 in 1 : vector<2x15xf32>, vector<2x1xf32> -> vector<2x16xf32>
    %c0_61 = arith.constant 0 : index
    %c0_62 = arith.constant 0 : index
    %143 = vector.load %arg21[%c0_61, %c0_62] : memref<2x16xf32, #tpu.memory_space<vmem>>, vector<2x16xf32>
    tpu.vector_store %arg21[%c0_61, %c0_62], %142 {strides = array<i32>} : memref<2x16xf32, #tpu.memory_space<vmem>>, vector<2x16xf32>,
    return
  }
}

</mosaic_0001>

<bundles_post_ra>
// kernel: _lambda_.1
= control target key start
LH: loop header
LB: loop body
LE: loop exit
PB: predicated region body
PF: predicated region fallthrough
CT: control target
= control target key end

     0   :  { %s14511_s0 = inlined_call_operand.vmem [shape: f32[512,8], index: 0, kind: input, shape index: {}]   ;;  %s14512_s1 = inlined_call_operand.hbm [shape: f32[2048,512], index: 1, kind: input, shape index: {}]   ;;  %s14513_s2 = inlined_call_operand.hbm [shape: f32[128,32], index: 2, kind: input, shape index: {}]   ;;  %s14514_s3 = inlined_call_operand.hbm [shape: f32[1,32], index: 3, kind: input, shape index: {}]   ;;  %s14515_s4 = inlined_call_operand.hbm [shape: f32[512,128], index: 4, kind: input, shape index: {}]   ;;  %s14516_s5 = inlined_call_operand.hbm [shape: f32[512,64], index: 5, kind: input, shape index: {}]   ;;  %s14517_s6 = inlined_call_operand.hbm [shape: f32[1,64], index: 6, kind: input, shape index: {}]   ;;  %s14518_s7 = inlined_call_operand.hbm [shape: f32[128,32], index: 7, kind: input, shape index: {}]   ;;  %s14519_s8 = inlined_call_operand.hbm [shape: f32[1024,128], index: 8, kind: input, shape index: {}]   ;;  %s14520_s9 = inlined_call_operand.hbm [shape: f32[1,128], index: 9, kind: input, shape index: {}]   ;;  %s14521_s10 = inlined_call_operand.hbm [shape: f32[32,8], index: 10, kind: input, shape index: {}]   ;;  %s14522_s11 = inlined_call_operand.hbm [shape: f32[2048,256], index: 11, kind: input, shape index: {}]   ;;  %s14523_s12 = inlined_call_operand.hbm [shape: f32[1,256], index: 12, kind: input, shape index: {}]   ;;  %s14524_s13 = inlined_call_operand.hbm [shape: f32[256,128], index: 13, kind: input, shape index: {}]   ;;  %s14525_s14 = inlined_call_operand.hbm [shape: f32[1,128], index: 14, kind: input, shape index: {}]   ;;  %s14526_s15 = inlined_call_operand.hbm [shape: f32[128,128], index: 15, kind: input, shape index: {}]   ;;  %s14527_s16 = inlined_call_operand.hbm [shape: f32[1,128], index: 16, kind: input, shape index: {}]   ;;  %s14528_s17 = inlined_call_operand.hbm [shape: f32[128,128], index: 17, kind: input, shape index: {}]   ;;  %s14529_s18 = inlined_call_operand.hbm [shape: f32[1,128], index: 18, kind: input, shape index: {}]   ;;  %s14530_s19 = inlined_call_operand.hbm [shape: f32[128,16], index: 19, kind: input, shape index: {}]   ;;  %s14531_s20 = inlined_call_operand.hbm [shape: f32[1,16], index: 20, kind: input, shape index: {}]   ;;  %s14532_s21 = inlined_call_operand.vmem [shape: f32[2,16], index: 21, kind: output, shape index: {}]  }
   0x1   :  { %14567 = sst [smem:[#allocation91_spill]] %s14511_s0 }
   0x2   :  { %14568 = sst [smem:[#allocation92_spill]] %s14512_s1 }
   0x3   :  { %14569 = sst [smem:[#allocation93_spill]] %s14513_s2 }
   0x4   :  { %14570 = sst [smem:[#allocation94_spill]] %s14514_s3 }
   0x5   :  { %14571 = sst [smem:[#allocation95_spill]] %s14515_s4 }
   0x6   :  { %14572 = sst [smem:[#allocation96_spill]] %s14516_s5 }
   0x7   :  { %14573 = sst [smem:[#allocation97_spill]] %s14530_s19 }
   0x8   :  { %14574 = sst [smem:[#allocation98_spill]] %s14531_s20 }
   0x9   :  { %14575 = sst [smem:[#allocation99_spill]] %s14532_s21 }
   0xa   :  { %26 = vsyncpa [#allocation3], 0 }
   0xb   :  { %27 = vsyncpa [#allocation5], 0 }
   0xc   :  { %28 = vsyncpa [#allocation8], 0 }
   0xd   :  { %29 = vsyncpa [#allocation11], 0 }
   0xe   :  { %30 = vsyncpa [#allocation14], 0 }
   0xf   :  { %31 = vsyncpa [#allocation17], 0 }
  0x10   :  { %32 = vsyncpa [#allocation20], 0 }
  0x11   :  { %33 = vsyncpa [#allocation23], 0 }
  0x12   :  { %34 = vsyncpa [#allocation26], 0 }
  0x13   :  { %35 = vsyncpa [#allocation29], 0 }
  0x14   :  { %36 = vsyncpa [#allocation32], 0  ;;  %s12201_s2 = smov [#allocation4]   ;;  %s14576_s3 = sld [smem:[#allocation93_spill]] }
  0x15   :  { %s56_s25 = sshll.u32 %s12201_s2, 4  ;;  %s57_s25 = int_to_ptr.vmem [resolvable:$true] %s56_s25 }
  0x1a   :  { %s11739_s28 = scalar_lea.hbm %s14576_s3, 2048 }
  0x1b   :  { %p11740_p0 = scmp.ne.s32.totalorder %s14576_s3, %s11739_s28  ;;  %p11743_p1 = scmp.lt.u32.totalorder %s11739_s28, %s14576_s3 }
  0x1d   :  { %p11745_p2 = pnand %p11743_p1, %p11740_p0 }
  0x1f   :  { %11748 = shalt.err (!%p11745_p2)
}
  0x20   :  { %s11749_s5 = scalar_lea.vmem %s57_s25, 2048  ;;  %p11754_p4 = scmp.lt.s32.totalorder %s57_s25, %s57_s25 }
  0x21   :  { %p11750_p3 = scmp.ne.s32.totalorder %s57_s25, %s11749_s5  ;;  %p11755_p5 = scmp.lt.s32.totalorder %s11749_s5, %s11749_s5 }
  0x23   :  { %p11756_p6 = por %p11755_p5, %p11754_p4 }
  0x25   :  { %p11757_p7 = pnand %p11756_p6, %p11750_p3 }
  0x27   :  { %11760 = shalt.err (!%p11757_p7)
}
  0x28   :  { %s12202_s22 = smov 128   ;;  %s12203_s23 = smov 8  }
  0x29   :  { %62 = dma.hbm_to_vmem [thread:$0]  %s14576_s3, 2048, %s57_s25, [#allocation5], %s12202_s22, %s12202_s22, %s12203_s23  }
  0x2a   :  { %s12204_s2 = smov [#allocation7]   ;;  %s12205_s27 = smov [#allocation10]  }
  0x2b   :  { %s78_s26 = sshll.u32 %s12204_s2, 4  ;;  %s103_s28 = sshll.u32 %s12205_s27, 4  ;;  %s79_s26 = int_to_ptr.vmem [resolvable:$true] %s78_s26  ;;  %s104_s28 = int_to_ptr.vmem [resolvable:$true] %s103_s28 }
  0x2c   :  { %s14577_s4 = sld [smem:[#allocation95_spill]] }
  0x32   :  { %s11761_s30 = scalar_lea.hbm %s14577_s4, 8192 }
  0x33   :  { %p11762_p8 = scmp.ne.s32.totalorder %s14577_s4, %s11761_s30  ;;  %p11765_p9 = scmp.lt.u32.totalorder %s11761_s30, %s14577_s4 }
  0x35   :  { %p11767_p10 = pnand %p11765_p9, %p11762_p8 }
  0x37   :  { %11770 = shalt.err (!%p11767_p10)
}
  0x38   :  { %s11771_s25 = scalar_lea.vmem %s79_s26, 8192  ;;  %p11776_p12 = scmp.lt.s32.totalorder %s79_s26, %s79_s26 }
  0x39   :  { %p11772_p11 = scmp.ne.s32.totalorder %s79_s26, %s11771_s25  ;;  %p11777_p13 = scmp.lt.s32.totalorder %s11771_s25, %s11771_s25 }
  0x3b   :  { %p11778_p0 = por %p11777_p13, %p11776_p12 }
  0x3d   :  { %p11779_p1 = pnand %p11778_p0, %p11772_p11 }
  0x3f   :  { %11782 = shalt.err (!%p11779_p1)
}
  0x40   :  { %84 = dma.hbm_to_vmem [thread:$0]  %s14577_s4, 8192, %s79_s26, [#allocation8], %s12202_s22, %s12202_s22, %s12203_s23  }
  0x41   :  { %s11783_s20 = scalar_lea.hbm %s14517_s6, 16 }
  0x42   :  { %p11784_p2 = scmp.ne.s32.totalorder %s14517_s6, %s11783_s20  ;;  %p11787_p3 = scmp.lt.u32.totalorder %s11783_s20, %s14517_s6 }
  0x44   :  { %p11789_p4 = pnand %p11787_p3, %p11784_p2 }
  0x46   :  { %11792 = shalt.err (!%p11789_p4)
}
  0x47   :  { %s11793_s0 = scalar_lea.vmem %s104_s28, 16  ;;  %s11797_s30 = scalar_lea.vmem %s104_s28, 32 }
  0x48   :  { %p11794_p5 = scmp.ne.s32.totalorder %s104_s28, %s11793_s0  ;;  %p11798_p6 = scmp.lt.s32.totalorder %s104_s28, %s104_s28 }
  0x49   :  { %p11799_p7 = scmp.lt.s32.totalorder %s11797_s30, %s11793_s0 }
  0x4b   :  { %p11800_p8 = por %p11799_p7, %p11798_p6 }
  0x4d   :  { %p11801_p9 = pnand %p11800_p8, %p11794_p5 }
  0x4f   :  { %11804 = shalt.err (!%p11801_p9)
}
  0x50   :  { %106 = dma.hbm_to_vmem [thread:$0]  %s14517_s6, 16, %s104_s28, [#allocation11]  }
  0x51   :  { %s12206_s5 = smov [#allocation13]   ;;  %s12207_s3 = smov [#allocation16]  }
  0x52   :  { %s124_s25 = sshll.u32 %s12206_s5, 4  ;;  %s146_s1 = sshll.u32 %s12207_s3, 4  ;;  %s125_s25 = int_to_ptr.vmem [resolvable:$true] %s124_s25  ;;  %s147_s1 = int_to_ptr.vmem [resolvable:$true] %s146_s1 }
  0x53   :  { %s11805_s20 = scalar_lea.hbm %s14519_s8, 16384 }
  0x54   :  { %p11806_p10 = scmp.ne.s32.totalorder %s14519_s8, %s11805_s20  ;;  %p11809_p11 = scmp.lt.u32.totalorder %s11805_s20, %s14519_s8 }
  0x56   :  { %p11811_p12 = pnand %p11809_p11, %p11806_p10 }
  0x58   :  { %11814 = shalt.err (!%p11811_p12)
}
  0x59   :  { %s11815_s6 = scalar_lea.vmem %s125_s25, 16384  ;;  %p11820_p0 = scmp.lt.s32.totalorder %s125_s25, %s125_s25 }
  0x5a   :  { %p11816_p13 = scmp.ne.s32.totalorder %s125_s25, %s11815_s6  ;;  %p11821_p1 = scmp.lt.s32.totalorder %s11815_s6, %s11815_s6 }
  0x5c   :  { %p11822_p2 = por %p11821_p1, %p11820_p0 }
  0x5e   :  { %p11823_p3 = pnand %p11822_p2, %p11816_p13 }
  0x60   :  { %11826 = shalt.err (!%p11823_p3)
}
  0x61   :  { %130 = dma.hbm_to_vmem [thread:$0]  %s14519_s8, 16384, %s125_s25, [#allocation14], %s12202_s22, %s12202_s22, %s12203_s23  }
  0x62   :  { %s11827_s4 = scalar_lea.hbm %s14521_s10, 512 }
  0x63   :  { %p11828_p4 = scmp.ne.s32.totalorder %s14521_s10, %s11827_s4  ;;  %p11831_p5 = scmp.lt.u32.totalorder %s11827_s4, %s14521_s10 }
  0x65   :  { %p11833_p6 = pnand %p11831_p5, %p11828_p4 }
  0x67   :  { %11836 = shalt.err (!%p11833_p6)
}
  0x68   :  { %s11837_s20 = scalar_lea.vmem %s147_s1, 512  ;;  %p11842_p8 = scmp.lt.s32.totalorder %s147_s1, %s147_s1 }
  0x69   :  { %p11838_p7 = scmp.ne.s32.totalorder %s147_s1, %s11837_s20  ;;  %p11843_p9 = scmp.lt.s32.totalorder %s11837_s20, %s11837_s20 }
  0x6b   :  { %p11844_p10 = por %p11843_p9, %p11842_p8 }
  0x6d   :  { %p11845_p11 = pnand %p11844_p10, %p11838_p7 }
  0x6f   :  { %11848 = shalt.err (!%p11845_p11)
}
  0x70   :  { %152 = dma.hbm_to_vmem [thread:$0]  %s14521_s10, 512, %s147_s1, [#allocation17], %s12202_s22, %s12202_s22, %s12203_s23  }
  0x71   :  { %s12208_s24 = smov [#allocation19]   ;;  %s12209_s27 = smov [#allocation22]  }
  0x72   :  { %s171_s2 = sshll.u32 %s12208_s24, 4  ;;  %s193_s29 = sshll.u32 %s12209_s27, 4  ;;  %s172_s2 = int_to_ptr.vmem [resolvable:$true] %s171_s2  ;;  %s194_s29 = int_to_ptr.vmem [resolvable:$true] %s193_s29 }
  0x73   :  { %s11849_s0 = scalar_lea.hbm %s14523_s12, 32 }
  0x74   :  { %p11850_p12 = scmp.ne.s32.totalorder %s14523_s12, %s11849_s0  ;;  %p11853_p13 = scmp.lt.u32.totalorder %s11849_s0, %s14523_s12 }
  0x76   :  { %p11855_p0 = pnand %p11853_p13, %p11850_p12 }
  0x78   :  { %11858 = shalt.err (!%p11855_p0)
}
  0x79   :  { %s11859_s10 = scalar_lea.vmem %s172_s2, 32  ;;  %p11864_p2 = scmp.lt.s32.totalorder %s172_s2, %s172_s2 }
  0x7a   :  { %p11860_p1 = scmp.ne.s32.totalorder %s172_s2, %s11859_s10  ;;  %p11865_p3 = scmp.lt.s32.totalorder %s11859_s10, %s11859_s10 }
  0x7c   :  { %p11866_p4 = por %p11865_p3, %p11864_p2 }
  0x7e   :  { %p11867_p5 = pnand %p11866_p4, %p11860_p1 }
  0x80   :  { %11870 = shalt.err (!%p11867_p5)
}
  0x81   :  { %174 = dma.hbm_to_vmem [thread:$0]  %s14523_s12, 32, %s172_s2, [#allocation20]  }
  0x82   :  { %s11871_s20 = scalar_lea.hbm %s14525_s14, 16 }
  0x83   :  { %p11872_p6 = scmp.ne.s32.totalorder %s14525_s14, %s11871_s20  ;;  %p11875_p7 = scmp.lt.u32.totalorder %s11871_s20, %s14525_s14 }
  0x85   :  { %p11877_p8 = pnand %p11875_p7, %p11872_p6 }
  0x87   :  { %11880 = shalt.err (!%p11877_p8)
}
  0x88   :  { %s11881_s6 = scalar_lea.vmem %s194_s29, 16  ;;  %s11885_s28 = scalar_lea.vmem %s194_s29, 32 }
  0x89   :  { %p11882_p9 = scmp.ne.s32.totalorder %s194_s29, %s11881_s6  ;;  %p11886_p10 = scmp.lt.s32.totalorder %s194_s29, %s194_s29 }
  0x8a   :  { %p11887_p11 = scmp.lt.s32.totalorder %s11885_s28, %s11881_s6 }
  0x8c   :  { %p11888_p12 = por %p11887_p11, %p11886_p10 }
  0x8e   :  { %p11889_p13 = pnand %p11888_p12, %p11882_p9 }
  0x90   :  { %11892 = shalt.err (!%p11889_p13)
}
  0x91   :  { %196 = dma.hbm_to_vmem [thread:$0]  %s14525_s14, 16, %s194_s29, [#allocation23]  }
  0x92   :  { %s12210_s0 = smov [#allocation25]   ;;  %s12211_s26 = smov [#allocation28]  }
  0x93   :  { %s215_s30 = sshll.u32 %s12210_s0, 4  ;;  %s237_s4 = sshll.u32 %s12211_s26, 4  ;;  %s216_s30 = int_to_ptr.vmem [resolvable:$true] %s215_s30  ;;  %s238_s4 = int_to_ptr.vmem [resolvable:$true] %s237_s4 }
  0x94   :  { %s11893_s1 = scalar_lea.hbm %s14527_s16, 16 }
  0x95   :  { %p11894_p0 = scmp.ne.s32.totalorder %s14527_s16, %s11893_s1  ;;  %p11897_p1 = scmp.lt.u32.totalorder %s11893_s1, %s14527_s16 }
  0x97   :  { %p11899_p2 = pnand %p11897_p1, %p11894_p0 }
  0x99   :  { %11902 = shalt.err (!%p11899_p2)
}
  0x9a   :  { %s11903_s14 = scalar_lea.vmem %s216_s30, 16  ;;  %s11907_s29 = scalar_lea.vmem %s216_s30, 32 }
  0x9b   :  { %p11904_p3 = scmp.ne.s32.totalorder %s216_s30, %s11903_s14  ;;  %p11908_p4 = scmp.lt.s32.totalorder %s216_s30, %s216_s30 }
  0x9c   :  { %p11909_p5 = scmp.lt.s32.totalorder %s11907_s29, %s11903_s14 }
  0x9e   :  { %p11910_p6 = por %p11909_p5, %p11908_p4 }
  0xa0   :  { %p11911_p7 = pnand %p11910_p6, %p11904_p3 }
  0xa2   :  { %11914 = shalt.err (!%p11911_p7)
}
  0xa3   :  { %218 = dma.hbm_to_vmem [thread:$0]  %s14527_s16, 16, %s216_s30, [#allocation26]  }
  0xa4   :  { %s11915_s6 = scalar_lea.hbm %s14529_s18, 16 }
  0xa5   :  { %p11916_p8 = scmp.ne.s32.totalorder %s14529_s18, %s11915_s6  ;;  %p11919_p9 = scmp.lt.u32.totalorder %s11915_s6, %s14529_s18 }
  0xa7   :  { %p11921_p10 = pnand %p11919_p9, %p11916_p8 }
  0xa9   :  { %11924 = shalt.err (!%p11921_p10)
}
  0xaa   :  { %s11925_s26 = scalar_lea.vmem %s238_s4, 16  ;;  %s11929_s5 = scalar_lea.vmem %s238_s4, 32 }
  0xab   :  { %p11926_p11 = scmp.ne.s32.totalorder %s238_s4, %s11925_s26  ;;  %p11930_p12 = scmp.lt.s32.totalorder %s238_s4, %s238_s4 }
  0xac   :  { %p11931_p13 = scmp.lt.s32.totalorder %s11929_s5, %s11925_s26 }
  0xae   :  { %p11932_p0 = por %p11931_p13, %p11930_p12 }
  0xb0   :  { %p11933_p1 = pnand %p11932_p0, %p11926_p11 }
  0xb2   :  { %11936 = shalt.err (!%p11933_p1)
}
  0xb3   :  { %240 = dma.hbm_to_vmem [thread:$0]  %s14529_s18, 16, %s238_s4, [#allocation29]  }
  0xb4   :  { %s12212_s10 = smov [#allocation2]   ;;  %s14578_s19 = sld [smem:[#allocation92_spill]] }
  0xb5   :  { %s44_s1 = sshll.u32 %s12212_s10, 4  ;;  %s45_s1 = int_to_ptr.vmem [resolvable:$true] %s44_s1 }
  0xba   :  { %s11937_s20 = scalar_lea.hbm %s14578_s19, 131072 }
  0xbb   :  { %p11938_p2 = scmp.ne.s32.totalorder %s14578_s19, %s11937_s20  ;;  %p11941_p3 = scmp.lt.u32.totalorder %s11937_s20, %s14578_s19 }
  0xbd   :  { %p11943_p4 = pnand %p11941_p3, %p11938_p2 }
  0xbf   :  { %11946 = shalt.err (!%p11943_p4)
}
  0xc0   :  { %s11947_s24 = scalar_lea.vmem %s45_s1, 131072  ;;  %p11952_p6 = scmp.lt.s32.totalorder %s45_s1, %s45_s1 }
  0xc1   :  { %p11948_p5 = scmp.ne.s32.totalorder %s45_s1, %s11947_s24  ;;  %p11953_p7 = scmp.lt.s32.totalorder %s11947_s24, %s11947_s24 }
  0xc3   :  { %p11954_p8 = por %p11953_p7, %p11952_p6 }
  0xc5   :  { %p11955_p9 = pnand %p11954_p8, %p11948_p5 }
  0xc7   :  { %11958 = shalt.err (!%p11955_p9)
}
  0xc8   :  { %s12213_s18 = smov 512   ;;  %s12214_s4 = smov 32  }
  0xc9   :  { %50 = dma.hbm_to_vmem [thread:$0]  %s14578_s19, 131072, %s45_s1, [#allocation3], %s12213_s18, %s12213_s18, %s12214_s4  }
  0xca   :  { %s12215_s28 = smov [#allocation6]   ;;  %s12216_s2 = smov [#allocation9]  }
  0xcb   :  { %s69_s12 = sshll.u32 %s12215_s28, 4  ;;  %s90_s0 = sshll.u32 %s12216_s2, 4  ;;  %s70_s12 = int_to_ptr.vmem [resolvable:$true] %s69_s12  ;;  %s12485_s0 = int_to_ptr.vmem [resolvable:$true] %s90_s0 }
  0xcc   :  { %s14579_s16 = sld [smem:[#allocation94_spill]] }
  0xd2   :  { %s11959_s30 = scalar_lea.hbm %s14579_s16, 16 }
  0xd3   :  { %p11960_p10 = scmp.ne.s32.totalorder %s14579_s16, %s11959_s30  ;;  %p11963_p11 = scmp.lt.u32.totalorder %s11959_s30, %s14579_s16 }
  0xd5   :  { %p11965_p12 = pnand %p11963_p11, %p11960_p10 }
  0xd7   :  { %11968 = shalt.err (!%p11965_p12)
}
  0xd8   :  { %s11969_s1 = scalar_lea.vmem %s70_s12, 16  ;;  %s11973_s19 = scalar_lea.vmem %s70_s12, 32 }
  0xd9   :  { %p11970_p13 = scmp.ne.s32.totalorder %s70_s12, %s11969_s1  ;;  %p11974_p0 = scmp.lt.s32.totalorder %s70_s12, %s70_s12 }
  0xda   :  { %p11975_p1 = scmp.lt.s32.totalorder %s11973_s19, %s11969_s1 }
  0xdc   :  { %p11976_p2 = por %p11975_p1, %p11974_p0 }
  0xde   :  { %p11977_p3 = pnand %p11976_p2, %p11970_p13 }
  0xe0   :  { %11980 = shalt.err (!%p11977_p3)
}
  0xe1   :  { %72 = dma.hbm_to_vmem [thread:$0]  %s14579_s16, 16, %s70_s12, [#allocation5]  }
  0xe2   :  { %s14580_s24 = sld [smem:[#allocation96_spill]] }
  0xe8   :  { %s11981_s18 = scalar_lea.hbm %s14580_s24, 8192 }
  0xe9   :  { %p11982_p4 = scmp.ne.s32.totalorder %s14580_s24, %s11981_s18  ;;  %p11985_p5 = scmp.lt.u32.totalorder %s11981_s18, %s14580_s24 }
  0xeb   :  { %p11987_p6 = pnand %p11985_p5, %p11982_p4 }
  0xed   :  { %11990 = shalt.err (!%p11987_p6)
}
  0xee   :  { %s11991_s26 = scalar_lea.vmem %s12485_s0, 8192  ;;  %p11996_p8 = scmp.lt.s32.totalorder %s12485_s0, %s12485_s0 }
  0xef   :  { %p11992_p7 = scmp.ne.s32.totalorder %s12485_s0, %s11991_s26  ;;  %p11997_p9 = scmp.lt.s32.totalorder %s11991_s26, %s11991_s26 }
  0xf1   :  { %p11998_p10 = por %p11997_p9, %p11996_p8 }
  0xf3   :  { %p11999_p11 = pnand %p11998_p10, %p11992_p7 }
  0xf5   :  { %12002 = shalt.err (!%p11999_p11)
}
  0xf6   :  { %96 = dma.hbm_to_vmem [thread:$0]  %s14580_s24, 8192, %s12485_s0, [#allocation8], %s12202_s22, %s12202_s22, %s12203_s23  }
  0xf7   :  { %s12217_s16 = smov [#allocation12]   ;;  %s12218_s10 = smov [#allocation15]  }
  0xf8   :  { %s112_s30 = sshll.u32 %s12217_s16, 4  ;;  %s137_s3 = sshll.u32 %s12218_s10, 4  ;;  %s113_s30 = int_to_ptr.vmem [resolvable:$true] %s112_s30  ;;  %s138_s3 = int_to_ptr.vmem [resolvable:$true] %s137_s3 }
  0xf9   :  { %s12003_s1 = scalar_lea.hbm %s14518_s7, 2048 }
  0xfa   :  { %p12004_p12 = scmp.ne.s32.totalorder %s14518_s7, %s12003_s1  ;;  %p12007_p13 = scmp.lt.u32.totalorder %s12003_s1, %s14518_s7 }
  0xfc   :  { %p12009_p0 = pnand %p12007_p13, %p12004_p12 }
  0xfe   :  { %12012 = shalt.err (!%p12009_p0)
}
  0xff   :  { %s12013_s0 = scalar_lea.vmem %s113_s30, 2048  ;;  %p12018_p2 = scmp.lt.s32.totalorder %s113_s30, %s113_s30 }
 0x100   :  { %p12014_p1 = scmp.ne.s32.totalorder %s113_s30, %s12013_s0  ;;  %p12019_p3 = scmp.lt.s32.totalorder %s12013_s0, %s12013_s0 }
 0x102   :  { %p12020_p4 = por %p12019_p3, %p12018_p2 }
 0x104   :  { %p12021_p5 = pnand %p12020_p4, %p12014_p1 }
 0x106   :  { %12024 = shalt.err (!%p12021_p5)
}
 0x107   :  { %118 = dma.hbm_to_vmem [thread:$0]  %s14518_s7, 2048, %s113_s30, [#allocation11], %s12202_s22, %s12202_s22, %s12203_s23  }
 0x108   :  { %s12025_s6 = scalar_lea.hbm %s14520_s9, 16 }
 0x109   :  { %p12026_p6 = scmp.ne.s32.totalorder %s14520_s9, %s12025_s6  ;;  %p12029_p7 = scmp.lt.u32.totalorder %s12025_s6, %s14520_s9 }
 0x10b   :  { %p12031_p8 = pnand %p12029_p7, %p12026_p6 }
 0x10d   :  { %12034 = shalt.err (!%p12031_p8)
}
 0x10e   :  { %s12035_s5 = scalar_lea.vmem %s138_s3, 16  ;;  %s12039_s16 = scalar_lea.vmem %s138_s3, 32 }
 0x10f   :  { %p12036_p9 = scmp.ne.s32.totalorder %s138_s3, %s12035_s5  ;;  %p12040_p10 = scmp.lt.s32.totalorder %s138_s3, %s138_s3 }
 0x110   :  { %p12041_p11 = scmp.lt.s32.totalorder %s12039_s16, %s12035_s5 }
 0x112   :  { %p12042_p12 = por %p12041_p11, %p12040_p10 }
 0x114   :  { %p12043_p13 = pnand %p12042_p12, %p12036_p9 }
 0x116   :  { %12046 = shalt.err (!%p12043_p13)
}
 0x117   :  { %140 = dma.hbm_to_vmem [thread:$0]  %s14520_s9, 16, %s138_s3, [#allocation14]  }
 0x118   :  { %s12219_s10 = smov [#allocation18]   ;;  %s12047_s19 = scalar_lea.hbm %s14522_s11, 65536 }
 0x119   :  { %s158_s21 = sshll.u32 %s12219_s10, 4  ;;  %p12048_p0 = scmp.ne.s32.totalorder %s14522_s11, %s12047_s19  ;;  %s159_s21 = int_to_ptr.vmem [resolvable:$true] %s158_s21 }
 0x11a   :  { %p12051_p1 = scmp.lt.u32.totalorder %s12047_s19, %s14522_s11 }
 0x11c   :  { %p12053_p2 = pnand %p12051_p1, %p12048_p0 }
 0x11e   :  { %12056 = shalt.err (!%p12053_p2)
}
 0x11f   :  { %s12057_s25 = scalar_lea.vmem %s159_s21, 65536  ;;  %p12062_p4 = scmp.lt.s32.totalorder %s159_s21, %s159_s21 }
 0x120   :  { %p12058_p3 = scmp.ne.s32.totalorder %s159_s21, %s12057_s25  ;;  %p12063_p5 = scmp.lt.s32.totalorder %s12057_s25, %s12057_s25 }
 0x122   :  { %p12064_p6 = por %p12063_p5, %p12062_p4 }
 0x124   :  { %p12065_p7 = pnand %p12064_p6, %p12058_p3 }
 0x126   :  { %12068 = shalt.err (!%p12065_p7)
}
 0x127   :  { %s12220_s9 = smov 256   ;;  %s12221_s3 = smov 16  }
 0x128   :  { %164 = dma.hbm_to_vmem [thread:$0]  %s14522_s11, 65536, %s159_s21, [#allocation17], %s12220_s9, %s12220_s9, %s12221_s3  }
 0x129   :  { %s12222_s27 = smov [#allocation21]   ;;  %s12223_s28 = smov [#allocation24]  }
 0x12a   :  { %s180_s6 = sshll.u32 %s12222_s27, 4  ;;  %s202_s2 = sshll.u32 %s12223_s28, 4  ;;  %s181_s6 = int_to_ptr.vmem [resolvable:$true] %s180_s6  ;;  %s203_s2 = int_to_ptr.vmem [resolvable:$true] %s202_s2 }
 0x12b   :  { %s12069_s5 = scalar_lea.hbm %s14524_s13, 4096 }
 0x12c   :  { %p12070_p8 = scmp.ne.s32.totalorder %s14524_s13, %s12069_s5  ;;  %p12073_p9 = scmp.lt.u32.totalorder %s12069_s5, %s14524_s13 }
 0x12e   :  { %p12075_p10 = pnand %p12073_p9, %p12070_p8 }
 0x130   :  { %12078 = shalt.err (!%p12075_p10)
}
 0x131   :  { %s12079_s11 = scalar_lea.vmem %s181_s6, 4096  ;;  %p12084_p12 = scmp.lt.s32.totalorder %s181_s6, %s181_s6 }
 0x132   :  { %p12080_p11 = scmp.ne.s32.totalorder %s181_s6, %s12079_s11  ;;  %p12085_p13 = scmp.lt.s32.totalorder %s12079_s11, %s12079_s11 }
 0x134   :  { %p12086_p0 = por %p12085_p13, %p12084_p12 }
 0x136   :  { %p12087_p1 = pnand %p12086_p0, %p12080_p11 }
 0x138   :  { %12090 = shalt.err (!%p12087_p1)
}
 0x139   :  { %186 = dma.hbm_to_vmem [thread:$0]  %s14524_s13, 4096, %s181_s6, [#allocation20], %s12202_s22, %s12202_s22, %s12203_s23  }
 0x13a   :  { %s12091_s14 = scalar_lea.hbm %s14526_s15, 2048 }
 0x13b   :  { %p12092_p2 = scmp.ne.s32.totalorder %s14526_s15, %s12091_s14  ;;  %p12095_p3 = scmp.lt.u32.totalorder %s12091_s14, %s14526_s15 }
 0x13d   :  { %p12097_p4 = pnand %p12095_p3, %p12092_p2 }
 0x13f   :  { %12100 = shalt.err (!%p12097_p4)
}
 0x140   :  { %s12101_s9 = scalar_lea.vmem %s203_s2, 2048  ;;  %p12106_p6 = scmp.lt.s32.totalorder %s203_s2, %s203_s2 }
 0x141   :  { %p12102_p5 = scmp.ne.s32.totalorder %s203_s2, %s12101_s9  ;;  %p12107_p7 = scmp.lt.s32.totalorder %s12101_s9, %s12101_s9 }
 0x143   :  { %p12108_p8 = por %p12107_p7, %p12106_p6 }
 0x145   :  { %p12109_p9 = pnand %p12108_p8, %p12102_p5 }
 0x147   :  { %12112 = shalt.err (!%p12109_p9)
}
 0x148   :  { %208 = dma.hbm_to_vmem [thread:$0]  %s14526_s15, 2048, %s203_s2, [#allocation23], %s12202_s22, %s12202_s22, %s12203_s23  }
 0x149   :  { %s12224_s18 = smov [#allocation27]   ;;  %s12225_s6 = smov [#allocation30]  }
 0x14a   :  { %s224_s27 = sshll.u32 %s12224_s18, 4  ;;  %s246_s28 = sshll.u32 %s12225_s6, 4  ;;  %s225_s27 = int_to_ptr.vmem [resolvable:$true] %s224_s27  ;;  %s247_s28 = int_to_ptr.vmem [resolvable:$true] %s246_s28 }
 0x14b   :  { %s12113_s5 = scalar_lea.hbm %s14528_s17, 2048 }
 0x14c   :  { %p12114_p10 = scmp.ne.s32.totalorder %s14528_s17, %s12113_s5  ;;  %p12117_p11 = scmp.lt.u32.totalorder %s12113_s5, %s14528_s17 }
 0x14e   :  { %p12119_p12 = pnand %p12117_p11, %p12114_p10 }
 0x150   :  { %12122 = shalt.err (!%p12119_p12)
}
 0x151   :  { %s12123_s15 = scalar_lea.vmem %s225_s27, 2048  ;;  %p12128_p0 = scmp.lt.s32.totalorder %s225_s27, %s225_s27 }
 0x152   :  { %p12124_p13 = scmp.ne.s32.totalorder %s225_s27, %s12123_s15  ;;  %p12129_p1 = scmp.lt.s32.totalorder %s12123_s15, %s12123_s15 }
 0x154   :  { %p12130_p2 = por %p12129_p1, %p12128_p0 }
 0x156   :  { %p12131_p3 = pnand %p12130_p2, %p12124_p13 }
 0x158   :  { %12134 = shalt.err (!%p12131_p3)
}
 0x159   :  { %230 = dma.hbm_to_vmem [thread:$0]  %s14528_s17, 2048, %s225_s27, [#allocation26], %s12202_s22, %s12202_s22, %s12203_s23  }
 0x15a   :  { %s14581_s1 = sld [smem:[#allocation97_spill]] }
 0x160   :  { %s12135_s19 = scalar_lea.hbm %s14581_s1, 2048 }
 0x161   :  { %p12136_p4 = scmp.ne.s32.totalorder %s14581_s1, %s12135_s19  ;;  %p12139_p5 = scmp.lt.u32.totalorder %s12135_s19, %s14581_s1 }
 0x163   :  { %p12141_p6 = pnand %p12139_p5, %p12136_p4 }
 0x165   :  { %12144 = shalt.err (!%p12141_p6)
}
 0x166   :  { %s12145_s25 = scalar_lea.vmem %s247_s28, 2048  ;;  %p12150_p8 = scmp.lt.s32.totalorder %s247_s28, %s247_s28 }
 0x167   :  { %p12146_p7 = scmp.ne.s32.totalorder %s247_s28, %s12145_s25  ;;  %p12151_p9 = scmp.lt.s32.totalorder %s12145_s25, %s12145_s25 }
 0x169   :  { %p12152_p10 = por %p12151_p9, %p12150_p8 }
 0x16b   :  { %p12153_p11 = pnand %p12152_p10, %p12146_p7 }
 0x16d   :  { %12156 = shalt.err (!%p12153_p11)
}
 0x16e   :  { %252 = dma.hbm_to_vmem [thread:$0]  %s14581_s1, 2048, %s247_s28, [#allocation29], %s12202_s22, %s12202_s22, %s12203_s23  }
 0x16f   :  { %s12226_s13 = smov [#allocation31]   ;;  %s14582_s6 = sld [smem:[#allocation98_spill]] }
 0x170   :  { %s259_s24 = sshll.u32 %s12226_s13, 4  ;;  %s260_s24 = int_to_ptr.vmem [resolvable:$true] %s259_s24 }
 0x175   :  { %s12157_s26 = scalar_lea.hbm %s14582_s6, 16 }
 0x176   :  { %p12158_p12 = scmp.ne.s32.totalorder %s14582_s6, %s12157_s26  ;;  %p12161_p13 = scmp.lt.u32.totalorder %s12157_s26, %s14582_s6 }
 0x178   :  { %p12163_p0 = pnand %p12161_p13, %p12158_p12 }
 0x17a   :  { %12166 = shalt.err (!%p12163_p0)
}
 0x17b   :  { %s12167_s30 = scalar_lea.vmem %s260_s24, 16  ;;  %s12171_s22 = scalar_lea.vmem %s260_s24, 32 }
 0x17c   :  { %p12168_p1 = scmp.ne.s32.totalorder %s260_s24, %s12167_s30  ;;  %p12172_p2 = scmp.lt.s32.totalorder %s260_s24, %s260_s24 }
 0x17d   :  { %p12173_p3 = scmp.lt.s32.totalorder %s12171_s22, %s12167_s30 }
 0x17f   :  { %p12174_p4 = por %p12173_p3, %p12172_p2 }
 0x181   :  { %p12175_p5 = pnand %p12174_p4, %p12168_p1 }
 0x183   :  { %12178 = shalt.err (!%p12175_p5)
}
 0x184   :  { %262 = dma.hbm_to_vmem [thread:$0]  %s14582_s6, 16, %s260_s24, [#allocation32]  }
 0x185   :  { %12179 = dma.done.wait [#allocation3], 131072  }
 0x186   :  { %12180 = vsyncadd [#allocation3], 4294836224 }
 0x187   :  { %12181 = dma.done.wait [#allocation5], 2064  }
 0x188   :  { %12182 = vsyncadd [#allocation5], 4294965232 }
 0x189   :  { %12183 = dma.done.wait [#allocation8], 16384  }
 0x18a   :  { %12184 = vsyncadd [#allocation8], 4294950912 }
 0x18b   :  { %12185 = dma.done.wait [#allocation11], 2064  }
 0x18c   :  { %12186 = vsyncadd [#allocation11], 4294965232 }
 0x18d   :  { %12187 = dma.done.wait [#allocation14], 16400  }
 0x18e   :  { %12188 = vsyncadd [#allocation14], 4294950896 }
 0x18f   :  { %12189 = dma.done.wait [#allocation17], 66048  }
 0x190   :  { %12190 = vsyncadd [#allocation17], 4294901248 }
 0x191   :  { %12191 = dma.done.wait [#allocation20], 4128  }
 0x192   :  { %12192 = vsyncadd [#allocation20], 4294963168 }
 0x193   :  { %12193 = dma.done.wait [#allocation23], 2064  }
 0x194   :  { %12194 = vsyncadd [#allocation23], 4294965232 }
 0x195   :  { %12195 = dma.done.wait [#allocation26], 2064  }
 0x196   :  { %12196 = vsyncadd [#allocation26], 4294965232 }
 0x197   :  { %12197 = dma.done.wait [#allocation29], 2064  }
 0x198   :  { %12198 = vsyncadd [#allocation29], 4294965232 }
 0x199   :  { %12199 = dma.done.wait [#allocation32], 16  }
 0x19a   :  { %12200 = vsyncadd [#allocation32], 4294967280  ;;  %v14541_v0 = vmov 0.0|0.0   ;;  %s14583_s11 = sld [smem:[#allocation91_spill]]  ;;  %v388_v12 = vld [vmem:[#allocation2 + $0x8] sm:$0xff]  ;;  %v387_v52 = vld [vmem:[#allocation2] sm:$0xff] }
 0x19b   :  { %9551 = vmatprep.subr.bf16.mxu0 %v14541_v0  ;;  %10527 = vmatprep.subr.bf16.mxu1 %v14541_v0  ;;  %v392_v54 = vld [vmem:[#allocation2 + $0x28] sm:$0xff]  ;;  %v391_v57 = vld [vmem:[#allocation2 + $0x20] sm:$0xff]  ;;  %s12231_s5 = smov 56   ;;  %s12232_s16 = smov 64   ;;  %vm5061_vm0 = vcmask 64512   ;;  %vm5078_vm1 = vcmask 130048  }
 0x19c   :  { %1475 = vmatprep.mubr.f32.mxu0 %v388_v12  ;;  %v396_v59 = vld [vmem:[#allocation2 + $0x48] sm:$0xff]  ;;  %v395_v62 = vld [vmem:[#allocation2 + $0x40] sm:$0xff]  ;;  %s12233_s7 = smov 72   ;;  %vm5095_vm2 = vcmask 195584   ;;  %vm5112_vm3 = vcmask 261120   ;;  %vm5129_vm4 = vcmask 326656  }
 0x19d   :  { %v407_v12 = vld [vmem:[#allocation2 + $0xa0] sm:$0xff]  ;;  %vm5146_vm5 = vcmask 392192   ;;  %vm5163_vm6 = vcmask 457728   ;;  %vm5180_vm7 = vcmask 523264   ;;  %s12234_s30 = smov 80   ;;  %vm5197_vm8 = vcmask 588800  }
 0x19e   :  { %s12235_s22 = smov 88   ;;  %vm5214_vm9 = vcmask 654336   ;;  %s12236_s28 = smov 96   ;;  %vm5231_vm10 = vcmask 719872   ;;  %vm5248_vm11 = vcmask 785408   ;;  %vm5265_vm12 = vcmask 850944  }
 0x19f   :  { %s12237_s10 = smov 104   ;;  %s12238_s15 = smov 112   ;;  %vm5282_vm13 = vcmask 916480   ;;  %vm5299_vm14 = vcmask 982016   ;;  %vm12240_vm15 = vmmov 0  }
 0x1a0   :  { %v323_v1 = vld [vmem:[%s14583_s11] sm:$0xff]  ;;  %v324_v2 = vld [vmem:[%s14583_s11 + $0x8] sm:$0xff]  ;;  %v325_v3 = vld [vmem:[%s14583_s11 + $0x10] sm:$0xff]  ;;  %s12239_s2 = smov 120   ;;  %s14717_s20 = sld [smem:[#allocation99_spill]] }
 0x1a1   :  { %v9552_v4 = vpack.c.bf16 %v324_v2, %v323_v1  ;;  %v326_v5 = vld [vmem:[%s14583_s11 + $0x18] sm:$0xff]  ;;  %v327_v7 = vld [vmem:[%s14583_s11 + $0x20] sm:$0xff]  ;;  %v328_v8 = vld [vmem:[%s14583_s11 + $0x28] sm:$0xff] }
 0x1a2   :  { %v9555_v6 = vpack.c.bf16 %v326_v5, %v325_v3  ;;  %v9558_v9 = vpack.c.bf16 %v328_v8, %v327_v7  ;;  %v329_v10 = vld [vmem:[%s14583_s11 + $0x30] sm:$0xff]  ;;  %v330_v11 = vld [vmem:[%s14583_s11 + $0x38] sm:$0xff]  ;;  %v331_v14 = vld [vmem:[%s14583_s11 + $0x40] sm:$0xff] }
 0x1a3   :  { %9553 = vmatpush1.bf16.msra.mxu0 %v9552_v4  ;;  %10543 = vmatpush1.bf16.msra.mxu1 %v9552_v4  ;;  %v9561_v13 = vpack.c.bf16 %v330_v11, %v329_v10  ;;  %v332_v15 = vld [vmem:[%s14583_s11 + $0x48] sm:$0xff]  ;;  %v333_v17 = vld [vmem:[%s14583_s11 + $0x50] sm:$0xff]  ;;  %v334_v18 = vld [vmem:[%s14583_s11 + $0x58] sm:$0xff] }
 0x1a4   :  { %9554 = vmatprep.subr.bf16.mxu0 %v14541_v0  ;;  %10528 = vmatprep.subr.bf16.mxu1 %v14541_v0  ;;  %v9564_v16 = vpack.c.bf16 %v332_v15, %v331_v14  ;;  %v9567_v19 = vpack.c.bf16 %v334_v18, %v333_v17  ;;  %v335_v20 = vld [vmem:[%s14583_s11 + $0x60] sm:$0xff]  ;;  %v336_v21 = vld [vmem:[%s14583_s11 + $0x68] sm:$0xff]  ;;  %v337_v23 = vld [vmem:[%s14583_s11 + $0x70] sm:$0xff] }
 0x1a5   :  { %v9570_v22 = vpack.c.bf16 %v336_v21, %v335_v20  ;;  %v338_v24 = vld [vmem:[%s14583_s11 + $0x78] sm:$0xff]  ;;  %v339_v26 = vld [vmem:[%s14583_s11 + $0x80] sm:$0xff]  ;;  %v340_v27 = vld [vmem:[%s14583_s11 + $0x88] sm:$0xff] }
 0x1a6   :  { %v9573_v25 = vpack.c.bf16 %v338_v24, %v337_v23  ;;  %v9576_v28 = vpack.c.bf16 %v340_v27, %v339_v26  ;;  %v341_v29 = vld [vmem:[%s14583_s11 + $0x90] sm:$0xff]  ;;  %v342_v30 = vld [vmem:[%s14583_s11 + $0x98] sm:$0xff]  ;;  %v343_v32 = vld [vmem:[%s14583_s11 + $0xa0] sm:$0xff] }
 0x1a7   :  { %9556 = vmatpush1.bf16.msra.mxu0 %v9555_v6  ;;  %10544 = vmatpush1.bf16.msra.mxu1 %v9555_v6  ;;  %v9579_v31 = vpack.c.bf16 %v342_v30, %v341_v29  ;;  %v344_v33 = vld [vmem:[%s14583_s11 + $0xa8] sm:$0xff]  ;;  %v345_v35 = vld [vmem:[%s14583_s11 + $0xb0] sm:$0xff]  ;;  %v346_v36 = vld [vmem:[%s14583_s11 + $0xb8] sm:$0xff] }
 0x1a8   :  { %9557 = vmatprep.subr.bf16.mxu0 %v14541_v0  ;;  %10529 = vmatprep.subr.bf16.mxu1 %v14541_v0  ;;  %v9582_v34 = vpack.c.bf16 %v344_v33, %v343_v32  ;;  %v9585_v37 = vpack.c.bf16 %v346_v36, %v345_v35  ;;  %v347_v38 = vld [vmem:[%s14583_s11 + $0xc0] sm:$0xff]  ;;  %v348_v39 = vld [vmem:[%s14583_s11 + $0xc8] sm:$0xff]  ;;  %v349_v41 = vld [vmem:[%s14583_s11 + $0xd0] sm:$0xff] }
 0x1a9   :  { %v9588_v40 = vpack.c.bf16 %v348_v39, %v347_v38  ;;  %v350_v42 = vld [vmem:[%s14583_s11 + $0xd8] sm:$0xff]  ;;  %v351_v44 = vld [vmem:[%s14583_s11 + $0xe0] sm:$0xff]  ;;  %v352_v45 = vld [vmem:[%s14583_s11 + $0xe8] sm:$0xff] }
 0x1aa   :  { %v9591_v43 = vpack.c.bf16 %v350_v42, %v349_v41  ;;  %v9594_v46 = vpack.c.bf16 %v352_v45, %v351_v44  ;;  %v353_v47 = vld [vmem:[%s14583_s11 + $0xf0] sm:$0xff]  ;;  %v354_v48 = vld [vmem:[%s14583_s11 + $0xf8] sm:$0xff]  ;;  %v355_v50 = vld [vmem:[%s14583_s11 + $0x100] sm:$0xff] }
 0x1ab   :  { %9559 = vmatpush1.bf16.msra.mxu0 %v9558_v9  ;;  %10545 = vmatpush1.bf16.msra.mxu1 %v9558_v9  ;;  %v9597_v49 = vpack.c.bf16 %v354_v48, %v353_v47  ;;  %v356_v51 = vld [vmem:[%s14583_s11 + $0x108] sm:$0xff]  ;;  %v357_v55 = vld [vmem:[%s14583_s11 + $0x110] sm:$0xff]  ;;  %v358_v56 = vld [vmem:[%s14583_s11 + $0x118] sm:$0xff] }
 0x1ac   :  { %9560 = vmatprep.subr.bf16.mxu0 %v14541_v0  ;;  %10530 = vmatprep.subr.bf16.mxu1 %v14541_v0  ;;  %v9600_v53 = vpack.c.bf16 %v356_v51, %v355_v50  ;;  %v9603_v58 = vpack.c.bf16 %v358_v56, %v357_v55  ;;  %v359_v60 = vld [vmem:[%s14583_s11 + $0x120] sm:$0xff]  ;;  %v360_v61 = vld [vmem:[%s14583_s11 + $0x128] sm:$0xff]  ;;  %v361_v2 = vld [vmem:[%s14583_s11 + $0x130] sm:$0xff] }
 0x1ad   :  { %v9606_v63 = vpack.c.bf16 %v360_v61, %v359_v60  ;;  %v400_v1 = vld [vmem:[#allocation2 + $0x68] sm:$0xff]  ;;  %v362_v3 = vld [vmem:[%s14583_s11 + $0x138] sm:$0xff]  ;;  %v399_v4 = vld [vmem:[#allocation2 + $0x60] sm:$0xff] }
 0x1ae   :  { %v9609_v5 = vpack.c.bf16 %v362_v3, %v361_v2  ;;  %v404_v6 = vld [vmem:[#allocation2 + $0x88] sm:$0xff]  ;;  %v363_v7 = vld [vmem:[%s14583_s11 + $0x140] sm:$0xff]  ;;  %v366_v20 = vld [vmem:[%s14583_s11 + $0x158] sm:$0xff] }
 0x1af   :  { %9562 = vmatpush1.bf16.msra.mxu0 %v9561_v13  ;;  %10546 = vmatpush1.bf16.msra.mxu1 %v9561_v13  ;;  %v364_v8 = vld [vmem:[%s14583_s11 + $0x148] sm:$0xff]  ;;  %v403_v9 = vld [vmem:[#allocation2 + $0x80] sm:$0xff]  ;;  %v369_v56 = vld [vmem:[%s14583_s11 + $0x170] sm:$0xff] }
 0x1b0   :  { %9563 = vmatprep.subr.bf16.mxu0 %v14541_v0  ;;  %10531 = vmatprep.subr.bf16.mxu1 %v14541_v0  ;;  %v9612_v10 = vpack.c.bf16 %v364_v8, %v363_v7  ;;  %v408_v11 = vld [vmem:[#allocation2 + $0xa8] sm:$0xff]  ;;  %v411_v14 = vld [vmem:[#allocation2 + $0xc0] sm:$0xff] }
 0x1b1   :  { %v412_v13 = vld [vmem:[#allocation2 + $0xc8] sm:$0xff]  ;;  %v419_v18 = vld [vmem:[#allocation2 + $0x100] sm:$0xff] }
 0x1b2   :  { %v416_v15 = vld [vmem:[#allocation2 + $0xe8] sm:$0xff]  ;;  %v423_v23 = vld [vmem:[#allocation2 + $0x120] sm:$0xff] }
 0x1b3   :  { %9565 = vmatpush1.bf16.msra.mxu0 %v9564_v16  ;;  %10547 = vmatpush1.bf16.msra.mxu1 %v9564_v16  ;;  %v415_v16 = vld [vmem:[#allocation2 + $0xe0] sm:$0xff]  ;;  %v420_v17 = vld [vmem:[#allocation2 + $0x108] sm:$0xff] }
 0x1b4   :  { %9566 = vmatprep.subr.bf16.mxu0 %v14541_v0  ;;  %10532 = vmatprep.subr.bf16.mxu1 %v14541_v0  ;;  %v424_v21 = vld [vmem:[#allocation2 + $0x128] sm:$0xff]  ;;  %v431_v27 = vld [vmem:[#allocation2 + $0x160] sm:$0xff] }
 0x1b5   :  { %v428_v24 = vld [vmem:[#allocation2 + $0x148] sm:$0xff]  ;;  %v435_v29 = vld [vmem:[#allocation2 + $0x180] sm:$0xff] }
 0x1b6   :  { %v432_v26 = vld [vmem:[#allocation2 + $0x168] sm:$0xff]  ;;  %v443_v33 = vld [vmem:[#allocation2 + $0x1c0] sm:$0xff] }
 0x1b7   :  { %9568 = vmatpush1.bf16.msra.mxu0 %v9567_v19  ;;  %10548 = vmatpush1.bf16.msra.mxu1 %v9567_v19  ;;  %v365_v19 = vld [vmem:[%s14583_s11 + $0x150] sm:$0xff]  ;;  %v440_v30 = vld [vmem:[#allocation2 + $0x1a8] sm:$0xff]  ;;  %v447_v35 = vld [vmem:[#allocation2 + $0x1e0] sm:$0xff] }
 0x1b8   :  { %9569 = vmatprep.subr.bf16.mxu0 %v14541_v0  ;;  %10533 = vmatprep.subr.bf16.mxu1 %v14541_v0  ;;  %v444_v32 = vld [vmem:[#allocation2 + $0x1c8] sm:$0xff]  ;;  %v451_v39 = vld [vmem:[#allocation2 + $0x200] sm:$0xff] }
 0x1b9   :  { %v452_v36 = vld [vmem:[#allocation2 + $0x208] sm:$0xff]  ;;  %v455_v42 = vld [vmem:[#allocation2 + $0x220] sm:$0xff] }
 0x1ba   :  { %v368_v38 = vld [vmem:[%s14583_s11 + $0x168] sm:$0xff]  ;;  %v459_v44 = vld [vmem:[#allocation2 + $0x240] sm:$0xff] }
 0x1bb   :  { %9571 = vmatpush1.bf16.msra.mxu0 %v9570_v22  ;;  %10549 = vmatpush1.bf16.msra.mxu1 %v9570_v22  ;;  %v9615_v22 = vpack.c.bf16 %v366_v20, %v365_v19  ;;  %v456_v41 = vld [vmem:[#allocation2 + $0x228] sm:$0xff]  ;;  %v467_v48 = vld [vmem:[#allocation2 + $0x280] sm:$0xff] }
 0x1bc   :  { %9572 = vmatprep.subr.bf16.mxu0 %v14541_v0  ;;  %10534 = vmatprep.subr.bf16.mxu1 %v14541_v0  ;;  %v464_v45 = vld [vmem:[#allocation2 + $0x268] sm:$0xff]  ;;  %v471_v50 = vld [vmem:[#allocation2 + $0x2a0] sm:$0xff] }
 0x1bd   :  { %v468_v47 = vld [vmem:[#allocation2 + $0x288] sm:$0xff]  ;;  %v487_v61 = vld [vmem:[#allocation2 + $0x320] sm:$0xff] }
 0x1be   :  { %v476_v51 = vld [vmem:[#allocation2 + $0x2c8] sm:$0xff]  ;;  %v495_v2 = vld [vmem:[#allocation2 + $0x360] sm:$0xff] }
 0x1bf   :  { %9574 = vmatpush1.bf16.msra.mxu0 %v9573_v25  ;;  %10550 = vmatpush1.bf16.msra.mxu1 %v9573_v25  ;;  %v427_v25 = vld [vmem:[#allocation2 + $0x140] sm:$0xff]  ;;  %v484_v55 = vld [vmem:[#allocation2 + $0x308] sm:$0xff] }
 0x1c0   :  { %9575 = vmatprep.subr.bf16.mxu0 %v14541_v0  ;;  %10535 = vmatprep.subr.bf16.mxu1 %v14541_v0  ;;  %v488_v60 = vld [vmem:[#allocation2 + $0x328] sm:$0xff]  ;;  %v507_v8 = vld [vmem:[#allocation2 + $0x3c0] sm:$0xff] }
 0x1c1   :  { %v500_v3 = vld [vmem:[#allocation2 + $0x388] sm:$0xff]  ;;  %v523_v19 = vld [vmem:[#allocation2 + $0x440] sm:$0xff] }
 0x1c2   :  { %v508_v7 = vld [vmem:[#allocation2 + $0x3c8] sm:$0xff] }
 0x1c3   :  { %9577 = vmatpush1.bf16.msra.mxu0 %v9576_v28  ;;  %10551 = vmatpush1.bf16.msra.mxu1 %v9576_v28  ;;  %v436_v28 = vld [vmem:[#allocation2 + $0x188] sm:$0xff] }
 0x1c4   :  { %9578 = vmatprep.subr.bf16.mxu0 %v14541_v0  ;;  %10536 = vmatprep.subr.bf16.mxu1 %v14541_v0  ;;  %v528_v20 = vld [vmem:[#allocation2 + $0x468] sm:$0xff] }
 0x1c7   :  { %9580 = vmatpush1.bf16.msra.mxu0 %v9579_v31  ;;  %10552 = vmatpush1.bf16.msra.mxu1 %v9579_v31  ;;  %v439_v31 = vld [vmem:[#allocation2 + $0x1a0] sm:$0xff] }
 0x1c8   :  { %9581 = vmatprep.subr.bf16.mxu0 %v14541_v0  ;;  %10537 = vmatprep.subr.bf16.mxu1 %v14541_v0 }
 0x1cb   :  { %9583 = vmatpush1.bf16.msra.mxu0 %v9582_v34  ;;  %10553 = vmatpush1.bf16.msra.mxu1 %v9582_v34  ;;  %v448_v34 = vld [vmem:[#allocation2 + $0x1e8] sm:$0xff] }
 0x1cc   :  { %9584 = vmatprep.subr.bf16.mxu0 %v14541_v0  ;;  %10538 = vmatprep.subr.bf16.mxu1 %v14541_v0 }
 0x1cf   :  { %9586 = vmatpush1.bf16.msra.mxu0 %v9585_v37  ;;  %10554 = vmatpush1.bf16.msra.mxu1 %v9585_v37  ;;  %v367_v37 = vld [vmem:[%s14583_s11 + $0x160] sm:$0xff] }
 0x1d0   :  { %9587 = vmatprep.subr.bf16.mxu0 %v14541_v0  ;;  %10539 = vmatprep.subr.bf16.mxu1 %v14541_v0 }
 0x1d3   :  { %9589 = vmatpush1.bf16.msra.mxu0 %v9588_v40  ;;  %10555 = vmatpush1.bf16.msra.mxu1 %v9588_v40  ;;  %v9618_v40 = vpack.c.bf16 %v368_v38, %v367_v37  ;;  %v556_v37 = vld [vmem:[#allocation2 + $0x548] sm:$0xff]  ;;  %v555_v38 = vld [vmem:[#allocation2 + $0x540] sm:$0xff] }
 0x1d4   :  { %9590 = vmatprep.subr.bf16.mxu0 %v14541_v0  ;;  %10540 = vmatprep.subr.bf16.mxu1 %v14541_v0 }
 0x1d7   :  { %9592 = vmatpush1.bf16.msra.mxu0 %v9591_v43  ;;  %10556 = vmatpush1.bf16.msra.mxu1 %v9591_v43  ;;  %v460_v43 = vld [vmem:[#allocation2 + $0x248] sm:$0xff] }
 0x1d8   :  { %9593 = vmatprep.subr.bf16.mxu0 %v14541_v0  ;;  %10541 = vmatprep.subr.bf16.mxu1 %v14541_v0 }
 0x1db   :  { %9595 = vmatpush1.bf16.msra.mxu0 %v9594_v46  ;;  %10557 = vmatpush1.bf16.msra.mxu1 %v9594_v46  ;;  %v463_v46 = vld [vmem:[#allocation2 + $0x260] sm:$0xff] }
 0x1dc   :  { %9596 = vmatprep.subr.bf16.mxu0 %v14541_v0  ;;  %10542 = vmatprep.subr.bf16.mxu1 %v14541_v0 }
 0x1df   :  { %9598 = vmatpush1.bf16.msra.mxu0 %v9597_v49  ;;  %10558 = vmatpush1.bf16.msra.mxu1 %v9597_v49  ;;  %v472_v49 = vld [vmem:[#allocation2 + $0x2a8] sm:$0xff] }
 0x1e0   :  { %9599 = vmatprep.subr.bf16.mxu0 %v14541_v0 }
 0x1e2   :  { %1476 = vmatmul.mubr.f32.vlgmr.msra.gmra.mrb[0].mxu0 %v387_v52  ;;  %v475_v52 = vld [vmem:[#allocation2 + $0x2c0] sm:$0xff] }
 0x1e3   :  { %1480 = vmatprep.mubr.f32.mxu0 %v392_v54  ;;  %9601 = vmatpush1.bf16.msra.mxu0 %v9600_v53  ;;  %v480_v53 = vld [vmem:[#allocation2 + $0x2e8] sm:$0xff]  ;;  %v479_v54 = vld [vmem:[#allocation2 + $0x2e0] sm:$0xff] }
 0x1e4   :  { %9602 = vmatprep.subr.bf16.mxu0 %v14541_v0 }
 0x1e6   :  { %1481 = vmatmul.mubr.f32.gmra.mrb[2].mxu0 %v391_v57  ;;  %v370_v57 = vld [vmem:[%s14583_s11 + $0x178] sm:$0xff] }
 0x1e7   :  { %1485 = vmatprep.mubr.f32.mxu0 %v396_v59  ;;  %9604 = vmatpush1.bf16.msra.mxu0 %v9603_v58  ;;  %v483_v58 = vld [vmem:[#allocation2 + $0x300] sm:$0xff]  ;;  %v9621_v59 = vpack.c.bf16 %v370_v57, %v369_v56  ;;  %v588_v56 = vld [vmem:[#allocation2 + $0x648] sm:$0xff] }
 0x1e8   :  { %9605 = vmatprep.subr.bf16.mxu0 %v14541_v0  ;;  %v587_v57 = vld [vmem:[#allocation2 + $0x640] sm:$0xff] }
 0x1ea   :  { %1486 = vmatmul.mubr.f32.gmra.mrb[4].mxu0 %v395_v62  ;;  %v492_v62 = vld [vmem:[#allocation2 + $0x348] sm:$0xff] }
 0x1eb   :  { %1490 = vmatprep.mubr.f32.mxu0 %v400_v1  ;;  %9607 = vmatpush1.bf16.msra.mxu0 %v9606_v63  ;;  %v491_v63 = vld [vmem:[#allocation2 + $0x340] sm:$0xff]  ;;  %v496_v1 = vld [vmem:[#allocation2 + $0x368] sm:$0xff] }
 0x1ec   :  { %9608 = vmatprep.subr.bf16.mxu0 %v14541_v0 }
 0x1ee   :  { %1491 = vmatmul.mubr.f32.gmra.mrb[6].mxu0 %v399_v4  ;;  %v499_v4 = vld [vmem:[#allocation2 + $0x380] sm:$0xff] }
 0x1ef   :  { %1495 = vmatprep.mubr.f32.mxu0 %v404_v6  ;;  %9610 = vmatpush1.bf16.msra.mxu0 %v9609_v5  ;;  %v504_v5 = vld [vmem:[#allocation2 + $0x3a8] sm:$0xff]  ;;  %v503_v6 = vld [vmem:[#allocation2 + $0x3a0] sm:$0xff] }
 0x1f0   :  { %9611 = vmatprep.subr.bf16.mxu0 %v14541_v0 }
 0x1f2   :  { %1496 = vmatmul.mubr.f32.gmra.mrb[8].mxu0 %v403_v9  ;;  %v512_v9 = vld [vmem:[#allocation2 + $0x3e8] sm:$0xff] }
 0x1f3   :  { %1500 = vmatprep.mubr.f32.mxu0 %v408_v11  ;;  %9613 = vmatpush1.bf16.msra.mxu0 %v9612_v10  ;;  %v511_v10 = vld [vmem:[#allocation2 + $0x3e0] sm:$0xff] }
 0x1f4   :  { %9614 = vmatprep.subr.bf16.mxu0 %v14541_v0  ;;  %v371_v11 = vld [vmem:[%s14583_s11 + $0x180] sm:$0xff] }
 0x1f6   :  { %1501 = vmatmul.mubr.f32.gmra.mrb[10].mxu0 %v407_v12  ;;  %v372_v12 = vld [vmem:[%s14583_s11 + $0x188] sm:$0xff] }
 0x1f7   :  { %1505 = vmatprep.mubr.f32.mxu0 %v412_v13  ;;  %9616 = vmatpush1.bf16.msra.mxu0 %v9615_v22  ;;  %v516_v13 = vld [vmem:[#allocation2 + $0x408] sm:$0xff] }
 0x1f8   :  { %9617 = vmatprep.subr.bf16.mxu0 %v14541_v0  ;;  %v532_v22 = vld [vmem:[#allocation2 + $0x488] sm:$0xff] }
 0x1fa   :  { %1506 = vmatmul.mubr.f32.gmra.mrb[12].mxu0 %v411_v14  ;;  %v9624_v14 = vpack.c.bf16 %v372_v12, %v371_v11  ;;  %v615_v11 = vld [vmem:[#allocation2 + $0x720] sm:$0xff]  ;;  %v620_v12 = vld [vmem:[#allocation2 + $0x748] sm:$0xff] }
 0x1fb   :  { %1510 = vmatprep.mubr.f32.mxu0 %v416_v15  ;;  %9619 = vmatpush1.bf16.msra.mxu0 %v9618_v40  ;;  %v515_v15 = vld [vmem:[#allocation2 + $0x400] sm:$0xff] }
 0x1fc   :  { %9620 = vmatprep.subr.bf16.mxu0 %v14541_v0  ;;  %v559_v40 = vld [vmem:[#allocation2 + $0x560] sm:$0xff] }
 0x1fe   :  { %1511 = vmatmul.mubr.f32.gmra.mrb[14].mxu0 %v415_v16  ;;  %v520_v16 = vld [vmem:[#allocation2 + $0x428] sm:$0xff] }
 0x1ff   :  { %1515 = vmatprep.mubr.f32.mxu0 %v420_v17  ;;  %9622 = vmatpush1.bf16.msra.mxu0 %v9621_v59  ;;  %v519_v17 = vld [vmem:[#allocation2 + $0x420] sm:$0xff] }
 0x200   :  { %9623 = vmatprep.subr.bf16.mxu0 %v14541_v0  ;;  %v591_v59 = vld [vmem:[#allocation2 + $0x660] sm:$0xff] }
 0x202   :  { %1516 = vmatmul.mubr.f32.gmra.mrb[16].mxu0 %v419_v18  ;;  %v524_v18 = vld [vmem:[#allocation2 + $0x448] sm:$0xff] }
 0x203   :  { %1520 = vmatprep.mubr.f32.mxu0 %v424_v21  ;;  %9625 = vmatpush1.bf16.msra.mxu0 %v9624_v14  ;;  %v527_v21 = vld [vmem:[#allocation2 + $0x460] sm:$0xff]  ;;  %v624_v14 = vld [vmem:[#allocation2 + $0x768] sm:$0xff] }
 0x204   :  { %9626 = vmatprep.subr.bf16.mxu0 %v14541_v0 }
 0x206   :  { %1521 = vmatmul.mubr.f32.gmra.mrb[18].mxu0 %v423_v23  ;;  %v531_v23 = vld [vmem:[#allocation2 + $0x480] sm:$0xff] }
 0x207   :  { %1525 = vmatprep.mubr.f32.mxu0 %v428_v24  ;;  %v536_v24 = vld [vmem:[#allocation2 + $0x4a8] sm:$0xff] }
 0x20a   :  { %1526 = vmatmul.mubr.f32.gmra.mrb[20].mxu0 %v427_v25  ;;  %v535_v25 = vld [vmem:[#allocation2 + $0x4a0] sm:$0xff] }
 0x20b   :  { %1530 = vmatprep.mubr.f32.mxu0 %v432_v26  ;;  %v540_v26 = vld [vmem:[#allocation2 + $0x4c8] sm:$0xff] }
 0x20e   :  { %1531 = vmatmul.mubr.f32.gmra.mrb[22].mxu0 %v431_v27  ;;  %v539_v27 = vld [vmem:[#allocation2 + $0x4c0] sm:$0xff] }
 0x20f   :  { %1535 = vmatprep.mubr.f32.mxu0 %v436_v28  ;;  %v544_v28 = vld [vmem:[#allocation2 + $0x4e8] sm:$0xff] }
 0x212   :  { %1536 = vmatmul.mubr.f32.gmra.mrb[24].mxu0 %v435_v29  ;;  %v373_v29 = vld [vmem:[%s14583_s11 + $0x190] sm:$0xff] }
 0x213   :  { %1540 = vmatprep.mubr.f32.mxu0 %v440_v30  ;;  %v374_v30 = vld [vmem:[%s14583_s11 + $0x198] sm:$0xff] }
 0x216   :  { %1541 = vmatmul.mubr.f32.gmra.mrb[26].mxu0 %v439_v31  ;;  %v543_v31 = vld [vmem:[#allocation2 + $0x4e0] sm:$0xff] }
 0x217   :  { %1545 = vmatprep.mubr.f32.mxu0 %v444_v32  ;;  %v9627_v32 = vpack.c.bf16 %v374_v30, %v373_v29  ;;  %v648_v29 = vld [vmem:[#allocation2 + $0x828] sm:$0xff]  ;;  %v647_v30 = vld [vmem:[#allocation2 + $0x820] sm:$0xff] }
 0x219   :  { %9628 = vmatpush1.bf16.msra.mxu0 %v9627_v32  ;;  %v651_v32 = vld [vmem:[#allocation2 + $0x840] sm:$0xff] }
 0x21a   :  { %1546 = vmatmul.mubr.f32.gmra.mrb[28].mxu0 %v443_v33  ;;  %v548_v33 = vld [vmem:[#allocation2 + $0x508] sm:$0xff]  ;;  %9629 = vmatprep.subr.bf16.mxu0 %v14541_v0 }
 0x21b   :  { %1550 = vmatprep.mubr.f32.mxu0 %v448_v34  ;;  %v547_v34 = vld [vmem:[#allocation2 + $0x500] sm:$0xff] }
 0x21e   :  { %1551 = vmatmul.mubr.f32.gmra.mrb[30].mxu0 %v447_v35  ;;  %v552_v35 = vld [vmem:[#allocation2 + $0x528] sm:$0xff] }
 0x21f   :  { %1555 = vmatprep.mubr.f32.mxu0 %v452_v36  ;;  %v551_v36 = vld [vmem:[#allocation2 + $0x520] sm:$0xff] }
 0x222   :  { %1556 = vmatmul.mubr.f32.gmra.mrb[32].mxu0 %v451_v39  ;;  %v560_v39 = vld [vmem:[#allocation2 + $0x568] sm:$0xff] }
 0x223   :  { %1560 = vmatprep.mubr.f32.mxu0 %v456_v41  ;;  %v564_v41 = vld [vmem:[#allocation2 + $0x588] sm:$0xff] }
 0x226   :  { %1561 = vmatmul.mubr.f32.gmra.mrb[34].mxu0 %v455_v42  ;;  %v563_v42 = vld [vmem:[#allocation2 + $0x580] sm:$0xff] }
 0x227   :  { %1565 = vmatprep.mubr.f32.mxu0 %v460_v43  ;;  %v568_v43 = vld [vmem:[#allocation2 + $0x5a8] sm:$0xff] }
 0x22a   :  { %1566 = vmatmul.mubr.f32.gmra.mrb[36].mxu0 %v459_v44  ;;  %v567_v44 = vld [vmem:[#allocation2 + $0x5a0] sm:$0xff] }
 0x22b   :  { %1570 = vmatprep.mubr.f32.mxu0 %v464_v45  ;;  %v572_v45 = vld [vmem:[#allocation2 + $0x5c8] sm:$0xff] }
 0x22e   :  { %1571 = vmatmul.mubr.f32.gmra.mrb[38].mxu0 %v463_v46  ;;  %v571_v46 = vld [vmem:[#allocation2 + $0x5c0] sm:$0xff] }
 0x22f   :  { %1575 = vmatprep.mubr.f32.mxu0 %v468_v47  ;;  %v576_v47 = vld [vmem:[#allocation2 + $0x5e8] sm:$0xff] }
 0x232   :  { %1576 = vmatmul.mubr.f32.gmra.mrb[40].mxu0 %v467_v48  ;;  %v375_v48 = vld [vmem:[%s14583_s11 + $0x1a0] sm:$0xff] }
 0x233   :  { %1580 = vmatprep.mubr.f32.mxu0 %v472_v49  ;;  %v376_v49 = vld [vmem:[%s14583_s11 + $0x1a8] sm:$0xff] }
 0x236   :  { %1581 = vmatmul.mubr.f32.gmra.mrb[42].mxu0 %v471_v50  ;;  %v575_v50 = vld [vmem:[#allocation2 + $0x5e0] sm:$0xff] }
 0x237   :  { %1585 = vmatprep.mubr.f32.mxu0 %v476_v51  ;;  %v9630_v51 = vpack.c.bf16 %v376_v49, %v375_v48  ;;  %v680_v48 = vld [vmem:[#allocation2 + $0x928] sm:$0xff]  ;;  %v679_v49 = vld [vmem:[#allocation2 + $0x920] sm:$0xff] }
 0x239   :  { %9631 = vmatpush1.bf16.msra.mxu0 %v9630_v51  ;;  %v683_v51 = vld [vmem:[#allocation2 + $0x940] sm:$0xff] }
 0x23a   :  { %1586 = vmatmul.mubr.f32.gmra.mrb[44].mxu0 %v475_v52  ;;  %v580_v52 = vld [vmem:[#allocation2 + $0x608] sm:$0xff]  ;;  %9632 = vmatprep.subr.bf16.mxu0 %v14541_v0 }
 0x23b   :  { %1590 = vmatprep.mubr.f32.mxu0 %v480_v53  ;;  %v579_v53 = vld [vmem:[#allocation2 + $0x600] sm:$0xff] }
 0x23e   :  { %1591 = vmatmul.mubr.f32.gmra.mrb[46].mxu0 %v479_v54  ;;  %v584_v54 = vld [vmem:[#allocation2 + $0x628] sm:$0xff] }
 0x23f   :  { %1595 = vmatprep.mubr.f32.mxu0 %v484_v55  ;;  %v583_v55 = vld [vmem:[#allocation2 + $0x620] sm:$0xff] }
 0x242   :  { %1596 = vmatmul.mubr.f32.gmra.mrb[48].mxu0 %v483_v58  ;;  %v592_v58 = vld [vmem:[#allocation2 + $0x668] sm:$0xff] }
 0x243   :  { %1600 = vmatprep.mubr.f32.mxu0 %v488_v60  ;;  %v596_v60 = vld [vmem:[#allocation2 + $0x688] sm:$0xff] }
 0x246   :  { %1601 = vmatmul.mubr.f32.gmra.mrb[50].mxu0 %v487_v61  ;;  %v595_v61 = vld [vmem:[#allocation2 + $0x680] sm:$0xff] }
 0x247   :  { %1605 = vmatprep.mubr.f32.mxu0 %v492_v62  ;;  %v600_v62 = vld [vmem:[#allocation2 + $0x6a8] sm:$0xff] }
 0x24a   :  { %1606 = vmatmul.mubr.f32.gmra.mrb[52].mxu0 %v491_v63  ;;  %v599_v63 = vld [vmem:[#allocation2 + $0x6a0] sm:$0xff] }
 0x24b   :  { %1610 = vmatprep.mubr.f32.mxu0 %v496_v1  ;;  %v604_v1 = vld [vmem:[#allocation2 + $0x6c8] sm:$0xff] }
 0x24e   :  { %1611 = vmatmul.mubr.f32.gmra.mrb[54].mxu0 %v495_v2  ;;  %v603_v2 = vld [vmem:[#allocation2 + $0x6c0] sm:$0xff] }
 0x24f   :  { %1615 = vmatprep.mubr.f32.mxu0 %v500_v3  ;;  %v608_v3 = vld [vmem:[#allocation2 + $0x6e8] sm:$0xff] }
 0x252   :  { %1616 = vmatmul.mubr.f32.gmra.mrb[56].mxu0 %v499_v4  ;;  %v377_v4 = vld [vmem:[%s14583_s11 + $0x1b0] sm:$0xff] }
 0x253   :  { %1620 = vmatprep.mubr.f32.mxu0 %v504_v5  ;;  %v378_v5 = vld [vmem:[%s14583_s11 + $0x1b8] sm:$0xff] }
 0x256   :  { %1621 = vmatmul.mubr.f32.gmra.mrb[58].mxu0 %v503_v6  ;;  %v607_v6 = vld [vmem:[#allocation2 + $0x6e0] sm:$0xff] }
 0x257   :  { %1625 = vmatprep.mubr.f32.mxu0 %v508_v7  ;;  %v9633_v7 = vpack.c.bf16 %v378_v5, %v377_v4  ;;  %v712_v4 = vld [vmem:[#allocation2 + $0xa28] sm:$0xff]  ;;  %v711_v5 = vld [vmem:[#allocation2 + $0xa20] sm:$0xff] }
 0x259   :  { %9634 = vmatpush1.bf16.msra.mxu0 %v9633_v7  ;;  %v715_v7 = vld [vmem:[#allocation2 + $0xa40] sm:$0xff] }
 0x25a   :  { %1626 = vmatmul.mubr.f32.gmra.mrb[60].mxu0 %v507_v8  ;;  %v612_v8 = vld [vmem:[#allocation2 + $0x708] sm:$0xff]  ;;  %9635 = vmatprep.subr.bf16.mxu0 %v14541_v0 }
 0x25b   :  { %1630 = vmatprep.mubr.f32.mxu0 %v512_v9  ;;  %v611_v9 = vld [vmem:[#allocation2 + $0x700] sm:$0xff] }
 0x25e   :  { %1631 = vmatmul.mubr.f32.gmra.mrb[62].mxu0 %v511_v10  ;;  %v616_v10 = vld [vmem:[#allocation2 + $0x728] sm:$0xff] }
 0x25f   :  { %1635 = vmatprep.mubr.f32.mxu0 %v516_v13  ;;  %v619_v13 = vld [vmem:[#allocation2 + $0x740] sm:$0xff] }
 0x262   :  { %1636 = vmatmul.mubr.f32.gmra.mrb[64].mxu0 %v515_v15  ;;  %v623_v15 = vld [vmem:[#allocation2 + $0x760] sm:$0xff] }
 0x263   :  { %1640 = vmatprep.mubr.f32.mxu0 %v520_v16  ;;  %v628_v16 = vld [vmem:[#allocation2 + $0x788] sm:$0xff] }
 0x266   :  { %1641 = vmatmul.mubr.f32.gmra.mrb[66].mxu0 %v519_v17  ;;  %v627_v17 = vld [vmem:[#allocation2 + $0x780] sm:$0xff] }
 0x267   :  { %1645 = vmatprep.mubr.f32.mxu0 %v524_v18  ;;  %v632_v18 = vld [vmem:[#allocation2 + $0x7a8] sm:$0xff] }
 0x26a   :  { %1646 = vmatmul.mubr.f32.gmra.mrb[68].mxu0 %v523_v19  ;;  %v631_v19 = vld [vmem:[#allocation2 + $0x7a0] sm:$0xff] }
 0x26b   :  { %1650 = vmatprep.mubr.f32.mxu0 %v528_v20  ;;  %v636_v20 = vld [vmem:[#allocation2 + $0x7c8] sm:$0xff] }
 0x26e   :  { %1651 = vmatmul.mubr.f32.gmra.mrb[70].mxu0 %v527_v21  ;;  %v379_v21 = vld [vmem:[%s14583_s11 + $0x1c0] sm:$0xff] }
 0x26f   :  { %1655 = vmatprep.mubr.f32.mxu0 %v532_v22  ;;  %v380_v22 = vld [vmem:[%s14583_s11 + $0x1c8] sm:$0xff] }
 0x272   :  { %1656 = vmatmul.mubr.f32.gmra.mrb[72].mxu0 %v531_v23  ;;  %v635_v23 = vld [vmem:[#allocation2 + $0x7c0] sm:$0xff] }
 0x273   :  { %1660 = vmatprep.mubr.f32.mxu0 %v536_v24  ;;  %v9636_v24 = vpack.c.bf16 %v380_v22, %v379_v21  ;;  %v740_v21 = vld [vmem:[#allocation2 + $0xb08] sm:$0xff]  ;;  %v739_v22 = vld [vmem:[#allocation2 + $0xb00] sm:$0xff] }
 0x275   :  { %9637 = vmatpush1.bf16.msra.mxu0 %v9636_v24  ;;  %v743_v24 = vld [vmem:[#allocation2 + $0xb20] sm:$0xff] }
 0x276   :  { %1661 = vmatmul.mubr.f32.gmra.mrb[74].mxu0 %v535_v25  ;;  %v640_v25 = vld [vmem:[#allocation2 + $0x7e8] sm:$0xff]  ;;  %9638 = vmatprep.subr.bf16.mxu0 %v14541_v0 }
 0x277   :  { %1665 = vmatprep.mubr.f32.mxu0 %v540_v26  ;;  %v639_v26 = vld [vmem:[#allocation2 + $0x7e0] sm:$0xff] }
 0x27a   :  { %1666 = vmatmul.mubr.f32.gmra.mrb[76].mxu0 %v539_v27  ;;  %v644_v27 = vld [vmem:[#allocation2 + $0x808] sm:$0xff] }
 0x27b   :  { %1670 = vmatprep.mubr.f32.mxu0 %v544_v28  ;;  %v643_v28 = vld [vmem:[#allocation2 + $0x800] sm:$0xff] }
 0x27e   :  { %1671 = vmatmul.mubr.f32.gmra.mrb[78].mxu0 %v543_v31  ;;  %v652_v31 = vld [vmem:[#allocation2 + $0x848] sm:$0xff] }
 0x27f   :  { %1675 = vmatprep.mubr.f32.mxu0 %v548_v33  ;;  %v656_v33 = vld [vmem:[#allocation2 + $0x868] sm:$0xff] }
 0x282   :  { %1676 = vmatmul.mubr.f32.gmra.mrb[80].mxu0 %v547_v34  ;;  %v655_v34 = vld [vmem:[#allocation2 + $0x860] sm:$0xff] }
 0x283   :  { %1680 = vmatprep.mubr.f32.mxu0 %v552_v35  ;;  %v660_v35 = vld [vmem:[#allocation2 + $0x888] sm:$0xff] }
 0x286   :  { %1681 = vmatmul.mubr.f32.gmra.mrb[82].mxu0 %v551_v36  ;;  %v659_v36 = vld [vmem:[#allocation2 + $0x880] sm:$0xff] }
 0x287   :  { %1685 = vmatprep.mubr.f32.mxu0 %v556_v37  ;;  %v664_v37 = vld [vmem:[#allocation2 + $0x8a8] sm:$0xff] }
 0x28a   :  { %1686 = vmatmul.mubr.f32.gmra.mrb[84].mxu0 %v555_v38  ;;  %v663_v38 = vld [vmem:[#allocation2 + $0x8a0] sm:$0xff] }
 0x28b   :  { %1690 = vmatprep.mubr.f32.mxu0 %v560_v39  ;;  %v668_v39 = vld [vmem:[#allocation2 + $0x8c8] sm:$0xff] }
 0x28e   :  { %1691 = vmatmul.mubr.f32.gmra.mrb[86].mxu0 %v559_v40  ;;  %v381_v40 = vld [vmem:[%s14583_s11 + $0x1d0] sm:$0xff] }
 0x28f   :  { %1695 = vmatprep.mubr.f32.mxu0 %v564_v41  ;;  %v382_v41 = vld [vmem:[%s14583_s11 + $0x1d8] sm:$0xff] }
 0x292   :  { %1696 = vmatmul.mubr.f32.gmra.mrb[88].mxu0 %v563_v42  ;;  %v667_v42 = vld [vmem:[#allocation2 + $0x8c0] sm:$0xff] }
 0x293   :  { %1700 = vmatprep.mubr.f32.mxu0 %v568_v43  ;;  %v9639_v43 = vpack.c.bf16 %v382_v41, %v381_v40  ;;  %v775_v40 = vld [vmem:[#allocation2 + $0xc20] sm:$0xff]  ;;  %v780_v41 = vld [vmem:[#allocation2 + $0xc48] sm:$0xff] }
 0x295   :  { %9640 = vmatpush1.bf16.msra.mxu0 %v9639_v43  ;;  %v784_v43 = vld [vmem:[#allocation2 + $0xc68] sm:$0xff] }
 0x296   :  { %1701 = vmatmul.mubr.f32.gmra.mrb[90].mxu0 %v567_v44  ;;  %v672_v44 = vld [vmem:[#allocation2 + $0x8e8] sm:$0xff]  ;;  %9641 = vmatprep.subr.bf16.mxu0 %v14541_v0 }
 0x297   :  { %1705 = vmatprep.mubr.f32.mxu0 %v572_v45  ;;  %v671_v45 = vld [vmem:[#allocation2 + $0x8e0] sm:$0xff] }
 0x29a   :  { %1706 = vmatmul.mubr.f32.gmra.mrb[92].mxu0 %v571_v46  ;;  %v676_v46 = vld [vmem:[#allocation2 + $0x908] sm:$0xff] }
 0x29b   :  { %1710 = vmatprep.mubr.f32.mxu0 %v576_v47  ;;  %v675_v47 = vld [vmem:[#allocation2 + $0x900] sm:$0xff] }
 0x29e   :  { %1711 = vmatmul.mubr.f32.gmra.mrb[94].mxu0 %v575_v50  ;;  %v684_v50 = vld [vmem:[#allocation2 + $0x948] sm:$0xff] }
 0x29f   :  { %1715 = vmatprep.mubr.f32.mxu0 %v580_v52  ;;  %v688_v52 = vld [vmem:[#allocation2 + $0x968] sm:$0xff] }
 0x2a2   :  { %1716 = vmatmul.mubr.f32.gmra.mrb[96].mxu0 %v579_v53  ;;  %v687_v53 = vld [vmem:[#allocation2 + $0x960] sm:$0xff] }
 0x2a3   :  { %1720 = vmatprep.mubr.f32.mxu0 %v584_v54  ;;  %v692_v54 = vld [vmem:[#allocation2 + $0x988] sm:$0xff] }
 0x2a6   :  { %1721 = vmatmul.mubr.f32.gmra.mrb[98].mxu0 %v583_v55  ;;  %v691_v55 = vld [vmem:[#allocation2 + $0x980] sm:$0xff] }
 0x2a7   :  { %1725 = vmatprep.mubr.f32.mxu0 %v588_v56  ;;  %v696_v56 = vld [vmem:[#allocation2 + $0x9a8] sm:$0xff] }
 0x2aa   :  { %1726 = vmatmul.mubr.f32.gmra.mrb[100].mxu0 %v587_v57  ;;  %v695_v57 = vld [vmem:[#allocation2 + $0x9a0] sm:$0xff] }
 0x2ab   :  { %1730 = vmatprep.mubr.f32.mxu0 %v592_v58  ;;  %v700_v58 = vld [vmem:[#allocation2 + $0x9c8] sm:$0xff] }
 0x2ae   :  { %1731 = vmatmul.mubr.f32.gmra.mrb[102].mxu0 %v591_v59  ;;  %v383_v59 = vld [vmem:[%s14583_s11 + $0x1e0] sm:$0xff] }
 0x2af   :  { %1735 = vmatprep.mubr.f32.mxu0 %v596_v60  ;;  %v384_v60 = vld [vmem:[%s14583_s11 + $0x1e8] sm:$0xff] }
 0x2b2   :  { %1736 = vmatmul.mubr.f32.gmra.mrb[104].mxu0 %v595_v61  ;;  %v699_v61 = vld [vmem:[#allocation2 + $0x9c0] sm:$0xff] }
 0x2b3   :  { %1740 = vmatprep.mubr.f32.mxu0 %v600_v62  ;;  %v9642_v62 = vpack.c.bf16 %v384_v60, %v383_v59  ;;  %v816_v59 = vld [vmem:[#allocation2 + $0xd68] sm:$0xff]  ;;  %v815_v60 = vld [vmem:[#allocation2 + $0xd60] sm:$0xff] }
 0x2b5   :  { %9643 = vmatpush1.bf16.msra.mxu0 %v9642_v62  ;;  %v819_v62 = vld [vmem:[#allocation2 + $0xd80] sm:$0xff] }
 0x2b6   :  { %1741 = vmatmul.mubr.f32.gmra.mrb[106].mxu0 %v599_v63  ;;  %v704_v63 = vld [vmem:[#allocation2 + $0x9e8] sm:$0xff]  ;;  %9644 = vmatprep.subr.bf16.mxu0 %v14541_v0 }
 0x2b7   :  { %1745 = vmatprep.mubr.f32.mxu0 %v604_v1  ;;  %v703_v1 = vld [vmem:[#allocation2 + $0x9e0] sm:$0xff] }
 0x2ba   :  { %1746 = vmatmul.mubr.f32.gmra.mrb[108].mxu0 %v603_v2  ;;  %v708_v2 = vld [vmem:[#allocation2 + $0xa08] sm:$0xff] }
 0x2bb   :  { %1750 = vmatprep.mubr.f32.mxu0 %v608_v3  ;;  %v707_v3 = vld [vmem:[#allocation2 + $0xa00] sm:$0xff] }
 0x2be   :  { %1751 = vmatmul.mubr.f32.gmra.mrb[110].mxu0 %v607_v6  ;;  %v716_v6 = vld [vmem:[#allocation2 + $0xa48] sm:$0xff] }
 0x2bf   :  { %1755 = vmatprep.mubr.f32.mxu0 %v612_v8  ;;  %v720_v8 = vld [vmem:[#allocation2 + $0xa68] sm:$0xff] }
 0x2c2   :  { %1756 = vmatmul.mubr.f32.gmra.mrb[112].mxu0 %v611_v9  ;;  %v719_v9 = vld [vmem:[#allocation2 + $0xa60] sm:$0xff] }
 0x2c3   :  { %1760 = vmatprep.mubr.f32.mxu0 %v616_v10  ;;  %v724_v10 = vld [vmem:[#allocation2 + $0xa88] sm:$0xff] }
 0x2c6   :  { %1761 = vmatmul.mubr.f32.gmra.mrb[114].mxu0 %v615_v11  ;;  %v723_v11 = vld [vmem:[#allocation2 + $0xa80] sm:$0xff] }
 0x2c7   :  { %1765 = vmatprep.mubr.f32.mxu0 %v620_v12  ;;  %v728_v12 = vld [vmem:[#allocation2 + $0xaa8] sm:$0xff] }
 0x2ca   :  { %1766 = vmatmul.mubr.f32.gmra.mrb[116].mxu0 %v619_v13  ;;  %v727_v13 = vld [vmem:[#allocation2 + $0xaa0] sm:$0xff] }
 0x2cb   :  { %1770 = vmatprep.mubr.f32.mxu0 %v624_v14  ;;  %v385_v14 = vld [vmem:[%s14583_s11 + $0x1f0] sm:$0xff] }
 0x2ce   :  { %1771 = vmatmul.mubr.f32.gmra.mrb[118].mxu0 %v623_v15  ;;  %v386_v15 = vld [vmem:[%s14583_s11 + $0x1f8] sm:$0xff]  ;;  %s12230_s11 = smov 48  }
 0x2cf   :  { %1775 = vmatprep.mubr.f32.mxu0 %v628_v16  ;;  %v732_v16 = vld [vmem:[#allocation2 + $0xac8] sm:$0xff] }
 0x2d2   :  { %1776 = vmatmul.mubr.f32.gmra.mrb[120].mxu0 %v627_v17  ;;  %v9645_v17 = vpack.c.bf16 %v386_v15, %v385_v14  ;;  %v852_v14 = vld [vmem:[#allocation2 + $0xe88] sm:$0xff]  ;;  %v851_v15 = vld [vmem:[#allocation2 + $0xe80] sm:$0xff] }
 0x2d3   :  { %1780 = vmatprep.mubr.f32.mxu0 %v632_v18  ;;  %v731_v18 = vld [vmem:[#allocation2 + $0xac0] sm:$0xff] }
 0x2d4   :  { %9646 = vmatpush1.bf16.msra.mxu0 %v9645_v17  ;;  %v855_v17 = vld [vmem:[#allocation2 + $0xea0] sm:$0xff] }
 0x2d6   :  { %1781 = vmatmul.mubr.f32.gmra.mrb[122].mxu0 %v631_v19  ;;  %v736_v19 = vld [vmem:[#allocation2 + $0xae8] sm:$0xff] }
 0x2d7   :  { %1785 = vmatprep.mubr.f32.mxu0 %v636_v20  ;;  %v735_v20 = vld [vmem:[#allocation2 + $0xae0] sm:$0xff] }
 0x2da   :  { %1786 = vmatmul.mubr.f32.gmra.mrb[124].mxu0 %v635_v23  ;;  %v744_v23 = vld [vmem:[#allocation2 + $0xb28] sm:$0xff] }
 0x2db   :  { %1790 = vmatprep.mubr.f32.mxu0 %v640_v25  ;;  %v748_v25 = vld [vmem:[#allocation2 + $0xb48] sm:$0xff] }
 0x2de   :  { %1791 = vmatmul.mubr.f32.gmra.mrb[126].mxu0 %v639_v26  ;;  %v747_v26 = vld [vmem:[#allocation2 + $0xb40] sm:$0xff] }
 0x2df   :  { %1795 = vmatprep.mubr.f32.mxu0 %v644_v27  ;;  %v752_v27 = vld [vmem:[#allocation2 + $0xb68] sm:$0xff] }
 0x2e2   :  { %1796 = vmatmul.mubr.f32.gmra.mrb[128].mxu0 %v643_v28  ;;  %v751_v28 = vld [vmem:[#allocation2 + $0xb60] sm:$0xff] }
 0x2e3   :  { %1800 = vmatprep.mubr.f32.mxu0 %v648_v29  ;;  %v756_v29 = vld [vmem:[#allocation2 + $0xb88] sm:$0xff] }
 0x2e6   :  { %1801 = vmatmul.mubr.f32.gmra.mrb[130].mxu0 %v647_v30  ;;  %v755_v30 = vld [vmem:[#allocation2 + $0xb80] sm:$0xff] }
 0x2e7   :  { %1805 = vmatprep.mubr.f32.mxu0 %v652_v31  ;;  %v760_v31 = vld [vmem:[#allocation2 + $0xba8] sm:$0xff] }
 0x2ea   :  { %1806 = vmatmul.mubr.f32.gmra.mrb[132].mxu0 %v651_v32  ;;  %v759_v32 = vld [vmem:[#allocation2 + $0xba0] sm:$0xff] }
 0x2eb   :  { %1810 = vmatprep.mubr.f32.mxu0 %v656_v33  ;;  %v764_v33 = vld [vmem:[#allocation2 + $0xbc8] sm:$0xff] }
 0x2ee   :  { %1811 = vmatmul.mubr.f32.gmra.mrb[134].mxu0 %v655_v34  ;;  %v763_v34 = vld [vmem:[#allocation2 + $0xbc0] sm:$0xff] }
 0x2ef   :  { %1815 = vmatprep.mubr.f32.mxu0 %v660_v35  ;;  %v768_v35 = vld [vmem:[#allocation2 + $0xbe8] sm:$0xff] }
 0x2f2   :  { %1816 = vmatmul.mubr.f32.gmra.mrb[136].mxu0 %v659_v36  ;;  %v767_v36 = vld [vmem:[#allocation2 + $0xbe0] sm:$0xff] }
 0x2f3   :  { %1820 = vmatprep.mubr.f32.mxu0 %v664_v37  ;;  %v772_v37 = vld [vmem:[#allocation2 + $0xc08] sm:$0xff] }
 0x2f6   :  { %1821 = vmatmul.mubr.f32.gmra.mrb[138].mxu0 %v663_v38  ;;  %v771_v38 = vld [vmem:[#allocation2 + $0xc00] sm:$0xff] }
 0x2f7   :  { %1825 = vmatprep.mubr.f32.mxu0 %v668_v39  ;;  %v776_v39 = vld [vmem:[#allocation2 + $0xc28] sm:$0xff] }
 0x2fa   :  { %1826 = vmatmul.mubr.f32.gmra.mrb[140].mxu0 %v667_v42  ;;  %v779_v42 = vld [vmem:[#allocation2 + $0xc40] sm:$0xff] }
 0x2fb   :  { %1830 = vmatprep.mubr.f32.mxu0 %v672_v44  ;;  %v783_v44 = vld [vmem:[#allocation2 + $0xc60] sm:$0xff] }
 0x2fe   :  { %1831 = vmatmul.mubr.f32.gmra.mrb[142].mxu0 %v671_v45  ;;  %v788_v45 = vld [vmem:[#allocation2 + $0xc88] sm:$0xff] }
 0x2ff   :  { %1835 = vmatprep.mubr.f32.mxu0 %v676_v46  ;;  %v787_v46 = vld [vmem:[#allocation2 + $0xc80] sm:$0xff] }
 0x302   :  { %1836 = vmatmul.mubr.f32.gmra.mrb[144].mxu0 %v675_v47  ;;  %v792_v47 = vld [vmem:[#allocation2 + $0xca8] sm:$0xff] }
 0x303   :  { %1840 = vmatprep.mubr.f32.mxu0 %v680_v48  ;;  %v791_v48 = vld [vmem:[#allocation2 + $0xca0] sm:$0xff] }
 0x306   :  { %1841 = vmatmul.mubr.f32.gmra.mrb[146].mxu0 %v679_v49  ;;  %v796_v49 = vld [vmem:[#allocation2 + $0xcc8] sm:$0xff] }
 0x307   :  { %1845 = vmatprep.mubr.f32.mxu0 %v684_v50  ;;  %v795_v50 = vld [vmem:[#allocation2 + $0xcc0] sm:$0xff] }
 0x30a   :  { %1846 = vmatmul.mubr.f32.gmra.mrb[148].mxu0 %v683_v51  ;;  %v800_v51 = vld [vmem:[#allocation2 + $0xce8] sm:$0xff] }
 0x30b   :  { %1850 = vmatprep.mubr.f32.mxu0 %v688_v52  ;;  %v799_v52 = vld [vmem:[#allocation2 + $0xce0] sm:$0xff] }
 0x30e   :  { %1851 = vmatmul.mubr.f32.gmra.mrb[150].mxu0 %v687_v53  ;;  %v804_v53 = vld [vmem:[#allocation2 + $0xd08] sm:$0xff] }
 0x30f   :  { %1855 = vmatprep.mubr.f32.mxu0 %v692_v54  ;;  %v803_v54 = vld [vmem:[#allocation2 + $0xd00] sm:$0xff] }
 0x312   :  { %1856 = vmatmul.mubr.f32.gmra.mrb[152].mxu0 %v691_v55  ;;  %v808_v55 = vld [vmem:[#allocation2 + $0xd28] sm:$0xff] }
 0x313   :  { %1860 = vmatprep.mubr.f32.mxu0 %v696_v56  ;;  %v807_v56 = vld [vmem:[#allocation2 + $0xd20] sm:$0xff] }
 0x316   :  { %1861 = vmatmul.mubr.f32.gmra.mrb[154].mxu0 %v695_v57  ;;  %v812_v57 = vld [vmem:[#allocation2 + $0xd48] sm:$0xff] }
 0x317   :  { %1865 = vmatprep.mubr.f32.mxu0 %v700_v58  ;;  %v811_v58 = vld [vmem:[#allocation2 + $0xd40] sm:$0xff] }
 0x31a   :  { %1866 = vmatmul.mubr.f32.gmra.mrb[156].mxu0 %v699_v61  ;;  %v820_v61 = vld [vmem:[#allocation2 + $0xd88] sm:$0xff] }
 0x31b   :  { %1870 = vmatprep.mubr.f32.mxu0 %v704_v63  ;;  %v824_v63 = vld [vmem:[#allocation2 + $0xda8] sm:$0xff] }
 0x31e   :  { %1871 = vmatmul.mubr.f32.gmra.mrb[158].mxu0 %v703_v1  ;;  %v823_v1 = vld [vmem:[#allocation2 + $0xda0] sm:$0xff] }
 0x31f   :  { %1875 = vmatprep.mubr.f32.mxu0 %v708_v2  ;;  %v828_v2 = vld [vmem:[#allocation2 + $0xdc8] sm:$0xff] }
 0x322   :  { %1876 = vmatmul.mubr.f32.gmra.mrb[160].mxu0 %v707_v3  ;;  %v827_v3 = vld [vmem:[#allocation2 + $0xdc0] sm:$0xff] }
 0x323   :  { %1880 = vmatprep.mubr.f32.mxu0 %v712_v4  ;;  %v832_v4 = vld [vmem:[#allocation2 + $0xde8] sm:$0xff] }
 0x326   :  { %1881 = vmatmul.mubr.f32.gmra.mrb[162].mxu0 %v711_v5  ;;  %v831_v5 = vld [vmem:[#allocation2 + $0xde0] sm:$0xff] }
 0x327   :  { %1885 = vmatprep.mubr.f32.mxu0 %v716_v6  ;;  %v836_v6 = vld [vmem:[#allocation2 + $0xe08] sm:$0xff] }
 0x32a   :  { %1886 = vmatmul.mubr.f32.gmra.mrb[164].mxu0 %v715_v7  ;;  %v835_v7 = vld [vmem:[#allocation2 + $0xe00] sm:$0xff] }
 0x32b   :  { %1890 = vmatprep.mubr.f32.mxu0 %v720_v8  ;;  %v840_v8 = vld [vmem:[#allocation2 + $0xe28] sm:$0xff] }
 0x32e   :  { %1891 = vmatmul.mubr.f32.gmra.mrb[166].mxu0 %v719_v9  ;;  %v839_v9 = vld [vmem:[#allocation2 + $0xe20] sm:$0xff] }
 0x32f   :  { %1895 = vmatprep.mubr.f32.mxu0 %v724_v10  ;;  %v844_v10 = vld [vmem:[#allocation2 + $0xe48] sm:$0xff] }
 0x332   :  { %1896 = vmatmul.mubr.f32.gmra.mrb[168].mxu0 %v723_v11  ;;  %v843_v11 = vld [vmem:[#allocation2 + $0xe40] sm:$0xff] }
 0x333   :  { %1900 = vmatprep.mubr.f32.mxu0 %v728_v12  ;;  %v848_v12 = vld [vmem:[#allocation2 + $0xe68] sm:$0xff] }
 0x336   :  { %1901 = vmatmul.mubr.f32.gmra.mrb[170].mxu0 %v727_v13  ;;  %v847_v13 = vld [vmem:[#allocation2 + $0xe60] sm:$0xff] }
 0x337   :  { %1905 = vmatprep.mubr.f32.mxu0 %v732_v16  ;;  %v856_v16 = vld [vmem:[#allocation2 + $0xea8] sm:$0xff] }
 0x33a   :  { %1906 = vmatmul.mubr.f32.gmra.mrb[172].mxu0 %v731_v18  ;;  %v860_v18 = vld [vmem:[#allocation2 + $0xec8] sm:$0xff] }
 0x33b   :  { %1910 = vmatprep.mubr.f32.mxu0 %v736_v19  ;;  %v859_v19 = vld [vmem:[#allocation2 + $0xec0] sm:$0xff] }
 0x33e   :  { %1911 = vmatmul.mubr.f32.gmra.mrb[174].mxu0 %v735_v20  ;;  %v864_v20 = vld [vmem:[#allocation2 + $0xee8] sm:$0xff] }
 0x33f   :  { %1915 = vmatprep.mubr.f32.mxu0 %v740_v21  ;;  %v863_v21 = vld [vmem:[#allocation2 + $0xee0] sm:$0xff] }
 0x342   :  { %1916 = vmatmul.mubr.f32.gmra.mrb[176].mxu0 %v739_v22  ;;  %v868_v22 = vld [vmem:[#allocation2 + $0xf08] sm:$0xff] }
 0x343   :  { %1920 = vmatprep.mubr.f32.mxu0 %v744_v23  ;;  %v867_v23 = vld [vmem:[#allocation2 + $0xf00] sm:$0xff] }
 0x346   :  { %1921 = vmatmul.mubr.f32.gmra.mrb[178].mxu0 %v743_v24  ;;  %v872_v24 = vld [vmem:[#allocation2 + $0xf28] sm:$0xff] }
 0x347   :  { %1925 = vmatprep.mubr.f32.mxu0 %v748_v25  ;;  %v871_v25 = vld [vmem:[#allocation2 + $0xf20] sm:$0xff] }
 0x34a   :  { %1926 = vmatmul.mubr.f32.gmra.mrb[180].mxu0 %v747_v26  ;;  %v876_v26 = vld [vmem:[#allocation2 + $0xf48] sm:$0xff] }
 0x34b   :  { %1930 = vmatprep.mubr.f32.mxu0 %v752_v27  ;;  %v875_v27 = vld [vmem:[#allocation2 + $0xf40] sm:$0xff] }
 0x34e   :  { %1931 = vmatmul.mubr.f32.gmra.mrb[182].mxu0 %v751_v28  ;;  %v390_v28 = vld [vmem:[#allocation2 + $0x18] sm:$0xff] }
 0x34f   :  { %1935 = vmatprep.mubr.f32.mxu0 %v756_v29  ;;  %v389_v29 = vld [vmem:[#allocation2 + $0x10] sm:$0xff] }
 0x352   :  { %1936 = vmatmul.mubr.f32.gmra.mrb[184].mxu0 %v755_v30  ;;  %v394_v30 = vld [vmem:[#allocation2 + $0x38] sm:$0xff] }
 0x353   :  { %1940 = vmatprep.mubr.f32.mxu0 %v760_v31  ;;  %v393_v31 = vld [vmem:[#allocation2 + $0x30] sm:$0xff] }
 0x356   :  { %1941 = vmatmul.mubr.f32.gmra.mrb[186].mxu0 %v759_v32  ;;  %v398_v32 = vld [vmem:[#allocation2 + $0x58] sm:$0xff] }
 0x357   :  { %1945 = vmatprep.mubr.f32.mxu0 %v764_v33  ;;  %v397_v33 = vld [vmem:[#allocation2 + $0x50] sm:$0xff] }
 0x35a   :  { %1946 = vmatmul.mubr.f32.gmra.mrb[188].mxu0 %v763_v34  ;;  %v402_v34 = vld [vmem:[#allocation2 + $0x78] sm:$0xff] }
 0x35b   :  { %1950 = vmatprep.mubr.f32.mxu0 %v768_v35  ;;  %v401_v35 = vld [vmem:[#allocation2 + $0x70] sm:$0xff] }
 0x35e   :  { %1951 = vmatmul.mubr.f32.gmra.mrb[190].mxu0 %v767_v36  ;;  %v406_v36 = vld [vmem:[#allocation2 + $0x98] sm:$0xff] }
 0x35f   :  { %1955 = vmatprep.mubr.f32.mxu0 %v772_v37  ;;  %v405_v37 = vld [vmem:[#allocation2 + $0x90] sm:$0xff] }
 0x362   :  { %1956 = vmatmul.mubr.f32.gmra.mrb[192].mxu0 %v771_v38  ;;  %v410_v38 = vld [vmem:[#allocation2 + $0xb8] sm:$0xff] }
 0x363   :  { %1960 = vmatprep.mubr.f32.mxu0 %v776_v39  ;;  %v409_v39 = vld [vmem:[#allocation2 + $0xb0] sm:$0xff] }
 0x366   :  { %1961 = vmatmul.mubr.f32.gmra.mrb[194].mxu0 %v775_v40  ;;  %v414_v40 = vld [vmem:[#allocation2 + $0xd8] sm:$0xff] }
 0x367   :  { %1965 = vmatprep.mubr.f32.mxu0 %v780_v41  ;;  %v413_v41 = vld [vmem:[#allocation2 + $0xd0] sm:$0xff] }
 0x36a   :  { %1966 = vmatmul.mubr.f32.gmra.mrb[196].mxu0 %v779_v42  ;;  %v418_v42 = vld [vmem:[#allocation2 + $0xf8] sm:$0xff] }
 0x36b   :  { %1970 = vmatprep.mubr.f32.mxu0 %v784_v43  ;;  %v417_v43 = vld [vmem:[#allocation2 + $0xf0] sm:$0xff] }
 0x36e   :  { %1971 = vmatmul.mubr.f32.gmra.mrb[198].mxu0 %v783_v44  ;;  %v422_v44 = vld [vmem:[#allocation2 + $0x118] sm:$0xff] }
 0x36f   :  { %1975 = vmatprep.mubr.f32.mxu0 %v788_v45  ;;  %v421_v45 = vld [vmem:[#allocation2 + $0x110] sm:$0xff] }
 0x372   :  { %1976 = vmatmul.mubr.f32.gmra.mrb[200].mxu0 %v787_v46  ;;  %v426_v46 = vld [vmem:[#allocation2 + $0x138] sm:$0xff] }
 0x373   :  { %1980 = vmatprep.mubr.f32.mxu0 %v792_v47  ;;  %v425_v47 = vld [vmem:[#allocation2 + $0x130] sm:$0xff] }
 0x376   :  { %1981 = vmatmul.mubr.f32.gmra.mrb[202].mxu0 %v791_v48  ;;  %v430_v48 = vld [vmem:[#allocation2 + $0x158] sm:$0xff] }
 0x377   :  { %1985 = vmatprep.mubr.f32.mxu0 %v796_v49  ;;  %v429_v49 = vld [vmem:[#allocation2 + $0x150] sm:$0xff] }
 0x37a   :  { %1986 = vmatmul.mubr.f32.gmra.mrb[204].mxu0 %v795_v50  ;;  %v434_v50 = vld [vmem:[#allocation2 + $0x178] sm:$0xff] }
 0x37b   :  { %1990 = vmatprep.mubr.f32.mxu0 %v800_v51  ;;  %v433_v51 = vld [vmem:[#allocation2 + $0x170] sm:$0xff] }
 0x37e   :  { %1991 = vmatmul.mubr.f32.gmra.mrb[206].mxu0 %v799_v52  ;;  %v438_v52 = vld [vmem:[#allocation2 + $0x198] sm:$0xff] }
 0x37f   :  { %1995 = vmatprep.mubr.f32.mxu0 %v804_v53  ;;  %v437_v53 = vld [vmem:[#allocation2 + $0x190] sm:$0xff] }
 0x382   :  { %1996 = vmatmul.mubr.f32.gmra.mrb[208].mxu0 %v803_v54  ;;  %v442_v54 = vld [vmem:[#allocation2 + $0x1b8] sm:$0xff] }
 0x383   :  { %2000 = vmatprep.mubr.f32.mxu0 %v808_v55  ;;  %v441_v55 = vld [vmem:[#allocation2 + $0x1b0] sm:$0xff] }
 0x386   :  { %2001 = vmatmul.mubr.f32.gmra.mrb[210].mxu0 %v807_v56  ;;  %v446_v56 = vld [vmem:[#allocation2 + $0x1d8] sm:$0xff] }
 0x387   :  { %2005 = vmatprep.mubr.f32.mxu0 %v812_v57  ;;  %v445_v57 = vld [vmem:[#allocation2 + $0x1d0] sm:$0xff] }
 0x38a   :  { %2006 = vmatmul.mubr.f32.gmra.mrb[212].mxu0 %v811_v58  ;;  %v450_v58 = vld [vmem:[#allocation2 + $0x1f8] sm:$0xff] }
 0x38b   :  { %2010 = vmatprep.mubr.f32.mxu0 %v816_v59  ;;  %v449_v59 = vld [vmem:[#allocation2 + $0x1f0] sm:$0xff] }
 0x38e   :  { %2011 = vmatmul.mubr.f32.gmra.mrb[214].mxu0 %v815_v60  ;;  %v454_v60 = vld [vmem:[#allocation2 + $0x218] sm:$0xff] }
 0x38f   :  { %2015 = vmatprep.mubr.f32.mxu0 %v820_v61  ;;  %v453_v61 = vld [vmem:[#allocation2 + $0x210] sm:$0xff] }
 0x392   :  { %2016 = vmatmul.mubr.f32.gmra.mrb[216].mxu0 %v819_v62  ;;  %v458_v62 = vld [vmem:[#allocation2 + $0x238] sm:$0xff] }
 0x393   :  { %2020 = vmatprep.mubr.f32.mxu0 %v824_v63  ;;  %v457_v63 = vld [vmem:[#allocation2 + $0x230] sm:$0xff] }
 0x396   :  { %2021 = vmatmul.mubr.f32.gmra.mrb[218].mxu0 %v823_v1  ;;  %v462_v1 = vld [vmem:[#allocation2 + $0x258] sm:$0xff] }
 0x397   :  { %2025 = vmatprep.mubr.f32.mxu0 %v828_v2  ;;  %v461_v2 = vld [vmem:[#allocation2 + $0x250] sm:$0xff] }
 0x39a   :  { %2026 = vmatmul.mubr.f32.gmra.mrb[220].mxu0 %v827_v3  ;;  %v466_v3 = vld [vmem:[#allocation2 + $0x278] sm:$0xff] }
 0x39b   :  { %2030 = vmatprep.mubr.f32.mxu0 %v832_v4  ;;  %v465_v4 = vld [vmem:[#allocation2 + $0x270] sm:$0xff] }
 0x39e   :  { %2031 = vmatmul.mubr.f32.gmra.mrb[222].mxu0 %v831_v5  ;;  %v470_v5 = vld [vmem:[#allocation2 + $0x298] sm:$0xff] }
 0x39f   :  { %2035 = vmatprep.mubr.f32.mxu0 %v836_v6  ;;  %v469_v6 = vld [vmem:[#allocation2 + $0x290] sm:$0xff] }
 0x3a2   :  { %2036 = vmatmul.mubr.f32.gmra.mrb[224].mxu0 %v835_v7  ;;  %v474_v7 = vld [vmem:[#allocation2 + $0x2b8] sm:$0xff] }
 0x3a3   :  { %2040 = vmatprep.mubr.f32.mxu0 %v840_v8  ;;  %v473_v8 = vld [vmem:[#allocation2 + $0x2b0] sm:$0xff] }
 0x3a6   :  { %2041 = vmatmul.mubr.f32.gmra.mrb[226].mxu0 %v839_v9  ;;  %v478_v9 = vld [vmem:[#allocation2 + $0x2d8] sm:$0xff] }
 0x3a7   :  { %2045 = vmatprep.mubr.f32.mxu0 %v844_v10  ;;  %v477_v10 = vld [vmem:[#allocation2 + $0x2d0] sm:$0xff] }
 0x3aa   :  { %2046 = vmatmul.mubr.f32.gmra.mrb[228].mxu0 %v843_v11  ;;  %v482_v11 = vld [vmem:[#allocation2 + $0x2f8] sm:$0xff] }
 0x3ab   :  { %2050 = vmatprep.mubr.f32.mxu0 %v848_v12  ;;  %v481_v12 = vld [vmem:[#allocation2 + $0x2f0] sm:$0xff] }
 0x3ae   :  { %2051 = vmatmul.mubr.f32.gmra.mrb[230].mxu0 %v847_v13  ;;  %v486_v13 = vld [vmem:[#allocation2 + $0x318] sm:$0xff] }
 0x3af   :  { %2055 = vmatprep.mubr.f32.mxu0 %v852_v14  ;;  %v485_v14 = vld [vmem:[#allocation2 + $0x310] sm:$0xff] }
 0x3b2   :  { %2056 = vmatmul.mubr.f32.gmra.mrb[232].mxu0 %v851_v15  ;;  %v490_v15 = vld [vmem:[#allocation2 + $0x338] sm:$0xff] }
 0x3b3   :  { %2060 = vmatprep.mubr.f32.mxu0 %v856_v16  ;;  %v489_v16 = vld [vmem:[#allocation2 + $0x330] sm:$0xff] }
 0x3b6   :  { %2061 = vmatmul.mubr.f32.gmra.mrb[234].mxu0 %v855_v17  ;;  %v494_v17 = vld [vmem:[#allocation2 + $0x358] sm:$0xff] }
 0x3b7   :  { %2065 = vmatprep.mubr.f32.mxu0 %v860_v18  ;;  %v493_v18 = vld [vmem:[#allocation2 + $0x350] sm:$0xff] }
 0x3ba   :  { %2066 = vmatmul.mubr.f32.gmra.mrb[236].mxu0 %v859_v19  ;;  %v498_v19 = vld [vmem:[#allocation2 + $0x378] sm:$0xff] }
 0x3bb   :  { %2070 = vmatprep.mubr.f32.mxu0 %v864_v20  ;;  %v497_v20 = vld [vmem:[#allocation2 + $0x370] sm:$0xff] }
 0x3be   :  { %2071 = vmatmul.mubr.f32.gmra.mrb[238].mxu0 %v863_v21  ;;  %v502_v21 = vld [vmem:[#allocation2 + $0x398] sm:$0xff] }
 0x3bf   :  { %2075 = vmatprep.mubr.f32.mxu0 %v868_v22  ;;  %v501_v22 = vld [vmem:[#allocation2 + $0x390] sm:$0xff] }
 0x3c2   :  { %2076 = vmatmul.mubr.f32.gmra.mrb[240].mxu0 %v867_v23  ;;  %v506_v23 = vld [vmem:[#allocation2 + $0x3b8] sm:$0xff] }
 0x3c3   :  { %2080 = vmatprep.mubr.f32.mxu0 %v872_v24  ;;  %v505_v24 = vld [vmem:[#allocation2 + $0x3b0] sm:$0xff] }
 0x3c6   :  { %2081 = vmatmul.mubr.f32.gmra.mrb[242].mxu0 %v871_v25  ;;  %v510_v25 = vld [vmem:[#allocation2 + $0x3d8] sm:$0xff] }
 0x3c7   :  { %2085 = vmatprep.mubr.f32.mxu0 %v876_v26  ;;  %v509_v26 = vld [vmem:[#allocation2 + $0x3d0] sm:$0xff] }
 0x3ca   :  { %2086 = vmatmul.mubr.f32.gmra.mrb[244].mxu0 %v875_v27  ;;  %v514_v27 = vld [vmem:[#allocation2 + $0x3f8] sm:$0xff] }
 0x3cb   :  { %2820 = vmatprep.mubr.f32.mxu0 %v390_v28  ;;  %v513_v28 = vld [vmem:[#allocation2 + $0x3f0] sm:$0xff] }
 0x3ce   :  { %2821 = vmatmul.mubr.f32.vlgmr.msra.gmra.mrb[0].mxu0 %v389_v29  ;;  %v518_v29 = vld [vmem:[#allocation2 + $0x418] sm:$0xff] }
 0x3cf   :  { %2825 = vmatprep.mubr.f32.mxu0 %v394_v30  ;;  %v517_v30 = vld [vmem:[#allocation2 + $0x410] sm:$0xff] }
 0x3d2   :  { %2826 = vmatmul.mubr.f32.gmra.mrb[2].mxu0 %v393_v31  ;;  %v522_v31 = vld [vmem:[#allocation2 + $0x438] sm:$0xff] }
 0x3d3   :  { %2830 = vmatprep.mubr.f32.mxu0 %v398_v32  ;;  %v521_v32 = vld [vmem:[#allocation2 + $0x430] sm:$0xff] }
 0x3d6   :  { %2831 = vmatmul.mubr.f32.gmra.mrb[4].mxu0 %v397_v33  ;;  %v526_v33 = vld [vmem:[#allocation2 + $0x458] sm:$0xff] }
 0x3d7   :  { %2835 = vmatprep.mubr.f32.mxu0 %v402_v34  ;;  %v525_v34 = vld [vmem:[#allocation2 + $0x450] sm:$0xff] }
 0x3da   :  { %2836 = vmatmul.mubr.f32.gmra.mrb[6].mxu0 %v401_v35  ;;  %v530_v35 = vld [vmem:[#allocation2 + $0x478] sm:$0xff] }
 0x3db   :  { %2840 = vmatprep.mubr.f32.mxu0 %v406_v36  ;;  %v529_v36 = vld [vmem:[#allocation2 + $0x470] sm:$0xff] }
 0x3de   :  { %2841 = vmatmul.mubr.f32.gmra.mrb[8].mxu0 %v405_v37  ;;  %v534_v37 = vld [vmem:[#allocation2 + $0x498] sm:$0xff] }
 0x3df   :  { %2845 = vmatprep.mubr.f32.mxu0 %v410_v38  ;;  %v533_v38 = vld [vmem:[#allocation2 + $0x490] sm:$0xff] }
 0x3e2   :  { %2846 = vmatmul.mubr.f32.gmra.mrb[10].mxu0 %v409_v39  ;;  %v538_v39 = vld [vmem:[#allocation2 + $0x4b8] sm:$0xff] }
 0x3e3   :  { %2850 = vmatprep.mubr.f32.mxu0 %v414_v40  ;;  %v537_v40 = vld [vmem:[#allocation2 + $0x4b0] sm:$0xff] }
 0x3e6   :  { %2851 = vmatmul.mubr.f32.gmra.mrb[12].mxu0 %v413_v41  ;;  %v542_v41 = vld [vmem:[#allocation2 + $0x4d8] sm:$0xff] }
 0x3e7   :  { %2855 = vmatprep.mubr.f32.mxu0 %v418_v42  ;;  %v541_v42 = vld [vmem:[#allocation2 + $0x4d0] sm:$0xff] }
 0x3ea   :  { %2856 = vmatmul.mubr.f32.gmra.mrb[14].mxu0 %v417_v43  ;;  %v546_v43 = vld [vmem:[#allocation2 + $0x4f8] sm:$0xff] }
 0x3eb   :  { %2860 = vmatprep.mubr.f32.mxu0 %v422_v44  ;;  %v545_v44 = vld [vmem:[#allocation2 + $0x4f0] sm:$0xff] }
 0x3ee   :  { %2861 = vmatmul.mubr.f32.gmra.mrb[16].mxu0 %v421_v45  ;;  %v550_v45 = vld [vmem:[#allocation2 + $0x518] sm:$0xff] }
 0x3ef   :  { %2865 = vmatprep.mubr.f32.mxu0 %v426_v46  ;;  %v549_v46 = vld [vmem:[#allocation2 + $0x510] sm:$0xff] }
 0x3f2   :  { %2866 = vmatmul.mubr.f32.gmra.mrb[18].mxu0 %v425_v47  ;;  %v554_v47 = vld [vmem:[#allocation2 + $0x538] sm:$0xff] }
 0x3f3   :  { %2870 = vmatprep.mubr.f32.mxu0 %v430_v48  ;;  %v553_v48 = vld [vmem:[#allocation2 + $0x530] sm:$0xff] }
 0x3f6   :  { %2871 = vmatmul.mubr.f32.gmra.mrb[20].mxu0 %v429_v49  ;;  %v558_v49 = vld [vmem:[#allocation2 + $0x558] sm:$0xff] }
 0x3f7   :  { %2875 = vmatprep.mubr.f32.mxu0 %v434_v50  ;;  %v557_v50 = vld [vmem:[#allocation2 + $0x550] sm:$0xff] }
 0x3fa   :  { %2876 = vmatmul.mubr.f32.gmra.mrb[22].mxu0 %v433_v51  ;;  %v562_v51 = vld [vmem:[#allocation2 + $0x578] sm:$0xff] }
 0x3fb   :  { %2880 = vmatprep.mubr.f32.mxu0 %v438_v52  ;;  %v561_v52 = vld [vmem:[#allocation2 + $0x570] sm:$0xff] }
 0x3fe   :  { %2881 = vmatmul.mubr.f32.gmra.mrb[24].mxu0 %v437_v53  ;;  %v566_v53 = vld [vmem:[#allocation2 + $0x598] sm:$0xff] }
 0x3ff   :  { %2885 = vmatprep.mubr.f32.mxu0 %v442_v54  ;;  %v565_v54 = vld [vmem:[#allocation2 + $0x590] sm:$0xff] }
 0x402   :  { %2886 = vmatmul.mubr.f32.gmra.mrb[26].mxu0 %v441_v55  ;;  %v570_v55 = vld [vmem:[#allocation2 + $0x5b8] sm:$0xff] }
 0x403   :  { %2890 = vmatprep.mubr.f32.mxu0 %v446_v56  ;;  %v569_v56 = vld [vmem:[#allocation2 + $0x5b0] sm:$0xff] }
 0x406   :  { %2891 = vmatmul.mubr.f32.gmra.mrb[28].mxu0 %v445_v57  ;;  %v574_v57 = vld [vmem:[#allocation2 + $0x5d8] sm:$0xff] }
 0x407   :  { %2895 = vmatprep.mubr.f32.mxu0 %v450_v58  ;;  %v573_v58 = vld [vmem:[#allocation2 + $0x5d0] sm:$0xff] }
 0x40a   :  { %2896 = vmatmul.mubr.f32.gmra.mrb[30].mxu0 %v449_v59  ;;  %v578_v59 = vld [vmem:[#allocation2 + $0x5f8] sm:$0xff] }
 0x40b   :  { %2900 = vmatprep.mubr.f32.mxu0 %v454_v60  ;;  %v577_v60 = vld [vmem:[#allocation2 + $0x5f0] sm:$0xff] }
 0x40e   :  { %2901 = vmatmul.mubr.f32.gmra.mrb[32].mxu0 %v453_v61  ;;  %v582_v61 = vld [vmem:[#allocation2 + $0x618] sm:$0xff] }
 0x40f   :  { %2905 = vmatprep.mubr.f32.mxu0 %v458_v62  ;;  %v581_v62 = vld [vmem:[#allocation2 + $0x610] sm:$0xff] }
 0x412   :  { %2906 = vmatmul.mubr.f32.gmra.mrb[34].mxu0 %v457_v63  ;;  %v586_v63 = vld [vmem:[#allocation2 + $0x638] sm:$0xff] }
 0x413   :  { %2910 = vmatprep.mubr.f32.mxu0 %v462_v1  ;;  %v585_v1 = vld [vmem:[#allocation2 + $0x630] sm:$0xff] }
 0x416   :  { %2911 = vmatmul.mubr.f32.gmra.mrb[36].mxu0 %v461_v2  ;;  %v590_v2 = vld [vmem:[#allocation2 + $0x658] sm:$0xff] }
 0x417   :  { %2915 = vmatprep.mubr.f32.mxu0 %v466_v3  ;;  %v589_v3 = vld [vmem:[#allocation2 + $0x650] sm:$0xff] }
 0x41a   :  { %2916 = vmatmul.mubr.f32.gmra.mrb[38].mxu0 %v465_v4  ;;  %v594_v4 = vld [vmem:[#allocation2 + $0x678] sm:$0xff] }
 0x41b   :  { %2920 = vmatprep.mubr.f32.mxu0 %v470_v5  ;;  %v593_v5 = vld [vmem:[#allocation2 + $0x670] sm:$0xff] }
 0x41e   :  { %2921 = vmatmul.mubr.f32.gmra.mrb[40].mxu0 %v469_v6  ;;  %v598_v6 = vld [vmem:[#allocation2 + $0x698] sm:$0xff] }
 0x41f   :  { %2925 = vmatprep.mubr.f32.mxu0 %v474_v7  ;;  %v597_v7 = vld [vmem:[#allocation2 + $0x690] sm:$0xff] }
 0x422   :  { %2926 = vmatmul.mubr.f32.gmra.mrb[42].mxu0 %v473_v8  ;;  %v602_v8 = vld [vmem:[#allocation2 + $0x6b8] sm:$0xff] }
 0x423   :  { %2930 = vmatprep.mubr.f32.mxu0 %v478_v9  ;;  %v601_v9 = vld [vmem:[#allocation2 + $0x6b0] sm:$0xff] }
 0x426   :  { %2931 = vmatmul.mubr.f32.gmra.mrb[44].mxu0 %v477_v10  ;;  %v606_v10 = vld [vmem:[#allocation2 + $0x6d8] sm:$0xff] }
 0x427   :  { %2935 = vmatprep.mubr.f32.mxu0 %v482_v11 }
 0x42a   :  { %2936 = vmatmul.mubr.f32.gmra.mrb[46].mxu0 %v481_v12 }
 0x42b   :  { %2940 = vmatprep.mubr.f32.mxu0 %v486_v13  ;;  %v605_v13 = vld [vmem:[#allocation2 + $0x6d0] sm:$0xff] }
 0x42e   :  { %2941 = vmatmul.mubr.f32.gmra.mrb[48].mxu0 %v485_v14  ;;  %v610_v14 = vld [vmem:[#allocation2 + $0x6f8] sm:$0xff] }
 0x42f   :  { %2945 = vmatprep.mubr.f32.mxu0 %v490_v15 }
 0x432   :  { %2946 = vmatmul.mubr.f32.gmra.mrb[50].mxu0 %v489_v16 }
 0x433   :  { %2950 = vmatprep.mubr.f32.mxu0 %v494_v17  ;;  %v609_v17 = vld [vmem:[#allocation2 + $0x6f0] sm:$0xff] }
 0x436   :  { %2951 = vmatmul.mubr.f32.gmra.mrb[52].mxu0 %v493_v18  ;;  %v614_v18 = vld [vmem:[#allocation2 + $0x718] sm:$0xff] }
 0x437   :  { %2955 = vmatprep.mubr.f32.mxu0 %v498_v19 }
 0x43a   :  { %2956 = vmatmul.mubr.f32.gmra.mrb[54].mxu0 %v497_v20 }
 0x43b   :  { %2960 = vmatprep.mubr.f32.mxu0 %v502_v21  ;;  %v613_v21 = vld [vmem:[#allocation2 + $0x710] sm:$0xff] }
 0x43e   :  { %2961 = vmatmul.mubr.f32.gmra.mrb[56].mxu0 %v501_v22  ;;  %v618_v22 = vld [vmem:[#allocation2 + $0x738] sm:$0xff] }
 0x43f   :  { %2965 = vmatprep.mubr.f32.mxu0 %v506_v23 }
 0x442   :  { %2966 = vmatmul.mubr.f32.gmra.mrb[58].mxu0 %v505_v24 }
 0x443   :  { %2970 = vmatprep.mubr.f32.mxu0 %v510_v25  ;;  %v617_v25 = vld [vmem:[#allocation2 + $0x730] sm:$0xff] }
 0x446   :  { %2971 = vmatmul.mubr.f32.gmra.mrb[60].mxu0 %v509_v26  ;;  %v622_v26 = vld [vmem:[#allocation2 + $0x758] sm:$0xff] }
 0x447   :  { %2975 = vmatprep.mubr.f32.mxu0 %v514_v27 }
 0x44a   :  { %2976 = vmatmul.mubr.f32.gmra.mrb[62].mxu0 %v513_v28 }
 0x44b   :  { %2980 = vmatprep.mubr.f32.mxu0 %v518_v29  ;;  %v621_v29 = vld [vmem:[#allocation2 + $0x750] sm:$0xff] }
 0x44e   :  { %2981 = vmatmul.mubr.f32.gmra.mrb[64].mxu0 %v517_v30  ;;  %v626_v30 = vld [vmem:[#allocation2 + $0x778] sm:$0xff] }
 0x44f   :  { %2985 = vmatprep.mubr.f32.mxu0 %v522_v31 }
 0x452   :  { %2986 = vmatmul.mubr.f32.gmra.mrb[66].mxu0 %v521_v32 }
 0x453   :  { %2990 = vmatprep.mubr.f32.mxu0 %v526_v33  ;;  %v625_v33 = vld [vmem:[#allocation2 + $0x770] sm:$0xff] }
 0x456   :  { %2991 = vmatmul.mubr.f32.gmra.mrb[68].mxu0 %v525_v34  ;;  %v630_v34 = vld [vmem:[#allocation2 + $0x798] sm:$0xff] }
 0x457   :  { %2995 = vmatprep.mubr.f32.mxu0 %v530_v35 }
 0x45a   :  { %2996 = vmatmul.mubr.f32.gmra.mrb[70].mxu0 %v529_v36 }
 0x45b   :  { %3000 = vmatprep.mubr.f32.mxu0 %v534_v37  ;;  %v629_v37 = vld [vmem:[#allocation2 + $0x790] sm:$0xff] }
 0x45e   :  { %3001 = vmatmul.mubr.f32.gmra.mrb[72].mxu0 %v533_v38  ;;  %v634_v38 = vld [vmem:[#allocation2 + $0x7b8] sm:$0xff] }
 0x45f   :  { %3005 = vmatprep.mubr.f32.mxu0 %v538_v39 }
 0x462   :  { %3006 = vmatmul.mubr.f32.gmra.mrb[74].mxu0 %v537_v40 }
 0x463   :  { %3010 = vmatprep.mubr.f32.mxu0 %v542_v41  ;;  %v633_v41 = vld [vmem:[#allocation2 + $0x7b0] sm:$0xff] }
 0x466   :  { %3011 = vmatmul.mubr.f32.gmra.mrb[76].mxu0 %v541_v42  ;;  %v638_v42 = vld [vmem:[#allocation2 + $0x7d8] sm:$0xff] }
 0x467   :  { %3015 = vmatprep.mubr.f32.mxu0 %v546_v43 }
 0x46a   :  { %3016 = vmatmul.mubr.f32.gmra.mrb[78].mxu0 %v545_v44 }
 0x46b   :  { %3020 = vmatprep.mubr.f32.mxu0 %v550_v45  ;;  %v637_v45 = vld [vmem:[#allocation2 + $0x7d0] sm:$0xff] }
 0x46e   :  { %3021 = vmatmul.mubr.f32.gmra.mrb[80].mxu0 %v549_v46  ;;  %v642_v46 = vld [vmem:[#allocation2 + $0x7f8] sm:$0xff] }
 0x46f   :  { %3025 = vmatprep.mubr.f32.mxu0 %v554_v47 }
 0x472   :  { %3026 = vmatmul.mubr.f32.gmra.mrb[82].mxu0 %v553_v48 }
 0x473   :  { %3030 = vmatprep.mubr.f32.mxu0 %v558_v49  ;;  %v641_v49 = vld [vmem:[#allocation2 + $0x7f0] sm:$0xff] }
 0x476   :  { %3031 = vmatmul.mubr.f32.gmra.mrb[84].mxu0 %v557_v50  ;;  %v646_v50 = vld [vmem:[#allocation2 + $0x818] sm:$0xff] }
 0x477   :  { %3035 = vmatprep.mubr.f32.mxu0 %v562_v51 }
 0x47a   :  { %3036 = vmatmul.mubr.f32.gmra.mrb[86].mxu0 %v561_v52 }
 0x47b   :  { %3040 = vmatprep.mubr.f32.mxu0 %v566_v53  ;;  %v645_v53 = vld [vmem:[#allocation2 + $0x810] sm:$0xff] }
 0x47e   :  { %3041 = vmatmul.mubr.f32.gmra.mrb[88].mxu0 %v565_v54  ;;  %v650_v54 = vld [vmem:[#allocation2 + $0x838] sm:$0xff] }
 0x47f   :  { %3045 = vmatprep.mubr.f32.mxu0 %v570_v55 }
 0x482   :  { %3046 = vmatmul.mubr.f32.gmra.mrb[90].mxu0 %v569_v56 }
 0x483   :  { %3050 = vmatprep.mubr.f32.mxu0 %v574_v57  ;;  %v649_v57 = vld [vmem:[#allocation2 + $0x830] sm:$0xff] }
 0x486   :  { %3051 = vmatmul.mubr.f32.gmra.mrb[92].mxu0 %v573_v58  ;;  %v654_v58 = vld [vmem:[#allocation2 + $0x858] sm:$0xff] }
 0x487   :  { %3055 = vmatprep.mubr.f32.mxu0 %v578_v59 }
 0x48a   :  { %3056 = vmatmul.mubr.f32.gmra.mrb[94].mxu0 %v577_v60 }
 0x48b   :  { %3060 = vmatprep.mubr.f32.mxu0 %v582_v61  ;;  %v653_v61 = vld [vmem:[#allocation2 + $0x850] sm:$0xff] }
 0x48e   :  { %3061 = vmatmul.mubr.f32.gmra.mrb[96].mxu0 %v581_v62  ;;  %v658_v62 = vld [vmem:[#allocation2 + $0x878] sm:$0xff] }
 0x48f   :  { %3065 = vmatprep.mubr.f32.mxu0 %v586_v63 }
 0x492   :  { %3066 = vmatmul.mubr.f32.gmra.mrb[98].mxu0 %v585_v1 }
 0x493   :  { %3070 = vmatprep.mubr.f32.mxu0 %v590_v2  ;;  %v657_v2 = vld [vmem:[#allocation2 + $0x870] sm:$0xff] }
 0x496   :  { %3071 = vmatmul.mubr.f32.gmra.mrb[100].mxu0 %v589_v3  ;;  %v662_v3 = vld [vmem:[#allocation2 + $0x898] sm:$0xff] }
 0x497   :  { %3075 = vmatprep.mubr.f32.mxu0 %v594_v4 }
 0x49a   :  { %3076 = vmatmul.mubr.f32.gmra.mrb[102].mxu0 %v593_v5 }
 0x49b   :  { %3080 = vmatprep.mubr.f32.mxu0 %v598_v6  ;;  %v661_v6 = vld [vmem:[#allocation2 + $0x890] sm:$0xff] }
 0x49e   :  { %3081 = vmatmul.mubr.f32.gmra.mrb[104].mxu0 %v597_v7  ;;  %v666_v7 = vld [vmem:[#allocation2 + $0x8b8] sm:$0xff] }
 0x49f   :  { %3085 = vmatprep.mubr.f32.mxu0 %v602_v8 }
 0x4a1   :  { %v12871_v11 = vpop.f32.mrb[0].mxu0 }
 0x4a2   :  { %v2824_v12 = vpop.f32.mrb[1].mxu0  ;;  %3086 = vmatmul.mubr.f32.gmra.mrb[106].mxu0 %v601_v9 }
 0x4a3   :  { %3090 = vmatprep.mubr.f32.mxu0 %v606_v10  ;;  %v665_v10 = vld [vmem:[#allocation2 + $0x8b0] sm:$0xff]  ;;  %v670_v12 = vld [vmem:[#allocation2 + $0x8d8] sm:$0xff] }
 0x4a5   :  { %v12873_v15 = vpop.f32.mrb[2].mxu0 }
 0x4a6   :  { %v2829_v16 = vpop.f32.mrb[3].mxu0  ;;  %3091 = vmatmul.mubr.f32.gmra.mrb[108].mxu0 %v605_v13 }
 0x4a7   :  { %3095 = vmatprep.mubr.f32.mxu0 %v610_v14  ;;  %v669_v16 = vld [vmem:[#allocation2 + $0x8d0] sm:$0xff] }
 0x4a9   :  { %v12875_v19 = vpop.f32.mrb[4].mxu0 }
 0x4aa   :  { %v2834_v20 = vpop.f32.mrb[5].mxu0  ;;  %3096 = vmatmul.mubr.f32.gmra.mrb[110].mxu0 %v609_v17  ;;  %v674_v17 = vld [vmem:[#allocation2 + $0x8f8] sm:$0xff] }
 0x4ab   :  { %3100 = vmatprep.mubr.f32.mxu0 %v614_v18 }
 0x4ad   :  { %v12877_v23 = vpop.f32.mrb[6].mxu0 }
 0x4ae   :  { %v2839_v24 = vpop.f32.mrb[7].mxu0  ;;  %3101 = vmatmul.mubr.f32.gmra.mrb[112].mxu0 %v613_v21 }
 0x4af   :  { %3105 = vmatprep.mubr.f32.mxu0 %v618_v22  ;;  %v673_v22 = vld [vmem:[#allocation2 + $0x8f0] sm:$0xff]  ;;  %v678_v24 = vld [vmem:[#allocation2 + $0x918] sm:$0xff] }
 0x4b1   :  { %v12879_v27 = vpop.f32.mrb[8].mxu0 }
 0x4b2   :  { %14584 = vst [vmem:[#allocation44_spill] sm:$0xff] %v12879_v27  ;;  %v2844_v28 = vpop.f32.mrb[9].mxu0  ;;  %3106 = vmatmul.mubr.f32.gmra.mrb[114].mxu0 %v617_v25 }
 0x4b3   :  { %3110 = vmatprep.mubr.f32.mxu0 %v622_v26  ;;  %v677_v28 = vld [vmem:[#allocation2 + $0x910] sm:$0xff] }
 0x4b5   :  { %v12881_v31 = vpop.f32.mrb[10].mxu0 }
 0x4b6   :  { %14585 = vst [vmem:[#allocation45_spill] sm:$0xff] %v12881_v31  ;;  %v2849_v32 = vpop.f32.mrb[11].mxu0  ;;  %3111 = vmatmul.mubr.f32.gmra.mrb[116].mxu0 %v621_v29  ;;  %v682_v29 = vld [vmem:[#allocation2 + $0x938] sm:$0xff] }
 0x4b7   :  { %3115 = vmatprep.mubr.f32.mxu0 %v626_v30 }
 0x4b9   :  { %v12883_v35 = vpop.f32.mrb[12].mxu0 }
 0x4ba   :  { %v2854_v36 = vpop.f32.mrb[13].mxu0  ;;  %3116 = vmatmul.mubr.f32.gmra.mrb[118].mxu0 %v625_v33 }
 0x4bb   :  { %3120 = vmatprep.mubr.f32.mxu0 %v630_v34  ;;  %v681_v34 = vld [vmem:[#allocation2 + $0x930] sm:$0xff]  ;;  %v686_v36 = vld [vmem:[#allocation2 + $0x958] sm:$0xff] }
 0x4bd   :  { %v12885_v39 = vpop.f32.mrb[14].mxu0 }
 0x4be   :  { %v2859_v40 = vpop.f32.mrb[15].mxu0  ;;  %3121 = vmatmul.mubr.f32.gmra.mrb[120].mxu0 %v629_v37 }
 0x4bf   :  { %3125 = vmatprep.mubr.f32.mxu0 %v634_v38  ;;  %v685_v40 = vld [vmem:[#allocation2 + $0x950] sm:$0xff] }
 0x4c1   :  { %v12887_v43 = vpop.f32.mrb[16].mxu0 }
 0x4c2   :  { %14586 = vst [vmem:[#allocation46_spill] sm:$0xff] %v12887_v43  ;;  %v2864_v44 = vpop.f32.mrb[17].mxu0  ;;  %3126 = vmatmul.mubr.f32.gmra.mrb[122].mxu0 %v633_v41  ;;  %v690_v41 = vld [vmem:[#allocation2 + $0x978] sm:$0xff] }
 0x4c3   :  { %3130 = vmatprep.mubr.f32.mxu0 %v638_v42 }
 0x4c5   :  { %v12889_v47 = vpop.f32.mrb[18].mxu0 }
 0x4c6   :  { %14587 = vst [vmem:[#allocation47_spill] sm:$0xff] %v12889_v47  ;;  %v2869_v48 = vpop.f32.mrb[19].mxu0  ;;  %3131 = vmatmul.mubr.f32.gmra.mrb[124].mxu0 %v637_v45 }
 0x4c7   :  { %3135 = vmatprep.mubr.f32.mxu0 %v642_v46  ;;  %v689_v46 = vld [vmem:[#allocation2 + $0x970] sm:$0xff]  ;;  %v694_v48 = vld [vmem:[#allocation2 + $0x998] sm:$0xff] }
 0x4c9   :  { %v12891_v51 = vpop.f32.mrb[20].mxu0 }
 0x4ca   :  { %v2874_v52 = vpop.f32.mrb[21].mxu0  ;;  %3136 = vmatmul.mubr.f32.gmra.mrb[126].mxu0 %v641_v49 }
 0x4cb   :  { %3140 = vmatprep.mubr.f32.mxu0 %v646_v50  ;;  %v693_v52 = vld [vmem:[#allocation2 + $0x990] sm:$0xff] }
 0x4cd   :  { %v12893_v55 = vpop.f32.mrb[22].mxu0 }
 0x4ce   :  { %v2879_v56 = vpop.f32.mrb[23].mxu0  ;;  %3141 = vmatmul.mubr.f32.gmra.mrb[128].mxu0 %v645_v53  ;;  %v698_v53 = vld [vmem:[#allocation2 + $0x9b8] sm:$0xff] }
 0x4cf   :  { %3145 = vmatprep.mubr.f32.mxu0 %v650_v54 }
 0x4d1   :  { %v12895_v59 = vpop.f32.mrb[24].mxu0 }
 0x4d2   :  { %v2884_v60 = vpop.f32.mrb[25].mxu0  ;;  %3146 = vmatmul.mubr.f32.gmra.mrb[130].mxu0 %v649_v57 }
 0x4d3   :  { %3150 = vmatprep.mubr.f32.mxu0 %v654_v58  ;;  %v697_v58 = vld [vmem:[#allocation2 + $0x9b0] sm:$0xff]  ;;  %v702_v60 = vld [vmem:[#allocation2 + $0x9d8] sm:$0xff] }
 0x4d5   :  { %v12897_v63 = vpop.f32.mrb[26].mxu0 }
 0x4d6   :  { %v2889_v1 = vpop.f32.mrb[27].mxu0  ;;  %3151 = vmatmul.mubr.f32.gmra.mrb[132].mxu0 %v653_v61 }
 0x4d7   :  { %3155 = vmatprep.mubr.f32.mxu0 %v658_v62  ;;  %v701_v1 = vld [vmem:[#allocation2 + $0x9d0] sm:$0xff] }
 0x4d9   :  { %v12899_v4 = vpop.f32.mrb[28].mxu0 }
 0x4da   :  { %v2894_v5 = vpop.f32.mrb[29].mxu0  ;;  %3156 = vmatmul.mubr.f32.gmra.mrb[134].mxu0 %v657_v2  ;;  %v706_v2 = vld [vmem:[#allocation2 + $0x9f8] sm:$0xff] }
 0x4db   :  { %3160 = vmatprep.mubr.f32.mxu0 %v662_v3 }
 0x4dd   :  { %v12901_v8 = vpop.f32.mrb[30].mxu0 }
 0x4de   :  { %v2899_v9 = vpop.f32.mrb[31].mxu0  ;;  %3161 = vmatmul.mubr.f32.gmra.mrb[136].mxu0 %v661_v6 }
 0x4df   :  { %3165 = vmatprep.mubr.f32.mxu0 %v666_v7  ;;  %v705_v7 = vld [vmem:[#allocation2 + $0x9f0] sm:$0xff]  ;;  %v710_v9 = vld [vmem:[#allocation2 + $0xa18] sm:$0xff] }
 0x4e1   :  { %v2902_v13 = vpop.f32.mrb[32].mxu0 }
 0x4e2   :  { %v2904_v14 = vpop.f32.mrb[33].mxu0  ;;  %3166 = vmatmul.mubr.f32.gmra.mrb[138].mxu0 %v665_v10 }
 0x4e3   :  { %3170 = vmatprep.mubr.f32.mxu0 %v670_v12  ;;  %v714_v14 = vld [vmem:[#allocation2 + $0xa38] sm:$0xff] }
 0x4e5   :  { %v2907_v18 = vpop.f32.mrb[34].mxu0 }
 0x4e6   :  { %v2909_v20 = vpop.f32.mrb[35].mxu0  ;;  %3171 = vmatmul.mubr.f32.gmra.mrb[140].mxu0 %v669_v16  ;;  %v10995_v21 = vpack.i.bf16 %v2907_v18, %v2902_v13  ;;  %v709_v13 = vld [vmem:[#allocation2 + $0xa10] sm:$0xff] }
 0x4e7   :  { %3175 = vmatprep.mubr.f32.mxu0 %v674_v17  ;;  %v713_v20 = vld [vmem:[#allocation2 + $0xa30] sm:$0xff] }
 0x4e8   :  { %10996 = vrot.lane.b32.xlu0 %v10995_v21, %s12203_s23  ;;  %v718_v21 = vld [vmem:[#allocation2 + $0xa58] sm:$0xff] }
 0x4e9   :  { %v2912_v25 = vpop.f32.mrb[36].mxu0 }
 0x4ea   :  { %v2914_v26 = vpop.f32.mrb[37].mxu0  ;;  %3176 = vmatmul.mubr.f32.gmra.mrb[142].mxu0 %v673_v22 }
 0x4eb   :  { %3180 = vmatprep.mubr.f32.mxu0 %v678_v24  ;;  %v722_v26 = vld [vmem:[#allocation2 + $0xa78] sm:$0xff] }
 0x4ed   :  { %v2917_v30 = vpop.f32.mrb[38].mxu0 }
 0x4ee   :  { %v2919_v32 = vpop.f32.mrb[39].mxu0  ;;  %3181 = vmatmul.mubr.f32.gmra.mrb[144].mxu0 %v677_v28  ;;  %v11000_v33 = vpack.i.bf16 %v2917_v30, %v2912_v25  ;;  %v717_v25 = vld [vmem:[#allocation2 + $0xa50] sm:$0xff] }
 0x4ef   :  { %3185 = vmatprep.mubr.f32.mxu0 %v682_v29  ;;  %v721_v32 = vld [vmem:[#allocation2 + $0xa70] sm:$0xff] }
 0x4f0   :  { %11001 = vrot.lane.b32.xlu0 %v11000_v33, %s12203_s23  ;;  %v726_v33 = vld [vmem:[#allocation2 + $0xa98] sm:$0xff] }
 0x4f1   :  { %v2922_v37 = vpop.f32.mrb[40].mxu0 }
 0x4f2   :  { %v2924_v38 = vpop.f32.mrb[41].mxu0  ;;  %3186 = vmatmul.mubr.f32.gmra.mrb[146].mxu0 %v681_v34 }
 0x4f3   :  { %3190 = vmatprep.mubr.f32.mxu0 %v686_v36  ;;  %v730_v38 = vld [vmem:[#allocation2 + $0xab8] sm:$0xff] }
 0x4f5   :  { %v2927_v42 = vpop.f32.mrb[42].mxu0 }
 0x4f6   :  { %v2929_v44 = vpop.f32.mrb[43].mxu0  ;;  %3191 = vmatmul.mubr.f32.gmra.mrb[148].mxu0 %v685_v40  ;;  %v11005_v45 = vpack.i.bf16 %v2927_v42, %v2922_v37  ;;  %v725_v37 = vld [vmem:[#allocation2 + $0xa90] sm:$0xff] }
 0x4f7   :  { %3195 = vmatprep.mubr.f32.mxu0 %v690_v41  ;;  %v729_v44 = vld [vmem:[#allocation2 + $0xab0] sm:$0xff] }
 0x4f8   :  { %11006 = vrot.lane.b32.xlu0 %v11005_v45, %s12203_s23  ;;  %v734_v45 = vld [vmem:[#allocation2 + $0xad8] sm:$0xff] }
 0x4f9   :  { %v2932_v49 = vpop.f32.mrb[44].mxu0 }
 0x4fa   :  { %v2934_v50 = vpop.f32.mrb[45].mxu0  ;;  %3196 = vmatmul.mubr.f32.gmra.mrb[150].mxu0 %v689_v46 }
 0x4fb   :  { %3200 = vmatprep.mubr.f32.mxu0 %v694_v48  ;;  %v738_v50 = vld [vmem:[#allocation2 + $0xaf8] sm:$0xff] }
 0x4fd   :  { %v2937_v54 = vpop.f32.mrb[46].mxu0 }
 0x4fe   :  { %v2939_v56 = vpop.f32.mrb[47].mxu0  ;;  %3201 = vmatmul.mubr.f32.gmra.mrb[152].mxu0 %v693_v52  ;;  %v11010_v57 = vpack.i.bf16 %v2937_v54, %v2932_v49  ;;  %v733_v49 = vld [vmem:[#allocation2 + $0xad0] sm:$0xff] }
 0x4ff   :  { %3205 = vmatprep.mubr.f32.mxu0 %v698_v53  ;;  %v737_v56 = vld [vmem:[#allocation2 + $0xaf0] sm:$0xff] }
 0x500   :  { %11011 = vrot.lane.b32.xlu0 %v11010_v57, %s12203_s23  ;;  %v742_v57 = vld [vmem:[#allocation2 + $0xb18] sm:$0xff] }
 0x501   :  { %v2942_v61 = vpop.f32.mrb[48].mxu0 }
 0x502   :  { %v2944_v62 = vpop.f32.mrb[49].mxu0  ;;  %3206 = vmatmul.mubr.f32.gmra.mrb[154].mxu0 %v697_v58 }
 0x503   :  { %3210 = vmatprep.mubr.f32.mxu0 %v702_v60  ;;  %v746_v62 = vld [vmem:[#allocation2 + $0xb38] sm:$0xff] }
 0x505   :  { %v2947_v3 = vpop.f32.mrb[50].mxu0 }
 0x506   :  { %v2949_v5 = vpop.f32.mrb[51].mxu0  ;;  %3211 = vmatmul.mubr.f32.gmra.mrb[156].mxu0 %v701_v1  ;;  %v11015_v6 = vpack.i.bf16 %v2947_v3, %v2942_v61  ;;  %v741_v61 = vld [vmem:[#allocation2 + $0xb10] sm:$0xff] }
 0x507   :  { %3215 = vmatprep.mubr.f32.mxu0 %v706_v2  ;;  %v745_v5 = vld [vmem:[#allocation2 + $0xb30] sm:$0xff] }
 0x508   :  { %11016 = vrot.lane.b32.xlu1 %v11015_v6, %s12203_s23  ;;  %v750_v6 = vld [vmem:[#allocation2 + $0xb58] sm:$0xff] }
 0x509   :  { %v2952_v10 = vpop.f32.mrb[52].mxu0 }
 0x50a   :  { %v2954_v12 = vpop.f32.mrb[53].mxu0  ;;  %3216 = vmatmul.mubr.f32.gmra.mrb[158].mxu0 %v705_v7 }
 0x50b   :  { %3220 = vmatprep.mubr.f32.mxu0 %v710_v9  ;;  %v754_v12 = vld [vmem:[#allocation2 + $0xb78] sm:$0xff] }
 0x50d   :  { %v2957_v16 = vpop.f32.mrb[54].mxu0 }
 0x50e   :  { %v2959_v17 = vpop.f32.mrb[55].mxu0  ;;  %3221 = vmatmul.mubr.f32.gmra.mrb[160].mxu0 %v709_v13  ;;  %v11020_v18 = vpack.i.bf16 %v2957_v16, %v2952_v10  ;;  %v749_v10 = vld [vmem:[#allocation2 + $0xb50] sm:$0xff] }
 0x50f   :  { %3225 = vmatprep.mubr.f32.mxu0 %v714_v14  ;;  %v880_v17 = vld [vmem:[#allocation2 + $0xf68] sm:$0xff] }
 0x510   :  { %11021 = vrot.lane.b32.xlu0 %v11020_v18, %s12203_s23  ;;  %v753_v18 = vld [vmem:[#allocation2 + $0xb70] sm:$0xff]  ;;  %2090 = vmatprep.mubr.f32.mxu1 %v880_v17  ;;  %v786_v17 = vld [vmem:[#allocation2 + $0xc78] sm:$0xff] }
 0x511   :  { %v2962_v22 = vpop.f32.mrb[56].mxu0 }
 0x512   :  { %v2964_v24 = vpop.f32.mrb[57].mxu0  ;;  %3226 = vmatmul.mubr.f32.gmra.mrb[162].mxu0 %v713_v20  ;;  %v758_v20 = vld [vmem:[#allocation2 + $0xb98] sm:$0xff] }
 0x513   :  { %3230 = vmatprep.mubr.f32.mxu0 %v718_v21  ;;  %v879_v21 = vld [vmem:[#allocation2 + $0xf60] sm:$0xff] }
 0x514   :  { %2091 = vmatmul.mubr.f32.vlgmr.msra.gmra.mrb[0].mxu1 %v879_v21 }
 0x515   :  { %v2967_v28 = vpop.f32.mrb[58].mxu0 }
 0x516   :  { %v2969_v29 = vpop.f32.mrb[59].mxu0  ;;  %3231 = vmatmul.mubr.f32.gmra.mrb[164].mxu0 %v717_v25  ;;  %v11025_v30 = vpack.i.bf16 %v2967_v28, %v2962_v22  ;;  %v757_v25 = vld [vmem:[#allocation2 + $0xb90] sm:$0xff]  ;;  %v762_v28 = vld [vmem:[#allocation2 + $0xbb8] sm:$0xff] }
 0x517   :  { %3235 = vmatprep.mubr.f32.mxu0 %v722_v26  ;;  %v884_v26 = vld [vmem:[#allocation2 + $0xf88] sm:$0xff]  ;;  %v883_v29 = vld [vmem:[#allocation2 + $0xf80] sm:$0xff] }
 0x518   :  { %11026 = vrot.lane.b32.xlu1 %v11025_v30, %s12203_s23  ;;  %2095 = vmatprep.mubr.f32.mxu1 %v884_v26  ;;  %v790_v26 = vld [vmem:[#allocation2 + $0xc98] sm:$0xff] }
 0x519   :  { %v2972_v34 = vpop.f32.mrb[60].mxu0  ;;  %2096 = vmatmul.mubr.f32.gmra.mrb[2].mxu1 %v883_v29 }
 0x51a   :  { %v2974_v36 = vpop.f32.mrb[61].mxu0  ;;  %3236 = vmatmul.mubr.f32.gmra.mrb[166].mxu0 %v721_v32 }
 0x51b   :  { %3240 = vmatprep.mubr.f32.mxu0 %v726_v33  ;;  %v761_v36 = vld [vmem:[#allocation2 + $0xbb0] sm:$0xff] }
 0x51d   :  { %v2977_v40 = vpop.f32.mrb[62].mxu0 }
 0x51e   :  { %v2979_v41 = vpop.f32.mrb[63].mxu0  ;;  %3241 = vmatmul.mubr.f32.gmra.mrb[168].mxu0 %v725_v37  ;;  %v11030_v42 = vpack.i.bf16 %v2977_v40, %v2972_v34  ;;  %v888_v34 = vld [vmem:[#allocation2 + $0xfa8] sm:$0xff]  ;;  %v766_v37 = vld [vmem:[#allocation2 + $0xbd8] sm:$0xff] }
 0x51f   :  { %3245 = vmatprep.mubr.f32.mxu0 %v730_v38  ;;  %2100 = vmatprep.mubr.f32.mxu1 %v888_v34  ;;  %v887_v38 = vld [vmem:[#allocation2 + $0xfa0] sm:$0xff]  ;;  %v794_v34 = vld [vmem:[#allocation2 + $0xcb8] sm:$0xff] }
 0x520   :  { %11031 = vrot.lane.b32.xlu0 %v11030_v42, %s12203_s23  ;;  %2101 = vmatmul.mubr.f32.gmra.mrb[4].mxu1 %v887_v38  ;;  %v765_v42 = vld [vmem:[#allocation2 + $0xbd0] sm:$0xff]  ;;  %s12228_s23 = smov 24  }
 0x521   :  { %v2982_v46 = vpop.f32.mrb[64].mxu0 }
 0x522   :  { %v2984_v48 = vpop.f32.mrb[65].mxu0  ;;  %3246 = vmatmul.mubr.f32.gmra.mrb[170].mxu0 %v729_v44  ;;  %v892_v44 = vld [vmem:[#allocation2 + $0xfc8] sm:$0xff] }
 0x523   :  { %3250 = vmatprep.mubr.f32.mxu0 %v734_v45  ;;  %v770_v45 = vld [vmem:[#allocation2 + $0xbf8] sm:$0xff]  ;;  %2105 = vmatprep.mubr.f32.mxu1 %v892_v44 }
 0x524   :  { %v798_v44 = vld [vmem:[#allocation2 + $0xcd8] sm:$0xff] }
 0x525   :  { %v2987_v52 = vpop.f32.mrb[66].mxu0 }
 0x526   :  { %v2989_v53 = vpop.f32.mrb[67].mxu0  ;;  %3251 = vmatmul.mubr.f32.gmra.mrb[172].mxu0 %v733_v49  ;;  %v11035_v54 = vpack.i.bf16 %v2987_v52, %v2982_v46  ;;  %v891_v46 = vld [vmem:[#allocation2 + $0xfc0] sm:$0xff]  ;;  %v896_v52 = vld [vmem:[#allocation2 + $0xfe8] sm:$0xff] }
 0x527   :  { %3255 = vmatprep.mubr.f32.mxu0 %v738_v50  ;;  %2106 = vmatmul.mubr.f32.gmra.mrb[6].mxu1 %v891_v46  ;;  %v769_v53 = vld [vmem:[#allocation2 + $0xbf0] sm:$0xff] }
 0x528   :  { %11036 = vrot.lane.b32.xlu0 %v11035_v54, %s12221_s3  ;;  %2110 = vmatprep.mubr.f32.mxu1 %v896_v52  ;;  %v774_v54 = vld [vmem:[#allocation2 + $0xc18] sm:$0xff] }
 0x529   :  { %v2992_v58 = vpop.f32.mrb[68].mxu0  ;;  %v802_v52 = vld [vmem:[#allocation2 + $0xcf8] sm:$0xff] }
 0x52a   :  { %v2994_v60 = vpop.f32.mrb[69].mxu0  ;;  %3256 = vmatmul.mubr.f32.gmra.mrb[174].mxu0 %v737_v56  ;;  %v895_v56 = vld [vmem:[#allocation2 + $0xfe0] sm:$0xff] }
 0x52b   :  { %3260 = vmatprep.mubr.f32.mxu0 %v742_v57  ;;  %2111 = vmatmul.mubr.f32.gmra.mrb[8].mxu1 %v895_v56  ;;  %v773_v60 = vld [vmem:[#allocation2 + $0xc10] sm:$0xff] }
 0x52d   :  { %v2997_v1 = vpop.f32.mrb[70].mxu0 }
 0x52e   :  { %v2999_v2 = vpop.f32.mrb[71].mxu0  ;;  %3261 = vmatmul.mubr.f32.gmra.mrb[176].mxu0 %v741_v61  ;;  %v11040_v3 = vpack.i.bf16 %v2997_v1, %v2992_v58  ;;  %v900_v61 = vld [vmem:[#allocation2 + $0x1008] sm:$0xff]  ;;  %v899_v1 = vld [vmem:[#allocation2 + $0x1000] sm:$0xff] }
 0x52f   :  { %3265 = vmatprep.mubr.f32.mxu0 %v746_v62  ;;  %v778_v62 = vld [vmem:[#allocation2 + $0xc38] sm:$0xff]  ;;  %2115 = vmatprep.mubr.f32.mxu1 %v900_v61 }
 0x530   :  { %11041 = vrot.lane.b32.xlu0 %v11040_v3, %s12221_s3  ;;  %2116 = vmatmul.mubr.f32.gmra.mrb[10].mxu1 %v899_v1  ;;  %v806_v61 = vld [vmem:[#allocation2 + $0xd18] sm:$0xff] }
 0x531   :  { %v3002_v7 = vpop.f32.mrb[72].mxu0 }
 0x532   :  { %v3004_v9 = vpop.f32.mrb[73].mxu0  ;;  %3266 = vmatmul.mubr.f32.gmra.mrb[178].mxu0 %v745_v5 }
 0x533   :  { %3270 = vmatprep.mubr.f32.mxu0 %v750_v6  ;;  %v904_v6 = vld [vmem:[#allocation2 + $0x1028] sm:$0xff]  ;;  %v782_v9 = vld [vmem:[#allocation2 + $0xc58] sm:$0xff] }
 0x534   :  { %2120 = vmatprep.mubr.f32.mxu1 %v904_v6  ;;  %v810_v6 = vld [vmem:[#allocation2 + $0xd38] sm:$0xff] }
 0x535   :  { %v3007_v13 = vpop.f32.mrb[74].mxu0 }
 0x536   :  { %v3009_v14 = vpop.f32.mrb[75].mxu0  ;;  %3271 = vmatmul.mubr.f32.gmra.mrb[180].mxu0 %v749_v10  ;;  %v11045_v16 = vpack.i.bf16 %v3007_v13, %v3002_v7  ;;  %v777_v7 = vld [vmem:[#allocation2 + $0xc30] sm:$0xff]  ;;  %v903_v10 = vld [vmem:[#allocation2 + $0x1020] sm:$0xff] }
 0x537   :  { %3275 = vmatprep.mubr.f32.mxu0 %v754_v12  ;;  %2121 = vmatmul.mubr.f32.gmra.mrb[12].mxu1 %v903_v10  ;;  %v781_v14 = vld [vmem:[#allocation2 + $0xc50] sm:$0xff] }
 0x538   :  { %11046 = vrot.lane.b32.xlu1 %v11045_v16, %s12221_s3  ;;  %v908_v16 = vld [vmem:[#allocation2 + $0x1048] sm:$0xff] }
 0x539   :  { %v3012_v22 = vpop.f32.mrb[76].mxu0  ;;  %2125 = vmatprep.mubr.f32.mxu1 %v908_v16  ;;  %v814_v16 = vld [vmem:[#allocation2 + $0xd58] sm:$0xff] }
 0x53a   :  { %v3014_v24 = vpop.f32.mrb[77].mxu0  ;;  %3276 = vmatmul.mubr.f32.gmra.mrb[182].mxu0 %v753_v18  ;;  %v907_v18 = vld [vmem:[#allocation2 + $0x1040] sm:$0xff] }
 0x53b   :  { %3280 = vmatprep.mubr.f32.mxu0 %v758_v20  ;;  %2126 = vmatmul.mubr.f32.gmra.mrb[14].mxu1 %v907_v18  ;;  %v912_v24 = vld [vmem:[#allocation2 + $0x1068] sm:$0xff] }
 0x53c   :  { %2130 = vmatprep.mubr.f32.mxu1 %v912_v24  ;;  %v818_v24 = vld [vmem:[#allocation2 + $0xd78] sm:$0xff] }
 0x53d   :  { %v3017_v30 = vpop.f32.mrb[78].mxu0 }
 0x53e   :  { %v3019_v32 = vpop.f32.mrb[79].mxu0  ;;  %3281 = vmatmul.mubr.f32.gmra.mrb[184].mxu0 %v757_v25  ;;  %v11050_v33 = vpack.i.bf16 %v3017_v30, %v3012_v22  ;;  %v785_v25 = vld [vmem:[#allocation2 + $0xc70] sm:$0xff] }
 0x53f   :  { %3285 = vmatprep.mubr.f32.mxu0 %v762_v28  ;;  %v911_v28 = vld [vmem:[#allocation2 + $0x1060] sm:$0xff]  ;;  %v789_v32 = vld [vmem:[#allocation2 + $0xc90] sm:$0xff] }
 0x540   :  { %11051 = vrot.lane.b32.xlu0 %v11050_v33, %s12221_s3  ;;  %2131 = vmatmul.mubr.f32.gmra.mrb[16].mxu1 %v911_v28  ;;  %v916_v33 = vld [vmem:[#allocation2 + $0x1088] sm:$0xff] }
 0x541   :  { %v3022_v40 = vpop.f32.mrb[80].mxu0  ;;  %2135 = vmatprep.mubr.f32.mxu1 %v916_v33  ;;  %v822_v33 = vld [vmem:[#allocation2 + $0xd98] sm:$0xff] }
 0x542   :  { %v3024_v41 = vpop.f32.mrb[81].mxu0  ;;  %3286 = vmatmul.mubr.f32.gmra.mrb[186].mxu0 %v761_v36  ;;  %v915_v36 = vld [vmem:[#allocation2 + $0x1080] sm:$0xff] }
 0x543   :  { %3290 = vmatprep.mubr.f32.mxu0 %v766_v37  ;;  %v920_v41 = vld [vmem:[#allocation2 + $0x10a8] sm:$0xff] }
 0x544   :  { %2136 = vmatmul.mubr.f32.gmra.mrb[18].mxu1 %v915_v36 }
 0x545   :  { %v3027_v48 = vpop.f32.mrb[82].mxu0  ;;  %2140 = vmatprep.mubr.f32.mxu1 %v920_v41  ;;  %v826_v41 = vld [vmem:[#allocation2 + $0xdb8] sm:$0xff] }
 0x546   :  { %v3029_v49 = vpop.f32.mrb[83].mxu0  ;;  %3291 = vmatmul.mubr.f32.gmra.mrb[188].mxu0 %v765_v42  ;;  %v11055_v50 = vpack.i.bf16 %v3027_v48, %v3022_v40  ;;  %v793_v42 = vld [vmem:[#allocation2 + $0xcb0] sm:$0xff] }
 0x547   :  { %3295 = vmatprep.mubr.f32.mxu0 %v770_v45  ;;  %v919_v45 = vld [vmem:[#allocation2 + $0x10a0] sm:$0xff]  ;;  %v797_v49 = vld [vmem:[#allocation2 + $0xcd0] sm:$0xff] }
 0x548   :  { %11056 = vrot.lane.b32.xlu1 %v11055_v50, %s12221_s3  ;;  %2141 = vmatmul.mubr.f32.gmra.mrb[20].mxu1 %v919_v45  ;;  %v924_v50 = vld [vmem:[#allocation2 + $0x10c8] sm:$0xff] }
 0x549   :  { %v3032_v57 = vpop.f32.mrb[84].mxu0  ;;  %2145 = vmatprep.mubr.f32.mxu1 %v924_v50  ;;  %v830_v50 = vld [vmem:[#allocation2 + $0xdd8] sm:$0xff] }
 0x54a   :  { %v3034_v58 = vpop.f32.mrb[85].mxu0  ;;  %3296 = vmatmul.mubr.f32.gmra.mrb[190].mxu0 %v769_v53  ;;  %v923_v53 = vld [vmem:[#allocation2 + $0x10c0] sm:$0xff] }
 0x54b   :  { %3300 = vmatprep.mubr.f32.mxu0 %v774_v54  ;;  %v928_v58 = vld [vmem:[#allocation2 + $0x10e8] sm:$0xff] }
 0x54c   :  { %2146 = vmatmul.mubr.f32.gmra.mrb[22].mxu1 %v923_v53 }
 0x54d   :  { %v3037_v2 = vpop.f32.mrb[86].mxu0  ;;  %2150 = vmatprep.mubr.f32.mxu1 %v928_v58  ;;  %v834_v58 = vld [vmem:[#allocation2 + $0xdf8] sm:$0xff] }
 0x54e   :  { %v3039_v3 = vpop.f32.mrb[87].mxu0  ;;  %3301 = vmatmul.mubr.f32.gmra.mrb[192].mxu0 %v773_v60  ;;  %v11060_v5 = vpack.i.bf16 %v3037_v2, %v3032_v57  ;;  %v801_v60 = vld [vmem:[#allocation2 + $0xcf0] sm:$0xff] }
 0x54f   :  { %3305 = vmatprep.mubr.f32.mxu0 %v778_v62  ;;  %v927_v62 = vld [vmem:[#allocation2 + $0x10e0] sm:$0xff]  ;;  %v805_v3 = vld [vmem:[#allocation2 + $0xd10] sm:$0xff] }
 0x550   :  { %11061 = vrot.lane.b32.xlu0 %v11060_v5, %s12221_s3  ;;  %2151 = vmatmul.mubr.f32.gmra.mrb[24].mxu1 %v927_v62  ;;  %v932_v5 = vld [vmem:[#allocation2 + $0x1108] sm:$0xff] }
 0x551   :  { %v3042_v12 = vpop.f32.mrb[88].mxu0  ;;  %2155 = vmatprep.mubr.f32.mxu1 %v932_v5  ;;  %v838_v5 = vld [vmem:[#allocation2 + $0xe18] sm:$0xff] }
 0x552   :  { %v3044_v13 = vpop.f32.mrb[89].mxu0  ;;  %3306 = vmatmul.mubr.f32.gmra.mrb[194].mxu0 %v777_v7  ;;  %v931_v7 = vld [vmem:[#allocation2 + $0x1100] sm:$0xff] }
 0x553   :  { %3310 = vmatprep.mubr.f32.mxu0 %v782_v9  ;;  %v936_v13 = vld [vmem:[#allocation2 + $0x1128] sm:$0xff] }
 0x554   :  { %2156 = vmatmul.mubr.f32.gmra.mrb[26].mxu1 %v931_v7 }
 0x555   :  { %v3047_v20 = vpop.f32.mrb[90].mxu0  ;;  %2160 = vmatprep.mubr.f32.mxu1 %v936_v13  ;;  %v842_v13 = vld [vmem:[#allocation2 + $0xe38] sm:$0xff] }
 0x556   :  { %v3049_v21 = vpop.f32.mrb[91].mxu0  ;;  %3311 = vmatmul.mubr.f32.gmra.mrb[196].mxu0 %v781_v14  ;;  %v11065_v22 = vpack.i.bf16 %v3047_v20, %v3042_v12  ;;  %v809_v14 = vld [vmem:[#allocation2 + $0xd30] sm:$0xff] }
 0x557   :  { %3315 = vmatprep.mubr.f32.mxu0 %v786_v17  ;;  %v935_v17 = vld [vmem:[#allocation2 + $0x1120] sm:$0xff]  ;;  %v813_v21 = vld [vmem:[#allocation2 + $0xd50] sm:$0xff] }
 0x558   :  { %11066 = vrot.lane.b32.xlu1 %v11065_v22, %s12221_s3  ;;  %2161 = vmatmul.mubr.f32.gmra.mrb[28].mxu1 %v935_v17  ;;  %v940_v22 = vld [vmem:[#allocation2 + $0x1148] sm:$0xff] }
 0x559   :  { %v3052_v29 = vpop.f32.mrb[92].mxu0  ;;  %2165 = vmatprep.mubr.f32.mxu1 %v940_v22  ;;  %v846_v22 = vld [vmem:[#allocation2 + $0xe58] sm:$0xff] }
 0x55a   :  { %3316 = vmatmul.mubr.f32.gmra.mrb[198].mxu0 %v785_v25  ;;  %v3054_v30 = vpop.f32.mrb[93].mxu0  ;;  %v939_v25 = vld [vmem:[#allocation2 + $0x1140] sm:$0xff] }
 0x55b   :  { %3320 = vmatprep.mubr.f32.mxu0 %v790_v26  ;;  %v944_v30 = vld [vmem:[#allocation2 + $0x1168] sm:$0xff] }
 0x55c   :  { %2166 = vmatmul.mubr.f32.gmra.mrb[30].mxu1 %v939_v25 }
 0x55d   :  { %v3057_v37 = vpop.f32.mrb[94].mxu0  ;;  %2170 = vmatprep.mubr.f32.mxu1 %v944_v30  ;;  %v850_v30 = vld [vmem:[#allocation2 + $0xe78] sm:$0xff] }
 0x55e   :  { %v3059_v38 = vpop.f32.mrb[95].mxu0  ;;  %3321 = vmatmul.mubr.f32.gmra.mrb[200].mxu0 %v789_v32  ;;  %v11070_v40 = vpack.i.bf16 %v3057_v37, %v3052_v29  ;;  %v817_v32 = vld [vmem:[#allocation2 + $0xd70] sm:$0xff] }
 0x55f   :  { %3325 = vmatprep.mubr.f32.mxu0 %v794_v34  ;;  %v943_v34 = vld [vmem:[#allocation2 + $0x1160] sm:$0xff]  ;;  %v821_v38 = vld [vmem:[#allocation2 + $0xd90] sm:$0xff] }
 0x560   :  { %11071 = vrot.lane.b32.xlu0 %v11070_v40, %s12221_s3  ;;  %2171 = vmatmul.mubr.f32.gmra.mrb[32].mxu1 %v943_v34  ;;  %v948_v40 = vld [vmem:[#allocation2 + $0x1188] sm:$0xff]  ;;  %s12229_s3 = smov 40  }
 0x561   :  { %v3062_v46 = vpop.f32.mrb[96].mxu0  ;;  %2175 = vmatprep.mubr.f32.mxu1 %v948_v40  ;;  %v854_v40 = vld [vmem:[#allocation2 + $0xe98] sm:$0xff] }
 0x562   :  { %3326 = vmatmul.mubr.f32.gmra.mrb[202].mxu0 %v793_v42  ;;  %v3064_v48 = vpop.f32.mrb[97].mxu0  ;;  %v947_v42 = vld [vmem:[#allocation2 + $0x1180] sm:$0xff] }
 0x563   :  { %3330 = vmatprep.mubr.f32.mxu0 %v798_v44  ;;  %v952_v48 = vld [vmem:[#allocation2 + $0x11a8] sm:$0xff] }
 0x564   :  { %2176 = vmatmul.mubr.f32.gmra.mrb[34].mxu1 %v947_v42 }
 0x565   :  { %v3067_v54 = vpop.f32.mrb[98].mxu0  ;;  %2180 = vmatprep.mubr.f32.mxu1 %v952_v48  ;;  %v858_v48 = vld [vmem:[#allocation2 + $0xeb8] sm:$0xff] }
 0x566   :  { %v11075_v56 = vpack.i.bf16 %v3067_v54, %v3062_v46  ;;  %v3069_v57 = vpop.f32.mrb[99].mxu0  ;;  %3331 = vmatmul.mubr.f32.gmra.mrb[204].mxu0 %v797_v49  ;;  %v825_v49 = vld [vmem:[#allocation2 + $0xdb0] sm:$0xff] }
 0x567   :  { %3335 = vmatprep.mubr.f32.mxu0 %v802_v52  ;;  %v951_v52 = vld [vmem:[#allocation2 + $0x11a0] sm:$0xff]  ;;  %v956_v57 = vld [vmem:[#allocation2 + $0x11c8] sm:$0xff] }
 0x568   :  { %11076 = vrot.lane.b32.xlu1 %v11075_v56, %s12228_s23  ;;  %2181 = vmatmul.mubr.f32.gmra.mrb[36].mxu1 %v951_v52  ;;  %v829_v56 = vld [vmem:[#allocation2 + $0xdd0] sm:$0xff] }
 0x569   :  { %v3072_v1 = vpop.f32.mrb[100].mxu0  ;;  %2185 = vmatprep.mubr.f32.mxu1 %v956_v57  ;;  %v862_v57 = vld [vmem:[#allocation2 + $0xed8] sm:$0xff] }
 0x56a   :  { %3336 = vmatmul.mubr.f32.gmra.mrb[206].mxu0 %v801_v60  ;;  %v3074_v2 = vpop.f32.mrb[101].mxu0  ;;  %v955_v60 = vld [vmem:[#allocation2 + $0x11c0] sm:$0xff] }
 0x56b   :  { %3340 = vmatprep.mubr.f32.mxu0 %v806_v61  ;;  %v960_v2 = vld [vmem:[#allocation2 + $0x11e8] sm:$0xff] }
 0x56c   :  { %2186 = vmatmul.mubr.f32.gmra.mrb[38].mxu1 %v955_v60 }
 0x56d   :  { %v3077_v9 = vpop.f32.mrb[102].mxu0  ;;  %2190 = vmatprep.mubr.f32.mxu1 %v960_v2  ;;  %v866_v2 = vld [vmem:[#allocation2 + $0xef8] sm:$0xff] }
 0x56e   :  { %v11080_v10 = vpack.i.bf16 %v3077_v9, %v3072_v1  ;;  %v3079_v12 = vpop.f32.mrb[103].mxu0  ;;  %3341 = vmatmul.mubr.f32.gmra.mrb[208].mxu0 %v805_v3  ;;  %v833_v3 = vld [vmem:[#allocation2 + $0xdf0] sm:$0xff] }
 0x56f   :  { %3345 = vmatprep.mubr.f32.mxu0 %v810_v6  ;;  %v959_v6 = vld [vmem:[#allocation2 + $0x11e0] sm:$0xff]  ;;  %v964_v12 = vld [vmem:[#allocation2 + $0x1208] sm:$0xff] }
 0x570   :  { %11081 = vrot.lane.b32.xlu0 %v11080_v10, %s12228_s23  ;;  %2191 = vmatmul.mubr.f32.gmra.mrb[40].mxu1 %v959_v6  ;;  %v837_v10 = vld [vmem:[#allocation2 + $0xe10] sm:$0xff] }
 0x571   :  { %v3082_v18 = vpop.f32.mrb[104].mxu0  ;;  %2195 = vmatprep.mubr.f32.mxu1 %v964_v12  ;;  %v870_v12 = vld [vmem:[#allocation2 + $0xf18] sm:$0xff] }
 0x572   :  { %3346 = vmatmul.mubr.f32.gmra.mrb[210].mxu0 %v809_v14  ;;  %v3084_v20 = vpop.f32.mrb[105].mxu0  ;;  %v963_v14 = vld [vmem:[#allocation2 + $0x1200] sm:$0xff] }
 0x573   :  { %3350 = vmatprep.mubr.f32.mxu0 %v814_v16  ;;  %v968_v20 = vld [vmem:[#allocation2 + $0x1228] sm:$0xff] }
 0x574   :  { %2196 = vmatmul.mubr.f32.gmra.mrb[42].mxu1 %v963_v14 }
 0x575   :  { %v3087_v26 = vpop.f32.mrb[106].mxu0  ;;  %2200 = vmatprep.mubr.f32.mxu1 %v968_v20  ;;  %v874_v20 = vld [vmem:[#allocation2 + $0xf38] sm:$0xff] }
 0x576   :  { %v11085_v28 = vpack.i.bf16 %v3087_v26, %v3082_v18  ;;  %v3089_v29 = vpop.f32.mrb[107].mxu0  ;;  %3351 = vmatmul.mubr.f32.gmra.mrb[212].mxu0 %v813_v21  ;;  %v841_v21 = vld [vmem:[#allocation2 + $0xe30] sm:$0xff] }
 0x577   :  { %3355 = vmatprep.mubr.f32.mxu0 %v818_v24  ;;  %v967_v24 = vld [vmem:[#allocation2 + $0x1220] sm:$0xff]  ;;  %v972_v29 = vld [vmem:[#allocation2 + $0x1248] sm:$0xff] }
 0x578   :  { %11086 = vrot.lane.b32.xlu0 %v11085_v28, %s12228_s23  ;;  %2201 = vmatmul.mubr.f32.gmra.mrb[44].mxu1 %v967_v24  ;;  %v845_v28 = vld [vmem:[#allocation2 + $0xe50] sm:$0xff] }
 0x579   :  { %v3092_v36 = vpop.f32.mrb[108].mxu0  ;;  %2205 = vmatprep.mubr.f32.mxu1 %v972_v29  ;;  %v878_v29 = vld [vmem:[#allocation2 + $0xf58] sm:$0xff] }
 0x57a   :  { %3356 = vmatmul.mubr.f32.gmra.mrb[214].mxu0 %v817_v32  ;;  %v3094_v37 = vpop.f32.mrb[109].mxu0  ;;  %v971_v32 = vld [vmem:[#allocation2 + $0x1240] sm:$0xff] }
 0x57b   :  { %3360 = vmatprep.mubr.f32.mxu0 %v822_v33  ;;  %v976_v37 = vld [vmem:[#allocation2 + $0x1268] sm:$0xff] }
 0x57c   :  { %2206 = vmatmul.mubr.f32.gmra.mrb[46].mxu1 %v971_v32 }
 0x57d   :  { %v3097_v44 = vpop.f32.mrb[110].mxu0  ;;  %2210 = vmatprep.mubr.f32.mxu1 %v976_v37  ;;  %v882_v37 = vld [vmem:[#allocation2 + $0xf78] sm:$0xff] }
 0x57e   :  { %v11090_v45 = vpack.i.bf16 %v3097_v44, %v3092_v36  ;;  %v3099_v46 = vpop.f32.mrb[111].mxu0  ;;  %3361 = vmatmul.mubr.f32.gmra.mrb[216].mxu0 %v821_v38  ;;  %v849_v38 = vld [vmem:[#allocation2 + $0xe70] sm:$0xff] }
 0x57f   :  { %3365 = vmatprep.mubr.f32.mxu0 %v826_v41  ;;  %v975_v41 = vld [vmem:[#allocation2 + $0x1260] sm:$0xff]  ;;  %v980_v46 = vld [vmem:[#allocation2 + $0x1288] sm:$0xff] }
 0x580   :  { %11091 = vrot.lane.b32.xlu0 %v11090_v45, %s12228_s23  ;;  %2211 = vmatmul.mubr.f32.gmra.mrb[48].mxu1 %v975_v41  ;;  %v853_v45 = vld [vmem:[#allocation2 + $0xe90] sm:$0xff] }
 0x581   :  { %v3102_v53 = vpop.f32.mrb[112].mxu0  ;;  %2215 = vmatprep.mubr.f32.mxu1 %v980_v46  ;;  %v886_v46 = vld [vmem:[#allocation2 + $0xf98] sm:$0xff] }
 0x582   :  { %3366 = vmatmul.mubr.f32.gmra.mrb[218].mxu0 %v825_v49  ;;  %v3104_v54 = vpop.f32.mrb[113].mxu0  ;;  %v979_v49 = vld [vmem:[#allocation2 + $0x1280] sm:$0xff] }
 0x583   :  { %3370 = vmatprep.mubr.f32.mxu0 %v830_v50  ;;  %v984_v54 = vld [vmem:[#allocation2 + $0x12a8] sm:$0xff] }
 0x584   :  { %2216 = vmatmul.mubr.f32.gmra.mrb[50].mxu1 %v979_v49 }
 0x585   :  { %v3107_v61 = vpop.f32.mrb[114].mxu0  ;;  %2220 = vmatprep.mubr.f32.mxu1 %v984_v54  ;;  %v890_v54 = vld [vmem:[#allocation2 + $0xfb8] sm:$0xff] }
 0x586   :  { %v11095_v62 = vpack.i.bf16 %v3107_v61, %v3102_v53  ;;  %v3109_v1 = vpop.f32.mrb[115].mxu0  ;;  %3371 = vmatmul.mubr.f32.gmra.mrb[220].mxu0 %v829_v56  ;;  %v857_v56 = vld [vmem:[#allocation2 + $0xeb0] sm:$0xff] }
 0x587   :  { %3375 = vmatprep.mubr.f32.mxu0 %v834_v58  ;;  %v983_v58 = vld [vmem:[#allocation2 + $0x12a0] sm:$0xff]  ;;  %v988_v1 = vld [vmem:[#allocation2 + $0x12c8] sm:$0xff] }
 0x588   :  { %11096 = vrot.lane.b32.xlu1 %v11095_v62, %s12228_s23  ;;  %2221 = vmatmul.mubr.f32.gmra.mrb[52].mxu1 %v983_v58  ;;  %v861_v62 = vld [vmem:[#allocation2 + $0xed0] sm:$0xff] }
 0x589   :  { %v3112_v7 = vpop.f32.mrb[116].mxu0  ;;  %2225 = vmatprep.mubr.f32.mxu1 %v988_v1  ;;  %v894_v1 = vld [vmem:[#allocation2 + $0xfd8] sm:$0xff] }
 0x58a   :  { %3376 = vmatmul.mubr.f32.gmra.mrb[222].mxu0 %v833_v3  ;;  %v3114_v9 = vpop.f32.mrb[117].mxu0  ;;  %v987_v3 = vld [vmem:[#allocation2 + $0x12c0] sm:$0xff] }
 0x58b   :  { %3380 = vmatprep.mubr.f32.mxu0 %v838_v5  ;;  %v992_v9 = vld [vmem:[#allocation2 + $0x12e8] sm:$0xff] }
 0x58c   :  { %2226 = vmatmul.mubr.f32.gmra.mrb[54].mxu1 %v987_v3 }
 0x58d   :  { %v3117_v16 = vpop.f32.mrb[118].mxu0  ;;  %2230 = vmatprep.mubr.f32.mxu1 %v992_v9  ;;  %v898_v9 = vld [vmem:[#allocation2 + $0xff8] sm:$0xff] }
 0x58e   :  { %v11100_v17 = vpack.i.bf16 %v3117_v16, %v3112_v7  ;;  %v3119_v18 = vpop.f32.mrb[119].mxu0  ;;  %3381 = vmatmul.mubr.f32.gmra.mrb[224].mxu0 %v837_v10  ;;  %v865_v10 = vld [vmem:[#allocation2 + $0xef0] sm:$0xff] }
 0x58f   :  { %3385 = vmatprep.mubr.f32.mxu0 %v842_v13  ;;  %v991_v13 = vld [vmem:[#allocation2 + $0x12e0] sm:$0xff]  ;;  %v996_v18 = vld [vmem:[#allocation2 + $0x1308] sm:$0xff] }
 0x590   :  { %11101 = vrot.lane.b32.xlu0 %v11100_v17, %s12228_s23  ;;  %2231 = vmatmul.mubr.f32.gmra.mrb[56].mxu1 %v991_v13  ;;  %v869_v17 = vld [vmem:[#allocation2 + $0xf10] sm:$0xff] }
 0x591   :  { %v3122_v25 = vpop.f32.mrb[120].mxu0  ;;  %2235 = vmatprep.mubr.f32.mxu1 %v996_v18  ;;  %v902_v18 = vld [vmem:[#allocation2 + $0x1018] sm:$0xff] }
 0x592   :  { %3386 = vmatmul.mubr.f32.gmra.mrb[226].mxu0 %v841_v21  ;;  %v3124_v26 = vpop.f32.mrb[121].mxu0  ;;  %v995_v21 = vld [vmem:[#allocation2 + $0x1300] sm:$0xff] }
 0x593   :  { %3390 = vmatprep.mubr.f32.mxu0 %v846_v22  ;;  %v1000_v26 = vld [vmem:[#allocation2 + $0x1328] sm:$0xff] }
 0x594   :  { %2236 = vmatmul.mubr.f32.gmra.mrb[58].mxu1 %v995_v21 }
 0x595   :  { %v3127_v33 = vpop.f32.mrb[122].mxu0  ;;  %2240 = vmatprep.mubr.f32.mxu1 %v1000_v26  ;;  %v906_v26 = vld [vmem:[#allocation2 + $0x1038] sm:$0xff] }
 0x596   :  { %v11105_v34 = vpack.i.bf16 %v3127_v33, %v3122_v25  ;;  %v3129_v36 = vpop.f32.mrb[123].mxu0  ;;  %3391 = vmatmul.mubr.f32.gmra.mrb[228].mxu0 %v845_v28  ;;  %v873_v28 = vld [vmem:[#allocation2 + $0xf30] sm:$0xff] }
 0x597   :  { %3395 = vmatprep.mubr.f32.mxu0 %v850_v30  ;;  %v999_v30 = vld [vmem:[#allocation2 + $0x1320] sm:$0xff]  ;;  %v1004_v36 = vld [vmem:[#allocation2 + $0x1348] sm:$0xff] }
 0x598   :  { %11106 = vrot.lane.b32.xlu1 %v11105_v34, %s12228_s23  ;;  %2241 = vmatmul.mubr.f32.gmra.mrb[60].mxu1 %v999_v30  ;;  %v877_v34 = vld [vmem:[#allocation2 + $0xf50] sm:$0xff] }
 0x599   :  { %v3132_v42 = vpop.f32.mrb[124].mxu0  ;;  %2245 = vmatprep.mubr.f32.mxu1 %v1004_v36  ;;  %v910_v36 = vld [vmem:[#allocation2 + $0x1058] sm:$0xff] }
 0x59a   :  { %3396 = vmatmul.mubr.f32.gmra.mrb[230].mxu0 %v849_v38  ;;  %v3134_v44 = vpop.f32.mrb[125].mxu0  ;;  %v1003_v38 = vld [vmem:[#allocation2 + $0x1340] sm:$0xff] }
 0x59b   :  { %3400 = vmatprep.mubr.f32.mxu0 %v854_v40  ;;  %v1008_v44 = vld [vmem:[#allocation2 + $0x1368] sm:$0xff] }
 0x59c   :  { %2246 = vmatmul.mubr.f32.gmra.mrb[62].mxu1 %v1003_v38 }
 0x59d   :  { %v3137_v50 = vpop.f32.mrb[126].mxu0  ;;  %2250 = vmatprep.mubr.f32.mxu1 %v1008_v44  ;;  %v914_v44 = vld [vmem:[#allocation2 + $0x1078] sm:$0xff] }
 0x59e   :  { %v11110_v52 = vpack.i.bf16 %v3137_v50, %v3132_v42  ;;  %v3139_v53 = vpop.f32.mrb[127].mxu0  ;;  %3401 = vmatmul.mubr.f32.gmra.mrb[232].mxu0 %v853_v45  ;;  %v881_v45 = vld [vmem:[#allocation2 + $0xf70] sm:$0xff] }
 0x59f   :  { %3405 = vmatprep.mubr.f32.mxu0 %v858_v48  ;;  %v1007_v48 = vld [vmem:[#allocation2 + $0x1360] sm:$0xff]  ;;  %v1012_v53 = vld [vmem:[#allocation2 + $0x1388] sm:$0xff] }
 0x5a0   :  { %11111 = vrot.lane.b32.xlu0 %v11110_v52, %s12228_s23  ;;  %2251 = vmatmul.mubr.f32.gmra.mrb[64].mxu1 %v1007_v48  ;;  %v885_v52 = vld [vmem:[#allocation2 + $0xf90] sm:$0xff] }
 0x5a1   :  { %v3142_v60 = vpop.f32.mrb[128].mxu0  ;;  %2255 = vmatprep.mubr.f32.mxu1 %v1012_v53  ;;  %v918_v53 = vld [vmem:[#allocation2 + $0x1098] sm:$0xff] }
 0x5a2   :  { %3406 = vmatmul.mubr.f32.gmra.mrb[234].mxu0 %v857_v56  ;;  %v3144_v61 = vpop.f32.mrb[129].mxu0  ;;  %v1011_v56 = vld [vmem:[#allocation2 + $0x1380] sm:$0xff] }
 0x5a3   :  { %3410 = vmatprep.mubr.f32.mxu0 %v862_v57  ;;  %v1016_v61 = vld [vmem:[#allocation2 + $0x13a8] sm:$0xff] }
 0x5a4   :  { %2256 = vmatmul.mubr.f32.gmra.mrb[66].mxu1 %v1011_v56 }
 0x5a5   :  { %v3147_v5 = vpop.f32.mrb[130].mxu0  ;;  %2260 = vmatprep.mubr.f32.mxu1 %v1016_v61  ;;  %v922_v61 = vld [vmem:[#allocation2 + $0x10b8] sm:$0xff] }
 0x5a6   :  { %v3149_v6 = vpop.f32.mrb[131].mxu0  ;;  %3411 = vmatmul.mubr.f32.gmra.mrb[236].mxu0 %v861_v62  ;;  %v11115_v7 = vpack.i.bf16 %v3147_v5, %v3142_v60  ;;  %v889_v62 = vld [vmem:[#allocation2 + $0xfb0] sm:$0xff] }
 0x5a7   :  { %3415 = vmatprep.mubr.f32.mxu0 %v866_v2  ;;  %v1015_v2 = vld [vmem:[#allocation2 + $0x13a0] sm:$0xff]  ;;  %v893_v6 = vld [vmem:[#allocation2 + $0xfd0] sm:$0xff] }
 0x5a8   :  { %11116 = vrot.lane.b32.xlu1 %v11115_v7, %s12214_s4  ;;  %2261 = vmatmul.mubr.f32.gmra.mrb[68].mxu1 %v1015_v2  ;;  %v1020_v7 = vld [vmem:[#allocation2 + $0x13c8] sm:$0xff] }
 0x5a9   :  { %v3152_v14 = vpop.f32.mrb[132].mxu0  ;;  %2265 = vmatprep.mubr.f32.mxu1 %v1020_v7  ;;  %v926_v7 = vld [vmem:[#allocation2 + $0x10d8] sm:$0xff] }
 0x5aa   :  { %3416 = vmatmul.mubr.f32.gmra.mrb[238].mxu0 %v865_v10  ;;  %v3154_v16 = vpop.f32.mrb[133].mxu0  ;;  %v1019_v10 = vld [vmem:[#allocation2 + $0x13c0] sm:$0xff] }
 0x5ab   :  { %3420 = vmatprep.mubr.f32.mxu0 %v870_v12  ;;  %v1024_v16 = vld [vmem:[#allocation2 + $0x13e8] sm:$0xff] }
 0x5ac   :  { %2266 = vmatmul.mubr.f32.gmra.mrb[70].mxu1 %v1019_v10 }
 0x5ad   :  { %v3157_v22 = vpop.f32.mrb[134].mxu0  ;;  %2270 = vmatprep.mubr.f32.mxu1 %v1024_v16  ;;  %v930_v16 = vld [vmem:[#allocation2 + $0x10f8] sm:$0xff] }
 0x5ae   :  { %v3159_v24 = vpop.f32.mrb[135].mxu0  ;;  %3421 = vmatmul.mubr.f32.gmra.mrb[240].mxu0 %v869_v17  ;;  %v11120_v25 = vpack.i.bf16 %v3157_v22, %v3152_v14  ;;  %v897_v17 = vld [vmem:[#allocation2 + $0xff0] sm:$0xff] }
 0x5af   :  { %3425 = vmatprep.mubr.f32.mxu0 %v874_v20  ;;  %v1023_v20 = vld [vmem:[#allocation2 + $0x13e0] sm:$0xff]  ;;  %v901_v24 = vld [vmem:[#allocation2 + $0x1010] sm:$0xff] }
 0x5b0   :  { %11121 = vrot.lane.b32.xlu0 %v11120_v25, %s12214_s4  ;;  %2271 = vmatmul.mubr.f32.gmra.mrb[72].mxu1 %v1023_v20  ;;  %v1028_v25 = vld [vmem:[#allocation2 + $0x1408] sm:$0xff] }
 0x5b1   :  { %v3162_v32 = vpop.f32.mrb[136].mxu0  ;;  %2275 = vmatprep.mubr.f32.mxu1 %v1028_v25  ;;  %v934_v25 = vld [vmem:[#allocation2 + $0x1118] sm:$0xff] }
 0x5b2   :  { %3426 = vmatmul.mubr.f32.gmra.mrb[242].mxu0 %v873_v28  ;;  %v3164_v33 = vpop.f32.mrb[137].mxu0  ;;  %v1027_v28 = vld [vmem:[#allocation2 + $0x1400] sm:$0xff] }
 0x5b3   :  { %3430 = vmatprep.mubr.f32.mxu0 %v878_v29  ;;  %v1032_v33 = vld [vmem:[#allocation2 + $0x1428] sm:$0xff] }
 0x5b4   :  { %2276 = vmatmul.mubr.f32.gmra.mrb[74].mxu1 %v1027_v28 }
 0x5b5   :  { %v3167_v40 = vpop.f32.mrb[138].mxu0  ;;  %2280 = vmatprep.mubr.f32.mxu1 %v1032_v33  ;;  %v938_v33 = vld [vmem:[#allocation2 + $0x1138] sm:$0xff] }
 0x5b6   :  { %v3169_v41 = vpop.f32.mrb[139].mxu0  ;;  %3431 = vmatmul.mubr.f32.gmra.mrb[244].mxu0 %v877_v34  ;;  %v11125_v42 = vpack.i.bf16 %v3167_v40, %v3162_v32  ;;  %v905_v34 = vld [vmem:[#allocation2 + $0x1030] sm:$0xff] }
 0x5b7   :  { %3435 = vmatprep.mubr.f32.mxu0 %v882_v37  ;;  %v1031_v37 = vld [vmem:[#allocation2 + $0x1420] sm:$0xff]  ;;  %v909_v41 = vld [vmem:[#allocation2 + $0x1050] sm:$0xff] }
 0x5b8   :  { %11126 = vrot.lane.b32.xlu1 %v11125_v42, %s12214_s4  ;;  %2281 = vmatmul.mubr.f32.gmra.mrb[76].mxu1 %v1031_v37  ;;  %v1036_v42 = vld [vmem:[#allocation2 + $0x1448] sm:$0xff] }
 0x5b9   :  { %v3172_v49 = vpop.f32.mrb[140].mxu0  ;;  %2285 = vmatprep.mubr.f32.mxu1 %v1036_v42  ;;  %v942_v42 = vld [vmem:[#allocation2 + $0x1158] sm:$0xff] }
 0x5ba   :  { %3436 = vmatmul.mubr.f32.gmra.mrb[246].mxu0 %v881_v45  ;;  %v3174_v50 = vpop.f32.mrb[141].mxu0  ;;  %v1035_v45 = vld [vmem:[#allocation2 + $0x1440] sm:$0xff] }
 0x5bb   :  { %3440 = vmatprep.mubr.f32.mxu0 %v886_v46  ;;  %v1040_v50 = vld [vmem:[#allocation2 + $0x1468] sm:$0xff] }
 0x5bc   :  { %2286 = vmatmul.mubr.f32.gmra.mrb[78].mxu1 %v1035_v45 }
 0x5bd   :  { %v3177_v57 = vpop.f32.mrb[142].mxu0  ;;  %2290 = vmatprep.mubr.f32.mxu1 %v1040_v50  ;;  %v946_v50 = vld [vmem:[#allocation2 + $0x1178] sm:$0xff] }
 0x5be   :  { %v3179_v58 = vpop.f32.mrb[143].mxu0  ;;  %3441 = vmatmul.mubr.f32.gmra.mrb[248].mxu0 %v885_v52  ;;  %v11130_v60 = vpack.i.bf16 %v3177_v57, %v3172_v49  ;;  %v913_v52 = vld [vmem:[#allocation2 + $0x1070] sm:$0xff] }
 0x5bf   :  { %3445 = vmatprep.mubr.f32.mxu0 %v890_v54  ;;  %v1039_v54 = vld [vmem:[#allocation2 + $0x1460] sm:$0xff]  ;;  %v917_v58 = vld [vmem:[#allocation2 + $0x1090] sm:$0xff] }
 0x5c0   :  { %11131 = vrot.lane.b32.xlu0 %v11130_v60, %s12214_s4  ;;  %2291 = vmatmul.mubr.f32.gmra.mrb[80].mxu1 %v1039_v54  ;;  %v1044_v60 = vld [vmem:[#allocation2 + $0x1488] sm:$0xff] }
 0x5c1   :  { %v3182_v3 = vpop.f32.mrb[144].mxu0  ;;  %2295 = vmatprep.mubr.f32.mxu1 %v1044_v60  ;;  %v950_v60 = vld [vmem:[#allocation2 + $0x1198] sm:$0xff] }
 0x5c2   :  { %3446 = vmatmul.mubr.f32.gmra.mrb[250].mxu0 %v889_v62  ;;  %v3184_v5 = vpop.f32.mrb[145].mxu0  ;;  %v1043_v62 = vld [vmem:[#allocation2 + $0x1480] sm:$0xff] }
 0x5c3   :  { %3450 = vmatprep.mubr.f32.mxu0 %v894_v1  ;;  %v1048_v5 = vld [vmem:[#allocation2 + $0x14a8] sm:$0xff] }
 0x5c4   :  { %2296 = vmatmul.mubr.f32.gmra.mrb[82].mxu1 %v1043_v62 }
 0x5c5   :  { %v3187_v12 = vpop.f32.mrb[146].mxu0  ;;  %2300 = vmatprep.mubr.f32.mxu1 %v1048_v5  ;;  %v954_v5 = vld [vmem:[#allocation2 + $0x11b8] sm:$0xff] }
 0x5c6   :  { %v3189_v13 = vpop.f32.mrb[147].mxu0  ;;  %3451 = vmatmul.mubr.f32.gmra.mrb[252].mxu0 %v893_v6  ;;  %v11135_v14 = vpack.i.bf16 %v3187_v12, %v3182_v3  ;;  %v921_v6 = vld [vmem:[#allocation2 + $0x10b0] sm:$0xff] }
 0x5c7   :  { %3455 = vmatprep.mubr.f32.mxu0 %v898_v9  ;;  %v1047_v9 = vld [vmem:[#allocation2 + $0x14a0] sm:$0xff]  ;;  %v925_v13 = vld [vmem:[#allocation2 + $0x10d0] sm:$0xff] }
 0x5c8   :  { %11136 = vrot.lane.b32.xlu1 %v11135_v14, %s12214_s4  ;;  %2301 = vmatmul.mubr.f32.gmra.mrb[84].mxu1 %v1047_v9  ;;  %v1052_v14 = vld [vmem:[#allocation2 + $0x14c8] sm:$0xff] }
 0x5c9   :  { %v3192_v21 = vpop.f32.mrb[148].mxu0  ;;  %2305 = vmatprep.mubr.f32.mxu1 %v1052_v14  ;;  %v958_v14 = vld [vmem:[#allocation2 + $0x11d8] sm:$0xff] }
 0x5ca   :  { %3456 = vmatmul.mubr.f32.gmra.mrb[254].mxu0 %v897_v17  ;;  %v3194_v22 = vpop.f32.mrb[149].mxu0  ;;  %v1051_v17 = vld [vmem:[#allocation2 + $0x14c0] sm:$0xff] }
 0x5cb   :  { %3460 = vmatprep.mubr.f32.mxu0 %v902_v18  ;;  %v1056_v22 = vld [vmem:[#allocation2 + $0x14e8] sm:$0xff] }
 0x5cc   :  { %2306 = vmatmul.mubr.f32.gmra.mrb[86].mxu1 %v1051_v17 }
 0x5cd   :  { %v3197_v29 = vpop.f32.mrb[150].mxu0  ;;  %2310 = vmatprep.mubr.f32.mxu1 %v1056_v22  ;;  %v962_v22 = vld [vmem:[#allocation2 + $0x11f8] sm:$0xff] }
 0x5ce   :  { %v3199_v30 = vpop.f32.mrb[151].mxu0  ;;  %3461 = vmatmul.mubr.f32.gmra.mrb[0].mxu0 %v901_v24  ;;  %v11140_v32 = vpack.i.bf16 %v3197_v29, %v3192_v21  ;;  %v929_v24 = vld [vmem:[#allocation2 + $0x10f0] sm:$0xff] }
 0x5cf   :  { %3465 = vmatprep.mubr.f32.mxu0 %v906_v26  ;;  %v1055_v26 = vld [vmem:[#allocation2 + $0x14e0] sm:$0xff]  ;;  %v933_v30 = vld [vmem:[#allocation2 + $0x1110] sm:$0xff] }
 0x5d0   :  { %11141 = vrot.lane.b32.xlu0 %v11140_v32, %s12214_s4  ;;  %2311 = vmatmul.mubr.f32.gmra.mrb[88].mxu1 %v1055_v26  ;;  %v1060_v32 = vld [vmem:[#allocation2 + $0x1508] sm:$0xff] }
 0x5d1   :  { %v3202_v38 = vpop.f32.mrb[152].mxu0  ;;  %2315 = vmatprep.mubr.f32.mxu1 %v1060_v32  ;;  %v966_v32 = vld [vmem:[#allocation2 + $0x1218] sm:$0xff] }
 0x5d2   :  { %3466 = vmatmul.mubr.f32.gmra.mrb[2].mxu0 %v905_v34  ;;  %v3204_v40 = vpop.f32.mrb[153].mxu0  ;;  %v1059_v34 = vld [vmem:[#allocation2 + $0x1500] sm:$0xff] }
 0x5d3   :  { %3470 = vmatprep.mubr.f32.mxu0 %v910_v36  ;;  %v1064_v40 = vld [vmem:[#allocation2 + $0x1528] sm:$0xff] }
 0x5d4   :  { %2316 = vmatmul.mubr.f32.gmra.mrb[90].mxu1 %v1059_v34 }
 0x5d5   :  { %v3207_v46 = vpop.f32.mrb[154].mxu0  ;;  %2320 = vmatprep.mubr.f32.mxu1 %v1064_v40  ;;  %v970_v40 = vld [vmem:[#allocation2 + $0x1238] sm:$0xff] }
 0x5d6   :  { %v3209_v48 = vpop.f32.mrb[155].mxu0  ;;  %3471 = vmatmul.mubr.f32.gmra.mrb[4].mxu0 %v909_v41  ;;  %v11145_v49 = vpack.i.bf16 %v3207_v46, %v3202_v38  ;;  %v937_v41 = vld [vmem:[#allocation2 + $0x1130] sm:$0xff] }
 0x5d7   :  { %3475 = vmatprep.mubr.f32.mxu0 %v914_v44  ;;  %v1063_v44 = vld [vmem:[#allocation2 + $0x1520] sm:$0xff]  ;;  %v941_v48 = vld [vmem:[#allocation2 + $0x1150] sm:$0xff] }
 0x5d8   :  { %11146 = vrot.lane.b32.xlu1 %v11145_v49, %s12214_s4  ;;  %2321 = vmatmul.mubr.f32.gmra.mrb[92].mxu1 %v1063_v44  ;;  %v1068_v49 = vld [vmem:[#allocation2 + $0x1548] sm:$0xff] }
 0x5d9   :  { %v3212_v56 = vpop.f32.mrb[156].mxu0  ;;  %2325 = vmatprep.mubr.f32.mxu1 %v1068_v49  ;;  %v1096_v49 = vld [vmem:[#allocation2 + $0x1628] sm:$0xff] }
 0x5da   :  { %3476 = vmatmul.mubr.f32.gmra.mrb[6].mxu0 %v913_v52  ;;  %v3214_v57 = vpop.f32.mrb[157].mxu0  ;;  %v1067_v52 = vld [vmem:[#allocation2 + $0x1540] sm:$0xff] }
 0x5db   :  { %3480 = vmatprep.mubr.f32.mxu0 %v918_v53  ;;  %v1072_v57 = vld [vmem:[#allocation2 + $0x1568] sm:$0xff] }
 0x5dc   :  { %2326 = vmatmul.mubr.f32.gmra.mrb[94].mxu1 %v1067_v52  ;;  %v969_v52 = vld [vmem:[#allocation2 + $0x1230] sm:$0xff] }
 0x5dd   :  { %v3217_v1 = vpop.f32.mrb[158].mxu0  ;;  %2330 = vmatprep.mubr.f32.mxu1 %v1072_v57 }
 0x5de   :  { %v3219_v2 = vpop.f32.mrb[159].mxu0  ;;  %3481 = vmatmul.mubr.f32.gmra.mrb[8].mxu0 %v917_v58  ;;  %v11150_v3 = vpack.i.bf16 %v3217_v1, %v3212_v56  ;;  %v945_v58 = vld [vmem:[#allocation2 + $0x1170] sm:$0xff] }
 0x5df   :  { %3485 = vmatprep.mubr.f32.mxu0 %v922_v61  ;;  %v1071_v61 = vld [vmem:[#allocation2 + $0x1560] sm:$0xff]  ;;  %v949_v2 = vld [vmem:[#allocation2 + $0x1190] sm:$0xff] }
 0x5e0   :  { %11151 = vrot.lane.b32.xlu0 %v11150_v3, %s12214_s4  ;;  %2331 = vmatmul.mubr.f32.gmra.mrb[96].mxu1 %v1071_v61  ;;  %v1076_v3 = vld [vmem:[#allocation2 + $0x1588] sm:$0xff] }
 0x5e1   :  { %v3222_v10 = vpop.f32.mrb[160].mxu0  ;;  %2335 = vmatprep.mubr.f32.mxu1 %v1076_v3  ;;  %v1100_v61 = vld [vmem:[#allocation2 + $0x1648] sm:$0xff] }
 0x5e2   :  { %3486 = vmatmul.mubr.f32.gmra.mrb[10].mxu0 %v921_v6  ;;  %v3224_v12 = vpop.f32.mrb[161].mxu0  ;;  %v1075_v6 = vld [vmem:[#allocation2 + $0x1580] sm:$0xff] }
 0x5e3   :  { %3490 = vmatprep.mubr.f32.mxu0 %v926_v7  ;;  %v1080_v12 = vld [vmem:[#allocation2 + $0x15a8] sm:$0xff] }
 0x5e4   :  { %2336 = vmatmul.mubr.f32.gmra.mrb[98].mxu1 %v1075_v6 }
 0x5e5   :  { %v3227_v18 = vpop.f32.mrb[162].mxu0  ;;  %2340 = vmatprep.mubr.f32.mxu1 %v1080_v12  ;;  %v977_v12 = vld [vmem:[#allocation2 + $0x1270] sm:$0xff] }
 0x5e6   :  { %v11155_v20 = vpack.i.bf16 %v3227_v18, %v3222_v10  ;;  %v3229_v21 = vpop.f32.mrb[163].mxu0  ;;  %3491 = vmatmul.mubr.f32.gmra.mrb[12].mxu0 %v925_v13  ;;  %v953_v13 = vld [vmem:[#allocation2 + $0x11b0] sm:$0xff] }
 0x5e7   :  { %3495 = vmatprep.mubr.f32.mxu0 %v930_v16  ;;  %v1079_v16 = vld [vmem:[#allocation2 + $0x15a0] sm:$0xff]  ;;  %v1084_v21 = vld [vmem:[#allocation2 + $0x15c8] sm:$0xff] }
 0x5e8   :  { %11156 = vrot.lane.b32.xlu1 %v11155_v20, %s12229_s3  ;;  %2341 = vmatmul.mubr.f32.gmra.mrb[100].mxu1 %v1079_v16  ;;  %v957_v20 = vld [vmem:[#allocation2 + $0x11d0] sm:$0xff] }
 0x5e9   :  { %v3232_v28 = vpop.f32.mrb[164].mxu0  ;;  %2345 = vmatprep.mubr.f32.mxu1 %v1084_v21  ;;  %v1108_v21 = vld [vmem:[#allocation2 + $0x1688] sm:$0xff] }
 0x5ea   :  { %3496 = vmatmul.mubr.f32.gmra.mrb[14].mxu0 %v929_v24  ;;  %v3234_v29 = vpop.f32.mrb[165].mxu0  ;;  %v1083_v24 = vld [vmem:[#allocation2 + $0x15c0] sm:$0xff] }
 0x5eb   :  { %3500 = vmatprep.mubr.f32.mxu0 %v934_v25  ;;  %v1088_v29 = vld [vmem:[#allocation2 + $0x15e8] sm:$0xff] }
 0x5ec   :  { %2346 = vmatmul.mubr.f32.gmra.mrb[102].mxu1 %v1083_v24 }
 0x5ed   :  { %v3237_v36 = vpop.f32.mrb[166].mxu0  ;;  %2350 = vmatprep.mubr.f32.mxu1 %v1088_v29 }
 0x5ee   :  { %v11160_v37 = vpack.i.bf16 %v3237_v36, %v3232_v28  ;;  %v3239_v38 = vpop.f32.mrb[167].mxu0  ;;  %3501 = vmatmul.mubr.f32.gmra.mrb[16].mxu0 %v933_v30  ;;  %v961_v30 = vld [vmem:[#allocation2 + $0x11f0] sm:$0xff] }
 0x5ef   :  { %3505 = vmatprep.mubr.f32.mxu0 %v938_v33  ;;  %v1087_v33 = vld [vmem:[#allocation2 + $0x15e0] sm:$0xff]  ;;  %v1092_v38 = vld [vmem:[#allocation2 + $0x1608] sm:$0xff] }
 0x5f0   :  { %11161 = vrot.lane.b32.xlu1 %v11160_v37, %s12229_s3  ;;  %2351 = vmatmul.mubr.f32.gmra.mrb[104].mxu1 %v1087_v33  ;;  %v965_v37 = vld [vmem:[#allocation2 + $0x1210] sm:$0xff]  ;;  %v1111_v33 = vld [vmem:[#allocation2 + $0x16a0] sm:$0xff] }
 0x5f1   :  { %v3242_v45 = vpop.f32.mrb[168].mxu0  ;;  %2355 = vmatprep.mubr.f32.mxu1 %v1092_v38 }
 0x5f2   :  { %3506 = vmatmul.mubr.f32.gmra.mrb[18].mxu0 %v937_v41  ;;  %v3244_v46 = vpop.f32.mrb[169].mxu0  ;;  %v12940_v41 = vpop.f32.mrb[0].mxu1 }
 0x5f3   :  { %3510 = vmatprep.mubr.f32.mxu0 %v942_v42  ;;  %v1091_v42 = vld [vmem:[#allocation2 + $0x1600] sm:$0xff] }
 0x5f4   :  { %2356 = vmatmul.mubr.f32.gmra.mrb[106].mxu1 %v1091_v42 }
 0x5f5   :  { %v3247_v53 = vpop.f32.mrb[170].mxu0  ;;  %2360 = vmatprep.mubr.f32.mxu1 %v1096_v49  ;;  %v1115_v49 = vld [vmem:[#allocation2 + $0x16c0] sm:$0xff] }
 0x5f6   :  { %v11165_v54 = vpack.i.bf16 %v3247_v53, %v3242_v45  ;;  %v3249_v56 = vpop.f32.mrb[171].mxu0  ;;  %3511 = vmatmul.mubr.f32.gmra.mrb[20].mxu0 %v941_v48  ;;  %v2094_v45 = vpop.f32.mrb[1].mxu1  ;;  %v974_v53 = vld [vmem:[#allocation2 + $0x1258] sm:$0xff] }
 0x5f7   :  { %3515 = vmatprep.mubr.f32.mxu0 %v946_v50  ;;  %v1095_v50 = vld [vmem:[#allocation2 + $0x1620] sm:$0xff]  ;;  %v1116_v45 = vld [vmem:[#allocation2 + $0x16c8] sm:$0xff] }
 0x5f8   :  { %11166 = vrot.lane.b32.xlu1 %v11165_v54, %s12229_s3  ;;  %v12943_v54 = vpop.f32.mrb[2].mxu1  ;;  %2361 = vmatmul.mubr.f32.gmra.mrb[108].mxu1 %v1095_v50 }
 0x5f9   :  { %v3252_v62 = vpop.f32.mrb[172].mxu0  ;;  %v2099_v57 = vpop.f32.mrb[3].mxu1  ;;  %2365 = vmatprep.mubr.f32.mxu1 %v1100_v61 }
 0x5fa   :  { %3516 = vmatmul.mubr.f32.gmra.mrb[22].mxu0 %v945_v58  ;;  %v3254_v1 = vpop.f32.mrb[173].mxu0  ;;  %v993_v57 = vld [vmem:[#allocation2 + $0x12f0] sm:$0xff] }
 0x5fb   :  { %3520 = vmatprep.mubr.f32.mxu0 %v950_v60  ;;  %v973_v60 = vld [vmem:[#allocation2 + $0x1250] sm:$0xff]  ;;  %v12945_v1 = vpop.f32.mrb[4].mxu1 }
 0x5fd   :  { %v3257_v7 = vpop.f32.mrb[174].mxu0 }
 0x5fe   :  { %v11170_v9 = vpack.i.bf16 %v3257_v7, %v3252_v62  ;;  %v3259_v10 = vpop.f32.mrb[175].mxu0  ;;  %3521 = vmatmul.mubr.f32.gmra.mrb[24].mxu0 %v949_v2  ;;  %v978_v62 = vld [vmem:[#allocation2 + $0x1278] sm:$0xff]  ;;  %v1099_v2 = vld [vmem:[#allocation2 + $0x1640] sm:$0xff] }
 0x5ff   :  { %3525 = vmatprep.mubr.f32.mxu0 %v954_v5  ;;  %v2104_v5 = vpop.f32.mrb[5].mxu1  ;;  %2366 = vmatmul.mubr.f32.gmra.mrb[110].mxu1 %v1099_v2  ;;  %v1103_v10 = vld [vmem:[#allocation2 + $0x1660] sm:$0xff] }
 0x600   :  { %11171 = vrot.lane.b32.xlu0 %v11170_v9, %s12229_s3  ;;  %v1104_v9 = vld [vmem:[#allocation2 + $0x1668] sm:$0xff] }
 0x601   :  { %v3262_v17 = vpop.f32.mrb[176].mxu0  ;;  %2370 = vmatprep.mubr.f32.mxu1 %v1104_v9  ;;  %v1002_v9 = vld [vmem:[#allocation2 + $0x1338] sm:$0xff] }
 0x602   :  { %3526 = vmatmul.mubr.f32.gmra.mrb[26].mxu0 %v953_v13  ;;  %v3264_v18 = vpop.f32.mrb[177].mxu0  ;;  %v982_v13 = vld [vmem:[#allocation2 + $0x1298] sm:$0xff] }
 0x603   :  { %3530 = vmatprep.mubr.f32.mxu0 %v958_v14  ;;  %v12948_v14 = vpop.f32.mrb[6].mxu1  ;;  %2371 = vmatmul.mubr.f32.gmra.mrb[112].mxu1 %v1103_v10 }
 0x604   :  { %2375 = vmatprep.mubr.f32.mxu1 %v1108_v21  ;;  %v1128_v21 = vld [vmem:[#allocation2 + $0x1728] sm:$0xff] }
 0x605   :  { %v3267_v25 = vpop.f32.mrb[178].mxu0 }
 0x606   :  { %v11175_v26 = vpack.i.bf16 %v3267_v25, %v3262_v17  ;;  %v3269_v28 = vpop.f32.mrb[179].mxu0  ;;  %3531 = vmatmul.mubr.f32.gmra.mrb[28].mxu0 %v957_v20  ;;  %v2109_v17 = vpop.f32.mrb[7].mxu1  ;;  %v981_v20 = vld [vmem:[#allocation2 + $0x1290] sm:$0xff]  ;;  %v1107_v25 = vld [vmem:[#allocation2 + $0x1680] sm:$0xff] }
 0x607   :  { %3535 = vmatprep.mubr.f32.mxu0 %v962_v22  ;;  %v986_v22 = vld [vmem:[#allocation2 + $0x12b8] sm:$0xff]  ;;  %v12950_v24 = vpop.f32.mrb[8].mxu1  ;;  %2376 = vmatmul.mubr.f32.gmra.mrb[114].mxu1 %v1107_v25 }
 0x608   :  { %11176 = vrot.lane.b32.xlu1 %v11175_v26, %s12229_s3  ;;  %v2114_v28 = vpop.f32.mrb[9].mxu1 }
 0x609   :  { %v3272_v34 = vpop.f32.mrb[180].mxu0 }
 0x60a   :  { %3536 = vmatmul.mubr.f32.gmra.mrb[30].mxu0 %v961_v30  ;;  %v3274_v36 = vpop.f32.mrb[181].mxu0 }
 0x60b   :  { %3540 = vmatprep.mubr.f32.mxu0 %v966_v32  ;;  %v1112_v32 = vld [vmem:[#allocation2 + $0x16a8] sm:$0xff]  ;;  %v990_v36 = vld [vmem:[#allocation2 + $0x12d8] sm:$0xff] }
 0x60c   :  { %2380 = vmatprep.mubr.f32.mxu1 %v1112_v32  ;;  %v1005_v32 = vld [vmem:[#allocation2 + $0x1350] sm:$0xff] }
 0x60d   :  { %v3277_v44 = vpop.f32.mrb[182].mxu0  ;;  %2381 = vmatmul.mubr.f32.gmra.mrb[116].mxu1 %v1111_v33  ;;  %v1132_v33 = vld [vmem:[#allocation2 + $0x1748] sm:$0xff] }
 0x60e   :  { %v11180_v46 = vpack.i.bf16 %v3277_v44, %v3272_v34  ;;  %v3279_v48 = vpop.f32.mrb[183].mxu0  ;;  %3541 = vmatmul.mubr.f32.gmra.mrb[32].mxu0 %v965_v37  ;;  %v985_v34 = vld [vmem:[#allocation2 + $0x12b0] sm:$0xff]  ;;  %v12953_v37 = vpop.f32.mrb[10].mxu1  ;;  %2385 = vmatprep.mubr.f32.mxu1 %v1116_v45 }
 0x60f   :  { %3545 = vmatprep.mubr.f32.mxu0 %v970_v40  ;;  %v2119_v40 = vpop.f32.mrb[11].mxu1  ;;  %v989_v44 = vld [vmem:[#allocation2 + $0x12d0] sm:$0xff] }
 0x610   :  { %11181 = vrot.lane.b32.xlu0 %v11180_v46, %s12229_s3  ;;  %v994_v46 = vld [vmem:[#allocation2 + $0x12f8] sm:$0xff]  ;;  %v12955_v48 = vpop.f32.mrb[12].mxu1 }
 0x611   :  { %v3282_v56 = vpop.f32.mrb[184].mxu0  ;;  %2386 = vmatmul.mubr.f32.gmra.mrb[118].mxu1 %v1115_v49  ;;  %v1136_v49 = vld [vmem:[#allocation2 + $0x1768] sm:$0xff] }
 0x612   :  { %3546 = vmatmul.mubr.f32.gmra.mrb[34].mxu0 %v969_v52  ;;  %v3284_v58 = vpop.f32.mrb[185].mxu0  ;;  %v2124_v52 = vpop.f32.mrb[13].mxu1 }
 0x613   :  { %3550 = vmatprep.mubr.f32.mxu0 %v974_v53  ;;  %v1120_v58 = vld [vmem:[#allocation2 + $0x16e8] sm:$0xff]  ;;  %v12958_v61 = vpop.f32.mrb[14].mxu1 }
 0x614   :  { %2390 = vmatprep.mubr.f32.mxu1 %v1120_v58 }
 0x615   :  { %v3287_v3 = vpop.f32.mrb[186].mxu0 }
 0x616   :  { %v11185_v6 = vpack.i.bf16 %v3287_v3, %v3282_v56  ;;  %v3289_v7 = vpop.f32.mrb[187].mxu0  ;;  %3551 = vmatmul.mubr.f32.gmra.mrb[36].mxu0 %v973_v60  ;;  %v998_v60 = vld [vmem:[#allocation2 + $0x1318] sm:$0xff]  ;;  %v2129_v3 = vpop.f32.mrb[15].mxu1 }
 0x617   :  { %3555 = vmatprep.mubr.f32.mxu0 %v978_v62  ;;  %v1119_v62 = vld [vmem:[#allocation2 + $0x16e0] sm:$0xff]  ;;  %v1124_v7 = vld [vmem:[#allocation2 + $0x1708] sm:$0xff]  ;;  %v12960_v10 = vpop.f32.mrb[16].mxu1 }
 0x618   :  { %11186 = vrot.lane.b32.xlu1 %v11185_v6, %s12229_s3  ;;  %2391 = vmatmul.mubr.f32.gmra.mrb[120].mxu1 %v1119_v62  ;;  %v997_v6 = vld [vmem:[#allocation2 + $0x1310] sm:$0xff]  ;;  %v1140_v62 = vld [vmem:[#allocation2 + $0x1788] sm:$0xff] }
 0x619   :  { %v3292_v16 = vpop.f32.mrb[188].mxu0  ;;  %2395 = vmatprep.mubr.f32.mxu1 %v1124_v7 }
 0x61a   :  { %3556 = vmatmul.mubr.f32.gmra.mrb[38].mxu0 %v977_v12  ;;  %v3294_v18 = vpop.f32.mrb[189].mxu0  ;;  %v1123_v12 = vld [vmem:[#allocation2 + $0x1700] sm:$0xff] }
 0x61b   :  { %3560 = vmatprep.mubr.f32.mxu0 %v982_v13 }
 0x61c   :  { %2396 = vmatmul.mubr.f32.gmra.mrb[122].mxu1 %v1123_v12 }
 0x61d   :  { %v3297_v26 = vpop.f32.mrb[190].mxu0  ;;  %2400 = vmatprep.mubr.f32.mxu1 %v1128_v21 }
 0x61e   :  { %v11190_v29 = vpack.i.bf16 %v3297_v26, %v3292_v16  ;;  %v3299_v30 = vpop.f32.mrb[191].mxu0  ;;  %3561 = vmatmul.mubr.f32.gmra.mrb[40].mxu0 %v981_v20  ;;  %v2134_v16 = vpop.f32.mrb[17].mxu1  ;;  %v1001_v20 = vld [vmem:[#allocation2 + $0x1330] sm:$0xff]  ;;  %v1127_v26 = vld [vmem:[#allocation2 + $0x1720] sm:$0xff] }
 0x61f   :  { %3565 = vmatprep.mubr.f32.mxu0 %v986_v22  ;;  %v1006_v22 = vld [vmem:[#allocation2 + $0x1358] sm:$0xff]  ;;  %v12963_v25 = vpop.f32.mrb[18].mxu1  ;;  %v1144_v16 = vld [vmem:[#allocation2 + $0x17a8] sm:$0xff] }
 0x620   :  { %11191 = vrot.lane.b32.xlu1 %v11190_v29, %s12229_s3  ;;  %v2139_v29 = vpop.f32.mrb[19].mxu1  ;;  %2401 = vmatmul.mubr.f32.gmra.mrb[124].mxu1 %v1127_v26 }
 0x621   :  { %v3302_v38 = vpop.f32.mrb[192].mxu0  ;;  %2405 = vmatprep.mubr.f32.mxu1 %v1132_v33  ;;  %v1148_v29 = vld [vmem:[#allocation2 + $0x17c8] sm:$0xff]  ;;  %v1147_v33 = vld [vmem:[#allocation2 + $0x17c0] sm:$0xff] }
 0x622   :  { %3566 = vmatmul.mubr.f32.gmra.mrb[42].mxu0 %v985_v34  ;;  %v3304_v42 = vpop.f32.mrb[193].mxu0  ;;  %v1010_v34 = vld [vmem:[#allocation2 + $0x1378] sm:$0xff] }
 0x623   :  { %3570 = vmatprep.mubr.f32.mxu0 %v990_v36  ;;  %v12965_v36 = vpop.f32.mrb[20].mxu1 }
 0x624   :  { %v2144_v42 = vpop.f32.mrb[21].mxu1 }
 0x625   :  { %v3307_v50 = vpop.f32.mrb[194].mxu0  ;;  %v12968_v52 = vpop.f32.mrb[22].mxu1 }
 0x626   :  { %v11195_v53 = vpack.i.bf16 %v3307_v50, %v3302_v38  ;;  %v3309_v56 = vpop.f32.mrb[195].mxu0  ;;  %3571 = vmatmul.mubr.f32.gmra.mrb[44].mxu0 %v989_v44  ;;  %v1131_v38 = vld [vmem:[#allocation2 + $0x1740] sm:$0xff]  ;;  %v1014_v50 = vld [vmem:[#allocation2 + $0x1398] sm:$0xff] }
 0x627   :  { %3575 = vmatprep.mubr.f32.mxu0 %v994_v46  ;;  %2406 = vmatmul.mubr.f32.gmra.mrb[126].mxu1 %v1131_v38  ;;  %v1009_v46 = vld [vmem:[#allocation2 + $0x1370] sm:$0xff] }
 0x628   :  { %11196 = vrot.lane.b32.xlu1 %v11195_v53, %s12230_s11  ;;  %2410 = vmatprep.mubr.f32.mxu1 %v1136_v49  ;;  %v1135_v53 = vld [vmem:[#allocation2 + $0x1760] sm:$0xff] }
 0x629   :  { %v3312_v2 = vpop.f32.mrb[196].mxu0 }
 0x62a   :  { %3576 = vmatmul.mubr.f32.gmra.mrb[46].mxu0 %v993_v57  ;;  %v3314_v5 = vpop.f32.mrb[197].mxu0  ;;  %v2149_v57 = vpop.f32.mrb[23].mxu1 }
 0x62b   :  { %3580 = vmatprep.mubr.f32.mxu0 %v998_v60  ;;  %2411 = vmatmul.mubr.f32.gmra.mrb[128].mxu1 %v1135_v53  ;;  %v1013_v60 = vld [vmem:[#allocation2 + $0x1390] sm:$0xff]  ;;  %v12970_v3 = vpop.f32.mrb[24].mxu1  ;;  %v1139_v5 = vld [vmem:[#allocation2 + $0x1780] sm:$0xff] }
 0x62c   :  { %2415 = vmatprep.mubr.f32.mxu1 %v1140_v62  ;;  %v2154_v7 = vpop.f32.mrb[25].mxu1  ;;  %v1034_v62 = vld [vmem:[#allocation2 + $0x1438] sm:$0xff] }
 0x62d   :  { %v3317_v13 = vpop.f32.mrb[198].mxu0 }
 0x62e   :  { %v11200_v17 = vpack.i.bf16 %v3317_v13, %v3312_v2  ;;  %v3319_v18 = vpop.f32.mrb[199].mxu0  ;;  %3581 = vmatmul.mubr.f32.gmra.mrb[48].mxu0 %v997_v6  ;;  %v1018_v2 = vld [vmem:[#allocation2 + $0x13b8] sm:$0xff]  ;;  %v1017_v13 = vld [vmem:[#allocation2 + $0x13b0] sm:$0xff] }
 0x62f   :  { %3585 = vmatprep.mubr.f32.mxu0 %v1002_v9  ;;  %2416 = vmatmul.mubr.f32.gmra.mrb[130].mxu1 %v1139_v5  ;;  %v12973_v18 = vpop.f32.mrb[26].mxu1  ;;  %v1155_v5 = vld [vmem:[#allocation2 + $0x1800] sm:$0xff] }
 0x630   :  { %11201 = vrot.lane.b32.xlu0 %v11200_v17, %s12230_s11  ;;  %v1022_v17 = vld [vmem:[#allocation2 + $0x13d8] sm:$0xff]  ;;  %2420 = vmatprep.mubr.f32.mxu1 %v1144_v16  ;;  %v1160_v16 = vld [vmem:[#allocation2 + $0x1828] sm:$0xff] }
 0x631   :  { %v3322_v28 = vpop.f32.mrb[200].mxu0 }
 0x632   :  { %3586 = vmatmul.mubr.f32.gmra.mrb[50].mxu0 %v1001_v20  ;;  %v3324_v30 = vpop.f32.mrb[201].mxu0  ;;  %v1143_v20 = vld [vmem:[#allocation2 + $0x17a0] sm:$0xff] }
 0x633   :  { %3590 = vmatprep.mubr.f32.mxu0 %v1006_v22  ;;  %v2159_v22 = vpop.f32.mrb[27].mxu1  ;;  %2421 = vmatmul.mubr.f32.gmra.mrb[132].mxu1 %v1143_v20  ;;  %v1026_v30 = vld [vmem:[#allocation2 + $0x13f8] sm:$0xff] }
 0x634   :  { %2425 = vmatprep.mubr.f32.mxu1 %v1148_v29  ;;  %v1037_v29 = vld [vmem:[#allocation2 + $0x1450] sm:$0xff] }
 0x635   :  { %v3327_v40 = vpop.f32.mrb[202].mxu0 }
 0x636   :  { %v11205_v44 = vpack.i.bf16 %v3327_v40, %v3322_v28  ;;  %v3329_v45 = vpop.f32.mrb[203].mxu0  ;;  %3591 = vmatmul.mubr.f32.gmra.mrb[52].mxu0 %v1005_v32  ;;  %v1021_v28 = vld [vmem:[#allocation2 + $0x13d0] sm:$0xff]  ;;  %v12975_v32 = vpop.f32.mrb[28].mxu1 }
 0x637   :  { %3595 = vmatprep.mubr.f32.mxu0 %v1010_v34  ;;  %v2164_v38 = vpop.f32.mrb[29].mxu1  ;;  %2426 = vmatmul.mubr.f32.gmra.mrb[134].mxu1 %v1147_v33  ;;  %v1152_v45 = vld [vmem:[#allocation2 + $0x17e8] sm:$0xff]  ;;  %v1042_v33 = vld [vmem:[#allocation2 + $0x1478] sm:$0xff] }
 0x638   :  { %11206 = vrot.lane.b32.xlu1 %v11205_v44, %s12230_s11  ;;  %v1025_v44 = vld [vmem:[#allocation2 + $0x13f0] sm:$0xff]  ;;  %v12978_v49 = vpop.f32.mrb[30].mxu1  ;;  %2430 = vmatprep.mubr.f32.mxu1 %v1152_v45  ;;  %v1163_v38 = vld [vmem:[#allocation2 + $0x1840] sm:$0xff] }
 0x639   :  { %v3332_v56 = vpop.f32.mrb[204].mxu0 }
 0x63a   :  { %3596 = vmatmul.mubr.f32.gmra.mrb[54].mxu0 %v1009_v46  ;;  %v3334_v58 = vpop.f32.mrb[205].mxu0  ;;  %v1030_v46 = vld [vmem:[#allocation2 + $0x1418] sm:$0xff] }
 0x63b   :  { %3600 = vmatprep.mubr.f32.mxu0 %v1014_v50  ;;  %v1151_v50 = vld [vmem:[#allocation2 + $0x17e0] sm:$0xff]  ;;  %v1029_v58 = vld [vmem:[#allocation2 + $0x1410] sm:$0xff] }
 0x63c   :  { %2431 = vmatmul.mubr.f32.gmra.mrb[136].mxu1 %v1151_v50  ;;  %v1168_v50 = vld [vmem:[#allocation2 + $0x1868] sm:$0xff] }
 0x63d   :  { %v3337_v6 = vpop.f32.mrb[206].mxu0 }
 0x63e   :  { %v11210_v9 = vpack.i.bf16 %v3337_v6, %v3332_v56  ;;  %v3339_v12 = vpop.f32.mrb[207].mxu0  ;;  %3601 = vmatmul.mubr.f32.gmra.mrb[56].mxu0 %v1013_v60  ;;  %v2169_v56 = vpop.f32.mrb[31].mxu1  ;;  %v1156_v60 = vld [vmem:[#allocation2 + $0x1808] sm:$0xff] }
 0x63f   :  { %3605 = vmatprep.mubr.f32.mxu0 %v1018_v2  ;;  %v12980_v2 = vpop.f32.mrb[32].mxu1  ;;  %2435 = vmatprep.mubr.f32.mxu1 %v1156_v60 }
 0x640   :  { %11211 = vrot.lane.b32.xlu0 %v11210_v9, %s12230_s11  ;;  %v2174_v7 = vpop.f32.mrb[33].mxu1  ;;  %2436 = vmatmul.mubr.f32.gmra.mrb[138].mxu1 %v1155_v5  ;;  %v1045_v5 = vld [vmem:[#allocation2 + $0x1490] sm:$0xff] }
 0x641   :  { %v3342_v21 = vpop.f32.mrb[208].mxu0  ;;  %v12983_v20 = vpop.f32.mrb[34].mxu1  ;;  %2440 = vmatprep.mubr.f32.mxu1 %v1160_v16  ;;  %v1050_v7 = vld [vmem:[#allocation2 + $0x14b8] sm:$0xff] }
 0x642   :  { %3606 = vmatmul.mubr.f32.gmra.mrb[58].mxu0 %v1017_v13  ;;  %v3344_v26 = vpop.f32.mrb[209].mxu0  ;;  %v1033_v13 = vld [vmem:[#allocation2 + $0x1430] sm:$0xff] }
 0x643   :  { %3610 = vmatprep.mubr.f32.mxu0 %v1022_v17  ;;  %v1038_v17 = vld [vmem:[#allocation2 + $0x1458] sm:$0xff]  ;;  %v2179_v26 = vpop.f32.mrb[35].mxu1 }
 0x644   :  { %v1176_v26 = vld [vmem:[#allocation2 + $0x18a8] sm:$0xff] }
 0x645   :  { %v3347_v34 = vpop.f32.mrb[210].mxu0 }
 0x646   :  { %v11215_v40 = vpack.i.bf16 %v3347_v34, %v3342_v21  ;;  %v3349_v42 = vpop.f32.mrb[211].mxu0  ;;  %3611 = vmatmul.mubr.f32.gmra.mrb[60].mxu0 %v1021_v28  ;;  %v1159_v21 = vld [vmem:[#allocation2 + $0x1820] sm:$0xff]  ;;  %v12985_v34 = vpop.f32.mrb[36].mxu1 }
 0x647   :  { %3615 = vmatprep.mubr.f32.mxu0 %v1026_v30  ;;  %2441 = vmatmul.mubr.f32.gmra.mrb[140].mxu1 %v1159_v21  ;;  %v1164_v30 = vld [vmem:[#allocation2 + $0x1848] sm:$0xff]  ;;  %v2184_v42 = vpop.f32.mrb[37].mxu1 }
 0x648   :  { %11216 = vrot.lane.b32.xlu1 %v11215_v40, %s12230_s11  ;;  %2445 = vmatprep.mubr.f32.mxu1 %v1164_v30  ;;  %v12988_v56 = vpop.f32.mrb[38].mxu1  ;;  %v1175_v30 = vld [vmem:[#allocation2 + $0x18a0] sm:$0xff]  ;;  %v1053_v42 = vld [vmem:[#allocation2 + $0x14d0] sm:$0xff] }
 0x649   :  { %v3352_v53 = vpop.f32.mrb[212].mxu0  ;;  %v2189_v60 = vpop.f32.mrb[39].mxu1 }
 0x64a   :  { %3616 = vmatmul.mubr.f32.gmra.mrb[62].mxu0 %v1025_v44  ;;  %v3354_v57 = vpop.f32.mrb[213].mxu0 }
 0x64b   :  { %3620 = vmatprep.mubr.f32.mxu0 %v1030_v46  ;;  %2446 = vmatmul.mubr.f32.gmra.mrb[142].mxu1 %v1163_v38  ;;  %v1041_v46 = vld [vmem:[#allocation2 + $0x1470] sm:$0xff]  ;;  %v1167_v57 = vld [vmem:[#allocation2 + $0x1860] sm:$0xff] }
 0x64c   :  { %2450 = vmatprep.mubr.f32.mxu1 %v1168_v50  ;;  %v1179_v50 = vld [vmem:[#allocation2 + $0x18c0] sm:$0xff] }
 0x64d   :  { %v3357_v6 = vpop.f32.mrb[214].mxu0 }
 0x64e   :  { %v11220_v9 = vpack.i.bf16 %v3357_v6, %v3352_v53  ;;  %v3359_v12 = vpop.f32.mrb[215].mxu0  ;;  %3621 = vmatmul.mubr.f32.gmra.mrb[64].mxu0 %v1029_v58  ;;  %v1046_v53 = vld [vmem:[#allocation2 + $0x1498] sm:$0xff]  ;;  %v1172_v6 = vld [vmem:[#allocation2 + $0x1888] sm:$0xff] }
 0x64f   :  { %3625 = vmatprep.mubr.f32.mxu0 %v1034_v62  ;;  %2451 = vmatmul.mubr.f32.gmra.mrb[144].mxu1 %v1167_v57  ;;  %v1171_v12 = vld [vmem:[#allocation2 + $0x1880] sm:$0xff] }
 0x650   :  { %11221 = vrot.lane.b32.xlu0 %v11220_v9, %s12230_s11  ;;  %v12990_v9 = vpop.f32.mrb[40].mxu1  ;;  %2455 = vmatprep.mubr.f32.mxu1 %v1172_v6  ;;  %v1062_v6 = vld [vmem:[#allocation2 + $0x1518] sm:$0xff] }
 0x651   :  { %v3362_v22 = vpop.f32.mrb[216].mxu0  ;;  %v2194_v16 = vpop.f32.mrb[41].mxu1 }
 0x652   :  { %3626 = vmatmul.mubr.f32.gmra.mrb[66].mxu0 %v1033_v13  ;;  %v3364_v28 = vpop.f32.mrb[217].mxu0 }
 0x653   :  { %3630 = vmatprep.mubr.f32.mxu0 %v1038_v17  ;;  %2456 = vmatmul.mubr.f32.gmra.mrb[146].mxu1 %v1171_v12  ;;  %v1054_v28 = vld [vmem:[#allocation2 + $0x14d8] sm:$0xff]  ;;  %v1183_v12 = vld [vmem:[#allocation2 + $0x18e0] sm:$0xff] }
 0x654   :  { %2460 = vmatprep.mubr.f32.mxu1 %v1176_v26  ;;  %v1066_v26 = vld [vmem:[#allocation2 + $0x1538] sm:$0xff] }
 0x655   :  { %v3367_v40 = vpop.f32.mrb[218].mxu0 }
 0x656   :  { %v11225_v44 = vpack.i.bf16 %v3367_v40, %v3362_v22  ;;  %v3369_v45 = vpop.f32.mrb[219].mxu0  ;;  %3631 = vmatmul.mubr.f32.gmra.mrb[68].mxu0 %v1037_v29  ;;  %v1049_v22 = vld [vmem:[#allocation2 + $0x14b0] sm:$0xff]  ;;  %v12993_v29 = vpop.f32.mrb[42].mxu1 }
 0x657   :  { %3635 = vmatprep.mubr.f32.mxu0 %v1042_v33  ;;  %v2199_v38 = vpop.f32.mrb[43].mxu1  ;;  %2461 = vmatmul.mubr.f32.gmra.mrb[148].mxu1 %v1175_v30  ;;  %v1058_v45 = vld [vmem:[#allocation2 + $0x14f8] sm:$0xff]  ;;  %v1187_v30 = vld [vmem:[#allocation2 + $0x1900] sm:$0xff] }
 0x658   :  { %11226 = vrot.lane.b32.xlu1 %v11225_v44, %s12230_s11  ;;  %v1180_v44 = vld [vmem:[#allocation2 + $0x18c8] sm:$0xff] }
 0x659   :  { %v3372_v58 = vpop.f32.mrb[220].mxu0  ;;  %2465 = vmatprep.mubr.f32.mxu1 %v1180_v44  ;;  %v1065_v44 = vld [vmem:[#allocation2 + $0x1530] sm:$0xff] }
 0x65a   :  { %3636 = vmatmul.mubr.f32.gmra.mrb[70].mxu0 %v1041_v46  ;;  %v3374_v62 = vpop.f32.mrb[221].mxu0  ;;  %v12995_v46 = vpop.f32.mrb[44].mxu1 }
 0x65b   :  { %3640 = vmatprep.mubr.f32.mxu0 %v1046_v53  ;;  %v2204_v57 = vpop.f32.mrb[45].mxu1  ;;  %2466 = vmatmul.mubr.f32.gmra.mrb[150].mxu1 %v1179_v50  ;;  %v1057_v62 = vld [vmem:[#allocation2 + $0x14f0] sm:$0xff]  ;;  %v1192_v50 = vld [vmem:[#allocation2 + $0x1928] sm:$0xff] }
 0x65c   :  { %v5317_v57 = vld [vmem:[#allocation4 + $0x8] sm:$0xff] }
 0x65d   :  { %v3377_v13 = vpop.f32.mrb[222].mxu0 }
 0x65e   :  { %v11230_v17 = vpack.i.bf16 %v3377_v13, %v3372_v58  ;;  %v3379_v21 = vpop.f32.mrb[223].mxu0  ;;  %3641 = vmatmul.mubr.f32.gmra.mrb[72].mxu0 %v1045_v5  ;;  %v1184_v5 = vld [vmem:[#allocation2 + $0x18e8] sm:$0xff] }
 0x65f   :  { %3645 = vmatprep.mubr.f32.mxu0 %v1050_v7  ;;  %v12998_v7 = vpop.f32.mrb[46].mxu1  ;;  %2470 = vmatprep.mubr.f32.mxu1 %v1184_v5  ;;  %v1061_v21 = vld [vmem:[#allocation2 + $0x1510] sm:$0xff] }
 0x660   :  { %11231 = vrot.lane.b32.xlu0 %v11230_v17, %s12230_s11  ;;  %v2209_v16 = vpop.f32.mrb[47].mxu1  ;;  %2471 = vmatmul.mubr.f32.gmra.mrb[152].mxu1 %v1183_v12 }
 0x661   :  { %v3382_v33 = vpop.f32.mrb[224].mxu0  ;;  %v1196_v16 = vld [vmem:[#allocation2 + $0x1948] sm:$0xff] }
 0x662   :  { %3646 = vmatmul.mubr.f32.gmra.mrb[74].mxu0 %v1049_v22  ;;  %v3384_v40 = vpop.f32.mrb[225].mxu0  ;;  %v1188_v22 = vld [vmem:[#allocation2 + $0x1908] sm:$0xff] }
 0x663   :  { %3650 = vmatprep.mubr.f32.mxu0 %v1054_v28  ;;  %v13000_v28 = vpop.f32.mrb[48].mxu1  ;;  %2475 = vmatprep.mubr.f32.mxu1 %v1188_v22  ;;  %v1195_v22 = vld [vmem:[#allocation2 + $0x1940] sm:$0xff] }
 0x664   :  { %v2214_v38 = vpop.f32.mrb[49].mxu1  ;;  %2476 = vmatmul.mubr.f32.gmra.mrb[154].mxu1 %v1187_v30 }
 0x665   :  { %v3387_v53 = vpop.f32.mrb[226].mxu0  ;;  %2480 = vmatprep.mubr.f32.mxu1 %v1192_v50  ;;  %v1199_v50 = vld [vmem:[#allocation2 + $0x1960] sm:$0xff] }
 0x666   :  { %v11235_v58 = vpack.i.bf16 %v3387_v53, %v3382_v33  ;;  %v3389_v60 = vpop.f32.mrb[227].mxu0  ;;  %3651 = vmatmul.mubr.f32.gmra.mrb[76].mxu0 %v1053_v42  ;;  %v5316_v53 = vld [vmem:[#allocation4] sm:$0xff] }
 0x667   :  { %3655 = vmatprep.mubr.f32.mxu0 %v1058_v45  ;;  %v1070_v45 = vld [vmem:[#allocation2 + $0x1558] sm:$0xff]  ;;  %v1191_v60 = vld [vmem:[#allocation2 + $0x1920] sm:$0xff]  ;;  %v9647_v5 = vpack.c.bf16 %v5317_v57, %v5316_v53 }
 0x668   :  { %11236 = vrot.lane.b32.xlu1 %v11235_v58, %s12231_s5  ;;  %v13003_v58 = vpop.f32.mrb[50].mxu1  ;;  %2481 = vmatmul.mubr.f32.gmra.mrb[156].mxu1 %v1191_v60 }
 0x669   :  { %v3392_v13 = vpop.f32.mrb[228].mxu0  ;;  %9648 = vmatprep.subr.bf16.mxu1 %v9647_v5  ;;  %2485 = vmatprep.mubr.f32.mxu1 %v1196_v16 }
 0x66a   :  { %3656 = vmatmul.mubr.f32.gmra.mrb[78].mxu0 %v1057_v62  ;;  %v3394_v17 = vpop.f32.mrb[229].mxu0  ;;  %9650 = vmatpush3.bf16.msra.mxu1 %v9647_v5  ;;  %v1077_v5 = vld [vmem:[#allocation2 + $0x1590] sm:$0xff] }
 0x66b   :  { %3660 = vmatprep.mubr.f32.mxu0 %v1062_v6  ;;  %v2219_v6 = vpop.f32.mrb[51].mxu1  ;;  %v1074_v17 = vld [vmem:[#allocation2 + $0x1578] sm:$0xff] }
 0x66c   :  { %2486 = vmatmul.mubr.f32.gmra.mrb[158].mxu1 %v1195_v22  ;;  %v1082_v6 = vld [vmem:[#allocation2 + $0x15b8] sm:$0xff] }
 0x66d   :  { %v3397_v33 = vpop.f32.mrb[230].mxu0 }
 0x66e   :  { %v11240_v40 = vpack.i.bf16 %v3397_v33, %v3392_v13  ;;  %v3399_v42 = vpop.f32.mrb[231].mxu0  ;;  %3661 = vmatmul.mubr.f32.gmra.mrb[80].mxu0 %v1061_v21  ;;  %v1069_v13 = vld [vmem:[#allocation2 + $0x1550] sm:$0xff]  ;;  %v13005_v21 = vpop.f32.mrb[52].mxu1 }
 0x66f   :  { %3665 = vmatprep.mubr.f32.mxu0 %v1066_v26  ;;  %v2224_v30 = vpop.f32.mrb[53].mxu1  ;;  %v1200_v42 = vld [vmem:[#allocation2 + $0x1968] sm:$0xff] }
 0x670   :  { %11241 = vrot.lane.b32.xlu1 %v11240_v40, %s12231_s5  ;;  %v1073_v40 = vld [vmem:[#allocation2 + $0x1570] sm:$0xff]  ;;  %2490 = vmatprep.mubr.f32.mxu1 %v1200_v42  ;;  %v1207_v42 = vld [vmem:[#allocation2 + $0x19a0] sm:$0xff] }
 0x671   :  { %v3402_v62 = vpop.f32.mrb[232].mxu0  ;;  %2491 = vmatmul.mubr.f32.gmra.mrb[160].mxu1 %v1199_v50  ;;  %v1081_v30 = vld [vmem:[#allocation2 + $0x15b0] sm:$0xff] }
 0x672   :  { %3666 = vmatmul.mubr.f32.gmra.mrb[82].mxu0 %v1065_v44  ;;  %v3404_v12 = vpop.f32.mrb[233].mxu0  ;;  %v1078_v44 = vld [vmem:[#allocation2 + $0x1598] sm:$0xff] }
 0x673   :  { %3670 = vmatprep.mubr.f32.mxu0 %v1070_v45  ;;  %v13008_v45 = vpop.f32.mrb[54].mxu1 }
 0x674   :  { %v2229_v57 = vpop.f32.mrb[55].mxu1 }
 0x675   :  { %v3407_v26 = vpop.f32.mrb[234].mxu0  ;;  %v13010_v12 = vpop.f32.mrb[56].mxu1 }
 0x676   :  { %v11245_v33 = vpack.i.bf16 %v3407_v26, %v3402_v62  ;;  %v3409_v38 = vpop.f32.mrb[235].mxu0  ;;  %3671 = vmatmul.mubr.f32.gmra.mrb[84].mxu0 %v1069_v13  ;;  %v1204_v62 = vld [vmem:[#allocation2 + $0x1988] sm:$0xff]  ;;  %v1203_v13 = vld [vmem:[#allocation2 + $0x1980] sm:$0xff] }
 0x677   :  { %3675 = vmatprep.mubr.f32.mxu0 %v1074_v17  ;;  %2495 = vmatprep.mubr.f32.mxu1 %v1204_v62  ;;  %v2234_v17 = vpop.f32.mrb[57].mxu1  ;;  %v1086_v38 = vld [vmem:[#allocation2 + $0x15d8] sm:$0xff] }
 0x678   :  { %11246 = vrot.lane.b32.xlu1 %v11245_v33, %s12231_s5  ;;  %2496 = vmatmul.mubr.f32.gmra.mrb[162].mxu1 %v1203_v13  ;;  %v1208_v33 = vld [vmem:[#allocation2 + $0x19a8] sm:$0xff] }
 0x679   :  { %v3412_v53 = vpop.f32.mrb[236].mxu0  ;;  %2500 = vmatprep.mubr.f32.mxu1 %v1208_v33  ;;  %v1216_v33 = vld [vmem:[#allocation2 + $0x19e8] sm:$0xff] }
 0x67a   :  { %3676 = vmatmul.mubr.f32.gmra.mrb[86].mxu0 %v1073_v40  ;;  %v3414_v60 = vpop.f32.mrb[237].mxu0  ;;  %v13013_v40 = vpop.f32.mrb[58].mxu1 }
 0x67b   :  { %3680 = vmatprep.mubr.f32.mxu0 %v1078_v44  ;;  %v2239_v50 = vpop.f32.mrb[59].mxu1  ;;  %v1212_v60 = vld [vmem:[#allocation2 + $0x19c8] sm:$0xff] }
 0x67c   :  { %2501 = vmatmul.mubr.f32.gmra.mrb[164].mxu1 %v1207_v42  ;;  %v13015_v62 = vpop.f32.mrb[60].mxu1 }
 0x67d   :  { %v3417_v16 = vpop.f32.mrb[238].mxu0  ;;  %2505 = vmatprep.mubr.f32.mxu1 %v1212_v60  ;;  %v13020_v60 = vpop.permute.xlu0 %10996 }
 0x67e   :  { %v11250_v22 = vpack.i.bf16 %v3417_v16, %v3412_v53  ;;  %v3419_v26 = vpop.f32.mrb[239].mxu0  ;;  %3681 = vmatmul.mubr.f32.gmra.mrb[88].mxu0 %v1077_v5  ;;  %v1085_v53 = vld [vmem:[#allocation2 + $0x15d0] sm:$0xff]  ;;  %v1090_v5 = vld [vmem:[#allocation2 + $0x15f8] sm:$0xff]  ;;  %v2244_v16 = vpop.f32.mrb[61].mxu1 }
 0x67f   :  { %3685 = vmatprep.mubr.f32.mxu0 %v1082_v6  ;;  %v1211_v6 = vld [vmem:[#allocation2 + $0x19c0] sm:$0xff]  ;;  %v1089_v26 = vld [vmem:[#allocation2 + $0x15f0] sm:$0xff]  ;;  %v13018_v42 = vpop.f32.mrb[62].mxu1 }
 0x680   :  { %11251 = vrot.lane.b32.xlu0 %v11250_v22, %s12231_s5  ;;  %2506 = vmatmul.mubr.f32.gmra.mrb[166].mxu1 %v1211_v6  ;;  %v1219_v16 = vld [vmem:[#allocation2 + $0x1a00] sm:$0xff] }
 0x681   :  { %v3422_v44 = vpop.f32.mrb[240].mxu0  ;;  %2510 = vmatprep.mubr.f32.mxu1 %v1216_v33  ;;  %v13024_v33 = vpop.permute.xlu0 %11001 }
 0x682   :  { %3686 = vmatmul.mubr.f32.gmra.mrb[90].mxu0 %v1081_v30  ;;  %v3424_v57 = vpop.f32.mrb[241].mxu0  ;;  %v1094_v30 = vld [vmem:[#allocation2 + $0x1618] sm:$0xff] }
 0x683   :  { %3690 = vmatprep.mubr.f32.mxu0 %v1086_v38  ;;  %v1215_v38 = vld [vmem:[#allocation2 + $0x19e0] sm:$0xff]  ;;  %v2249_v57 = vpop.f32.mrb[63].mxu1 }
 0x684   :  { %2511 = vmatmul.mubr.f32.gmra.mrb[168].mxu1 %v1215_v38 }
 0x685   :  { %v3427_v13 = vpop.f32.mrb[242].mxu0 }
 0x686   :  { %v11255_v17 = vpack.i.bf16 %v3427_v13, %v3422_v44  ;;  %v3429_v22 = vpop.f32.mrb[243].mxu0  ;;  %3691 = vmatmul.mubr.f32.gmra.mrb[92].mxu0 %v1085_v53  ;;  %v1220_v44 = vld [vmem:[#allocation2 + $0x1a08] sm:$0xff]  ;;  %v1093_v53 = vld [vmem:[#allocation2 + $0x1610] sm:$0xff]  ;;  %v13022_v13 = vpop.f32.mrb[64].mxu1 }
 0x687   :  { %3695 = vmatprep.mubr.f32.mxu0 %v1090_v5  ;;  %2515 = vmatprep.mubr.f32.mxu1 %v1220_v44  ;;  %v1098_v5 = vld [vmem:[#allocation2 + $0x1638] sm:$0xff]  ;;  %v2254_v22 = vpop.f32.mrb[65].mxu1  ;;  %v1223_v44 = vld [vmem:[#allocation2 + $0x1a20] sm:$0xff] }
 0x688   :  { %11256 = vrot.lane.b32.xlu1 %v11255_v17, %s12231_s5  ;;  %2516 = vmatmul.mubr.f32.gmra.mrb[170].mxu1 %v1219_v16  ;;  %v13027_v43 = vpop.f32.mrb[66].mxu1  ;;  %v13029_v22 = vpop.permute.xlu0 %11006 }
 0x689   :  { %v3432_v50 = vpop.f32.mrb[244].mxu0  ;;  %14588 = vst [vmem:[#allocation48_spill] sm:$0xff] %v13027_v43  ;;  %v2259_v27 = vpop.f32.mrb[67].mxu1 }
 0x68a   :  { %3696 = vmatmul.mubr.f32.gmra.mrb[94].mxu0 %v1089_v26  ;;  %v3434_v6 = vpop.f32.mrb[245].mxu0  ;;  %v1097_v26 = vld [vmem:[#allocation2 + $0x1630] sm:$0xff] }
 0x68b   :  { %3700 = vmatprep.mubr.f32.mxu0 %v1094_v30  ;;  %v1224_v6 = vld [vmem:[#allocation2 + $0x1a28] sm:$0xff]  ;;  %v1102_v30 = vld [vmem:[#allocation2 + $0x1658] sm:$0xff] }
 0x68c   :  { %2520 = vmatprep.mubr.f32.mxu1 %v1224_v6  ;;  %v13035_v27 = vpop.permute.xlu0 %11011 }
 0x68d   :  { %v3437_v17 = vpop.f32.mrb[246].mxu0  ;;  %2521 = vmatmul.mubr.f32.gmra.mrb[172].mxu1 %v1223_v44 }
 0x68e   :  { %v3438_v57 = vadd.f32 %v3437_v17, %v12940_v41  ;;  %v3439_v38 = vpop.f32.mrb[247].mxu0  ;;  %3701 = vmatmul.mubr.f32.gmra.mrb[96].mxu0 %v1093_v53  ;;  %v1228_v53 = vld [vmem:[#allocation2 + $0x1a48] sm:$0xff]  ;;  %v13033_v17 = vpop.f32.mrb[68].mxu1 }
 0x68f   :  { %3705 = vmatprep.mubr.f32.mxu0 %v1098_v5  ;;  %v1101_v5 = vld [vmem:[#allocation2 + $0x1650] sm:$0xff]  ;;  %2525 = vmatprep.mubr.f32.mxu1 %v1228_v53  ;;  %14589 = vst [vmem:[#allocation49_spill] sm:$0xff] %v13033_v17  ;;  %v2264_v6 = vpop.f32.mrb[69].mxu1  ;;  %v1231_v53 = vld [vmem:[#allocation2 + $0x1a60] sm:$0xff] }
 0x690   :  { %v11260_v0 = vpack.i.bf16 %v3438_v57, %v3432_v50  ;;  %v1106_v50 = vld [vmem:[#allocation2 + $0x1678] sm:$0xff]  ;;  %v1227_v57 = vld [vmem:[#allocation2 + $0x1a40] sm:$0xff]  ;;  %v13040_v6 = vpop.permute.xlu0 %11021 }
 0x691   :  { %v3442_v47 = vpop.f32.mrb[248].mxu0  ;;  %2526 = vmatmul.mubr.f32.gmra.mrb[174].mxu1 %v1227_v57 }
 0x692   :  { %v3443_v16 = vadd.f32 %v3442_v47, %v12943_v54  ;;  %3706 = vmatmul.mubr.f32.gmra.mrb[98].mxu0 %v1097_v26  ;;  %v3444_v41 = vpop.f32.mrb[249].mxu0  ;;  %11261 = vrot.lane.b32.xlu0 %v11260_v0, %s12231_s5  ;;  %v1105_v54 = vld [vmem:[#allocation2 + $0x1670] sm:$0xff]  ;;  %v1232_v0 = vld [vmem:[#allocation2 + $0x1a68] sm:$0xff] }
 0x693   :  { %3710 = vmatprep.mubr.f32.mxu0 %v1102_v30  ;;  %v1110_v30 = vld [vmem:[#allocation2 + $0x1698] sm:$0xff]  ;;  %v13038_v41 = vpop.f32.mrb[70].mxu1  ;;  %2530 = vmatprep.mubr.f32.mxu1 %v1232_v0 }
 0x694   :  { %14590 = vst [vmem:[#allocation50_spill] sm:$0xff] %v13038_v41  ;;  %v2269_v31 = vpop.f32.mrb[71].mxu1 }
 0x695   :  { %v3447_v38 = vpop.f32.mrb[250].mxu0  ;;  %2531 = vmatmul.mubr.f32.gmra.mrb[176].mxu1 %v1231_v53  ;;  %v13046_v31 = vpop.permute.xlu0 %11031 }
 0x696   :  { %v3448_v44 = vadd.f32 %v3447_v38, %v12945_v1  ;;  %v3449_v47 = vpop.f32.mrb[251].mxu0  ;;  %3711 = vmatmul.mubr.f32.gmra.mrb[100].mxu0 %v1101_v5  ;;  %v1236_v5 = vld [vmem:[#allocation2 + $0x1a88] sm:$0xff]  ;;  %v13044_v38 = vpop.f32.mrb[72].mxu1 }
 0x697   :  { %3715 = vmatprep.mubr.f32.mxu0 %v1106_v50  ;;  %v1109_v50 = vld [vmem:[#allocation2 + $0x1690] sm:$0xff]  ;;  %2535 = vmatprep.mubr.f32.mxu1 %v1236_v5  ;;  %14591 = vst [vmem:[#allocation51_spill] sm:$0xff] %v13044_v38  ;;  %v2274_v0 = vpop.f32.mrb[73].mxu1  ;;  %v1239_v5 = vld [vmem:[#allocation2 + $0x1aa0] sm:$0xff] }
 0x698   :  { %v11265_v26 = vpack.i.bf16 %v3448_v44, %v3443_v16  ;;  %v1114_v16 = vld [vmem:[#allocation2 + $0x16b8] sm:$0xff]  ;;  %v1235_v44 = vld [vmem:[#allocation2 + $0x1a80] sm:$0xff] }
 0x699   :  { %v3452_v17 = vpop.f32.mrb[252].mxu0  ;;  %2536 = vmatmul.mubr.f32.gmra.mrb[178].mxu1 %v1235_v44  ;;  %v13051_v0 = vpop.permute.xlu0 %11036 }
 0x69a   :  { %v3453_v57 = vadd.f32 %v3452_v17, %v12948_v14  ;;  %3716 = vmatmul.mubr.f32.gmra.mrb[102].mxu0 %v1105_v54  ;;  %v3454_v1 = vpop.f32.mrb[253].mxu0  ;;  %11266 = vrot.lane.b32.xlu1 %v11265_v26, %s12231_s5  ;;  %v1113_v17 = vld [vmem:[#allocation2 + $0x16b0] sm:$0xff]  ;;  %v1240_v54 = vld [vmem:[#allocation2 + $0x1aa8] sm:$0xff]  ;;  %14593 = vst [vmem:[#allocation53_spill] sm:$0xff] %v13051_v0 }
 0x69b   :  { %3720 = vmatprep.mubr.f32.mxu0 %v1110_v30  ;;  %v1118_v30 = vld [vmem:[#allocation2 + $0x16d8] sm:$0xff]  ;;  %v13049_v1 = vpop.f32.mrb[74].mxu1  ;;  %2540 = vmatprep.mubr.f32.mxu1 %v1240_v54 }
 0x69c   :  { %14592 = vst [vmem:[#allocation52_spill] sm:$0xff] %v13049_v1  ;;  %v2279_v41 = vpop.f32.mrb[75].mxu1 }
 0x69d   :  { %v3457_v47 = vpop.f32.mrb[254].mxu0  ;;  %2541 = vmatmul.mubr.f32.gmra.mrb[180].mxu1 %v1239_v5  ;;  %v13059_v5 = vpop.permute.xlu0 %11041 }
 0x69e   :  { %v3458_v53 = vadd.f32 %v3457_v47, %v12950_v24  ;;  %v3459_v14 = vpop.f32.mrb[255].mxu0  ;;  %3721 = vmatmul.mubr.f32.gmra.mrb[104].mxu0 %v1109_v50  ;;  %v1244_v50 = vld [vmem:[#allocation2 + $0x1ac8] sm:$0xff]  ;;  %v1122_v47 = vld [vmem:[#allocation2 + $0x16f8] sm:$0xff]  ;;  %14596 = vst [vmem:[#allocation56_spill] sm:$0xff] %v13059_v5 }
 0x69f   :  { %3725 = vmatprep.mubr.f32.mxu0 %v1114_v16  ;;  %v13055_v16 = vpop.permute.xlu1 %11016  ;;  %2545 = vmatprep.mubr.f32.mxu1 %v1244_v50  ;;  %v1243_v14 = vld [vmem:[#allocation2 + $0x1ac0] sm:$0xff]  ;;  %v1126_v50 = vld [vmem:[#allocation2 + $0x1718] sm:$0xff] }
 0x6a0   :  { %v11270_v26 = vpack.i.bf16 %v3458_v53, %v3453_v57  ;;  %14594 = vst [vmem:[#allocation54_spill] sm:$0xff] %v13055_v16  ;;  %v1117_v57 = vld [vmem:[#allocation2 + $0x16d0] sm:$0xff]  ;;  %v13057_v53 = vpop.f32.mrb[76].mxu1  ;;  %v5319_v5 = vld [vmem:[#allocation4 + $0x18] sm:$0xff] }
 0x6a1   :  { %v3462_v38 = vpop.f32.mrb[0].mxu0  ;;  %14595 = vst [vmem:[#allocation55_spill] sm:$0xff] %v13057_v53  ;;  %v2284_v54 = vpop.f32.mrb[77].mxu1  ;;  %2546 = vmatmul.mubr.f32.gmra.mrb[182].mxu1 %v1243_v14  ;;  %v1247_v53 = vld [vmem:[#allocation2 + $0x1ae0] sm:$0xff] }
 0x6a2   :  { %v3463_v44 = vadd.f32 %v3462_v38, %v12953_v37  ;;  %3726 = vmatmul.mubr.f32.gmra.mrb[106].mxu0 %v1113_v17  ;;  %v3464_v24 = vpop.f32.mrb[1].mxu0  ;;  %11271 = vrot.lane.b32.xlu1 %v11270_v26, %s12231_s5  ;;  %v1121_v26 = vld [vmem:[#allocation2 + $0x16f0] sm:$0xff]  ;;  %v13064_v16 = vpop.f32.mrb[78].mxu1 }
 0x6a3   :  { %3730 = vmatprep.mubr.f32.mxu0 %v1118_v30  ;;  %v13062_v17 = vpop.permute.xlu1 %11026  ;;  %v1248_v30 = vld [vmem:[#allocation2 + $0x1ae8] sm:$0xff]  ;;  %14597 = vst [vmem:[#allocation57_spill] sm:$0xff] %v13064_v16  ;;  %v2289_v54 = vpop.f32.mrb[79].mxu1 }
 0x6a4   :  { %2550 = vmatprep.mubr.f32.mxu1 %v1248_v30  ;;  %v13066_v14 = vpop.permute.xlu0 %11051  ;;  %v1251_v30 = vld [vmem:[#allocation2 + $0x1b00] sm:$0xff] }
 0x6a5   :  { %v3467_v41 = vpop.f32.mrb[2].mxu0  ;;  %2551 = vmatmul.mubr.f32.gmra.mrb[184].mxu1 %v1247_v53 }
 0x6a6   :  { %v3468_v37 = vadd.f32 %v3467_v41, %v12955_v48  ;;  %v3469_v38 = vpop.f32.mrb[3].mxu0  ;;  %3731 = vmatmul.mubr.f32.gmra.mrb[108].mxu0 %v1117_v57 }
 0x6a7   :  { %3735 = vmatprep.mubr.f32.mxu0 %v1122_v47  ;;  %v1252_v47 = vld [vmem:[#allocation2 + $0x1b08] sm:$0xff]  ;;  %v13070_v41 = vpop.permute.xlu1 %11046  ;;  %v13072_v38 = vpop.f32.mrb[80].mxu1 }
 0x6a8   :  { %v11275_v24 = vpack.i.bf16 %v3468_v37, %v3463_v44  ;;  %14598 = vst [vmem:[#allocation58_spill] sm:$0xff] %v13070_v41  ;;  %v1125_v44 = vld [vmem:[#allocation2 + $0x1710] sm:$0xff]  ;;  %2555 = vmatprep.mubr.f32.mxu1 %v1252_v47  ;;  %v1130_v37 = vld [vmem:[#allocation2 + $0x1738] sm:$0xff]  ;;  %14599 = vst [vmem:[#allocation59_spill] sm:$0xff] %v13072_v38  ;;  %v2294_v54 = vpop.f32.mrb[81].mxu1  ;;  %v13074_v16 = vpop.permute.xlu0 %11061 }
 0x6a9   :  { %v3472_v1 = vpop.f32.mrb[4].mxu0  ;;  %2556 = vmatmul.mubr.f32.gmra.mrb[186].mxu1 %v1251_v30  ;;  %v13079_v41 = vpop.f32.mrb[82].mxu1  ;;  %v5318_v38 = vld [vmem:[#allocation4 + $0x10] sm:$0xff]  ;;  %v1255_v54 = vld [vmem:[#allocation2 + $0x1b20] sm:$0xff] }
 0x6aa   :  { %v3473_v48 = vadd.f32 %v3472_v1, %v12958_v61  ;;  %3736 = vmatmul.mubr.f32.gmra.mrb[110].mxu0 %v1121_v26  ;;  %v3474_v57 = vpop.f32.mrb[5].mxu0  ;;  %11276 = vrot.lane.b32.xlu1 %v11275_v24, %s12232_s16  ;;  %v1129_v24 = vld [vmem:[#allocation2 + $0x1730] sm:$0xff]  ;;  %14601 = vst [vmem:[#allocation61_spill] sm:$0xff] %v13079_v41  ;;  %v9651_v0 = vpack.c.bf16 %v5319_v5, %v5318_v38  ;;  %v2299_v43 = vpop.f32.mrb[83].mxu1 }
 0x6ab   :  { %3740 = vmatprep.mubr.f32.mxu0 %v1126_v50  ;;  %v13077_v26 = vpop.permute.xlu1 %11056  ;;  %v1134_v50 = vld [vmem:[#allocation2 + $0x1758] sm:$0xff]  ;;  %v1256_v57 = vld [vmem:[#allocation2 + $0x1b28] sm:$0xff]  ;;  %v1259_v43 = vld [vmem:[#allocation2 + $0x1b40] sm:$0xff] }
 0x6ac   :  { %14600 = vst [vmem:[#allocation60_spill] sm:$0xff] %v13077_v26  ;;  %2560 = vmatprep.mubr.f32.mxu1 %v1256_v57  ;;  %9652 = vmatprep.subr.bf16.mxu1 %v9651_v0  ;;  %v13087_v57 = vpop.f32.mrb[84].mxu1 }
 0x6ad   :  { %v3477_v53 = vpop.f32.mrb[6].mxu0  ;;  %2561 = vmatmul.mubr.f32.gmra.mrb[188].mxu1 %v1255_v54  ;;  %14602 = vst [vmem:[#allocation62_spill] sm:$0xff] %v13087_v57  ;;  %v2304_v38 = vpop.f32.mrb[85].mxu1 }
 0x6ae   :  { %v3478_v61 = vadd.f32 %v3477_v53, %v12960_v10  ;;  %v3479_v1 = vpop.f32.mrb[7].mxu0  ;;  %3741 = vmatmul.mubr.f32.gmra.mrb[112].mxu0 %v1125_v44  ;;  %v13081_v10 = vpop.permute.xlu0 %11071  ;;  %v1260_v53 = vld [vmem:[#allocation2 + $0x1b48] sm:$0xff]  ;;  %9654 = vmatpush3.bf16.msra.mxu1 %v9651_v0  ;;  %v1142_v0 = vld [vmem:[#allocation2 + $0x1798] sm:$0xff] }
 0x6af   :  { %3745 = vmatprep.mubr.f32.mxu0 %v1130_v37  ;;  %v1138_v1 = vld [vmem:[#allocation2 + $0x1778] sm:$0xff]  ;;  %2565 = vmatprep.mubr.f32.mxu1 %v1260_v53  ;;  %v13094_v41 = vpop.f32.mrb[86].mxu1  ;;  %v1263_v53 = vld [vmem:[#allocation2 + $0x1b60] sm:$0xff] }
 0x6b0   :  { %v11280_v47 = vpack.i.bf16 %v3478_v61, %v3473_v48  ;;  %v13085_v48 = vpop.permute.xlu1 %11066  ;;  %v1133_v61 = vld [vmem:[#allocation2 + $0x1750] sm:$0xff]  ;;  %14605 = vst [vmem:[#allocation65_spill] sm:$0xff] %v13094_v41  ;;  %v2309_v38 = vpop.f32.mrb[87].mxu1 }
 0x6b1   :  { %v3482_v30 = vpop.f32.mrb[8].mxu0  ;;  %2566 = vmatmul.mubr.f32.gmra.mrb[190].mxu1 %v1259_v43 }
 0x6b2   :  { %v3483_v44 = vadd.f32 %v3482_v30, %v12963_v25  ;;  %3746 = vmatmul.mubr.f32.gmra.mrb[114].mxu0 %v1129_v24  ;;  %v3484_v37 = vpop.f32.mrb[9].mxu0  ;;  %11281 = vrot.lane.b32.xlu0 %v11280_v47, %s12232_s16  ;;  %v13089_v25 = vpop.permute.xlu0 %11081  ;;  %v1264_v30 = vld [vmem:[#allocation2 + $0x1b68] sm:$0xff] }
 0x6b3   :  { %3750 = vmatprep.mubr.f32.mxu0 %v1134_v50  ;;  %14603 = vst [vmem:[#allocation63_spill] sm:$0xff] %v13089_v25  ;;  %v1137_v50 = vld [vmem:[#allocation2 + $0x1770] sm:$0xff]  ;;  %2570 = vmatprep.mubr.f32.mxu1 %v1264_v30  ;;  %v1267_v30 = vld [vmem:[#allocation2 + $0x1b80] sm:$0xff] }
 0x6b4   :  { %v13092_v54 = vpop.permute.xlu1 %11076 }
 0x6b5   :  { %v3487_v5 = vpop.f32.mrb[10].mxu0  ;;  %14604 = vst [vmem:[#allocation64_spill] sm:$0xff] %v13092_v54  ;;  %2571 = vmatmul.mubr.f32.gmra.mrb[192].mxu1 %v1263_v53 }
 0x6b6   :  { %v3488_v24 = vadd.f32 %v3487_v5, %v12965_v36  ;;  %v3489_v47 = vpop.f32.mrb[11].mxu0  ;;  %3751 = vmatmul.mubr.f32.gmra.mrb[116].mxu0 %v1133_v61  ;;  %v13096_v43 = vpop.permute.xlu0 %11086 }
 0x6b7   :  { %3755 = vmatprep.mubr.f32.mxu0 %v1138_v1  ;;  %14606 = vst [vmem:[#allocation66_spill] sm:$0xff] %v13096_v43  ;;  %v1268_v1 = vld [vmem:[#allocation2 + $0x1b88] sm:$0xff]  ;;  %v13102_v47 = vpop.f32.mrb[88].mxu1 }
 0x6b8   :  { %v11285_v37 = vpack.i.bf16 %v3488_v24, %v3483_v44  ;;  %v13100_v5 = vpop.permute.xlu1 %11096  ;;  %v1141_v44 = vld [vmem:[#allocation2 + $0x1790] sm:$0xff]  ;;  %2575 = vmatprep.mubr.f32.mxu1 %v1268_v1  ;;  %v1146_v24 = vld [vmem:[#allocation2 + $0x17b8] sm:$0xff]  ;;  %14608 = vst [vmem:[#allocation68_spill] sm:$0xff] %v13102_v47  ;;  %v2314_v53 = vpop.f32.mrb[89].mxu1  ;;  %v1271_v47 = vld [vmem:[#allocation2 + $0x1ba0] sm:$0xff] }
 0x6b9   :  { %v3492_v57 = vpop.f32.mrb[12].mxu0  ;;  %14607 = vst [vmem:[#allocation67_spill] sm:$0xff] %v13100_v5  ;;  %2576 = vmatmul.mubr.f32.gmra.mrb[194].mxu1 %v1267_v30  ;;  %v1150_v1 = vld [vmem:[#allocation2 + $0x17d8] sm:$0xff]  ;;  %v13109_v5 = vpop.f32.mrb[90].mxu1 }
 0x6ba   :  { %v3493_v36 = vadd.f32 %v3492_v57, %v12968_v52  ;;  %3756 = vmatmul.mubr.f32.gmra.mrb[118].mxu0 %v1137_v50  ;;  %v3494_v61 = vpop.f32.mrb[13].mxu0  ;;  %11286 = vrot.lane.b32.xlu1 %v11285_v37, %s12232_s16  ;;  %v13104_v41 = vpop.permute.xlu0 %11091  ;;  %v1145_v37 = vld [vmem:[#allocation2 + $0x17b0] sm:$0xff]  ;;  %14609 = vst [vmem:[#allocation69_spill] sm:$0xff] %v13109_v5 }
 0x6bb   :  { %3760 = vmatprep.mubr.f32.mxu0 %v1142_v0  ;;  %v1272_v0 = vld [vmem:[#allocation2 + $0x1ba8] sm:$0xff]  ;;  %v2319_v53 = vpop.f32.mrb[91].mxu1 }
 0x6bc   :  { %v13107_v50 = vpop.permute.xlu1 %11106  ;;  %2580 = vmatprep.mubr.f32.mxu1 %v1272_v0  ;;  %v1275_v0 = vld [vmem:[#allocation2 + $0x1bc0] sm:$0xff] }
 0x6bd   :  { %v3497_v38 = vpop.f32.mrb[14].mxu0  ;;  %2581 = vmatmul.mubr.f32.gmra.mrb[196].mxu1 %v1271_v47 }
 0x6be   :  { %v3498_v52 = vadd.f32 %v3497_v38, %v12970_v3  ;;  %v3499_v57 = vpop.f32.mrb[15].mxu0  ;;  %3761 = vmatmul.mubr.f32.gmra.mrb[120].mxu0 %v1141_v44  ;;  %v13111_v30 = vpop.permute.xlu0 %11101 }
 0x6bf   :  { %3765 = vmatprep.mubr.f32.mxu0 %v1146_v24  ;;  %v1276_v24 = vld [vmem:[#allocation2 + $0x1bc8] sm:$0xff]  ;;  %v13117_v57 = vpop.f32.mrb[92].mxu1 }
 0x6c0   :  { %v11290_v61 = vpack.i.bf16 %v3498_v52, %v3493_v36  ;;  %v13115_v38 = vpop.permute.xlu1 %11116  ;;  %v1149_v36 = vld [vmem:[#allocation2 + $0x17d0] sm:$0xff]  ;;  %2585 = vmatprep.mubr.f32.mxu1 %v1276_v24  ;;  %v1154_v52 = vld [vmem:[#allocation2 + $0x17f8] sm:$0xff]  ;;  %14611 = vst [vmem:[#allocation71_spill] sm:$0xff] %v13117_v57  ;;  %v2324_v47 = vpop.f32.mrb[93].mxu1  ;;  %v1279_v57 = vld [vmem:[#allocation2 + $0x1be0] sm:$0xff] }
 0x6c1   :  { %v3502_v26 = vpop.f32.mrb[16].mxu0  ;;  %14610 = vst [vmem:[#allocation70_spill] sm:$0xff] %v13115_v38  ;;  %2586 = vmatmul.mubr.f32.gmra.mrb[198].mxu1 %v1275_v0  ;;  %v1158_v24 = vld [vmem:[#allocation2 + $0x1818] sm:$0xff]  ;;  %v13124_v43 = vpop.f32.mrb[94].mxu1 }
 0x6c2   :  { %v3503_v3 = vadd.f32 %v3502_v26, %v12973_v18  ;;  %3766 = vmatmul.mubr.f32.gmra.mrb[122].mxu0 %v1145_v37  ;;  %v3504_v44 = vpop.f32.mrb[17].mxu0  ;;  %11291 = vrot.lane.b32.xlu0 %v11290_v61, %s12232_s16  ;;  %v13119_v5 = vpop.permute.xlu0 %11111  ;;  %v1153_v61 = vld [vmem:[#allocation2 + $0x17f0] sm:$0xff]  ;;  %14613 = vst [vmem:[#allocation73_spill] sm:$0xff] %v13124_v43 }
 0x6c3   :  { %3770 = vmatprep.mubr.f32.mxu0 %v1150_v1  ;;  %v1280_v1 = vld [vmem:[#allocation2 + $0x1be8] sm:$0xff]  ;;  %v2329_v47 = vpop.f32.mrb[95].mxu1 }
 0x6c4   :  { %v13122_v37 = vpop.permute.xlu1 %11126  ;;  %2590 = vmatprep.mubr.f32.mxu1 %v1280_v1  ;;  %v1283_v1 = vld [vmem:[#allocation2 + $0x1c00] sm:$0xff] }
 0x6c5   :  { %v3507_v53 = vpop.f32.mrb[18].mxu0  ;;  %14612 = vst [vmem:[#allocation72_spill] sm:$0xff] %v13122_v37  ;;  %2591 = vmatmul.mubr.f32.gmra.mrb[200].mxu1 %v1279_v57 }
 0x6c6   :  { %v3508_v18 = vadd.f32 %v3507_v53, %v12975_v32  ;;  %v3509_v26 = vpop.f32.mrb[19].mxu0  ;;  %3771 = vmatmul.mubr.f32.gmra.mrb[124].mxu0 %v1149_v36  ;;  %v13126_v0 = vpop.permute.xlu0 %11121 }
 0x6c7   :  { %3775 = vmatprep.mubr.f32.mxu0 %v1154_v52  ;;  %14614 = vst [vmem:[#allocation74_spill] sm:$0xff] %v13126_v0  ;;  %v1284_v52 = vld [vmem:[#allocation2 + $0x1c08] sm:$0xff]  ;;  %v13132_v26 = vpop.f32.mrb[96].mxu1 }
 0x6c8   :  { %v11295_v44 = vpack.i.bf16 %v3508_v18, %v3503_v3  ;;  %v13130_v53 = vpop.permute.xlu1 %11136  ;;  %v1157_v3 = vld [vmem:[#allocation2 + $0x1810] sm:$0xff]  ;;  %2595 = vmatprep.mubr.f32.mxu1 %v1284_v52  ;;  %v1162_v18 = vld [vmem:[#allocation2 + $0x1838] sm:$0xff]  ;;  %14616 = vst [vmem:[#allocation76_spill] sm:$0xff] %v13132_v26  ;;  %v2334_v57 = vpop.f32.mrb[97].mxu1  ;;  %v1287_v26 = vld [vmem:[#allocation2 + $0x1c20] sm:$0xff] }
 0x6c9   :  { %v3512_v25 = vpop.f32.mrb[20].mxu0  ;;  %14615 = vst [vmem:[#allocation75_spill] sm:$0xff] %v13130_v53  ;;  %2596 = vmatmul.mubr.f32.gmra.mrb[202].mxu1 %v1283_v1  ;;  %v1166_v52 = vld [vmem:[#allocation2 + $0x1858] sm:$0xff]  ;;  %v13139_v53 = vpop.f32.mrb[98].mxu1 }
 0x6ca   :  { %v3513_v32 = vadd.f32 %v3512_v25, %v12978_v49  ;;  %3776 = vmatmul.mubr.f32.gmra.mrb[126].mxu0 %v1153_v61  ;;  %v3514_v36 = vpop.f32.mrb[21].mxu0  ;;  %11296 = vrot.lane.b32.xlu1 %v11295_v44, %s12232_s16  ;;  %v13134_v43 = vpop.permute.xlu0 %11131  ;;  %v1161_v44 = vld [vmem:[#allocation2 + $0x1830] sm:$0xff]  ;;  %14617 = vst [vmem:[#allocation77_spill] sm:$0xff] %v13139_v53 }
 0x6cb   :  { %3780 = vmatprep.mubr.f32.mxu0 %v1158_v24  ;;  %v1288_v24 = vld [vmem:[#allocation2 + $0x1c28] sm:$0xff]  ;;  %v2339_v57 = vpop.f32.mrb[99].mxu1 }
 0x6cc   :  { %v13137_v61 = vpop.permute.xlu1 %11146  ;;  %2600 = vmatprep.mubr.f32.mxu1 %v1288_v24  ;;  %v1291_v24 = vld [vmem:[#allocation2 + $0x1c40] sm:$0xff] }
 0x6cd   :  { %v3517_v47 = vpop.f32.mrb[22].mxu0  ;;  %2601 = vmatmul.mubr.f32.gmra.mrb[204].mxu1 %v1287_v26 }
 0x6ce   :  { %v3518_v49 = vadd.f32 %v3517_v47, %v12980_v2  ;;  %v3519_v25 = vpop.f32.mrb[23].mxu0  ;;  %3781 = vmatmul.mubr.f32.gmra.mrb[128].mxu0 %v1157_v3  ;;  %v13141_v1 = vpop.permute.xlu0 %11141 }
 0x6cf   :  { %3785 = vmatprep.mubr.f32.mxu0 %v1162_v18  ;;  %v1292_v18 = vld [vmem:[#allocation2 + $0x1c48] sm:$0xff]  ;;  %v13147_v25 = vpop.f32.mrb[100].mxu1 }
 0x6d0   :  { %v11300_v36 = vpack.i.bf16 %v3518_v49, %v3513_v32  ;;  %v13145_v47 = vpop.permute.xlu1 %11156  ;;  %v1165_v32 = vld [vmem:[#allocation2 + $0x1850] sm:$0xff]  ;;  %2605 = vmatprep.mubr.f32.mxu1 %v1292_v18  ;;  %v1170_v49 = vld [vmem:[#allocation2 + $0x1878] sm:$0xff]  ;;  %14619 = vst [vmem:[#allocation79_spill] sm:$0xff] %v13147_v25  ;;  %v2344_v26 = vpop.f32.mrb[101].mxu1  ;;  %v1295_v25 = vld [vmem:[#allocation2 + $0x1c60] sm:$0xff] }
 0x6d1   :  { %v3522_v37 = vpop.f32.mrb[24].mxu0  ;;  %14618 = vst [vmem:[#allocation78_spill] sm:$0xff] %v13145_v47  ;;  %2606 = vmatmul.mubr.f32.gmra.mrb[206].mxu1 %v1291_v24  ;;  %v1174_v18 = vld [vmem:[#allocation2 + $0x1898] sm:$0xff]  ;;  %v13154_v0 = vpop.f32.mrb[102].mxu1 }
 0x6d2   :  { %v3523_v2 = vadd.f32 %v3522_v37, %v12983_v20  ;;  %3786 = vmatmul.mubr.f32.gmra.mrb[130].mxu0 %v1161_v44  ;;  %v3524_v3 = vpop.f32.mrb[25].mxu0  ;;  %11301 = vrot.lane.b32.xlu0 %v11300_v36, %s12232_s16  ;;  %v13149_v53 = vpop.permute.xlu0 %11151  ;;  %v1169_v36 = vld [vmem:[#allocation2 + $0x1870] sm:$0xff]  ;;  %14621 = vst [vmem:[#allocation81_spill] sm:$0xff] %v13154_v0 }
 0x6d3   :  { %3790 = vmatprep.mubr.f32.mxu0 %v1166_v52  ;;  %v1296_v52 = vld [vmem:[#allocation2 + $0x1c68] sm:$0xff]  ;;  %v2349_v26 = vpop.f32.mrb[103].mxu1 }
 0x6d4   :  { %v13152_v44 = vpop.permute.xlu1 %11161  ;;  %2610 = vmatprep.mubr.f32.mxu1 %v1296_v52  ;;  %v1299_v52 = vld [vmem:[#allocation2 + $0x1c80] sm:$0xff] }
 0x6d5   :  { %v3527_v57 = vpop.f32.mrb[26].mxu0  ;;  %14620 = vst [vmem:[#allocation80_spill] sm:$0xff] %v13152_v44  ;;  %2611 = vmatmul.mubr.f32.gmra.mrb[208].mxu1 %v1295_v25 }
 0x6d6   :  { %v3528_v20 = vadd.f32 %v3527_v57, %v12985_v34  ;;  %v3529_v37 = vpop.f32.mrb[27].mxu0  ;;  %3791 = vmatmul.mubr.f32.gmra.mrb[132].mxu0 %v1165_v32  ;;  %v13156_v24 = vpop.permute.xlu0 %11171 }
 0x6d7   :  { %3795 = vmatprep.mubr.f32.mxu0 %v1170_v49  ;;  %v1300_v49 = vld [vmem:[#allocation2 + $0x1c88] sm:$0xff]  ;;  %v13162_v37 = vpop.f32.mrb[104].mxu1 }
 0x6d8   :  { %v11305_v3 = vpack.i.bf16 %v3528_v20, %v3523_v2  ;;  %v13160_v57 = vpop.permute.xlu1 %11166  ;;  %v1173_v2 = vld [vmem:[#allocation2 + $0x1890] sm:$0xff]  ;;  %2615 = vmatprep.mubr.f32.mxu1 %v1300_v49  ;;  %v1178_v20 = vld [vmem:[#allocation2 + $0x18b8] sm:$0xff]  ;;  %14623 = vst [vmem:[#allocation83_spill] sm:$0xff] %v13162_v37  ;;  %v2354_v25 = vpop.f32.mrb[105].mxu1  ;;  %v1303_v37 = vld [vmem:[#allocation2 + $0x1ca0] sm:$0xff] }
 0x6d9   :  { %v3532_v47 = vpop.f32.mrb[28].mxu0  ;;  %14622 = vst [vmem:[#allocation82_spill] sm:$0xff] %v13160_v57  ;;  %2616 = vmatmul.mubr.f32.gmra.mrb[210].mxu1 %v1299_v52  ;;  %v1182_v49 = vld [vmem:[#allocation2 + $0x18d8] sm:$0xff]  ;;  %v13169_v57 = vpop.f32.mrb[106].mxu1 }
 0x6da   :  { %v3533_v34 = vadd.f32 %v3532_v47, %v12988_v56  ;;  %3796 = vmatmul.mubr.f32.gmra.mrb[134].mxu0 %v1169_v36  ;;  %v3534_v32 = vpop.f32.mrb[29].mxu0  ;;  %11306 = vrot.lane.b32.xlu1 %v11305_v3, %s12232_s16  ;;  %v13164_v0 = vpop.permute.xlu0 %11181  ;;  %v1177_v3 = vld [vmem:[#allocation2 + $0x18b0] sm:$0xff]  ;;  %14625 = vst [vmem:[#allocation85_spill] sm:$0xff] %v13169_v57 }
 0x6db   :  { %3800 = vmatprep.mubr.f32.mxu0 %v1174_v18  ;;  %v1304_v18 = vld [vmem:[#allocation2 + $0x1ca8] sm:$0xff]  ;;  %v2359_v25 = vpop.f32.mrb[107].mxu1 }
 0x6dc   :  { %v13167_v36 = vpop.permute.xlu1 %11176  ;;  %2620 = vmatprep.mubr.f32.mxu1 %v1304_v18  ;;  %v1307_v18 = vld [vmem:[#allocation2 + $0x1cc0] sm:$0xff] }
 0x6dd   :  { %v3537_v26 = vpop.f32.mrb[30].mxu0  ;;  %14624 = vst [vmem:[#allocation84_spill] sm:$0xff] %v13167_v36  ;;  %2621 = vmatmul.mubr.f32.gmra.mrb[212].mxu1 %v1303_v37 }
 0x6de   :  { %v3538_v56 = vadd.f32 %v3537_v26, %v12990_v9  ;;  %v3539_v47 = vpop.f32.mrb[31].mxu0  ;;  %3801 = vmatmul.mubr.f32.gmra.mrb[136].mxu0 %v1173_v2  ;;  %v13171_v52 = vpop.permute.xlu0 %11201 }
 0x6df   :  { %3805 = vmatprep.mubr.f32.mxu0 %v1178_v20  ;;  %14626 = vst [vmem:[#allocation86_spill] sm:$0xff] %v13171_v52  ;;  %v1308_v20 = vld [vmem:[#allocation2 + $0x1cc8] sm:$0xff]  ;;  %v13177_v47 = vpop.f32.mrb[108].mxu1 }
 0x6e0   :  { %v11310_v32 = vpack.i.bf16 %v3538_v56, %v3533_v34  ;;  %v13175_v26 = vpop.permute.xlu1 %11186  ;;  %v1181_v34 = vld [vmem:[#allocation2 + $0x18d0] sm:$0xff]  ;;  %2625 = vmatprep.mubr.f32.mxu1 %v1308_v20  ;;  %v1186_v56 = vld [vmem:[#allocation2 + $0x18f8] sm:$0xff]  ;;  %14627 = vst [vmem:[#allocation87_spill] sm:$0xff] %v13177_v47  ;;  %v2364_v37 = vpop.f32.mrb[109].mxu1  ;;  %v1311_v47 = vld [vmem:[#allocation2 + $0x1ce0] sm:$0xff] }
 0x6e1   :  { %v3542_v44 = vpop.f32.mrb[32].mxu0  ;;  %2626 = vmatmul.mubr.f32.gmra.mrb[214].mxu1 %v1307_v18  ;;  %v1190_v20 = vld [vmem:[#allocation2 + $0x1918] sm:$0xff]  ;;  %v13184_v36 = vpop.f32.mrb[110].mxu1  ;;  %v11014_v37 = vunpack.i.h.bf16 %v13035_v27 }
 0x6e2   :  { %v3543_v9 = vadd.f32 %v3542_v44, %v12993_v29  ;;  %3806 = vmatmul.mubr.f32.gmra.mrb[138].mxu0 %v1177_v3  ;;  %v3544_v2 = vpop.f32.mrb[33].mxu0  ;;  %11311 = vrot.lane.b32.xlu0 %v11310_v32, %s12232_s16  ;;  %v13179_v57 = vpop.permute.xlu0 %11211  ;;  %v1185_v32 = vld [vmem:[#allocation2 + $0x18f0] sm:$0xff]  ;;  %14628 = vst [vmem:[#allocation88_spill] sm:$0xff] %v13184_v36  ;;  %v11133_v36 = vunpack.i.l.bf16 %v13134_v43 }
 0x6e3   :  { %3810 = vmatprep.mubr.f32.mxu0 %v1182_v49  ;;  %v1312_v49 = vld [vmem:[#allocation2 + $0x1ce8] sm:$0xff]  ;;  %v2369_v52 = vpop.f32.mrb[111].mxu1  ;;  %v11214_v54 = vunpack.i.h.bf16 %v13179_v57 }
 0x6e4   :  { %v13182_v3 = vpop.permute.xlu1 %11191  ;;  %2630 = vmatprep.mubr.f32.mxu1 %v1312_v49  ;;  %v1189_v52 = vld [vmem:[#allocation2 + $0x1910] sm:$0xff] }
 0x6e5   :  { %v3547_v25 = vpop.f32.mrb[34].mxu0  ;;  %2631 = vmatmul.mubr.f32.gmra.mrb[216].mxu1 %v1311_v47  ;;  %v13197_v47 = vpop.f32.mrb[112].mxu1 }
 0x6e6   :  { %v3548_v29 = vadd.f32 %v3547_v25, %v12995_v46  ;;  %v3549_v44 = vpop.f32.mrb[35].mxu0  ;;  %3811 = vmatmul.mubr.f32.gmra.mrb[140].mxu0 %v1181_v34  ;;  %v11013_v46 = vunpack.i.l.bf16 %v13035_v27  ;;  %v13188_v25 = vpop.permute.xlu0 %11221  ;;  %v11094_v27 = vunpack.i.h.bf16 %v13104_v41  ;;  %14630 = vst [vmem:[#allocation90_spill] sm:$0xff] %v13197_v47 }
 0x6e7   :  { %3815 = vmatprep.mubr.f32.mxu0 %v1186_v56  ;;  %v11053_v44 = vunpack.i.l.bf16 %v13066_v14 }
 0x6e8   :  { %v11315_v2 = vpack.i.bf16 %v3548_v29, %v3543_v9  ;;  %v1316_v9 = vld [vmem:[#allocation2 + $0x1d08] sm:$0xff]  ;;  %v11054_v29 = vunpack.i.h.bf16 %v13066_v14  ;;  %v13194_v49 = vpop.permute.xlu1 %11196  ;;  %v11134_v14 = vunpack.i.h.bf16 %v13134_v43 }
 0x6e9   :  { %v3552_v18 = vpop.f32.mrb[36].mxu0  ;;  %14629 = vst [vmem:[#allocation89_spill] sm:$0xff] %v13194_v49  ;;  %2635 = vmatprep.mubr.f32.mxu1 %v1316_v9  ;;  %v5068_v9 = vsel %vm5061_vm0, %v12883_v35, %v11013_v46  ;;  %v11174_v49 = vunpack.i.h.bf16 %v13156_v24  ;;  %v1193_v35 = vld [vmem:[#allocation2 + $0x1930] sm:$0xff]  ;;  %v1320_v43 = vld [vmem:[#allocation2 + $0x1d28] sm:$0xff] }
 0x6ea   :  { %v3553_v34 = vadd.f32 %v3552_v18, %v12998_v7  ;;  %3816 = vmatmul.mubr.f32.gmra.mrb[142].mxu0 %v1185_v32  ;;  %v3554_v56 = vpop.f32.mrb[37].mxu0  ;;  %11316 = vrot.lane.b32.xlu0 %v11315_v2, %s12233_s7  ;;  %v1194_v7 = vld [vmem:[#allocation2 + $0x1938] sm:$0xff]  ;;  %v1315_v32 = vld [vmem:[#allocation2 + $0x1d00] sm:$0xff]  ;;  %v5069_v2 = vsel %vm5061_vm0, %v12885_v39, %v11014_v37  ;;  %v11093_v18 = vunpack.i.l.bf16 %v13104_v41  ;;  %v13207_v47 = vpop.permute.xlu0 %11231  ;;  %v5085_v37 = vsel %vm5078_vm1, %v5068_v9, %v11053_v44 }
 0x6eb   :  { %3820 = vmatprep.mubr.f32.mxu0 %v1190_v20  ;;  %v2374_v20 = vpop.f32.mrb[113].mxu1  ;;  %2636 = vmatmul.mubr.f32.gmra.mrb[218].mxu1 %v1315_v32  ;;  %v5086_v41 = vsel %vm5078_vm1, %v5069_v2, %v11054_v29  ;;  %v11173_v32 = vunpack.i.l.bf16 %v13156_v24  ;;  %v1319_v29 = vld [vmem:[#allocation2 + $0x1d20] sm:$0xff] }
 0x6ec   :  { %v13213_v20 = vpop.permute.xlu1 %11206  ;;  %v5103_v46 = vsel %vm5095_vm2, %v5086_v41, %v11094_v27  ;;  %2640 = vmatprep.mubr.f32.mxu1 %v1320_v43  ;;  %v5102_v44 = vsel %vm5095_vm2, %v5085_v37, %v11093_v18  ;;  %v5320_v41 = vld [vmem:[#allocation4 + $0x20] sm:$0xff]  ;;  %v5321_v18 = vld [vmem:[#allocation4 + $0x28] sm:$0xff] }
 0x6ed   :  { %v3557_v56 = vpop.f32.mrb[38].mxu0  ;;  %v5120_v24 = vsel %vm5112_vm3, %v5103_v46, %v11134_v14  ;;  %v5119_v27 = vsel %vm5112_vm3, %v5102_v44, %v11133_v36  ;;  %v1324_v37 = vld [vmem:[#allocation2 + $0x1d48] sm:$0xff]  ;;  %v1197_v36 = vld [vmem:[#allocation2 + $0x1950] sm:$0xff]  ;;  %v1202_v44 = vld [vmem:[#allocation2 + $0x1978] sm:$0xff] }
 0x6ee   :  { %v3558_v38 = vadd.f32 %v3557_v56, %v13000_v28  ;;  %v3559_v39 = vpop.f32.mrb[39].mxu0  ;;  %3821 = vmatmul.mubr.f32.gmra.mrb[144].mxu0 %v1189_v52  ;;  %v11213_v28 = vunpack.i.l.bf16 %v13179_v57  ;;  %v1198_v52 = vld [vmem:[#allocation2 + $0x1958] sm:$0xff]  ;;  %v5137_v9 = vsel %vm5129_vm4, %v5120_v24, %v11174_v49  ;;  %v5136_v14 = vsel %vm5129_vm4, %v5119_v27, %v11173_v32  ;;  %v1323_v24 = vld [vmem:[#allocation2 + $0x1d40] sm:$0xff] }
 0x6ef   :  { %3825 = vmatprep.mubr.f32.mxu0 %v1194_v7  ;;  %v13218_v39 = vpop.f32.mrb[114].mxu1  ;;  %2641 = vmatmul.mubr.f32.gmra.mrb[220].mxu1 %v1319_v29  ;;  %v9655_v49 = vpack.c.bf16 %v5321_v18, %v5320_v41  ;;  %v1206_v41 = vld [vmem:[#allocation2 + $0x1998] sm:$0xff] }
 0x6f0   :  { %v11320_v56 = vpack.i.bf16 %v3558_v38, %v3553_v34  ;;  %v2379_v2 = vpop.f32.mrb[115].mxu1  ;;  %v13227_v43 = vpop.permute.xlu1 %11216  ;;  %2645 = vmatprep.mubr.f32.mxu1 %v1324_v37  ;;  %v1327_v37 = vld [vmem:[#allocation2 + $0x1d60] sm:$0xff] }
 0x6f1   :  { %v3562_v7 = vpop.f32.mrb[40].mxu0  ;;  %9656 = vmatprep.subr.bf16.mxu1 %v9655_v49 }
 0x6f2   :  { %v3563_v38 = vadd.f32 %v3562_v7, %v13003_v58  ;;  %3826 = vmatmul.mubr.f32.gmra.mrb[146].mxu0 %v1193_v35  ;;  %v11252_v57 = vpop.permute.xlu0 %11251  ;;  %v3564_v34 = vpop.f32.mrb[41].mxu0  ;;  %11321 = vrot.lane.b32.xlu0 %v11320_v56, %s12233_s7  ;;  %v5154_v58 = vsel %vm5146_vm5, %v5137_v9, %v11214_v54  ;;  %v5153_v35 = vsel %vm5146_vm5, %v5136_v14, %v11213_v28  ;;  %v1201_v9 = vld [vmem:[#allocation2 + $0x1970] sm:$0xff] }
 0x6f3   :  { %v11254_v46 = vunpack.i.h.bf16 %v11252_v57  ;;  %v11253_v29 = vunpack.i.l.bf16 %v11252_v57  ;;  %3830 = vmatprep.mubr.f32.mxu0 %v1198_v52  ;;  %v13231_v56 = vpop.f32.mrb[116].mxu1  ;;  %2646 = vmatmul.mubr.f32.gmra.mrb[222].mxu1 %v1323_v24  ;;  %v1328_v57 = vld [vmem:[#allocation2 + $0x1d68] sm:$0xff]  ;;  %v1205_v24 = vld [vmem:[#allocation2 + $0x1990] sm:$0xff] }
 0x6f4   :  { %v2384_v52 = vpop.f32.mrb[117].mxu1  ;;  %9658 = vmatpush3.bf16.msra.mxu1 %v9655_v49  ;;  %v13240_v28 = vpop.permute.xlu1 %11226  ;;  %2650 = vmatprep.mubr.f32.mxu1 %v1328_v57 }
 0x6f5   :  { %v13234_v7 = vsel %vm5163_vm6, %v5154_v58, %v11254_v46  ;;  %v13237_v32 = vsel %vm5163_vm6, %v5153_v35, %v11253_v29  ;;  %v3567_v2 = vpop.f32.mrb[42].mxu0  ;;  %v13242_v18 = vpop.f32.mrb[118].mxu1  ;;  %v10999_v29 = vunpack.i.h.bf16 %v13020_v60  ;;  %v1332_v58 = vld [vmem:[#allocation2 + $0x1d88] sm:$0xff]  ;;  %v11003_v35 = vunpack.i.l.bf16 %v13024_v33  ;;  %v1210_v52 = vld [vmem:[#allocation2 + $0x19b8] sm:$0xff] }
 0x6f6   :  { %v3568_v27 = vadd.f32 %v3567_v2, %v13005_v21  ;;  %v3569_v54 = vpop.f32.mrb[43].mxu0  ;;  %3831 = vmatmul.mubr.f32.gmra.mrb[148].mxu0 %v1197_v36  ;;  %v2389_v46 = vpop.f32.mrb[119].mxu1  ;;  %v10998_v21 = vunpack.i.l.bf16 %v13020_v60  ;;  %v11024_v2 = vunpack.i.h.bf16 %v13040_v6 }
 0x6f7   :  { %3835 = vmatprep.mubr.f32.mxu0 %v1202_v44  ;;  %2651 = vmatmul.mubr.f32.gmra.mrb[224].mxu1 %v1327_v37  ;;  %v13253_v60 = vpop.f32.mrb[120].mxu1  ;;  %v11064_v54 = vunpack.i.h.bf16 %v13074_v16  ;;  %v13273_v46 = vsel %vm5061_vm0, %v12875_v19, %v11003_v35  ;;  %v1335_v35 = vld [vmem:[#allocation2 + $0x1da0] sm:$0xff] }
 0x6f8   :  { %v11325_v34 = vpack.i.bf16 %v3568_v27, %v3563_v38  ;;  %v11004_v38 = vunpack.i.h.bf16 %v13024_v33  ;;  %v13250_v44 = vpop.permute.xlu1 %11236  ;;  %2655 = vmatprep.mubr.f32.mxu1 %v1332_v58  ;;  %v11023_v27 = vunpack.i.l.bf16 %v13040_v6  ;;  %v2394_v57 = vpop.f32.mrb[121].mxu1  ;;  %v13259_v33 = vsel %vm5061_vm0, %v12873_v15, %v10999_v29 }
 0x6f9   :  { %v3572_v14 = vpop.f32.mrb[44].mxu0  ;;  %v11104_v15 = vunpack.i.h.bf16 %v13111_v30  ;;  %v11103_v29 = vunpack.i.l.bf16 %v13111_v30  ;;  %v13283_v19 = vpop.f32.mrb[122].mxu1 }
 0x6fa   :  { %v3573_v36 = vadd.f32 %v3572_v14, %v13008_v45  ;;  %3836 = vmatmul.mubr.f32.gmra.mrb[150].mxu0 %v1201_v9  ;;  %v3574_v49 = vpop.f32.mrb[45].mxu0  ;;  %11326 = vrot.lane.b32.xlu1 %v11325_v34, %s12233_s7  ;;  %v1331_v45 = vld [vmem:[#allocation2 + $0x1d80] sm:$0xff]  ;;  %v13263_v34 = vsel %vm5061_vm0, %v12871_v11, %v10998_v21  ;;  %v13269_v6 = vsel %vm5061_vm0, %v12877_v23, %v11004_v38  ;;  %v1336_v21 = vld [vmem:[#allocation2 + $0x1da8] sm:$0xff]  ;;  %v11143_v23 = vunpack.i.l.bf16 %v13141_v1  ;;  %v1214_v38 = vld [vmem:[#allocation2 + $0x19d8] sm:$0xff] }
 0x6fb   :  { %3840 = vmatprep.mubr.f32.mxu0 %v1206_v41  ;;  %2656 = vmatmul.mubr.f32.gmra.mrb[226].mxu1 %v1331_v45  ;;  %v11063_v41 = vunpack.i.l.bf16 %v13074_v16  ;;  %v1209_v16 = vld [vmem:[#allocation2 + $0x19b0] sm:$0xff]  ;;  %v11144_v49 = vunpack.i.h.bf16 %v13141_v1  ;;  %v5072_v30 = vsel %vm5061_vm0, %v12891_v51, %v11023_v27  ;;  %v11183_v45 = vunpack.i.l.bf16 %v13164_v0  ;;  %v1340_v51 = vld [vmem:[#allocation2 + $0x1dc8] sm:$0xff] }
 0x6fc   :  { %v13277_v11 = vpop.permute.xlu1 %11241  ;;  %2660 = vmatprep.mubr.f32.mxu1 %v1336_v21  ;;  %v11009_v27 = vunpack.i.h.bf16 %v13029_v22 }
 0x6fd   :  { %v3577_v9 = vpop.f32.mrb[46].mxu0  ;;  %v5089_v1 = vsel %vm5078_vm1, %v5072_v30, %v11063_v41 }
 0x6fe   :  { %v3578_v37 = vadd.f32 %v3577_v9, %v13010_v12  ;;  %v3579_v14 = vpop.f32.mrb[47].mxu0  ;;  %3841 = vmatmul.mubr.f32.gmra.mrb[152].mxu0 %v1205_v24  ;;  %v5073_v12 = vsel %vm5061_vm0, %v12893_v55, %v11024_v2  ;;  %v2399_v2 = vpop.f32.mrb[123].mxu1  ;;  %v11223_v9 = vunpack.i.l.bf16 %v13188_v25  ;;  %v5106_v41 = vsel %vm5095_vm2, %v5089_v1, %v11103_v29 }
 0x6ff   :  { %3845 = vmatprep.mubr.f32.mxu0 %v1210_v52  ;;  %v5090_v24 = vsel %vm5078_vm1, %v5073_v12, %v11064_v54  ;;  %v11184_v52 = vunpack.i.h.bf16 %v13164_v0  ;;  %2661 = vmatmul.mubr.f32.gmra.mrb[228].mxu1 %v1335_v35  ;;  %v11029_v0 = vunpack.i.h.bf16 %v13062_v17  ;;  %v5123_v12 = vsel %vm5112_vm3, %v5106_v41, %v11143_v23  ;;  %v1218_v35 = vld [vmem:[#allocation2 + $0x19f8] sm:$0xff]  ;;  %v13307_v30 = vpop.f32.mrb[124].mxu1 }
 0x700   :  { %v11330_v58 = vpack.i.bf16 %v3578_v37, %v3573_v36  ;;  %v11224_v36 = vunpack.i.h.bf16 %v13188_v25  ;;  %v5107_v54 = vsel %vm5095_vm2, %v5090_v24, %v11104_v15  ;;  %v13301_v14 = vpop.permute.xlu1 %11246  ;;  %v1213_v25 = vld [vmem:[#allocation2 + $0x19d0] sm:$0xff]  ;;  %2665 = vmatprep.mubr.f32.mxu1 %v1340_v51  ;;  %v1339_v15 = vld [vmem:[#allocation2 + $0x1dc0] sm:$0xff]  ;;  %v5140_v24 = vsel %vm5129_vm4, %v5123_v12, %v11183_v45  ;;  %v2404_v1 = vpop.f32.mrb[125].mxu1  ;;  %v1222_v12 = vld [vmem:[#allocation2 + $0x1a18] sm:$0xff] }
 0x701   :  { %v3582_v55 = vpop.f32.mrb[48].mxu0  ;;  %v5124_v21 = vsel %vm5112_vm3, %v5107_v54, %v11144_v49  ;;  %v5157_v23 = vsel %vm5146_vm5, %v5140_v24, %v11223_v9  ;;  %v11109_v54 = vunpack.i.h.bf16 %v13107_v50  ;;  %v11148_v9 = vunpack.i.l.bf16 %v13137_v61 }
 0x702   :  { %v13294_v57 = vadd.f32 %v3582_v55, %v13013_v40  ;;  %v3584_v37 = vpop.f32.mrb[49].mxu0  ;;  %3846 = vmatmul.mubr.f32.gmra.mrb[154].mxu0 %v1209_v16  ;;  %11331 = vrot.lane.b32.xlu0 %v11330_v58, %s12233_s7  ;;  %v11028_v40 = vunpack.i.l.bf16 %v13062_v17  ;;  %v11069_v16 = vunpack.i.h.bf16 %v13085_v48  ;;  %v5141_v29 = vsel %vm5129_vm4, %v5124_v21, %v11184_v52  ;;  %v1344_v21 = vld [vmem:[#allocation2 + $0x1de8] sm:$0xff] }
 0x703   :  { %3850 = vmatprep.mubr.f32.mxu0 %v1214_v38  ;;  %2666 = vmatmul.mubr.f32.gmra.mrb[230].mxu1 %v1339_v15  ;;  %v11068_v17 = vunpack.i.l.bf16 %v13085_v48  ;;  %v5158_v49 = vsel %vm5146_vm5, %v5141_v29, %v11224_v36  ;;  %v11108_v52 = vunpack.i.l.bf16 %v13107_v50  ;;  %v1217_v48 = vld [vmem:[#allocation2 + $0x19f0] sm:$0xff]  ;;  %v5075_v36 = vsel %vm5061_vm0, %v12897_v63, %v11029_v0  ;;  %v1343_v15 = vld [vmem:[#allocation2 + $0x1de0] sm:$0xff] }
 0x704   :  { %v11262_v58 = vpop.permute.xlu0 %11261  ;;  %2670 = vmatprep.mubr.f32.mxu1 %v1344_v21  ;;  %v5092_v29 = vsel %vm5078_vm1, %v5075_v36, %v11069_v16  ;;  %v11189_v63 = vunpack.i.h.bf16 %v13175_v26  ;;  %v11188_v0 = vunpack.i.l.bf16 %v13175_v26  ;;  %v11034_v26 = vunpack.i.h.bf16 %v13046_v31  ;;  %v1347_v36 = vld [vmem:[#allocation2 + $0x1e00] sm:$0xff] }
 0x705   :  { %v11264_v38 = vunpack.i.h.bf16 %v11262_v58  ;;  %v11263_v55 = vunpack.i.l.bf16 %v11262_v58  ;;  %v3587_v2 = vpop.f32.mrb[50].mxu0  ;;  %v13330_v58 = vpop.f32.mrb[126].mxu1  ;;  %v5109_v16 = vsel %vm5095_vm2, %v5092_v29, %v11109_v54 }
 0x706   :  { %v3588_v37 = vadd.f32 %v3587_v2, %v13015_v62  ;;  %v3589_v51 = vpop.f32.mrb[51].mxu0  ;;  %3851 = vmatmul.mubr.f32.gmra.mrb[156].mxu0 %v1213_v25  ;;  %v11149_v62 = vunpack.i.h.bf16 %v13137_v61  ;;  %v13327_v25 = vpop.permute.xlu1 %11256 }
 0x707   :  { %v13318_v45 = vsel %vm5163_vm6, %v5158_v49, %v11264_v38  ;;  %v13321_v41 = vsel %vm5163_vm6, %v5157_v23, %v11263_v55  ;;  %3855 = vmatprep.mubr.f32.mxu0 %v1218_v35  ;;  %v5074_v35 = vsel %vm5061_vm0, %v12895_v59, %v11028_v40  ;;  %v2409_v61 = vpop.f32.mrb[127].mxu1  ;;  %2671 = vmatmul.mubr.f32.gmra.mrb[232].mxu1 %v1343_v15  ;;  %v11228_v55 = vunpack.i.l.bf16 %v13240_v28  ;;  %v1348_v59 = vld [vmem:[#allocation2 + $0x1e08] sm:$0xff] }
 0x708   :  { %v11335_v50 = vpack.i.bf16 %v3588_v37, %v13294_v57  ;;  %v5091_v38 = vsel %vm5078_vm1, %v5074_v35, %v11068_v17  ;;  %v11229_v57 = vunpack.i.h.bf16 %v13240_v28  ;;  %v11008_v40 = vunpack.i.l.bf16 %v13029_v22  ;;  %v1221_v17 = vld [vmem:[#allocation2 + $0x1a10] sm:$0xff]  ;;  %2675 = vmatprep.mubr.f32.mxu1 %v1348_v59  ;;  %v13350_v21 = vpop.f32.mrb[128].mxu1 }
 0x709   :  { %v3592_v24 = vpop.f32.mrb[52].mxu0  ;;  %v5108_v49 = vsel %vm5095_vm2, %v5091_v38, %v11108_v52  ;;  %v11033_v28 = vunpack.i.l.bf16 %v13046_v31  ;;  %v5126_v23 = vsel %vm5112_vm3, %v5109_v16, %v11149_v62  ;;  %v2414_v35 = vpop.f32.mrb[129].mxu1  ;;  %v11073_v31 = vunpack.i.l.bf16 %v13081_v10  ;;  %v1230_v16 = vld [vmem:[#allocation2 + $0x1a58] sm:$0xff] }
 0x70a   :  { %v3593_v2 = vadd.f32 %v3592_v24, %v13018_v42  ;;  %v3594_v1 = vpop.f32.mrb[53].mxu0  ;;  %3856 = vmatmul.mubr.f32.gmra.mrb[158].mxu0 %v1217_v48  ;;  %11336 = vrot.lane.b32.xlu1 %v11335_v50, %s12233_s7  ;;  %v11074_v42 = vunpack.i.h.bf16 %v13081_v10  ;;  %v5125_v37 = vsel %vm5112_vm3, %v5108_v49, %v11148_v9  ;;  %v1226_v48 = vld [vmem:[#allocation2 + $0x1a38] sm:$0xff]  ;;  %v5143_v54 = vsel %vm5129_vm4, %v5126_v23, %v11189_v63  ;;  %v1225_v10 = vld [vmem:[#allocation2 + $0x1a30] sm:$0xff]  ;;  %v13370_v49 = vpop.f32.mrb[130].mxu1 }
 0x70b   :  { %3860 = vmatprep.mubr.f32.mxu0 %v1222_v12  ;;  %v5142_v52 = vsel %vm5129_vm4, %v5125_v37, %v11188_v0  ;;  %2676 = vmatmul.mubr.f32.gmra.mrb[234].mxu1 %v1347_v36  ;;  %v5160_v62 = vsel %vm5146_vm5, %v5143_v54, %v11229_v57  ;;  %v11114_v61 = vunpack.i.h.bf16 %v13119_v5  ;;  %v11113_v63 = vunpack.i.l.bf16 %v13119_v5  ;;  %v1352_v1 = vld [vmem:[#allocation2 + $0x1e28] sm:$0xff]  ;;  %v1351_v5 = vld [vmem:[#allocation2 + $0x1e20] sm:$0xff]  ;;  %v14631_v36 = vld [vmem:[#allocation48_spill] sm:$0xff] }
 0x70c   :  { %v11267_v51 = vpop.permute.xlu1 %11266  ;;  %v5159_v9 = vsel %vm5146_vm5, %v5142_v52, %v11228_v55  ;;  %v5077_v57 = vsel %vm5061_vm0, %v12901_v8, %v11034_v26  ;;  %v11153_v55 = vunpack.i.l.bf16 %v13149_v53  ;;  %2680 = vmatprep.mubr.f32.mxu1 %v1352_v1  ;;  %v11194_v37 = vunpack.i.h.bf16 %v13182_v3  ;;  %v2419_v26 = vpop.f32.mrb[131].mxu1  ;;  %v1229_v35 = vld [vmem:[#allocation2 + $0x1a50] sm:$0xff] }
 0x70d   :  { %v11269_v50 = vunpack.i.h.bf16 %v11267_v51  ;;  %v11268_v12 = vunpack.i.l.bf16 %v11267_v51  ;;  %v3597_v15 = vpop.f32.mrb[54].mxu0  ;;  %v5094_v23 = vsel %vm5078_vm1, %v5077_v57, %v11074_v42  ;;  %v11193_v51 = vunpack.i.l.bf16 %v13182_v3  ;;  %v14632_v3 = vld [vmem:[#allocation45_spill] sm:$0xff]  ;;  %v13395_v1 = vpop.f32.mrb[132].mxu1 }
 0x70e   :  { %v3598_v29 = vadd.f32 %v3597_v15, %v13022_v13  ;;  %v3599_v24 = vpop.f32.mrb[55].mxu0  ;;  %3861 = vmatmul.mubr.f32.gmra.mrb[160].mxu0 %v1221_v17  ;;  %v11154_v13 = vunpack.i.h.bf16 %v13149_v53  ;;  %v5076_v17 = vsel %vm5061_vm0, %v12899_v4, %v11033_v28  ;;  %v1356_v4 = vld [vmem:[#allocation2 + $0x1e48] sm:$0xff]  ;;  %v1355_v28 = vld [vmem:[#allocation2 + $0x1e40] sm:$0xff]  ;;  %v13386_v42 = vsel %vm5061_vm0, %v14632_v3, %v11009_v27  ;;  %v1234_v27 = vld [vmem:[#allocation2 + $0x1a78] sm:$0xff] }
 0x70f   :  { %v13361_v0 = vsel %vm5163_vm6, %v5160_v62, %v11269_v50  ;;  %v13364_v38 = vsel %vm5163_vm6, %v5159_v9, %v11268_v12  ;;  %3865 = vmatprep.mubr.f32.mxu0 %v1226_v48  ;;  %2681 = vmatmul.mubr.f32.gmra.mrb[236].mxu1 %v1351_v5  ;;  %v5093_v53 = vsel %vm5078_vm1, %v5076_v17, %v11073_v31  ;;  %v11233_v48 = vunpack.i.l.bf16 %v13207_v47  ;;  %v14633_v50 = vld [vmem:[#allocation53_spill] sm:$0xff]  ;;  %v14634_v62 = vld [vmem:[#allocation64_spill] sm:$0xff]  ;;  %v2424_v5 = vpop.f32.mrb[133].mxu1 }
 0x710   :  { %v11340_v59 = vpack.i.bf16 %v3598_v29, %v3593_v2  ;;  %v11234_v2 = vunpack.i.h.bf16 %v13207_v47  ;;  %v11039_v12 = vunpack.i.h.bf16 %v14633_v50  ;;  %v5111_v15 = vsel %vm5095_vm2, %v5094_v23, %v11114_v61  ;;  %2685 = vmatprep.mubr.f32.mxu1 %v1356_v4  ;;  %v1233_v4 = vld [vmem:[#allocation2 + $0x1a70] sm:$0xff] }
 0x711   :  { %v3602_v8 = vpop.f32.mrb[56].mxu0  ;;  %v5110_v47 = vsel %vm5095_vm2, %v5093_v53, %v11113_v63  ;;  %v11038_v31 = vunpack.i.l.bf16 %v14633_v50  ;;  %v11079_v9 = vunpack.i.h.bf16 %v14634_v62  ;;  %v5128_v29 = vsel %vm5112_vm3, %v5111_v15, %v11154_v13  ;;  %v14636_v53 = vld [vmem:[#allocation70_spill] sm:$0xff] }
 0x712   :  { %v3603_v54 = vadd.f32 %v3602_v8, %v14631_v36  ;;  %v3604_v52 = vpop.f32.mrb[57].mxu0  ;;  %3866 = vmatmul.mubr.f32.gmra.mrb[162].mxu0 %v1225_v10  ;;  %11341 = vrot.lane.b32.xlu0 %v11340_v59, %s12233_s7  ;;  %v5127_v24 = vsel %vm5112_vm3, %v5110_v47, %v11153_v55  ;;  %v5145_v57 = vsel %vm5129_vm4, %v5128_v29, %v11194_v37  ;;  %v11078_v17 = vunpack.i.l.bf16 %v14634_v62  ;;  %v14635_v55 = vld [vmem:[#allocation49_spill] sm:$0xff]  ;;  %v1359_v62 = vld [vmem:[#allocation2 + $0x1e60] sm:$0xff] }
 0x713   :  { %3870 = vmatprep.mubr.f32.mxu0 %v1230_v16  ;;  %v5144_v61 = vsel %vm5129_vm4, %v5127_v24, %v11193_v51  ;;  %2686 = vmatmul.mubr.f32.gmra.mrb[238].mxu1 %v1355_v28  ;;  %v5162_v23 = vsel %vm5146_vm5, %v5145_v57, %v11234_v2  ;;  %v11119_v36 = vunpack.i.h.bf16 %v14636_v53  ;;  %v11118_v37 = vunpack.i.l.bf16 %v14636_v53  ;;  %v1360_v28 = vld [vmem:[#allocation2 + $0x1e68] sm:$0xff]  ;;  %v1238_v47 = vld [vmem:[#allocation2 + $0x1a98] sm:$0xff] }
 0x714   :  { %v11272_v10 = vpop.permute.xlu1 %11271  ;;  %v5161_v13 = vsel %vm5146_vm5, %v5144_v61, %v11233_v48  ;;  %v5080_v2 = vsel %vm5078_vm1, %v13259_v33, %v11039_v12  ;;  %v14637_v48 = vld [vmem:[#allocation78_spill] sm:$0xff]  ;;  %2690 = vmatprep.mubr.f32.mxu1 %v1360_v28  ;;  %v5079_v29 = vsel %vm5078_vm1, %v13263_v34, %v11038_v31  ;;  %v1364_v34 = vld [vmem:[#allocation2 + $0x1e88] sm:$0xff]  ;;  %v14640_v31 = vld [vmem:[#allocation56_spill] sm:$0xff] }
 0x715   :  { %v11274_v63 = vunpack.i.h.bf16 %v11272_v10  ;;  %v11273_v59 = vunpack.i.l.bf16 %v11272_v10  ;;  %v3607_v16 = vpop.f32.mrb[58].mxu0  ;;  %v11159_v3 = vunpack.i.h.bf16 %v14637_v48  ;;  %v11158_v50 = vunpack.i.l.bf16 %v14637_v48  ;;  %v14638_v10 = vld [vmem:[#allocation89_spill] sm:$0xff]  ;;  %v1363_v48 = vld [vmem:[#allocation2 + $0x1e80] sm:$0xff] }
 0x716   :  { %v3608_v8 = vadd.f32 %v3607_v16, %v14635_v55  ;;  %v3609_v26 = vpop.f32.mrb[59].mxu0  ;;  %3871 = vmatmul.mubr.f32.gmra.mrb[164].mxu0 %v1229_v35  ;;  %v13415_v35 = vpop.f32.mrb[134].mxu1  ;;  %v5097_v24 = vsel %vm5095_vm2, %v5080_v2, %v11079_v9  ;;  %v11198_v57 = vunpack.i.l.bf16 %v14638_v10  ;;  %v5096_v61 = vsel %vm5095_vm2, %v5079_v29, %v11078_v17  ;;  %v1237_v55 = vld [vmem:[#allocation2 + $0x1a90] sm:$0xff]  ;;  %v1242_v28 = vld [vmem:[#allocation2 + $0x1ab8] sm:$0xff] }
 0x717   :  { %v13406_v51 = vsel %vm5163_vm6, %v5162_v23, %v11274_v63  ;;  %v13409_v52 = vsel %vm5163_vm6, %v5161_v13, %v11273_v59  ;;  %3875 = vmatprep.mubr.f32.mxu0 %v1234_v27  ;;  %v11199_v27 = vunpack.i.h.bf16 %v14638_v10  ;;  %v2429_v12 = vpop.f32.mrb[135].mxu1  ;;  %2691 = vmatmul.mubr.f32.gmra.mrb[240].mxu1 %v1359_v62  ;;  %v11238_v63 = vunpack.i.l.bf16 %v13250_v44  ;;  %v14639_v59 = vld [vmem:[#allocation50_spill] sm:$0xff]  ;;  %v14642_v10 = vld [vmem:[#allocation51_spill] sm:$0xff] }
 0x718   :  { %v11345_v15 = vpack.i.bf16 %v3608_v8, %v3603_v54  ;;  %v11239_v54 = vunpack.i.h.bf16 %v13250_v44  ;;  %v11044_v9 = vunpack.i.h.bf16 %v14640_v31  ;;  %v11043_v23 = vunpack.i.l.bf16 %v14640_v31  ;;  %2695 = vmatprep.mubr.f32.mxu1 %v1364_v34  ;;  %v14641_v44 = vld [vmem:[#allocation63_spill] sm:$0xff]  ;;  %v13436_v2 = vpop.f32.mrb[136].mxu1  ;;  %v1241_v34 = vld [vmem:[#allocation2 + $0x1ab0] sm:$0xff] }
 0x719   :  { %v3612_v33 = vpop.f32.mrb[60].mxu0  ;;  %v5114_v13 = vsel %vm5112_vm3, %v5097_v24, %v11119_v36  ;;  %v5113_v17 = vsel %vm5112_vm3, %v5096_v61, %v11118_v37  ;;  %v11084_v8 = vunpack.i.h.bf16 %v14641_v44  ;;  %v2434_v29 = vpop.f32.mrb[137].mxu1  ;;  %v11083_v24 = vunpack.i.l.bf16 %v14641_v44  ;;  %v14643_v61 = vld [vmem:[#allocation74_spill] sm:$0xff]  ;;  %v14644_v31 = vld [vmem:[#allocation80_spill] sm:$0xff]  ;;  %v1246_v44 = vld [vmem:[#allocation2 + $0x1ad8] sm:$0xff] }
 0x71a   :  { %v13426_v16 = vadd.f32 %v3612_v33, %v14639_v59  ;;  %v3614_v5 = vpop.f32.mrb[61].mxu0  ;;  %3876 = vmatmul.mubr.f32.gmra.mrb[166].mxu0 %v1233_v4  ;;  %11346 = vrot.lane.b32.xlu0 %v11345_v15, %s12233_s7  ;;  %v5131_v26 = vsel %vm5129_vm4, %v5114_v13, %v11159_v3  ;;  %v5130_v53 = vsel %vm5129_vm4, %v5113_v17, %v11158_v50  ;;  %v11164_v13 = vunpack.i.h.bf16 %v14644_v31  ;;  %v14646_v29 = vld [vmem:[#allocation52_spill] sm:$0xff] }
 0x71b   :  { %3880 = vmatprep.mubr.f32.mxu0 %v1238_v47  ;;  %v5148_v15 = vsel %vm5146_vm5, %v5131_v26, %v11199_v27  ;;  %v5147_v36 = vsel %vm5146_vm5, %v5130_v53, %v11198_v57  ;;  %2696 = vmatmul.mubr.f32.gmra.mrb[242].mxu1 %v1363_v48  ;;  %v11124_v27 = vunpack.i.h.bf16 %v14643_v61  ;;  %v11123_v57 = vunpack.i.l.bf16 %v14643_v61  ;;  %v13460_v26 = vpop.f32.mrb[138].mxu1  ;;  %v1367_v53 = vld [vmem:[#allocation2 + $0x1ea0] sm:$0xff] }
 0x71c   :  { %v11277_v4 = vpop.permute.xlu1 %11276  ;;  %v5165_v3 = vsel %vm5163_vm6, %v5148_v15, %v11239_v54  ;;  %v5164_v50 = vsel %vm5163_vm6, %v5147_v36, %v11238_v63  ;;  %v1368_v54 = vld [vmem:[#allocation2 + $0x1ea8] sm:$0xff]  ;;  %v5082_v63 = vsel %vm5078_vm1, %v13269_v6, %v11044_v9  ;;  %v11163_v17 = vunpack.i.l.bf16 %v14644_v31  ;;  %v14645_v48 = vld [vmem:[#allocation86_spill] sm:$0xff]  ;;  %v2439_v36 = vpop.f32.mrb[139].mxu1 }
 0x71d   :  { %v11279_v37 = vunpack.i.h.bf16 %v11277_v4  ;;  %v11278_v47 = vunpack.i.l.bf16 %v11277_v4  ;;  %v3617_v62 = vpop.f32.mrb[62].mxu0  ;;  %2700 = vmatprep.mubr.f32.mxu1 %v1368_v54  ;;  %v5081_v4 = vsel %vm5078_vm1, %v13273_v46, %v11043_v23  ;;  %v11204_v15 = vunpack.i.h.bf16 %v14645_v48  ;;  %v1372_v46 = vld [vmem:[#allocation2 + $0x1ec8] sm:$0xff]  ;;  %v14647_v23 = vld [vmem:[#allocation44_spill] sm:$0xff] }
 0x71e   :  { %v13444_v33 = vadd.f32 %v3617_v62, %v14642_v10  ;;  %v3619_v12 = vpop.f32.mrb[63].mxu0  ;;  %3881 = vmatmul.mubr.f32.gmra.mrb[168].mxu0 %v1237_v55  ;;  %v11203_v6 = vunpack.i.l.bf16 %v14645_v48  ;;  %v11243_v62 = vunpack.i.l.bf16 %v13277_v11  ;;  %v14648_v10 = vld [vmem:[#allocation58_spill] sm:$0xff]  ;;  %v1245_v54 = vld [vmem:[#allocation2 + $0x1ad0] sm:$0xff] }
 0x71f   :  { %v13449_v59 = vsel %vm5180_vm7, %v5165_v3, %v11279_v37  ;;  %v13452_v5 = vsel %vm5180_vm7, %v5164_v50, %v11278_v47  ;;  %3885 = vmatprep.mubr.f32.mxu0 %v1242_v28  ;;  %v5099_v28 = vsel %vm5095_vm2, %v5082_v63, %v11084_v8  ;;  %2701 = vmatmul.mubr.f32.gmra.mrb[244].mxu1 %v1367_v53  ;;  %v11244_v47 = vunpack.i.h.bf16 %v13277_v11  ;;  %v14649_v63 = vld [vmem:[#allocation66_spill] sm:$0xff] }
 0x720   :  { %v5098_v37 = vsel %vm5095_vm2, %v5081_v4, %v11083_v24  ;;  %v5066_v8 = vsel %vm5061_vm0, %v14647_v23, %v11008_v40  ;;  %v11049_v12 = vunpack.i.h.bf16 %v14648_v10  ;;  %v5116_v61 = vsel %vm5112_vm3, %v5099_v28, %v11124_v27  ;;  %2705 = vmatprep.mubr.f32.mxu1 %v1372_v46  ;;  %v1250_v4 = vld [vmem:[#allocation2 + $0x1af8] sm:$0xff]  ;;  %v13482_v40 = vpop.f32.mrb[140].mxu1  ;;  %v1371_v48 = vld [vmem:[#allocation2 + $0x1ec0] sm:$0xff]  ;;  %v14651_v23 = vld [vmem:[#allocation72_spill] sm:$0xff] }
 0x721   :  { %v3622_v9 = vpop.f32.mrb[64].mxu0  ;;  %v5115_v24 = vsel %vm5112_vm3, %v5098_v37, %v11123_v57  ;;  %v11048_v11 = vunpack.i.l.bf16 %v14648_v10  ;;  %v11089_v31 = vunpack.i.h.bf16 %v14649_v63  ;;  %v2444_v36 = vpop.f32.mrb[141].mxu1  ;;  %v11088_v37 = vunpack.i.l.bf16 %v14649_v63  ;;  %v1376_v63 = vld [vmem:[#allocation2 + $0x1ee8] sm:$0xff] }
 0x722   :  { %v3623_v3 = vadd.f32 %v3622_v9, %v14646_v29  ;;  %v3624_v50 = vpop.f32.mrb[65].mxu0  ;;  %3886 = vmatmul.mubr.f32.gmra.mrb[170].mxu0 %v1241_v34  ;;  %v5133_v34 = vsel %vm5129_vm4, %v5116_v61, %v11164_v13  ;;  %v5132_v22 = vsel %vm5129_vm4, %v5115_v24, %v11163_v17  ;;  %v14650_v29 = vld [vmem:[#allocation55_spill] sm:$0xff]  ;;  %v11129_v10 = vunpack.i.h.bf16 %v14651_v23  ;;  %v1249_v24 = vld [vmem:[#allocation2 + $0x1af0] sm:$0xff] }
 0x723   :  { %3890 = vmatprep.mubr.f32.mxu0 %v1246_v44  ;;  %v5150_v27 = vsel %vm5146_vm5, %v5133_v34, %v11204_v15  ;;  %v5149_v57 = vsel %vm5146_vm5, %v5132_v22, %v11203_v6  ;;  %2706 = vmatmul.mubr.f32.gmra.mrb[246].mxu1 %v1371_v48  ;;  %v11128_v15 = vunpack.i.l.bf16 %v14651_v23  ;;  %v13502_v48 = vpop.f32.mrb[142].mxu1  ;;  %v11248_v36 = vunpack.i.l.bf16 %v13301_v14 }
 0x724   :  { %v11282_v53 = vpop.permute.xlu0 %11281  ;;  %v5167_v13 = vsel %vm5163_vm6, %v5150_v27, %v11244_v47  ;;  %v5166_v17 = vsel %vm5163_vm6, %v5149_v57, %v11243_v62  ;;  %v5084_v47 = vsel %vm5078_vm1, %v13386_v42, %v11049_v12  ;;  %v14652_v62 = vld [vmem:[#allocation82_spill] sm:$0xff]  ;;  %2710 = vmatprep.mubr.f32.mxu1 %v1376_v63  ;;  %v5083_v57 = vsel %vm5078_vm1, %v5066_v8, %v11048_v11  ;;  %v2449_v42 = vpop.f32.mrb[143].mxu1  ;;  %v1380_v8 = vld [vmem:[#allocation2 + $0x1f08] sm:$0xff] }
 0x725   :  { %v11284_v44 = vunpack.i.h.bf16 %v11282_v53  ;;  %v11283_v28 = vunpack.i.l.bf16 %v11282_v53  ;;  %v3627_v9 = vpop.f32.mrb[66].mxu0  ;;  %v11169_v34 = vunpack.i.h.bf16 %v14652_v62  ;;  %v1254_v53 = vld [vmem:[#allocation2 + $0x1b18] sm:$0xff]  ;;  %v1375_v27 = vld [vmem:[#allocation2 + $0x1ee0] sm:$0xff]  ;;  %v5100_v12 = vsel %vm5095_vm2, %v5083_v57, %v11088_v37  ;;  %v13517_v23 = vpop.f32.mrb[144].mxu1 }
 0x726   :  { %v3628_v50 = vadd.f32 %v3627_v9, %v14650_v29  ;;  %v3629_v46 = vpop.f32.mrb[67].mxu0  ;;  %3891 = vmatmul.mubr.f32.gmra.mrb[172].mxu0 %v1245_v54  ;;  %v11168_v54 = vunpack.i.l.bf16 %v14652_v62 }
 0x727   :  { %v13493_v6 = vsel %vm5180_vm7, %v5167_v13, %v11284_v44  ;;  %v13496_v61 = vsel %vm5180_vm7, %v5166_v17, %v11283_v28  ;;  %3895 = vmatprep.mubr.f32.mxu0 %v1250_v4  ;;  %v5101_v44 = vsel %vm5095_vm2, %v5084_v47, %v11089_v31  ;;  %v11209_v4 = vunpack.i.h.bf16 %v13213_v20  ;;  %2711 = vmatmul.mubr.f32.gmra.mrb[248].mxu1 %v1375_v27  ;;  %v14653_v13 = vld [vmem:[#allocation57_spill] sm:$0xff]  ;;  %v1253_v31 = vld [vmem:[#allocation2 + $0x1b10] sm:$0xff]  ;;  %v14654_v27 = vld [vmem:[#allocation59_spill] sm:$0xff] }
 0x728   :  { %v11350_v22 = vpack.i.bf16 %v3628_v50, %v3623_v3  ;;  %v11208_v28 = vunpack.i.l.bf16 %v13213_v20  ;;  %v11249_v3 = vunpack.i.h.bf16 %v13301_v14  ;;  %v5118_v11 = vsel %vm5112_vm3, %v5101_v44, %v11129_v10  ;;  %2715 = vmatprep.mubr.f32.mxu1 %v1380_v8  ;;  %v1258_v46 = vld [vmem:[#allocation2 + $0x1b38] sm:$0xff] }
 0x729   :  { %v3632_v9 = vpop.f32.mrb[68].mxu0  ;;  %v5117_v20 = vsel %vm5112_vm3, %v5100_v12, %v11128_v15  ;;  %v5135_v37 = vsel %vm5129_vm4, %v5118_v11, %v11169_v34  ;;  %v2454_v15 = vpop.f32.mrb[145].mxu1  ;;  %v1262_v12 = vld [vmem:[#allocation2 + $0x1b58] sm:$0xff] }
 0x72a   :  { %v3633_v17 = vadd.f32 %v3632_v9, %v14653_v13  ;;  %v3634_v29 = vpop.f32.mrb[69].mxu0  ;;  %3896 = vmatmul.mubr.f32.gmra.mrb[174].mxu0 %v1249_v24  ;;  %11351 = vrot.lane.b32.xlu1 %v11350_v22, %s12234_s30  ;;  %v5134_v50 = vsel %vm5129_vm4, %v5117_v20, %v11168_v54  ;;  %v1379_v24 = vld [vmem:[#allocation2 + $0x1f00] sm:$0xff]  ;;  %v5152_v63 = vsel %vm5146_vm5, %v5135_v37, %v11209_v4  ;;  %v1384_v9 = vld [vmem:[#allocation2 + $0x1f28] sm:$0xff]  ;;  %v13530_v13 = vpop.f32.mrb[146].mxu1 }
 0x72b   :  { %3900 = vmatprep.mubr.f32.mxu0 %v1254_v53  ;;  %v5151_v47 = vsel %vm5146_vm5, %v5134_v50, %v11208_v28  ;;  %2716 = vmatmul.mubr.f32.gmra.mrb[250].mxu1 %v1379_v24  ;;  %v5169_v53 = vsel %vm5163_vm6, %v5152_v63, %v11249_v3  ;;  %v1257_v28 = vld [vmem:[#allocation2 + $0x1b30] sm:$0xff]  ;;  %v1383_v3 = vld [vmem:[#allocation2 + $0x1f20] sm:$0xff]  ;;  %v2459_v11 = vpop.f32.mrb[147].mxu1  ;;  %v14657_v50 = vld [vmem:[#allocation61_spill] sm:$0xff] }
 0x72c   :  { %v11287_v14 = vpop.permute.xlu1 %11286  ;;  %v5168_v34 = vsel %vm5163_vm6, %v5151_v47, %v11248_v36  ;;  %2720 = vmatprep.mubr.f32.mxu1 %v1384_v9  ;;  %v14655_v36 = vld [vmem:[#allocation54_spill] sm:$0xff]  ;;  %v1261_v24 = vld [vmem:[#allocation2 + $0x1b50] sm:$0xff]  ;;  %v14658_v15 = vld [vmem:[#allocation47_spill] sm:$0xff] }
 0x72d   :  { %v11289_v62 = vunpack.i.h.bf16 %v11287_v14  ;;  %v11288_v10 = vunpack.i.l.bf16 %v11287_v14  ;;  %v3637_v22 = vpop.f32.mrb[70].mxu0  ;;  %v11019_v29 = vunpack.i.h.bf16 %v14655_v36  ;;  %v11018_v20 = vunpack.i.l.bf16 %v14655_v36 }
 0x72e   :  { %v3638_v54 = vadd.f32 %v3637_v22, %v14654_v27  ;;  %v3639_v57 = vpop.f32.mrb[71].mxu0  ;;  %3901 = vmatmul.mubr.f32.gmra.mrb[176].mxu0 %v1253_v31  ;;  %v14656_v31 = vld [vmem:[#allocation60_spill] sm:$0xff]  ;;  %v1387_v22 = vld [vmem:[#allocation2 + $0x1f40] sm:$0xff] }
 0x72f   :  { %v13525_v44 = vsel %vm5180_vm7, %v5169_v53, %v11289_v62  ;;  %v13528_v4 = vsel %vm5180_vm7, %v5168_v34, %v11288_v10  ;;  %3905 = vmatprep.mubr.f32.mxu0 %v1258_v46  ;;  %2721 = vmatmul.mubr.f32.gmra.mrb[252].mxu1 %v1383_v3  ;;  %v11059_v37 = vunpack.i.h.bf16 %v14656_v31  ;;  %v11058_v63 = vunpack.i.l.bf16 %v14656_v31  ;;  %v1266_v62 = vld [vmem:[#allocation2 + $0x1b78] sm:$0xff]  ;;  %v13538_v10 = vpop.f32.mrb[148].mxu1  ;;  %v14659_v34 = vld [vmem:[#allocation67_spill] sm:$0xff] }
 0x730   :  { %v11355_v42 = vpack.i.bf16 %v3638_v54, %v3633_v17  ;;  %v1388_v17 = vld [vmem:[#allocation2 + $0x1f48] sm:$0xff]  ;;  %v5071_v53 = vsel %vm5061_vm0, %v14658_v15, %v11019_v29  ;;  %v11099_v27 = vunpack.i.h.bf16 %v14659_v34  ;;  %v2464_v9 = vpop.f32.mrb[149].mxu1  ;;  %v11098_v36 = vunpack.i.l.bf16 %v14659_v34 }
 0x731   :  { %v3642_v8 = vpop.f32.mrb[72].mxu0  ;;  %2725 = vmatprep.mubr.f32.mxu1 %v1388_v17  ;;  %v5088_v3 = vsel %vm5078_vm1, %v5071_v53, %v11059_v37  ;;  %v1270_v37 = vld [vmem:[#allocation2 + $0x1b98] sm:$0xff]  ;;  %v14663_v53 = vld [vmem:[#allocation84_spill] sm:$0xff] }
 0x732   :  { %v3643_v14 = vadd.f32 %v3642_v8, %v14657_v50  ;;  %v3644_v46 = vpop.f32.mrb[73].mxu0  ;;  %3906 = vmatmul.mubr.f32.gmra.mrb[178].mxu0 %v1257_v28  ;;  %11356 = vrot.lane.b32.xlu0 %v11355_v42, %s12234_s30  ;;  %v14660_v42 = vld [vmem:[#allocation46_spill] sm:$0xff]  ;;  %v14662_v50 = vld [vmem:[#allocation75_spill] sm:$0xff]  ;;  %v11178_v34 = vunpack.i.l.bf16 %v14663_v53  ;;  %v5322_v9 = vld [vmem:[#allocation4 + $0x30] sm:$0xff] }
 0x733   :  { %3910 = vmatprep.mubr.f32.mxu0 %v1262_v12  ;;  %2726 = vmatmul.mubr.f32.gmra.mrb[254].mxu1 %v1387_v22  ;;  %v5070_v12 = vsel %vm5061_vm0, %v14660_v42, %v11018_v20  ;;  %v14661_v8 = vld [vmem:[#allocation62_spill] sm:$0xff]  ;;  %v11139_v29 = vunpack.i.h.bf16 %v14662_v50  ;;  %v11138_v46 = vunpack.i.l.bf16 %v14662_v50  ;;  %v1265_v20 = vld [vmem:[#allocation2 + $0x1b70] sm:$0xff]  ;;  %v1392_v22 = vld [vmem:[#allocation2 + $0x1f68] sm:$0xff] }
 0x734   :  { %v11292_v47 = vpop.permute.xlu0 %11291  ;;  %v5087_v15 = vsel %vm5078_vm1, %v5070_v12, %v11058_v63  ;;  %v5323_v42 = vld [vmem:[#allocation4 + $0x38] sm:$0xff]  ;;  %2730 = vmatprep.mubr.f32.mxu1 %v1392_v22  ;;  %vm8725_vm1 = vcmask 121856  }
 0x735   :  { %v11294_v54 = vunpack.i.h.bf16 %v11292_v47  ;;  %v11293_v57 = vunpack.i.l.bf16 %v11292_v47  ;;  %v3647_v28 = vpop.f32.mrb[74].mxu0  ;;  %v5104_v12 = vsel %vm5095_vm2, %v5087_v15, %v11098_v36  ;;  %v14664_v50 = vld [vmem:[#allocation65_spill] sm:$0xff] }
 0x736   :  { %v3648_v11 = vadd.f32 %v3647_v28, %v14661_v8  ;;  %v3649_v31 = vpop.f32.mrb[75].mxu0  ;;  %3911 = vmatmul.mubr.f32.gmra.mrb[180].mxu0 %v1261_v24  ;;  %v11179_v24 = vunpack.i.h.bf16 %v14663_v53  ;;  %v13561_v8 = vpop.f32.mrb[150].mxu1 }
 0x737   :  { %v13552_v17 = vsel %vm5180_vm7, %v13234_v7, %v11294_v54  ;;  %v13556_v47 = vsel %vm5180_vm7, %v13237_v32, %v11293_v57  ;;  %3915 = vmatprep.mubr.f32.mxu0 %v1266_v62  ;;  %v1391_v7 = vld [vmem:[#allocation2 + $0x1f60] sm:$0xff]  ;;  %v5105_v32 = vsel %vm5095_vm2, %v5088_v3, %v11099_v27  ;;  %v11219_v62 = vunpack.i.h.bf16 %v13227_v43  ;;  %v2469_v63 = vpop.f32.mrb[151].mxu1  ;;  %v1396_v27 = vld [vmem:[#allocation2 + $0x1f88] sm:$0xff] }
 0x738   :  { %v11360_v28 = vpack.i.bf16 %v3648_v11, %v3643_v14  ;;  %v11218_v54 = vunpack.i.l.bf16 %v13227_v43  ;;  %v9659_v31 = vpack.c.bf16 %v5323_v42, %v5322_v9  ;;  %2731 = vmatmul.mubr.f32.gmra.mrb[150].mxu1 %v1391_v7  ;;  %v11259_v14 = vunpack.i.h.bf16 %v13327_v25  ;;  %v1269_v9 = vld [vmem:[#allocation2 + $0x1b90] sm:$0xff]  ;;  %v13575_v7 = vpop.f32.mrb[152].mxu1 }
 0x739   :  { %v3652_v57 = vpop.f32.mrb[76].mxu0  ;;  %v11258_v11 = vunpack.i.l.bf16 %v13327_v25  ;;  %v5122_v3 = vsel %vm5112_vm3, %v5105_v32, %v11139_v29  ;;  %v5121_v43 = vsel %vm5112_vm3, %v5104_v12, %v11138_v46  ;;  %v1274_v25 = vld [vmem:[#allocation2 + $0x1bb8] sm:$0xff]  ;;  %2735 = vmatprep.mubr.f32.mxu1 %v1396_v27  ;;  %v14665_v63 = vld [vmem:[#allocation68_spill] sm:$0xff]  ;;  %vm8727_vm2 = vcmask 123904  }
 0x73a   :  { %v3653_v53 = vadd.f32 %v3652_v57, %v14664_v50  ;;  %v3654_v22 = vpop.f32.mrb[77].mxu0  ;;  %3916 = vmatmul.mubr.f32.gmra.mrb[182].mxu0 %v1265_v20  ;;  %11361 = vrot.lane.b32.xlu1 %v11360_v28, %s12234_s30  ;;  %v5139_v36 = vsel %vm5129_vm4, %v5122_v3, %v11179_v24  ;;  %v5138_v15 = vsel %vm5129_vm4, %v5121_v43, %v11178_v34  ;;  %v1395_v20 = vld [vmem:[#allocation2 + $0x1f80] sm:$0xff]  ;;  %v2474_v57 = vpop.f32.mrb[153].mxu1  ;;  %v1278_v3 = vld [vmem:[#allocation2 + $0x1bd8] sm:$0xff] }
 0x73b   :  { %3920 = vmatprep.mubr.f32.mxu0 %v1270_v37  ;;  %9660 = vmatprep.subr.bf16.mxu1 %v9659_v31  ;;  %v5156_v28 = vsel %vm5146_vm5, %v5139_v36, %v11219_v62  ;;  %v5155_v29 = vsel %vm5146_vm5, %v5138_v15, %v11218_v54  ;;  %v1273_v54 = vld [vmem:[#allocation2 + $0x1bb0] sm:$0xff]  ;;  %v1400_v22 = vld [vmem:[#allocation2 + $0x1fa8] sm:$0xff]  ;;  %v13588_v43 = vpop.f32.mrb[154].mxu1  ;;  %v14666_v15 = vld [vmem:[#allocation69_spill] sm:$0xff] }
 0x73c   :  { %v11297_v42 = vpop.permute.xlu1 %11296  ;;  %9662 = vmatpush3.bf16.msra.mxu1 %v9659_v31  ;;  %v5173_v24 = vsel %vm5163_vm6, %v5156_v28, %v11259_v14  ;;  %v5172_v34 = vsel %vm5163_vm6, %v5155_v29, %v11258_v11  ;;  %v1399_v14 = vld [vmem:[#allocation2 + $0x1fa0] sm:$0xff]  ;;  %v2479_v36 = vpop.f32.mrb[155].mxu1 }
 0x73d   :  { %v11299_v32 = vunpack.i.h.bf16 %v11297_v42  ;;  %v11298_v46 = vunpack.i.l.bf16 %v11297_v42  ;;  %v3657_v37 = vpop.f32.mrb[78].mxu0  ;;  %2736 = vmatmul.mubr.f32.gmra.mrb[152].mxu1 %v1395_v20  ;;  %v1404_v20 = vld [vmem:[#allocation2 + $0x1fc8] sm:$0xff]  ;;  %v13592_v29 = vpop.f32.mrb[156].mxu1  ;;  %v1407_v36 = vld [vmem:[#allocation2 + $0x1fe0] sm:$0xff] }
 0x73e   :  { %v3658_v12 = vadd.f32 %v3657_v37, %v14665_v63  ;;  %v3659_v31 = vpop.f32.mrb[79].mxu0  ;;  %3921 = vmatmul.mubr.f32.gmra.mrb[184].mxu0 %v1269_v9  ;;  %2740 = vmatprep.mubr.f32.mxu1 %v1400_v22  ;;  %v1281_v22 = vld [vmem:[#allocation2 + $0x1bf0] sm:$0xff] }
 0x73f   :  { %v13583_v50 = vsel %vm5180_vm7, %v5173_v24, %v11299_v32  ;;  %v13586_v62 = vsel %vm5180_vm7, %v5172_v34, %v11298_v46  ;;  %3925 = vmatprep.mubr.f32.mxu0 %v1274_v25  ;;  %v1277_v25 = vld [vmem:[#allocation2 + $0x1bd0] sm:$0xff]  ;;  %v1403_v32 = vld [vmem:[#allocation2 + $0x1fc0] sm:$0xff]  ;;  %v2484_v24 = vpop.f32.mrb[157].mxu1  ;;  %v14667_v34 = vld [vmem:[#allocation71_spill] sm:$0xff] }
 0x740   :  { %v11365_v27 = vpack.i.bf16 %v3658_v12, %v3653_v53  ;;  %v1282_v53 = vld [vmem:[#allocation2 + $0x1bf8] sm:$0xff]  ;;  %v14669_v24 = vld [vmem:[#allocation76_spill] sm:$0xff] }
 0x741   :  { %v3662_v11 = vpop.f32.mrb[80].mxu0  ;;  %2741 = vmatmul.mubr.f32.gmra.mrb[154].mxu1 %v1399_v14  ;;  %v1286_v14 = vld [vmem:[#allocation2 + $0x1c18] sm:$0xff] }
 0x742   :  { %v3663_v9 = vadd.f32 %v3662_v11, %v14666_v15  ;;  %v3664_v42 = vpop.f32.mrb[81].mxu0  ;;  %3926 = vmatmul.mubr.f32.gmra.mrb[186].mxu0 %v1273_v54  ;;  %11366 = vrot.lane.b32.xlu0 %v11365_v27, %s12234_s30  ;;  %v1408_v27 = vld [vmem:[#allocation2 + $0x1fe8] sm:$0xff]  ;;  %v13603_v11 = vpop.f32.mrb[158].mxu1 }
 0x743   :  { %3930 = vmatprep.mubr.f32.mxu0 %v1278_v3  ;;  %2745 = vmatprep.mubr.f32.mxu1 %v1404_v20  ;;  %v2489_v42 = vpop.f32.mrb[159].mxu1  ;;  %v14668_v20 = vld [vmem:[#allocation73_spill] sm:$0xff] }
 0x744   :  { %v11302_v28 = vpop.permute.xlu0 %11301 }
 0x745   :  { %v11304_v46 = vunpack.i.h.bf16 %v11302_v28  ;;  %v11303_v37 = vunpack.i.l.bf16 %v11302_v28  ;;  %v3667_v57 = vpop.f32.mrb[82].mxu0  ;;  %2746 = vmatmul.mubr.f32.gmra.mrb[156].mxu1 %v1403_v32  ;;  %v13607_v32 = vpop.f32.mrb[160].mxu1 }
 0x746   :  { %v3668_v63 = vadd.f32 %v3667_v57, %v14667_v34  ;;  %v3669_v12 = vpop.f32.mrb[83].mxu0  ;;  %3931 = vmatmul.mubr.f32.gmra.mrb[188].mxu0 %v1277_v25  ;;  %2750 = vmatprep.mubr.f32.mxu1 %v1408_v27  ;;  %v2494_v57 = vpop.f32.mrb[161].mxu1  ;;  %v1289_v27 = vld [vmem:[#allocation2 + $0x1c30] sm:$0xff] }
 0x747   :  { %v13597_v31 = vsel %vm5180_vm7, %v13321_v41, %v11303_v37  ;;  %v13601_v54 = vsel %vm5180_vm7, %v13318_v45, %v11304_v46  ;;  %3935 = vmatprep.mubr.f32.mxu0 %v1282_v53  ;;  %v1285_v45 = vld [vmem:[#allocation2 + $0x1c10] sm:$0xff]  ;;  %v1290_v53 = vld [vmem:[#allocation2 + $0x1c38] sm:$0xff]  ;;  %v14671_v57 = vld [vmem:[#allocation79_spill] sm:$0xff] }
 0x748   :  { %v11370_v3 = vpack.i.bf16 %v3668_v63, %v3663_v9 }
 0x749   :  { %v3672_v15 = vpop.f32.mrb[84].mxu0  ;;  %2751 = vmatmul.mubr.f32.gmra.mrb[158].mxu1 %v1407_v36 }
 0x74a   :  { %v3673_v25 = vadd.f32 %v3672_v15, %v14668_v20  ;;  %v3674_v41 = vpop.f32.mrb[85].mxu0  ;;  %3936 = vmatmul.mubr.f32.gmra.mrb[190].mxu0 %v1281_v22  ;;  %11371 = vrot.lane.b32.xlu1 %v11370_v3, %s12234_s30  ;;  %v14670_v20 = vld [vmem:[#allocation77_spill] sm:$0xff] }
 0x74b   :  { %3940 = vmatprep.mubr.f32.mxu0 %v1286_v14  ;;  %v1294_v14 = vld [vmem:[#allocation2 + $0x1c58] sm:$0xff]  ;;  %v13618_v36 = vpop.f32.mrb[162].mxu1 }
 0x74c   :  { %v11307_v28 = vpop.permute.xlu1 %11306  ;;  %v2499_v42 = vpop.f32.mrb[163].mxu1 }
 0x74d   :  { %v11309_v9 = vunpack.i.h.bf16 %v11307_v28  ;;  %v11308_v46 = vunpack.i.l.bf16 %v11307_v28  ;;  %v3677_v37 = vpop.f32.mrb[86].mxu0 }
 0x74e   :  { %v3678_v34 = vadd.f32 %v3677_v37, %v14669_v24  ;;  %v3679_v63 = vpop.f32.mrb[87].mxu0  ;;  %3941 = vmatmul.mubr.f32.gmra.mrb[192].mxu0 %v1285_v45 }
 0x74f   :  { %v13612_v12 = vsel %vm5180_vm7, %v13364_v38, %v11308_v46  ;;  %v13616_v22 = vsel %vm5180_vm7, %v13361_v0, %v11309_v9  ;;  %3945 = vmatprep.mubr.f32.mxu0 %v1290_v53  ;;  %v1293_v38 = vld [vmem:[#allocation2 + $0x1c50] sm:$0xff]  ;;  %v1298_v46 = vld [vmem:[#allocation2 + $0x1c78] sm:$0xff]  ;;  %v13622_v0 = vpop.f32.mrb[164].mxu1 }
 0x750   :  { %v11375_v3 = vpack.i.bf16 %v3678_v34, %v3673_v25  ;;  %v2504_v37 = vpop.f32.mrb[165].mxu1 }
 0x751   :  { %v3682_v15 = vpop.f32.mrb[88].mxu0 }
 0x752   :  { %v3683_v41 = vadd.f32 %v3682_v15, %v14670_v20  ;;  %v3684_v28 = vpop.f32.mrb[89].mxu0  ;;  %3946 = vmatmul.mubr.f32.gmra.mrb[194].mxu0 %v1289_v27  ;;  %11376 = vrot.lane.b32.xlu0 %v11375_v3, %s12234_s30  ;;  %v1297_v3 = vld [vmem:[#allocation2 + $0x1c70] sm:$0xff]  ;;  %v1302_v15 = vld [vmem:[#allocation2 + $0x1c98] sm:$0xff] }
 0x753   :  { %3950 = vmatprep.mubr.f32.mxu0 %v1294_v14  ;;  %v13633_v42 = vpop.f32.mrb[166].mxu1 }
 0x754   :  { %v11312_v45 = vpop.permute.xlu0 %11311  ;;  %v2509_v28 = vpop.f32.mrb[167].mxu1 }
 0x755   :  { %v11314_v53 = vunpack.i.h.bf16 %v11312_v45  ;;  %v11313_v9 = vunpack.i.l.bf16 %v11312_v45  ;;  %v3687_v25 = vpop.f32.mrb[90].mxu0  ;;  %v14674_v45 = vld [vmem:[#allocation81_spill] sm:$0xff]  ;;  %v14680_v28 = vld [vmem:[#allocation87_spill] sm:$0xff] }
 0x756   :  { %v3688_v24 = vadd.f32 %v3687_v25, %v14671_v57  ;;  %v3689_v34 = vpop.f32.mrb[91].mxu0  ;;  %3951 = vmatmul.mubr.f32.gmra.mrb[196].mxu0 %v1293_v38 }
 0x757   :  { %v13627_v63 = vsel %vm5180_vm7, %v13406_v51, %v11314_v53  ;;  %v13631_v27 = vsel %vm5180_vm7, %v13409_v52, %v11313_v9  ;;  %3955 = vmatprep.mubr.f32.mxu0 %v1298_v46  ;;  %v1301_v51 = vld [vmem:[#allocation2 + $0x1c90] sm:$0xff]  ;;  %v1306_v53 = vld [vmem:[#allocation2 + $0x1cb8] sm:$0xff]  ;;  %v13639_v46 = vpop.f32.mrb[168].mxu1 }
 0x758   :  { %14672 = vst [vmem:[#allocation48_spill] sm:$0xff] %v13627_v63  ;;  %14673 = vst [vmem:[#allocation45_spill] sm:$0xff] %v13631_v27  ;;  %v11380_v14 = vpack.i.bf16 %v3688_v24, %v3683_v41  ;;  %v2514_v57 = vpop.f32.mrb[169].mxu1  ;;  %v14676_v24 = vld [vmem:[#allocation83_spill] sm:$0xff] }
 0x759   :  { %v3692_v20 = vpop.f32.mrb[92].mxu0  ;;  %v14679_v57 = vld [vmem:[#allocation85_spill] sm:$0xff] }
 0x75a   :  { %v13636_v25 = vadd.f32 %v3692_v20, %v14674_v45  ;;  %v3694_v38 = vpop.f32.mrb[93].mxu0  ;;  %3956 = vmatmul.mubr.f32.gmra.mrb[198].mxu0 %v1297_v3  ;;  %11381 = vrot.lane.b32.xlu1 %v11380_v14, %s12234_s30  ;;  %v1310_v45 = vld [vmem:[#allocation2 + $0x1cd8] sm:$0xff] }
 0x75b   :  { %3960 = vmatprep.mubr.f32.mxu0 %v1302_v15  ;;  %v1305_v15 = vld [vmem:[#allocation2 + $0x1cb0] sm:$0xff]  ;;  %v13654_v38 = vpop.f32.mrb[170].mxu1 }
 0x75c   :  { %14675 = vst [vmem:[#allocation53_spill] sm:$0xff] %v13636_v25  ;;  %v11317_v52 = vpop.permute.xlu0 %11316  ;;  %v14683_v25 = vld [vmem:[#allocation88_spill] sm:$0xff] }
 0x75d   :  { %v11319_v41 = vunpack.i.h.bf16 %v11317_v52  ;;  %v11318_v9 = vunpack.i.l.bf16 %v11317_v52  ;;  %v3697_v37 = vpop.f32.mrb[94].mxu0 }
 0x75e   :  { %v13642_v34 = vadd.f32 %v3697_v37, %v14676_v24  ;;  %v3699_v20 = vpop.f32.mrb[95].mxu0  ;;  %3961 = vmatmul.mubr.f32.gmra.mrb[200].mxu0 %v1301_v51  ;;  %v2519_v37 = vpop.f32.mrb[171].mxu1 }
 0x75f   :  { %v13646_v3 = vsel %vm5197_vm8, %v13449_v59, %v11319_v41  ;;  %v13650_v14 = vsel %vm5197_vm8, %v13452_v5, %v11318_v9  ;;  %3965 = vmatprep.mubr.f32.mxu0 %v1306_v53  ;;  %v1309_v59 = vld [vmem:[#allocation2 + $0x1cd0] sm:$0xff]  ;;  %v1314_v20 = vld [vmem:[#allocation2 + $0x1cf8] sm:$0xff] }
 0x760   :  { %14677 = vst [vmem:[#allocation64_spill] sm:$0xff] %v13642_v34  ;;  %14678 = vst [vmem:[#allocation49_spill] sm:$0xff] %v13650_v14  ;;  %v13657_v5 = vpop.f32.mrb[172].mxu1 }
 0x761   :  { %v3702_v52 = vpop.f32.mrb[96].mxu0  ;;  %v2524_v63 = vpop.f32.mrb[173].mxu1 }
 0x762   :  { %v3703_v51 = vadd.f32 %v3702_v52, %v14679_v57  ;;  %v3704_v24 = vpop.f32.mrb[97].mxu0  ;;  %3966 = vmatmul.mubr.f32.gmra.mrb[202].mxu0 %v1305_v15  ;;  %v1318_v57 = vld [vmem:[#allocation2 + $0x1d18] sm:$0xff] }
 0x763   :  { %3970 = vmatprep.mubr.f32.mxu0 %v1310_v45  ;;  %v1313_v45 = vld [vmem:[#allocation2 + $0x1cf0] sm:$0xff] }
 0x764   :  { %v11322_v41 = vpop.permute.xlu0 %11321  ;;  %v13668_v24 = vpop.f32.mrb[174].mxu1 }
 0x765   :  { %v11324_v53 = vunpack.i.h.bf16 %v11322_v41  ;;  %v11323_v9 = vunpack.i.l.bf16 %v11322_v41  ;;  %v3707_v55 = vpop.f32.mrb[98].mxu0  ;;  %v2529_v63 = vpop.f32.mrb[175].mxu1 }
 0x766   :  { %v3708_v27 = vadd.f32 %v3707_v55, %v14680_v28  ;;  %v3709_v14 = vpop.f32.mrb[99].mxu0  ;;  %3971 = vmatmul.mubr.f32.gmra.mrb[204].mxu0 %v1309_v59 }
 0x767   :  { %v13662_v37 = vsel %vm5197_vm8, %v13496_v61, %v11323_v9  ;;  %v13666_v15 = vsel %vm5197_vm8, %v13493_v6, %v11324_v53  ;;  %3975 = vmatprep.mubr.f32.mxu0 %v1314_v20  ;;  %v1317_v61 = vld [vmem:[#allocation2 + $0x1d10] sm:$0xff]  ;;  %v1322_v6 = vld [vmem:[#allocation2 + $0x1d38] sm:$0xff]  ;;  %v14684_v9 = vld [vmem:[#allocation90_spill] sm:$0xff] }
 0x768   :  { %14681 = vst [vmem:[#allocation70_spill] sm:$0xff] %v13662_v37  ;;  %14682 = vst [vmem:[#allocation78_spill] sm:$0xff] %v13666_v15  ;;  %v11385_v52 = vpack.i.bf16 %v3708_v27, %v3703_v51  ;;  %v13672_v59 = vpop.f32.mrb[176].mxu1 }
 0x769   :  { %v3712_v41 = vpop.f32.mrb[100].mxu0  ;;  %v2534_v53 = vpop.f32.mrb[177].mxu1 }
 0x76a   :  { %v3713_v55 = vadd.f32 %v3712_v41, %v14683_v25  ;;  %v3714_v14 = vpop.f32.mrb[101].mxu0  ;;  %3976 = vmatmul.mubr.f32.gmra.mrb[206].mxu0 %v1313_v45  ;;  %11386 = vrot.lane.b32.xlu0 %v11385_v52, %s12235_s22  ;;  %v1321_v52 = vld [vmem:[#allocation2 + $0x1d30] sm:$0xff]  ;;  %v1326_v41 = vld [vmem:[#allocation2 + $0x1d58] sm:$0xff] }
 0x76b   :  { %3980 = vmatprep.mubr.f32.mxu0 %v1318_v57 }
 0x76c   :  { %v11327_v28 = vpop.permute.xlu1 %11326  ;;  %v13683_v14 = vpop.f32.mrb[178].mxu1 }
 0x76d   :  { %v11329_v20 = vunpack.i.h.bf16 %v11327_v28  ;;  %v11328_v27 = vunpack.i.l.bf16 %v11327_v28  ;;  %v3717_v51 = vpop.f32.mrb[102].mxu0  ;;  %v2539_v53 = vpop.f32.mrb[179].mxu1 }
 0x76e   :  { %v3718_v15 = vadd.f32 %v3717_v51, %v14684_v9  ;;  %v3719_v63 = vpop.f32.mrb[103].mxu0  ;;  %3981 = vmatmul.mubr.f32.gmra.mrb[208].mxu0 %v1317_v61  ;;  %v5324_v53 = vld [vmem:[#allocation4 + $0x40] sm:$0xff] }
 0x76f   :  { %v13677_v25 = vsel %vm5197_vm8, %v13528_v4, %v11328_v27  ;;  %v13681_v45 = vsel %vm5197_vm8, %v13525_v44, %v11329_v20  ;;  %3985 = vmatprep.mubr.f32.mxu0 %v1322_v6  ;;  %v1325_v4 = vld [vmem:[#allocation2 + $0x1d50] sm:$0xff]  ;;  %v1330_v27 = vld [vmem:[#allocation2 + $0x1d78] sm:$0xff] }
 0x770   :  { %v11390_v57 = vpack.i.bf16 %v3718_v15, %v3713_v55  ;;  %v13687_v44 = vpop.f32.mrb[180].mxu1 }
 0x771   :  { %v3722_v28 = vpop.f32.mrb[104].mxu0  ;;  %v2544_v55 = vpop.f32.mrb[181].mxu1 }
 0x772   :  { %v3723_v51 = vadd.f32 %v3722_v28, %v13218_v39  ;;  %v3724_v9 = vpop.f32.mrb[105].mxu0  ;;  %3986 = vmatmul.mubr.f32.gmra.mrb[210].mxu0 %v1321_v52  ;;  %11391 = vrot.lane.b32.xlu0 %v11390_v57, %s12235_s22  ;;  %v1329_v57 = vld [vmem:[#allocation2 + $0x1d70] sm:$0xff]  ;;  %v1334_v28 = vld [vmem:[#allocation2 + $0x1d98] sm:$0xff] }
 0x773   :  { %3990 = vmatprep.mubr.f32.mxu0 %v1326_v41  ;;  %v5325_v9 = vld [vmem:[#allocation4 + $0x48] sm:$0xff] }
 0x774   :  { %v11332_v61 = vpop.permute.xlu0 %11331 }
 0x775   :  { %v11334_v6 = vunpack.i.h.bf16 %v11332_v61  ;;  %v11333_v20 = vunpack.i.l.bf16 %v11332_v61  ;;  %v3727_v15 = vpop.f32.mrb[106].mxu0  ;;  %v13698_v61 = vpop.f32.mrb[182].mxu1 }
 0x776   :  { %v3728_v63 = vadd.f32 %v3727_v15, %v13231_v56  ;;  %v3729_v37 = vpop.f32.mrb[107].mxu0  ;;  %3991 = vmatmul.mubr.f32.gmra.mrb[212].mxu0 %v1325_v4  ;;  %v9663_v56 = vpack.c.bf16 %v5325_v9, %v5324_v53 }
 0x777   :  { %v13692_v39 = vsel %vm5197_vm8, %v13556_v47, %v11333_v20  ;;  %v13696_v52 = vsel %vm5197_vm8, %v13552_v17, %v11334_v6  ;;  %3995 = vmatprep.mubr.f32.mxu0 %v1330_v27  ;;  %v2549_v37 = vpop.f32.mrb[183].mxu1  ;;  %v1333_v17 = vld [vmem:[#allocation2 + $0x1d90] sm:$0xff]  ;;  %v1338_v27 = vld [vmem:[#allocation2 + $0x1db8] sm:$0xff] }
 0x778   :  { %v11395_v41 = vpack.i.bf16 %v3728_v63, %v3723_v51  ;;  %9664 = vmatprep.subr.bf16.mxu1 %v9663_v56  ;;  %v13702_v51 = vpop.f32.mrb[184].mxu1 }
 0x779   :  { %v3732_v55 = vpop.f32.mrb[108].mxu0  ;;  %9666 = vmatpush3.bf16.msra.mxu1 %v9663_v56  ;;  %v2554_v34 = vpop.f32.mrb[185].mxu1 }
 0x77a   :  { %v3733_v4 = vadd.f32 %v3732_v55, %v13242_v18  ;;  %v3734_v15 = vpop.f32.mrb[109].mxu0  ;;  %3996 = vmatmul.mubr.f32.gmra.mrb[214].mxu0 %v1329_v57  ;;  %11396 = vrot.lane.b32.xlu1 %v11395_v41, %s12235_s22  ;;  %v1337_v41 = vld [vmem:[#allocation2 + $0x1db0] sm:$0xff]  ;;  %v1342_v55 = vld [vmem:[#allocation2 + $0x1dd8] sm:$0xff] }
 0x77b   :  { %4000 = vmatprep.mubr.f32.mxu0 %v1334_v28 }
 0x77c   :  { %v11337_v47 = vpop.permute.xlu1 %11336  ;;  %v13713_v56 = vpop.f32.mrb[186].mxu1 }
 0x77d   :  { %v11339_v6 = vunpack.i.h.bf16 %v11337_v47  ;;  %v11338_v20 = vunpack.i.l.bf16 %v11337_v47  ;;  %v3737_v63 = vpop.f32.mrb[110].mxu0  ;;  %v2559_v34 = vpop.f32.mrb[187].mxu1  ;;  %v1346_v47 = vld [vmem:[#allocation2 + $0x1df8] sm:$0xff] }
 0x77e   :  { %v3738_v53 = vadd.f32 %v3737_v63, %v13253_v60  ;;  %v3739_v9 = vpop.f32.mrb[111].mxu0  ;;  %4001 = vmatmul.mubr.f32.gmra.mrb[216].mxu0 %v1333_v17 }
 0x77f   :  { %v13707_v18 = vsel %vm5197_vm8, %v13586_v62, %v11338_v20  ;;  %v13711_v57 = vsel %vm5197_vm8, %v13583_v50, %v11339_v6  ;;  %4005 = vmatprep.mubr.f32.mxu0 %v1338_v27  ;;  %v1341_v62 = vld [vmem:[#allocation2 + $0x1dd0] sm:$0xff] }
 0x780   :  { %v11400_v28 = vpack.i.bf16 %v3738_v53, %v3733_v4  ;;  %v13717_v50 = vpop.f32.mrb[188].mxu1 }
 0x781   :  { %v3742_v37 = vpop.f32.mrb[112].mxu0  ;;  %v2564_v20 = vpop.f32.mrb[189].mxu1 }
 0x782   :  { %v3743_v60 = vadd.f32 %v3742_v37, %v13283_v19  ;;  %v3744_v15 = vpop.f32.mrb[113].mxu0  ;;  %4006 = vmatmul.mubr.f32.gmra.mrb[218].mxu0 %v1337_v41  ;;  %11401 = vrot.lane.b32.xlu0 %v11400_v28, %s12235_s22  ;;  %v1345_v41 = vld [vmem:[#allocation2 + $0x1df0] sm:$0xff] }
 0x783   :  { %4010 = vmatprep.mubr.f32.mxu0 %v1342_v55  ;;  %v1350_v55 = vld [vmem:[#allocation2 + $0x1e18] sm:$0xff] }
 0x784   :  { %v11342_v17 = vpop.permute.xlu0 %11341  ;;  %v13728_v37 = vpop.f32.mrb[190].mxu1 }
 0x785   :  { %v11344_v27 = vunpack.i.h.bf16 %v11342_v17  ;;  %v11343_v6 = vunpack.i.l.bf16 %v11342_v17  ;;  %v3747_v4 = vpop.f32.mrb[114].mxu0  ;;  %v2569_v15 = vpop.f32.mrb[191].mxu1 }
 0x786   :  { %v3748_v63 = vadd.f32 %v3747_v4, %v13307_v30  ;;  %v3749_v53 = vpop.f32.mrb[115].mxu0  ;;  %4011 = vmatmul.mubr.f32.gmra.mrb[220].mxu0 %v1341_v62 }
 0x787   :  { %v13722_v19 = vsel %vm5197_vm8, %v13597_v31, %v11343_v6  ;;  %v13726_v9 = vsel %vm5197_vm8, %v13601_v54, %v11344_v27  ;;  %4015 = vmatprep.mubr.f32.mxu0 %v1346_v47  ;;  %v1349_v31 = vld [vmem:[#allocation2 + $0x1e10] sm:$0xff]  ;;  %v1354_v6 = vld [vmem:[#allocation2 + $0x1e38] sm:$0xff] }
 0x788   :  { %v11405_v28 = vpack.i.bf16 %v3748_v63, %v3743_v60  ;;  %v13732_v54 = vpop.f32.mrb[192].mxu1 }
 0x789   :  { %v3752_v34 = vpop.f32.mrb[116].mxu0  ;;  %v2574_v4 = vpop.f32.mrb[193].mxu1 }
 0x78a   :  { %v3753_v30 = vadd.f32 %v3752_v34, %v13330_v58  ;;  %v3754_v17 = vpop.f32.mrb[117].mxu0  ;;  %4016 = vmatmul.mubr.f32.gmra.mrb[222].mxu0 %v1345_v41  ;;  %11406 = vrot.lane.b32.xlu1 %v11405_v28, %s12235_s22  ;;  %v1353_v41 = vld [vmem:[#allocation2 + $0x1e30] sm:$0xff] }
 0x78b   :  { %4020 = vmatprep.mubr.f32.mxu0 %v1350_v55  ;;  %v1358_v55 = vld [vmem:[#allocation2 + $0x1e58] sm:$0xff] }
 0x78c   :  { %v11347_v62 = vpop.permute.xlu0 %11346  ;;  %v13743_v34 = vpop.f32.mrb[194].mxu1 }
 0x78d   :  { %v11349_v47 = vunpack.i.h.bf16 %v11347_v62  ;;  %v11348_v27 = vunpack.i.l.bf16 %v11347_v62  ;;  %v3757_v60 = vpop.f32.mrb[118].mxu0  ;;  %v2579_v17 = vpop.f32.mrb[195].mxu1 }
 0x78e   :  { %v3758_v20 = vadd.f32 %v3757_v60, %v13350_v21  ;;  %v3759_v63 = vpop.f32.mrb[119].mxu0  ;;  %4021 = vmatmul.mubr.f32.gmra.mrb[224].mxu0 %v1349_v31  ;;  %v1362_v31 = vld [vmem:[#allocation2 + $0x1e78] sm:$0xff]  ;;  %v1361_v60 = vld [vmem:[#allocation2 + $0x1e70] sm:$0xff] }
 0x78f   :  { %v13737_v58 = vsel %vm5197_vm8, %v13616_v22, %v11349_v47  ;;  %v13741_v53 = vsel %vm5197_vm8, %v13612_v12, %v11348_v27  ;;  %4025 = vmatprep.mubr.f32.mxu0 %v1354_v6  ;;  %v1357_v22 = vld [vmem:[#allocation2 + $0x1e50] sm:$0xff]  ;;  %v1370_v17 = vld [vmem:[#allocation2 + $0x1eb8] sm:$0xff] }
 0x790   :  { %v11410_v28 = vpack.i.bf16 %v3758_v20, %v3753_v30  ;;  %v13747_v47 = vpop.f32.mrb[196].mxu1  ;;  %v1366_v20 = vld [vmem:[#allocation2 + $0x1e98] sm:$0xff] }
 0x791   :  { %v3762_v15 = vpop.f32.mrb[120].mxu0  ;;  %v2584_v6 = vpop.f32.mrb[197].mxu1 }
 0x792   :  { %v3763_v21 = vadd.f32 %v3762_v15, %v13370_v49  ;;  %v3764_v62 = vpop.f32.mrb[121].mxu0  ;;  %4026 = vmatmul.mubr.f32.gmra.mrb[226].mxu0 %v1353_v41  ;;  %11411 = vrot.lane.b32.xlu0 %v11410_v28, %s12235_s22  ;;  %v1365_v15 = vld [vmem:[#allocation2 + $0x1e90] sm:$0xff] }
 0x793   :  { %4030 = vmatprep.mubr.f32.mxu0 %v1358_v55 }
 0x794   :  { %v13750_v49 = vpop.f32.mrb[198].mxu1 }
 0x795   :  { %v3767_v12 = vpop.f32.mrb[122].mxu0  ;;  %v2589_v41 = vpop.f32.mrb[199].mxu1 }
 0x796   :  { %v3768_v30 = vadd.f32 %v3767_v12, %v13395_v1  ;;  %v3769_v27 = vpop.f32.mrb[123].mxu0  ;;  %4031 = vmatmul.mubr.f32.gmra.mrb[228].mxu0 %v1357_v22 }
 0x797   :  { %4035 = vmatprep.mubr.f32.mxu0 %v1362_v31 }
 0x798   :  { %v11415_v4 = vpack.i.bf16 %v3768_v30, %v3763_v21  ;;  %v13758_v62 = vpop.f32.mrb[200].mxu1  ;;  %v1369_v30 = vld [vmem:[#allocation2 + $0x1eb0] sm:$0xff] }
 0x799   :  { %v3772_v63 = vpop.f32.mrb[124].mxu0  ;;  %v2594_v31 = vpop.f32.mrb[201].mxu1 }
 0x79a   :  { %v13753_v28 = vadd.f32 %v3772_v63, %v13415_v35  ;;  %v3774_v55 = vpop.f32.mrb[125].mxu0  ;;  %4036 = vmatmul.mubr.f32.gmra.mrb[230].mxu0 %v1361_v60  ;;  %11416 = vrot.lane.b32.xlu0 %v11415_v4, %s12235_s22  ;;  %v1374_v60 = vld [vmem:[#allocation2 + $0x1ed8] sm:$0xff] }
 0x79b   :  { %4040 = vmatprep.mubr.f32.mxu0 %v1366_v20  ;;  %v1373_v55 = vld [vmem:[#allocation2 + $0x1ed0] sm:$0xff] }
 0x79c   :  { %v13756_v1 = vpop.permute.xlu1 %11351  ;;  %v13770_v4 = vpop.f32.mrb[202].mxu1 }
 0x79d   :  { %14685 = vst [vmem:[#allocation89_spill] sm:$0xff] %v13756_v1  ;;  %v11354_v21 = vunpack.i.h.bf16 %v13756_v1  ;;  %v3777_v22 = vpop.f32.mrb[126].mxu0  ;;  %v2599_v63 = vpop.f32.mrb[203].mxu1 }
 0x79e   :  { %v13762_v12 = vadd.f32 %v3777_v22, %v13436_v2  ;;  %v3779_v35 = vpop.f32.mrb[127].mxu0  ;;  %4041 = vmatmul.mubr.f32.gmra.mrb[232].mxu0 %v1365_v15  ;;  %v1378_v15 = vld [vmem:[#allocation2 + $0x1ef8] sm:$0xff] }
 0x79f   :  { %v13766_v6 = vsel %vm5214_vm9, %v13646_v3, %v11354_v21  ;;  %4045 = vmatprep.mubr.f32.mxu0 %v1370_v17  ;;  %v1377_v35 = vld [vmem:[#allocation2 + $0x1ef0] sm:$0xff] }
 0x7a0   :  { %14686 = vst [vmem:[#allocation50_spill] sm:$0xff] %v13766_v6  ;;  %v13773_v22 = vpop.f32.mrb[204].mxu1  ;;  %v1382_v6 = vld [vmem:[#allocation2 + $0x1f18] sm:$0xff] }
 0x7a1   :  { %v3782_v20 = vpop.f32.mrb[128].mxu0  ;;  %v2604_v17 = vpop.f32.mrb[205].mxu1 }
 0x7a2   :  { %v3783_v41 = vadd.f32 %v3782_v20, %v13460_v26  ;;  %v3784_v2 = vpop.f32.mrb[129].mxu0  ;;  %4046 = vmatmul.mubr.f32.gmra.mrb[234].mxu0 %v1369_v30 }
 0x7a3   :  { %4050 = vmatprep.mubr.f32.mxu0 %v1374_v60  ;;  %v1381_v2 = vld [vmem:[#allocation2 + $0x1f10] sm:$0xff] }
 0x7a4   :  { %v13776_v63 = vpop.f32.mrb[206].mxu1 }
 0x7a5   :  { %v3787_v3 = vpop.f32.mrb[130].mxu0  ;;  %v2609_v20 = vpop.f32.mrb[207].mxu1 }
 0x7a6   :  { %v3788_v21 = vadd.f32 %v3787_v3, %v13482_v40  ;;  %v3789_v31 = vpop.f32.mrb[131].mxu0  ;;  %4051 = vmatmul.mubr.f32.gmra.mrb[236].mxu0 %v1373_v55  ;;  %v1386_v3 = vld [vmem:[#allocation2 + $0x1f38] sm:$0xff] }
 0x7a7   :  { %4055 = vmatprep.mubr.f32.mxu0 %v1378_v15 }
 0x7a8   :  { %v11420_v27 = vpack.i.bf16 %v3788_v21, %v3783_v41  ;;  %v13780_v55 = vpop.f32.mrb[208].mxu1 }
 0x7a9   :  { %v3792_v26 = vpop.f32.mrb[132].mxu0  ;;  %v2614_v21 = vpop.f32.mrb[209].mxu1 }
 0x7aa   :  { %v3793_v30 = vadd.f32 %v3792_v26, %v13502_v48  ;;  %v3794_v60 = vpop.f32.mrb[133].mxu0  ;;  %4056 = vmatmul.mubr.f32.gmra.mrb[238].mxu0 %v1377_v35  ;;  %11421 = vrot.lane.b32.xlu1 %v11420_v27, %s12236_s28  ;;  %v1385_v27 = vld [vmem:[#allocation2 + $0x1f30] sm:$0xff]  ;;  %v13791_v35 = vpop.permute.xlu0 %11356 }
 0x7ab   :  { %4060 = vmatprep.mubr.f32.mxu0 %v1382_v6  ;;  %14687 = vst [vmem:[#allocation56_spill] sm:$0xff] %v13791_v35  ;;  %v1390_v60 = vld [vmem:[#allocation2 + $0x1f58] sm:$0xff] }
 0x7ac   :  { %v11362_v40 = vpop.permute.xlu1 %11361 }
 0x7ad   :  { %v11364_v15 = vunpack.i.h.bf16 %v11362_v40  ;;  %v11363_v41 = vunpack.i.l.bf16 %v11362_v40  ;;  %v3797_v17 = vpop.f32.mrb[134].mxu0  ;;  %v13793_v40 = vpop.f32.mrb[210].mxu1 }
 0x7ae   :  { %v3798_v31 = vadd.f32 %v3797_v17, %v13517_v23  ;;  %v3799_v20 = vpop.f32.mrb[135].mxu0  ;;  %4061 = vmatmul.mubr.f32.gmra.mrb[240].mxu0 %v1381_v2  ;;  %v2619_v23 = vpop.f32.mrb[211].mxu1 }
 0x7af   :  { %v13785_v48 = vsel %vm5214_vm9, %v13677_v25, %v11363_v41  ;;  %v13789_v6 = vsel %vm5214_vm9, %v13681_v45, %v11364_v15  ;;  %4065 = vmatprep.mubr.f32.mxu0 %v1386_v3  ;;  %v1389_v25 = vld [vmem:[#allocation2 + $0x1f50] sm:$0xff]  ;;  %v1394_v15 = vld [vmem:[#allocation2 + $0x1f78] sm:$0xff] }
 0x7b0   :  { %v11425_v26 = vpack.i.bf16 %v3798_v31, %v3793_v30  ;;  %v13797_v3 = vpop.f32.mrb[212].mxu1 }
 0x7b1   :  { %v3802_v21 = vpop.f32.mrb[136].mxu0  ;;  %v2624_v31 = vpop.f32.mrb[213].mxu1 }
 0x7b2   :  { %v3803_v2 = vadd.f32 %v3802_v21, %v13530_v13  ;;  %v3804_v17 = vpop.f32.mrb[137].mxu0  ;;  %4066 = vmatmul.mubr.f32.gmra.mrb[242].mxu0 %v1385_v27  ;;  %11426 = vrot.lane.b32.xlu0 %v11425_v26, %s12236_s28  ;;  %v1393_v26 = vld [vmem:[#allocation2 + $0x1f70] sm:$0xff]  ;;  %v1398_v21 = vld [vmem:[#allocation2 + $0x1f98] sm:$0xff] }
 0x7b3   :  { %4070 = vmatprep.mubr.f32.mxu0 %v1390_v60 }
 0x7b4   :  { %v11367_v45 = vpop.permute.xlu0 %11366  ;;  %v13808_v23 = vpop.f32.mrb[214].mxu1 }
 0x7b5   :  { %v11369_v41 = vunpack.i.h.bf16 %v11367_v45  ;;  %v11368_v20 = vunpack.i.l.bf16 %v11367_v45  ;;  %v3807_v30 = vpop.f32.mrb[138].mxu0  ;;  %v2629_v45 = vpop.f32.mrb[215].mxu1 }
 0x7b6   :  { %v3808_v35 = vadd.f32 %v3807_v30, %v13538_v10  ;;  %v3809_v1 = vpop.f32.mrb[139].mxu0  ;;  %4071 = vmatmul.mubr.f32.gmra.mrb[244].mxu0 %v1389_v25  ;;  %v5327_v25 = vld [vmem:[#allocation4 + $0x58] sm:$0xff] }
 0x7b7   :  { %v13802_v13 = vsel %vm5214_vm9, %v13692_v39, %v11368_v20  ;;  %v13806_v27 = vsel %vm5214_vm9, %v13696_v52, %v11369_v41  ;;  %4075 = vmatprep.mubr.f32.mxu0 %v1394_v15  ;;  %v5326_v39 = vld [vmem:[#allocation4 + $0x50] sm:$0xff]  ;;  %v1402_v15 = vld [vmem:[#allocation2 + $0x1fb8] sm:$0xff] }
 0x7b8   :  { %14688 = vst [vmem:[#allocation63_spill] sm:$0xff] %v13802_v13  ;;  %14689 = vst [vmem:[#allocation51_spill] sm:$0xff] %v13806_v27  ;;  %v11430_v60 = vpack.i.bf16 %v3808_v35, %v3803_v2  ;;  %v1397_v20 = vld [vmem:[#allocation2 + $0x1f90] sm:$0xff]  ;;  %v9667_v52 = vpack.c.bf16 %v5327_v25, %v5326_v39  ;;  %v13812_v30 = vpop.f32.mrb[216].mxu1  ;;  %v1406_v39 = vld [vmem:[#allocation2 + $0x1fd8] sm:$0xff] }
 0x7b9   :  { %v3812_v17 = vpop.f32.mrb[140].mxu0  ;;  %v2634_v45 = vpop.f32.mrb[217].mxu1 }
 0x7ba   :  { %v3813_v10 = vadd.f32 %v3812_v17, %v13561_v8  ;;  %v3814_v1 = vpop.f32.mrb[141].mxu0  ;;  %4076 = vmatmul.mubr.f32.gmra.mrb[246].mxu0 %v1393_v26  ;;  %11431 = vrot.lane.b32.xlu1 %v11430_v60, %s12236_s28 }
 0x7bb   :  { %4080 = vmatprep.mubr.f32.mxu0 %v1398_v21  ;;  %9668 = vmatprep.subr.bf16.mxu1 %v9667_v52  ;;  %v1401_v21 = vld [vmem:[#allocation2 + $0x1fb0] sm:$0xff] }
 0x7bc   :  { %v11372_v41 = vpop.permute.xlu1 %11371  ;;  %9670 = vmatpush3.bf16.msra.mxu1 %v9667_v52 }
 0x7bd   :  { %v11374_v35 = vunpack.i.h.bf16 %v11372_v41  ;;  %v11373_v2 = vunpack.i.l.bf16 %v11372_v41  ;;  %v3817_v31 = vpop.f32.mrb[142].mxu0 }
 0x7be   :  { %v3818_v8 = vadd.f32 %v3817_v31, %v13575_v7  ;;  %v3819_v17 = vpop.f32.mrb[143].mxu0  ;;  %4081 = vmatmul.mubr.f32.gmra.mrb[248].mxu0 %v1397_v20  ;;  %v13823_v25 = vpop.f32.mrb[218].mxu1 }
 0x7bf   :  { %v13817_v26 = vsel %vm5214_vm9, %v13707_v18, %v11373_v2  ;;  %v13821_v60 = vsel %vm5214_vm9, %v13711_v57, %v11374_v35  ;;  %4085 = vmatprep.mubr.f32.mxu0 %v1402_v15  ;;  %v2639_v45 = vpop.f32.mrb[219].mxu1  ;;  %v1405_v18 = vld [vmem:[#allocation2 + $0x1fd0] sm:$0xff]  ;;  %v1410_v2 = vld [vmem:[#allocation2 + $0x1ff8] sm:$0xff] }
 0x7c0   :  { %v11435_v1 = vpack.i.bf16 %v3818_v8, %v3813_v10 }
 0x7c1   :  { %v3822_v41 = vpop.f32.mrb[144].mxu0 }
 0x7c2   :  { %v3823_v7 = vadd.f32 %v3822_v41, %v13588_v43  ;;  %v3824_v20 = vpop.f32.mrb[145].mxu0  ;;  %4086 = vmatmul.mubr.f32.gmra.mrb[250].mxu0 %v1401_v21  ;;  %11436 = vrot.lane.b32.xlu0 %v11435_v1, %s12236_s28  ;;  %v13827_v57 = vpop.f32.mrb[220].mxu1  ;;  %v1409_v1 = vld [vmem:[#allocation2 + $0x1ff0] sm:$0xff] }
 0x7c3   :  { %4090 = vmatprep.mubr.f32.mxu0 %v1406_v39  ;;  %v2644_v31 = vpop.f32.mrb[221].mxu1 }
 0x7c4   :  { %v11377_v52 = vpop.permute.xlu0 %11376 }
 0x7c5   :  { %v11379_v15 = vunpack.i.h.bf16 %v11377_v52  ;;  %v11378_v35 = vunpack.i.l.bf16 %v11377_v52  ;;  %v3827_v10 = vpop.f32.mrb[146].mxu0 }
 0x7c6   :  { %v3828_v8 = vadd.f32 %v3827_v10, %v13592_v29  ;;  %v3829_v17 = vpop.f32.mrb[147].mxu0  ;;  %4091 = vmatmul.mubr.f32.gmra.mrb[252].mxu0 %v1405_v18  ;;  %v13838_v41 = vpop.f32.mrb[222].mxu1 }
 0x7c7   :  { %v13832_v43 = vsel %vm5214_vm9, %v13722_v19, %v11378_v35  ;;  %v13836_v21 = vsel %vm5214_vm9, %v13726_v9, %v11379_v15  ;;  %4095 = vmatprep.mubr.f32.mxu0 %v1410_v2  ;;  %v2649_v20 = vpop.f32.mrb[223].mxu1 }
 0x7c8   :  { %v11440_v39 = vpack.i.bf16 %v3828_v8, %v3823_v7 }
 0x7c9   :  { %v3832_v45 = vpop.f32.mrb[148].mxu0 }
 0x7ca   :  { %v3833_v52 = vadd.f32 %v3832_v45, %v13603_v11  ;;  %v3834_v29 = vpop.f32.mrb[149].mxu0  ;;  %4096 = vmatmul.mubr.f32.gmra.mrb[254].mxu0 %v1409_v1  ;;  %11441 = vrot.lane.b32.xlu1 %v11440_v39, %s12236_s28  ;;  %v13842_v19 = vpop.f32.mrb[224].mxu1 }
 0x7cb   :  { %v2654_v15 = vpop.f32.mrb[225].mxu1 }
 0x7cc   :  { %v11382_v18 = vpop.permute.xlu1 %11381 }
 0x7cd   :  { %v11384_v35 = vunpack.i.h.bf16 %v11382_v18  ;;  %v11383_v10 = vunpack.i.l.bf16 %v11382_v18  ;;  %v3837_v9 = vpop.f32.mrb[150].mxu0 }
 0x7ce   :  { %v3838_v2 = vadd.f32 %v3837_v9, %v13607_v32  ;;  %v3839_v7 = vpop.f32.mrb[151].mxu0  ;;  %v13853_v17 = vpop.f32.mrb[226].mxu1 }
 0x7cf   :  { %v13847_v31 = vsel %vm5214_vm9, %v13741_v53, %v11383_v10  ;;  %v13851_v11 = vsel %vm5214_vm9, %v13737_v58, %v11384_v35  ;;  %v2659_v39 = vpop.f32.mrb[227].mxu1 }
 0x7d0   :  { %v11445_v8 = vpack.i.bf16 %v3838_v2, %v3833_v52 }
 0x7d1   :  { %v3842_v1 = vpop.f32.mrb[152].mxu0 }
 0x7d2   :  { %v3843_v45 = vadd.f32 %v3842_v1, %v13618_v36  ;;  %v3844_v20 = vpop.f32.mrb[153].mxu0  ;;  %11446 = vrot.lane.b32.xlu0 %v11445_v8, %s12236_s28  ;;  %v13857_v32 = vpop.f32.mrb[228].mxu1 }
 0x7d3   :  { %v2664_v18 = vpop.f32.mrb[229].mxu1 }
 0x7d5   :  { %v3847_v29 = vpop.f32.mrb[154].mxu0 }
 0x7d6   :  { %v3848_v53 = vadd.f32 %v3847_v29, %v13622_v0  ;;  %v3849_v10 = vpop.f32.mrb[155].mxu0  ;;  %v13860_v58 = vpop.f32.mrb[230].mxu1 }
 0x7d7   :  { %v2669_v35 = vpop.f32.mrb[231].mxu1 }
 0x7d8   :  { %v11450_v9 = vpack.i.bf16 %v3848_v53, %v3843_v45 }
 0x7d9   :  { %v3852_v52 = vpop.f32.mrb[156].mxu0 }
 0x7da   :  { %v13863_v15 = vadd.f32 %v3852_v52, %v13633_v42  ;;  %v3854_v2 = vpop.f32.mrb[157].mxu0  ;;  %11451 = vrot.lane.b32.xlu1 %v11450_v9, %s12236_s28  ;;  %v13866_v36 = vpop.f32.mrb[232].mxu1 }
 0x7db   :  { %v2674_v8 = vpop.f32.mrb[233].mxu1 }
 0x7dd   :  { %v3857_v7 = vpop.f32.mrb[158].mxu0 }
 0x7de   :  { %v13869_v1 = vadd.f32 %v3857_v7, %v13639_v46  ;;  %v3859_v0 = vpop.f32.mrb[159].mxu0  ;;  %v13873_v45 = vpop.f32.mrb[234].mxu1 }
 0x7df   :  { %v2679_v29 = vpop.f32.mrb[235].mxu1 }
 0x7e1   :  { %v3862_v20 = vpop.f32.mrb[160].mxu0 }
 0x7e2   :  { %v3863_v42 = vadd.f32 %v3862_v20, %v13654_v38  ;;  %v3864_v18 = vpop.f32.mrb[161].mxu0  ;;  %v13876_v53 = vpop.f32.mrb[236].mxu1 }
 0x7e3   :  { %v2684_v9 = vpop.f32.mrb[237].mxu1 }
 0x7e5   :  { %v3867_v10 = vpop.f32.mrb[162].mxu0 }
 0x7e6   :  { %v3868_v52 = vadd.f32 %v3867_v10, %v13657_v5  ;;  %v3869_v35 = vpop.f32.mrb[163].mxu0  ;;  %v13879_v2 = vpop.f32.mrb[238].mxu1 }
 0x7e7   :  { %v2689_v8 = vpop.f32.mrb[239].mxu1 }
 0x7e8   :  { %v11455_v46 = vpack.i.bf16 %v3868_v52, %v3863_v42 }
 0x7e9   :  { %v3872_v7 = vpop.f32.mrb[164].mxu0 }
 0x7ea   :  { %v3873_v0 = vadd.f32 %v3872_v7, %v13668_v24  ;;  %v3874_v39 = vpop.f32.mrb[165].mxu0  ;;  %11456 = vrot.lane.b32.xlu1 %v11455_v46, %s12237_s10  ;;  %v13883_v20 = vpop.f32.mrb[240].mxu1 }
 0x7eb   :  { %v2694_v27 = vpop.f32.mrb[241].mxu1 }
 0x7ec   :  { %v11397_v38 = vpop.permute.xlu1 %11396 }
 0x7ed   :  { %v11399_v29 = vunpack.i.h.bf16 %v11397_v38  ;;  %v11398_v18 = vunpack.i.l.bf16 %v11397_v38  ;;  %v3877_v9 = vpop.f32.mrb[166].mxu0 }
 0x7ee   :  { %v3878_v5 = vadd.f32 %v3877_v9, %v13672_v59  ;;  %v3879_v42 = vpop.f32.mrb[167].mxu0  ;;  %v13894_v52 = vpop.f32.mrb[242].mxu1 }
 0x7ef   :  { %v13888_v10 = vsel %vm5231_vm10, %v13785_v48, %v11398_v18  ;;  %v13892_v24 = vsel %vm5231_vm10, %v13789_v6, %v11399_v29  ;;  %v2699_v46 = vpop.f32.mrb[243].mxu1  ;;  %v13901_v9 = vpop.permute.xlu0 %11386 }
 0x7f0   :  { %14690 = vst [vmem:[#allocation74_spill] sm:$0xff] %v13892_v24  ;;  %v11460_v39 = vpack.i.bf16 %v3878_v5, %v3873_v0 }
 0x7f1   :  { %v3882_v35 = vpop.f32.mrb[168].mxu0 }
 0x7f2   :  { %v3883_v7 = vadd.f32 %v3882_v35, %v13683_v14  ;;  %v3884_v27 = vpop.f32.mrb[169].mxu0  ;;  %11461 = vrot.lane.b32.xlu0 %v11460_v39, %s12237_s10  ;;  %v13898_v59 = vpop.f32.mrb[244].mxu1  ;;  %v5328_v39 = vld [vmem:[#allocation4 + $0x60] sm:$0xff]  ;;  %v5329_v35 = vld [vmem:[#allocation4 + $0x68] sm:$0xff] }
 0x7f3   :  { %v2704_v38 = vpop.f32.mrb[245].mxu1  ;;  %v13907_v46 = vpop.permute.xlu0 %11391  ;;  %v9671_v27 = vpack.c.bf16 %v5329_v35, %v5328_v39 }
 0x7f5   :  { %v3887_v8 = vpop.f32.mrb[170].mxu0  ;;  %9672 = vmatprep.subr.bf16.mxu1 %v9671_v27 }
 0x7f6   :  { %v3888_v48 = vadd.f32 %v3887_v8, %v13687_v44  ;;  %v3889_v18 = vpop.f32.mrb[171].mxu0  ;;  %v13903_v0 = vpop.f32.mrb[246].mxu1  ;;  %9674 = vmatpush3.bf16.msra.mxu1 %v9671_v27 }
 0x7f7   :  { %v2709_v5 = vpop.f32.mrb[247].mxu1 }
 0x7f8   :  { %v11465_v6 = vpack.i.bf16 %v3888_v48, %v3883_v7 }
 0x7f9   :  { %v3892_v29 = vpop.f32.mrb[172].mxu0 }
 0x7fa   :  { %v3893_v42 = vadd.f32 %v3892_v29, %v13698_v61  ;;  %v3894_v14 = vpop.f32.mrb[173].mxu0  ;;  %11466 = vrot.lane.b32.xlu1 %v11465_v6, %s12237_s10  ;;  %v13909_v44 = vpop.f32.mrb[248].mxu1 }
 0x7fb   :  { %v2714_v48 = vpop.f32.mrb[249].mxu1  ;;  %v13920_v29 = vpop.permute.xlu0 %11401 }
 0x7fc   :  { %v11407_v38 = vpop.permute.xlu1 %11406  ;;  %14691 = vst [vmem:[#allocation80_spill] sm:$0xff] %v13920_v29 }
 0x7fd   :  { %v11409_v8 = vunpack.i.h.bf16 %v11407_v38  ;;  %v11408_v18 = vunpack.i.l.bf16 %v11407_v38  ;;  %v3897_v7 = vpop.f32.mrb[174].mxu0 }
 0x7fe   :  { %v3898_v5 = vadd.f32 %v3897_v7, %v13702_v51  ;;  %v3899_v13 = vpop.f32.mrb[175].mxu0  ;;  %v13922_v39 = vpop.f32.mrb[250].mxu1 }
 0x7ff   :  { %v13914_v61 = vsel %vm5231_vm10, %v13817_v26, %v11408_v18  ;;  %v13918_v6 = vsel %vm5231_vm10, %v13821_v60, %v11409_v8  ;;  %v2719_v38 = vpop.f32.mrb[251].mxu1 }
 0x800   :  { %v11470_v14 = vpack.i.bf16 %v3898_v5, %v3893_v42 }
 0x801   :  { %v3902_v35 = vpop.f32.mrb[176].mxu0 }
 0x802   :  { %v3903_v48 = vadd.f32 %v3902_v35, %v13713_v56  ;;  %v3904_v51 = vpop.f32.mrb[177].mxu0  ;;  %11471 = vrot.lane.b32.xlu0 %v11470_v14, %s12237_s10  ;;  %v13926_v27 = vpop.f32.mrb[252].mxu1 }
 0x803   :  { %v2724_v60 = vpop.f32.mrb[253].mxu1 }
 0x804   :  { %v11412_v13 = vpop.permute.xlu0 %11411 }
 0x805   :  { %v11414_v26 = vunpack.i.h.bf16 %v11412_v13  ;;  %v11413_v18 = vunpack.i.l.bf16 %v11412_v13  ;;  %v3907_v7 = vpop.f32.mrb[178].mxu0 }
 0x806   :  { %v3908_v8 = vadd.f32 %v3907_v7, %v13717_v50  ;;  %v3909_v29 = vpop.f32.mrb[179].mxu0  ;;  %v13937_v14 = vpop.f32.mrb[254].mxu1 }
 0x807   :  { %v13931_v42 = vsel %vm5231_vm10, %v13832_v43, %v11413_v18  ;;  %v13935_v56 = vsel %vm5231_vm10, %v13836_v21, %v11414_v26  ;;  %v2729_v38 = vpop.f32.mrb[255].mxu1 }
 0x808   :  { %14692 = vst [vmem:[#allocation86_spill] sm:$0xff] %v13931_v42  ;;  %14693 = vst [vmem:[#allocation52_spill] sm:$0xff] %v13935_v56  ;;  %v11475_v5 = vpack.i.bf16 %v3908_v8, %v3903_v48 }
 0x809   :  { %v3912_v35 = vpop.f32.mrb[180].mxu0 }
 0x80a   :  { %v3913_v51 = vadd.f32 %v3912_v35, %v13728_v37  ;;  %v3914_v13 = vpop.f32.mrb[181].mxu0  ;;  %11476 = vrot.lane.b32.xlu1 %v11475_v5, %s12237_s10 }
 0x80b   :  { %v13941_v29 = vpop.f32.mrb[150].mxu1 }
 0x80c   :  { %v11417_v50 = vpop.permute.xlu0 %11416  ;;  %v2734_v60 = vpop.f32.mrb[151].mxu1 }
 0x80d   :  { %v11419_v7 = vunpack.i.h.bf16 %v11417_v50  ;;  %v11418_v43 = vunpack.i.l.bf16 %v11417_v50  ;;  %v3917_v18 = vpop.f32.mrb[182].mxu0 }
 0x80e   :  { %v3918_v21 = vadd.f32 %v3917_v18, %v13732_v54  ;;  %v3919_v26 = vpop.f32.mrb[183].mxu0 }
 0x80f   :  { %v13946_v48 = vsel %vm5231_vm10, %v13847_v31, %v11418_v43  ;;  %v13950_v37 = vsel %vm5231_vm10, %v13851_v11, %v11419_v7 }
 0x810   :  { %v11480_v8 = vpack.i.bf16 %v3918_v21, %v3913_v51  ;;  %v13952_v5 = vpop.f32.mrb[152].mxu1 }
 0x811   :  { %v3922_v35 = vpop.f32.mrb[184].mxu0  ;;  %v2739_v38 = vpop.f32.mrb[153].mxu1 }
 0x812   :  { %v13955_v13 = vadd.f32 %v3922_v35, %v13743_v34  ;;  %v3924_v50 = vpop.f32.mrb[185].mxu0  ;;  %11481 = vrot.lane.b32.xlu1 %v11480_v8, %s12237_s10 }
 0x814   :  { %v13958_v54 = vpop.f32.mrb[154].mxu1 }
 0x815   :  { %v3927_v18 = vpop.f32.mrb[186].mxu0  ;;  %v2744_v31 = vpop.f32.mrb[155].mxu1 }
 0x816   :  { %v13961_v43 = vadd.f32 %v3927_v18, %v13747_v47  ;;  %v3929_v11 = vpop.f32.mrb[187].mxu0 }
 0x818   :  { %v13965_v7 = vpop.f32.mrb[156].mxu1 }
 0x819   :  { %v3932_v60 = vpop.f32.mrb[188].mxu0  ;;  %v2749_v21 = vpop.f32.mrb[157].mxu1 }
 0x81a   :  { %v13968_v34 = vadd.f32 %v3932_v60, %v13750_v49  ;;  %v3934_v26 = vpop.f32.mrb[189].mxu0 }
 0x81c   :  { %v13970_v8 = vpop.f32.mrb[158].mxu1 }
 0x81d   :  { %v3937_v35 = vpop.f32.mrb[190].mxu0  ;;  %v2754_v38 = vpop.f32.mrb[159].mxu1 }
 0x81e   :  { %v13973_v50 = vadd.f32 %v3937_v35, %v13758_v62  ;;  %v3939_v47 = vpop.f32.mrb[191].mxu0 }
 0x821   :  { %v3942_v31 = vpop.f32.mrb[192].mxu0 }
 0x822   :  { %v3943_v11 = vadd.f32 %v3942_v31, %v13770_v4  ;;  %v3944_v51 = vpop.f32.mrb[193].mxu0 }
 0x825   :  { %v3947_v21 = vpop.f32.mrb[194].mxu0 }
 0x826   :  { %v3948_v49 = vadd.f32 %v3947_v21, %v13773_v22  ;;  %v3949_v60 = vpop.f32.mrb[195].mxu0  ;;  %v13984_v22 = vpop.permute.xlu1 %11421 }
 0x828   :  { %v11485_v26 = vpack.i.bf16 %v3948_v49, %v3943_v11 }
 0x829   :  { %v3952_v56 = vpop.f32.mrb[196].mxu0 }
 0x82a   :  { %v3953_v42 = vadd.f32 %v3952_v56, %v13776_v63  ;;  %v3954_v38 = vpop.f32.mrb[197].mxu0  ;;  %11486 = vrot.lane.b32.xlu1 %v11485_v26, %s12238_s15 }
 0x82c   :  { %v13987_v11 = vpop.permute.xlu1 %11431 }
 0x82d   :  { %v3957_v62 = vpop.f32.mrb[198].mxu0 }
 0x82e   :  { %v3958_v35 = vadd.f32 %v3957_v62, %v13780_v55  ;;  %v3959_v47 = vpop.f32.mrb[199].mxu0 }
 0x830   :  { %v11490_v18 = vpack.i.bf16 %v3958_v35, %v3953_v42  ;;  %v5331_v35 = vld [vmem:[#allocation4 + $0x78] sm:$0xff] }
 0x831   :  { %v3962_v24 = vpop.f32.mrb[200].mxu0 }
 0x832   :  { %v3963_v4 = vadd.f32 %v3962_v24, %v13793_v40  ;;  %v3964_v51 = vpop.f32.mrb[201].mxu0  ;;  %11491 = vrot.lane.b32.xlu0 %v11490_v18, %s12238_s15 }
 0x835   :  { %v3967_v31 = vpop.f32.mrb[202].mxu0 }
 0x836   :  { %v3968_v63 = vadd.f32 %v3967_v31, %v13797_v3  ;;  %v3969_v56 = vpop.f32.mrb[203].mxu0 }
 0x838   :  { %v11495_v21 = vpack.i.bf16 %v3968_v63, %v3963_v4 }
 0x839   :  { %v3972_v49 = vpop.f32.mrb[204].mxu0 }
 0x83a   :  { %v3973_v55 = vadd.f32 %v3972_v49, %v13808_v23  ;;  %v3974_v60 = vpop.f32.mrb[205].mxu0  ;;  %11496 = vrot.lane.b32.xlu1 %v11495_v21, %s12238_s15  ;;  %v5330_v23 = vld [vmem:[#allocation4 + $0x70] sm:$0xff] }
 0x83b   :  { %v9675_v4 = vpack.c.bf16 %v5331_v35, %v5330_v23 }
 0x83c   :  { %v11442_v42 = vpop.permute.xlu1 %11441 }
 0x83d   :  { %v11444_v40 = vunpack.i.h.bf16 %v11442_v42  ;;  %v11443_v24 = vunpack.i.l.bf16 %v11442_v42  ;;  %v3977_v26 = vpop.f32.mrb[206].mxu0  ;;  %9676 = vmatprep.subr.bf16.mxu1 %v9675_v4 }
 0x83e   :  { %v3978_v18 = vadd.f32 %v3977_v26, %v13812_v30  ;;  %v3979_v38 = vpop.f32.mrb[207].mxu0  ;;  %9678 = vmatpush3.bf16.msra.mxu1 %v9675_v4 }
 0x83f   :  { %v13994_v3 = vsel %vm5248_vm11, %v13914_v61, %v11443_v24  ;;  %v13998_v62 = vsel %vm5248_vm11, %v13918_v6, %v11444_v40 }
 0x840   :  { %v11500_v47 = vpack.i.bf16 %v3978_v18, %v3973_v55 }
 0x841   :  { %v3982_v51 = vpop.f32.mrb[208].mxu0 }
 0x842   :  { %v3983_v31 = vadd.f32 %v3982_v51, %v13823_v25  ;;  %v3984_v63 = vpop.f32.mrb[209].mxu0  ;;  %11501 = vrot.lane.b32.xlu0 %v11500_v47, %s12238_s15 }
 0x845   :  { %v3987_v30 = vpop.f32.mrb[210].mxu0 }
 0x846   :  { %v3988_v61 = vadd.f32 %v3987_v30, %v13827_v57  ;;  %v3989_v56 = vpop.f32.mrb[211].mxu0 }
 0x848   :  { %v11505_v21 = vpack.i.bf16 %v3988_v61, %v3983_v31 }
 0x849   :  { %v3992_v49 = vpop.f32.mrb[212].mxu0 }
 0x84a   :  { %v3993_v6 = vadd.f32 %v3992_v49, %v13838_v41  ;;  %v3994_v60 = vpop.f32.mrb[213].mxu0  ;;  %11506 = vrot.lane.b32.xlu1 %v11505_v21, %s12238_s15 }
 0x84c   :  { %v11452_v55 = vpop.permute.xlu1 %11451 }
 0x84d   :  { %v11454_v42 = vunpack.i.h.bf16 %v11452_v55  ;;  %v11453_v40 = vunpack.i.l.bf16 %v11452_v55  ;;  %v3997_v25 = vpop.f32.mrb[214].mxu0 }
 0x84e   :  { %v3998_v24 = vadd.f32 %v3997_v25, %v13842_v19  ;;  %v3999_v26 = vpop.f32.mrb[215].mxu0 }
 0x84f   :  { %v14008_v18 = vsel %vm5248_vm11, %v13946_v48, %v11453_v40  ;;  %v14012_v57 = vsel %vm5248_vm11, %v13950_v37, %v11454_v42 }
 0x850   :  { %v11510_v38 = vpack.i.bf16 %v3998_v24, %v3993_v6 }
 0x851   :  { %v4002_v41 = vpop.f32.mrb[216].mxu0 }
 0x852   :  { %v4003_v23 = vadd.f32 %v4002_v41, %v13853_v17  ;;  %v4004_v35 = vpop.f32.mrb[217].mxu0  ;;  %11511 = vrot.lane.b32.xlu0 %v11510_v38, %s12238_s15 }
 0x855   :  { %v4007_v47 = vpop.f32.mrb[218].mxu0 }
 0x856   :  { %v4008_v4 = vadd.f32 %v4007_v47, %v13857_v32  ;;  %v4009_v19 = vpop.f32.mrb[219].mxu0 }
 0x858   :  { %v11550_v51 = vpack.i.bf16 %v4008_v4, %v4003_v23 }
 0x859   :  { %v4012_v31 = vpop.f32.mrb[220].mxu0 }
 0x85a   :  { %v14018_v48 = vadd.f32 %v4012_v31, %v13860_v58  ;;  %v4014_v63 = vpop.f32.mrb[221].mxu0 }
 0x85d   :  { %v4017_v30 = vpop.f32.mrb[222].mxu0 }
 0x85e   :  { %v4018_v37 = vadd.f32 %v4017_v30, %v13866_v36  ;;  %v4019_v61 = vpop.f32.mrb[223].mxu0 }
 0x85f   :  { %v14698_v61 = vld [vmem:[#allocation53_spill] sm:$0xff] }
 0x860   :  { %v11570_v56 = vpack.i.bf16 %v4018_v37, %v14018_v48 }
 0x861   :  { %v4022_v17 = vpop.f32.mrb[224].mxu0 }
 0x862   :  { %v4023_v21 = vadd.f32 %v4022_v17, %v13873_v45  ;;  %v4024_v49 = vpop.f32.mrb[225].mxu0  ;;  %v14694_v45 = vpack.i.bf16 %v13961_v43, %v13955_v13 }
 0x865   :  { %v4027_v6 = vpop.f32.mrb[226].mxu0 }
 0x866   :  { %v4028_v32 = vadd.f32 %v4027_v6, %v13876_v53  ;;  %v4029_v60 = vpop.f32.mrb[227].mxu0 }
 0x868   :  { %v11515_v55 = vpack.i.bf16 %v4028_v32, %v4023_v21  ;;  %v14701_v32 = vpack.i.bf16 %v13869_v1, %v13863_v15 }
 0x869   :  { %v4032_v42 = vpop.f32.mrb[228].mxu0 }
 0x86a   :  { %v4033_v58 = vadd.f32 %v4032_v42, %v13879_v2  ;;  %v4034_v40 = vpop.f32.mrb[229].mxu0  ;;  %11516 = vrot.lane.b32.xlu1 %v11515_v55, %s12239_s2 }
 0x86d   :  { %v4037_v36 = vpop.f32.mrb[230].mxu0 }
 0x86e   :  { %v4038_v25 = vadd.f32 %v4037_v36, %v13883_v20  ;;  %v4039_v24 = vpop.f32.mrb[231].mxu0  ;;  %11531 = vrot.lane.b32.xlu1 %v14694_v45, %s12237_s10  ;;  %v14695_v20 = vpack.i.bf16 %v13444_v33, %v13426_v16  ;;  %v14696_v16 = vpack.i.bf16 %v13973_v50, %v13968_v34  ;;  %v14700_v34 = vpack.i.bf16 %v13762_v12, %v13753_v28  ;;  %v11457_v45 = vpop.permute.xlu1 %11456 }
 0x870   :  { %v11520_v26 = vpack.i.bf16 %v4038_v25, %v4033_v58 }
 0x871   :  { %v4042_v53 = vpop.f32.mrb[232].mxu0 }
 0x872   :  { %v4043_v38 = vadd.f32 %v4042_v53, %v13894_v52  ;;  %v4044_v41 = vpop.f32.mrb[233].mxu0  ;;  %11521 = vrot.lane.b32.xlu0 %v11520_v26, %s12239_s2  ;;  %v14072_v26 = vpop.permute.xlu1 %11466 }
 0x875   :  { %v4047_v2 = vpop.f32.mrb[234].mxu0 }
 0x876   :  { %v4048_v23 = vadd.f32 %v4047_v2, %v13898_v59  ;;  %v4049_v35 = vpop.f32.mrb[235].mxu0  ;;  %11526 = vrot.lane.b32.xlu0 %v14695_v20, %s12233_s7 }
 0x877   :  { %v14702_v35 = vld [vmem:[#allocation89_spill] sm:$0xff] }
 0x878   :  { %v11535_v47 = vpack.i.bf16 %v4048_v23, %v4043_v38  ;;  %v11353_v20 = vunpack.i.l.bf16 %v14702_v35 }
 0x879   :  { %v4052_v4 = vpop.f32.mrb[236].mxu0 }
 0x87a   :  { %v4053_v13 = vadd.f32 %v4052_v4, %v13903_v0  ;;  %v4054_v43 = vpop.f32.mrb[237].mxu0  ;;  %11536 = vrot.lane.b32.xlu1 %v11535_v47, %s12239_s2  ;;  %v11389_v47 = vunpack.i.h.bf16 %v13901_v9  ;;  %v11388_v4 = vunpack.i.l.bf16 %v13901_v9 }
 0x87b   :  { %v11423_v43 = vunpack.i.l.bf16 %v13984_v22 }
 0x87c   :  { %v14076_v53 = vpop.permute.xlu1 %11476 }
 0x87d   :  { %v4057_v52 = vpop.f32.mrb[238].mxu0 }
 0x87e   :  { %v4058_v19 = vadd.f32 %v4057_v52, %v13909_v44  ;;  %v4059_v31 = vpop.f32.mrb[239].mxu0  ;;  %11551 = vrot.lane.b32.xlu1 %v11550_v51, %s12238_s15  ;;  %v14697_v44 = vld [vmem:[#allocation64_spill] sm:$0xff] }
 0x87f   :  { %v14699_v51 = vpack.i.bf16 %v14697_v44, %v14698_v61  ;;  %v11459_v31 = vunpack.i.h.bf16 %v11457_v45 }
 0x880   :  { %v11540_v59 = vpack.i.bf16 %v4058_v19, %v4053_v13  ;;  %v11424_v13 = vunpack.i.h.bf16 %v13984_v22 }
 0x881   :  { %v4062_v48 = vpop.f32.mrb[240].mxu0 }
 0x882   :  { %v4063_v63 = vadd.f32 %v4062_v48, %v13922_v39  ;;  %v4064_v30 = vpop.f32.mrb[241].mxu0  ;;  %11566 = vrot.lane.b32.xlu1 %v14696_v16, %s12237_s10  ;;  %11541 = vrot.lane.b32.xlu0 %v11540_v59, %s12239_s2  ;;  %v11458_v59 = vunpack.i.l.bf16 %v11457_v45  ;;  %v14703_v48 = vld [vmem:[#allocation49_spill] sm:$0xff] }
 0x885   :  { %v4067_v33 = vpop.f32.mrb[242].mxu0 }
 0x886   :  { %v4068_v0 = vadd.f32 %v4067_v33, %v13926_v27  ;;  %v4069_v37 = vpop.f32.mrb[243].mxu0  ;;  %11546 = vrot.lane.b32.xlu0 %v14699_v51, %s12234_s30 }
 0x888   :  { %v11575_v17 = vpack.i.bf16 %v4068_v0, %v4063_v63  ;;  %v5215_v63 = vsel %vm5214_vm9, %v14703_v48, %v11353_v20  ;;  %v14704_v0 = vld [vmem:[#allocation50_spill] sm:$0xff] }
 0x889   :  { %v4072_v21 = vpop.f32.mrb[244].mxu0  ;;  %v5232_v33 = vsel %vm5231_vm10, %v5215_v63, %v11388_v4  ;;  %v5233_v9 = vsel %vm5231_vm10, %v14704_v0, %v11389_v47  ;;  %v11469_v63 = vunpack.i.h.bf16 %v14072_v26 }
 0x88a   :  { %v4073_v39 = vadd.f32 %v4072_v21, %v13937_v14  ;;  %v4074_v49 = vpop.f32.mrb[245].mxu0  ;;  %11576 = vrot.lane.b32.xlu1 %v11575_v17, %s12239_s2  ;;  %11556 = vrot.lane.b32.xlu0 %v14700_v34, %s12235_s22  ;;  %v5249_v37 = vsel %vm5248_vm11, %v5232_v33, %v11423_v43  ;;  %v5250_v22 = vsel %vm5248_vm11, %v5233_v9, %v11424_v13  ;;  %v14708_v9 = vld [vmem:[#allocation74_spill] sm:$0xff] }
 0x88b   :  { %v5267_v51 = vsel %vm5265_vm12, %v5250_v22, %v11459_v31  ;;  %v14705_v49 = vld [vmem:[#allocation56_spill] sm:$0xff]  ;;  %v11434_v31 = vunpack.i.h.bf16 %v13987_v11 }
 0x88c   :  { %v11359_v34 = vunpack.i.h.bf16 %v14705_v49 }
 0x88d   :  { %v4077_v50 = vpop.f32.mrb[246].mxu0 }
 0x88e   :  { %v4078_v27 = vadd.f32 %v4077_v50, %v13941_v29  ;;  %v4079_v6 = vpop.f32.mrb[247].mxu0  ;;  %11561 = vrot.lane.b32.xlu0 %v14701_v32, %s12236_s28  ;;  %v11358_v50 = vunpack.i.l.bf16 %v14705_v49  ;;  %v11394_v32 = vunpack.i.h.bf16 %v13907_v46 }
 0x890   :  { %v11580_v60 = vpack.i.bf16 %v4078_v27, %v4073_v39  ;;  %v5266_v39 = vsel %vm5265_vm12, %v5249_v37, %v11458_v59  ;;  %v11433_v59 = vunpack.i.l.bf16 %v13987_v11  ;;  %v5254_v37 = vsel %vm5248_vm11, %v14708_v9, %v11434_v31 }
 0x891   :  { %v4082_v55 = vpop.f32.mrb[248].mxu0  ;;  %v5271_v11 = vsel %vm5265_vm12, %v5254_v37, %v11469_v63  ;;  %v14712_v37 = vld [vmem:[#allocation86_spill] sm:$0xff] }
 0x892   :  { %v4083_v14 = vadd.f32 %v4082_v55, %v13952_v5  ;;  %v4084_v42 = vpop.f32.mrb[249].mxu0  ;;  %11581 = vrot.lane.b32.xlu1 %v11580_v60, %s12239_s2  ;;  %11571 = vrot.lane.b32.xlu0 %v11570_v56, %s12238_s15  ;;  %v11427_v56 = vpop.permute.xlu0 %11426  ;;  %v11393_v60 = vunpack.i.l.bf16 %v13907_v46  ;;  %v5253_v0 = vsel %vm5248_vm11, %v13888_v10, %v11433_v59 }
 0x893   :  { %v11429_v42 = vunpack.i.h.bf16 %v11427_v56 }
 0x895   :  { %v4087_v28 = vpop.f32.mrb[250].mxu0 }
 0x896   :  { %v4088_v12 = vadd.f32 %v4087_v28, %v13958_v54  ;;  %v4089_v58 = vpop.f32.mrb[251].mxu0  ;;  %v14074_v54 = vpop.permute.xlu0 %11436  ;;  %v11428_v28 = vunpack.i.l.bf16 %v11427_v56 }
 0x898   :  { %v11585_v29 = vpack.i.bf16 %v4088_v12, %v4083_v14 }
 0x899   :  { %v4092_v40 = vpop.f32.mrb[252].mxu0 }
 0x89a   :  { %v4093_v36 = vadd.f32 %v4092_v40, %v13965_v7  ;;  %v4094_v25 = vpop.f32.mrb[253].mxu0  ;;  %11586 = vrot.lane.b32.xlu1 %v11585_v29, %s12239_s2  ;;  %v14078_v38 = vpop.permute.xlu0 %11446  ;;  %v14706_v40 = vld [vmem:[#allocation70_spill] sm:$0xff] }
 0x89b   :  { %v14080_v7 = vpop.permute.xlu1 %11481  ;;  %v14707_v25 = vld [vmem:[#allocation78_spill] sm:$0xff] }
 0x89d   :  { %v4097_v15 = vpop.f32.mrb[254].mxu0 }
 0x89e   :  { %v4098_v1 = vadd.f32 %v4097_v15, %v13970_v8  ;;  %v4099_v5 = vpop.f32.mrb[255].mxu0  ;;  %v11462_v41 = vpop.permute.xlu0 %11461  ;;  %v5218_v15 = vsel %vm5214_vm9, %v14707_v25, %v11359_v34 }
 0x89f   :  { %v11487_v2 = vpop.permute.xlu1 %11486  ;;  %v11464_v58 = vunpack.i.h.bf16 %v11462_v41  ;;  %v11463_v29 = vunpack.i.l.bf16 %v11462_v41 }
 0x8a0   :  { %v11590_v24 = vpack.i.bf16 %v4098_v1, %v4093_v36  ;;  %v11489_v30 = vunpack.i.h.bf16 %v11487_v2  ;;  %v11488_v16 = vunpack.i.l.bf16 %v11487_v2  ;;  %v5217_v36 = vsel %vm5214_vm9, %v14706_v40, %v11358_v50 }
 0x8a1   :  { %v5234_v5 = vsel %vm5231_vm10, %v5217_v36, %v11393_v60  ;;  %v11439_v50 = vunpack.i.h.bf16 %v14074_v54 }
 0x8a2   :  { %11591 = vrot.lane.b32.xlu1 %v11590_v24, %s12239_s2  ;;  %v14082_v23 = vpop.permute.xlu0 %11471  ;;  %v5284_v27 = vsel %vm5282_vm13, %v5267_v51, %v11489_v30  ;;  %v5283_v6 = vsel %vm5282_vm13, %v5266_v39, %v11488_v16  ;;  %v5235_v24 = vsel %vm5231_vm10, %v5218_v15, %v11394_v32  ;;  %v5251_v45 = vsel %vm5248_vm11, %v5234_v5, %v11428_v28  ;;  %v14709_v39 = vld [vmem:[#allocation80_spill] sm:$0xff]  ;;  %v14710_v28 = vld [vmem:[#allocation63_spill] sm:$0xff] }
 0x8a3   :  { %v5252_v56 = vsel %vm5248_vm11, %v5235_v24, %v11429_v42  ;;  %v5268_v47 = vsel %vm5265_vm12, %v5251_v45, %v11463_v29  ;;  %v11468_v30 = vunpack.i.l.bf16 %v14072_v26  ;;  %v11404_v49 = vunpack.i.h.bf16 %v14709_v39  ;;  %v14711_v29 = vld [vmem:[#allocation51_spill] sm:$0xff] }
 0x8a4   :  { %v5269_v41 = vsel %vm5265_vm12, %v5252_v56, %v11464_v58  ;;  %v11474_v32 = vunpack.i.h.bf16 %v14082_v23  ;;  %v11473_v60 = vunpack.i.l.bf16 %v14082_v23 }
 0x8a6   :  { %v11492_v52 = vpop.permute.xlu0 %11491 }
 0x8a7   :  { %v11494_v1 = vunpack.i.h.bf16 %v11492_v52  ;;  %v11493_v46 = vunpack.i.l.bf16 %v11492_v52 }
 0x8a9   :  { %v5286_v4 = vsel %vm5282_vm13, %v5269_v41, %v11494_v1  ;;  %v5285_v13 = vsel %vm5282_vm13, %v5268_v47, %v11493_v46  ;;  %v11478_v41 = vunpack.i.l.bf16 %v14076_v53 }
 0x8ab   :  { %v5274_v31 = vsel %vm5265_vm12, %v13994_v3, %v11478_v41 }
 0x8ac   :  { %v14084_v8 = vpop.permute.xlu1 %11496 }
 0x8ad   :  { %v11499_v16 = vunpack.i.h.bf16 %v14084_v8  ;;  %v11498_v33 = vunpack.i.l.bf16 %v14084_v8  ;;  %v11403_v8 = vunpack.i.l.bf16 %v14709_v39 }
 0x8af   :  { %v5288_v26 = vsel %vm5282_vm13, %v5271_v11, %v11499_v16  ;;  %v5238_v58 = vsel %vm5231_vm10, %v14710_v28, %v11403_v8  ;;  %v11448_v16 = vunpack.i.l.bf16 %v14078_v38  ;;  %v14713_v11 = vld [vmem:[#allocation52_spill] sm:$0xff] }
 0x8b4   :  { %v14100_v44 = vpop.permute.xlu0 %11501 }
 0x8bc   :  { %v14091_v19 = vpop.permute.xlu1 %11506 }
 0x8c4   :  { %v14112_v12 = vpop.permute.xlu0 %11511 }
 0x8c5   :  { %v11514_v3 = vunpack.i.h.bf16 %v14112_v12 }
 0x8dc   :  { %v11517_v61 = vpop.permute.xlu1 %11516 }
 0x8dd   :  { %v11519_v17 = vunpack.i.h.bf16 %v11517_v61  ;;  %v11518_v21 = vunpack.i.l.bf16 %v11517_v61 }
 0x8df   :  { %v5301_v55 = vsel %vm5299_vm14, %v5284_v27, %v11519_v17  ;;  %v5300_v14 = vsel %vm5299_vm14, %v5283_v6, %v11518_v21  ;;  %v5270_v17 = vsel %vm5265_vm12, %v5253_v0, %v11468_v30  ;;  %v11438_v27 = vunpack.i.l.bf16 %v14074_v54 }
 0x8e0   :  { %9254 = vmatprep.mubr.f32.mxu1 %v5300_v14  ;;  %v14130_v48 = vpop.permute.xlu1 %11531  ;;  %v5287_v21 = vsel %vm5282_vm13, %v5270_v17, %v11498_v33  ;;  %v11503_v14 = vunpack.i.l.bf16 %v14100_v44  ;;  %v5239_v54 = vsel %vm5231_vm10, %v14711_v29, %v11404_v49  ;;  %v11483_v33 = vunpack.i.l.bf16 %v14080_v7 }
 0x8e1   :  { %9255 = vmatmul.mubr.f32.vlgmr.msra.gmra.mrb[0].mxu1 %v5301_v55  ;;  %v11504_v55 = vunpack.i.h.bf16 %v14100_v44  ;;  %v5255_v40 = vsel %vm5248_vm11, %v5238_v58, %v11438_v27  ;;  %v5256_v36 = vsel %vm5248_vm11, %v5239_v54, %v11439_v50  ;;  %v11513_v0 = vunpack.i.l.bf16 %v14112_v12 }
 0x8e2   :  { %v5273_v23 = vsel %vm5265_vm12, %v5256_v36, %v11474_v32  ;;  %v5272_v46 = vsel %vm5265_vm12, %v5255_v40, %v11473_v60  ;;  %v11534_v8 = vunpack.i.h.bf16 %v14130_v48 }
 0x8e3   :  { %v5290_v44 = vsel %vm5282_vm13, %v5273_v23, %v11504_v55  ;;  %v5289_v5 = vsel %vm5282_vm13, %v5272_v46, %v11503_v14 }
 0x8e4   :  { %v11522_v2 = vpop.permute.xlu0 %11521  ;;  %v5279_v55 = vsel %vm5265_vm12, %v14012_v57, %v11534_v8  ;;  %v14715_v57 = vld [vmem:[#allocation48_spill] sm:$0xff] }
 0x8e5   :  { %v11524_v35 = vunpack.i.h.bf16 %v11522_v2  ;;  %v11523_v20 = vunpack.i.l.bf16 %v11522_v2  ;;  %v11479_v2 = vunpack.i.h.bf16 %v14076_v53 }
 0x8e7   :  { %v5302_v43 = vsel %vm5299_vm14, %v5285_v13, %v11523_v20  ;;  %v5303_v52 = vsel %vm5299_vm14, %v5286_v4, %v11524_v35  ;;  %v11509_v35 = vunpack.i.h.bf16 %v14091_v19  ;;  %v11508_v20 = vunpack.i.l.bf16 %v14091_v19 }
 0x8e8   :  { %9257 = vmatprep.mubr.f32.mxu1 %v5302_v43  ;;  %v14150_v6 = vpop.permute.xlu0 %11526  ;;  %v5275_v4 = vsel %vm5265_vm12, %v13998_v62, %v11479_v2  ;;  %v11449_v19 = vunpack.i.h.bf16 %v14078_v38  ;;  %v11484_v62 = vunpack.i.h.bf16 %v14080_v7 }
 0x8e9   :  { %9258 = vmatmul.mubr.f32.gmra.mrb[2].mxu1 %v5303_v52  ;;  %v5292_v59 = vsel %vm5282_vm13, %v5275_v4, %v11509_v35  ;;  %v5291_v63 = vsel %vm5282_vm13, %v5274_v31, %v11508_v20  ;;  %v11529_v32 = vunpack.i.h.bf16 %v14150_v6  ;;  %v11528_v60 = vunpack.i.l.bf16 %v14150_v6  ;;  %v14714_v6 = vld [vmem:[#allocation45_spill] sm:$0xff] }
 0x8eb   :  { %v5213_v46 = vsel %vm5197_vm8, %v14715_v57, %v11529_v32 }
 0x8ec   :  { %v11537_v22 = vpop.permute.xlu1 %11536 }
 0x8ed   :  { %v11539_v61 = vunpack.i.h.bf16 %v11537_v22  ;;  %v11538_v51 = vunpack.i.l.bf16 %v11537_v22  ;;  %v5259_v22 = vsel %vm5248_vm11, %v14712_v37, %v11448_v16 }
 0x8ef   :  { %v5304_v10 = vsel %vm5299_vm14, %v5287_v21, %v11538_v51  ;;  %v5305_v34 = vsel %vm5299_vm14, %v5288_v26, %v11539_v61  ;;  %v5260_v61 = vsel %vm5248_vm11, %v14713_v11, %v11449_v19  ;;  %v5276_v21 = vsel %vm5265_vm12, %v5259_v22, %v11483_v33  ;;  %v5500_v33 = vld [vmem:[#allocation7] sm:$0xff] }
 0x8f0   :  { %9260 = vmatprep.mubr.f32.mxu1 %v5304_v10  ;;  %v14156_v42 = vpop.permute.xlu1 %11551  ;;  %v5277_v38 = vsel %vm5265_vm12, %v5260_v61, %v11484_v62  ;;  %v5293_v39 = vsel %vm5282_vm13, %v5276_v21, %v11513_v0  ;;  %v11533_v10 = vunpack.i.l.bf16 %v14130_v48 }
 0x8f1   :  { %9261 = vmatmul.mubr.f32.gmra.mrb[4].mxu1 %v5305_v34  ;;  %v5294_v7 = vsel %vm5282_vm13, %v5277_v38, %v11514_v3  ;;  %v11554_v50 = vunpack.i.h.bf16 %v14156_v42  ;;  %v11553_v27 = vunpack.i.l.bf16 %v14156_v42 }
 0x8f2   :  { %v5278_v48 = vsel %vm5265_vm12, %v14008_v18, %v11533_v10 }
 0x8f4   :  { %v11542_v25 = vpop.permute.xlu0 %11541  ;;  %v14170_v56 = vpop.permute.xlu1 %11566 }
 0x8f5   :  { %v11544_v15 = vunpack.i.h.bf16 %v11542_v25  ;;  %v11543_v1 = vunpack.i.l.bf16 %v11542_v25  ;;  %v5296_v25 = vsel %vm5282_vm13, %v5279_v55, %v11554_v50 }
 0x8f7   :  { %v5306_v24 = vsel %vm5299_vm14, %v5289_v5, %v11543_v1  ;;  %v5307_v45 = vsel %vm5299_vm14, %v5290_v44, %v11544_v15  ;;  %v5295_v15 = vsel %vm5282_vm13, %v5278_v48, %v11553_v27  ;;  %v5212_v1 = vsel %vm5197_vm8, %v14714_v6, %v11528_v60 }
 0x8f8   :  { %9263 = vmatprep.mubr.f32.mxu1 %v5306_v24  ;;  %v11547_v13 = vpop.permute.xlu0 %11546 }
 0x8f9   :  { %9264 = vmatmul.mubr.f32.gmra.mrb[6].mxu1 %v5307_v45  ;;  %v11549_v14 = vunpack.i.h.bf16 %v11547_v13  ;;  %v11548_v28 = vunpack.i.l.bf16 %v11547_v13  ;;  %v11569_v13 = vunpack.i.h.bf16 %v14170_v56 }
 0x8fb   :  { %v5229_v24 = vsel %vm5214_vm9, %v5212_v1, %v11548_v28  ;;  %v5230_v45 = vsel %vm5214_vm9, %v5213_v46, %v11549_v14 }
 0x8fc   :  { %v11577_v47 = vpop.permute.xlu1 %11576  ;;  %v11557_v9 = vpop.permute.xlu0 %11556 }
 0x8fd   :  { %v11579_v43 = vunpack.i.h.bf16 %v11577_v47  ;;  %v11578_v52 = vunpack.i.l.bf16 %v11577_v47  ;;  %v11559_v29 = vunpack.i.h.bf16 %v11557_v9  ;;  %v11558_v54 = vunpack.i.l.bf16 %v11557_v9 }
 0x8ff   :  { %v5308_v53 = vsel %vm5299_vm14, %v5291_v63, %v11578_v52  ;;  %v5309_v30 = vsel %vm5299_vm14, %v5292_v59, %v11579_v43  ;;  %v5246_v2 = vsel %vm5231_vm10, %v5229_v24, %v11558_v54  ;;  %v5247_v41 = vsel %vm5231_vm10, %v5230_v45, %v11559_v29 }
 0x900   :  { %9266 = vmatprep.mubr.f32.mxu1 %v5308_v53  ;;  %v11562_v34 = vpop.permute.xlu0 %11561  ;;  %v11568_v43 = vunpack.i.l.bf16 %v14170_v56  ;;  %v14232_v56 = vld [vmem:[#allocation6] ss:$0 sm:$0xff] }
 0x901   :  { %9267 = vmatmul.mubr.f32.gmra.mrb[8].mxu1 %v5309_v30  ;;  %v11564_v42 = vunpack.i.h.bf16 %v11562_v34  ;;  %v11563_v23 = vunpack.i.l.bf16 %v11562_v34 }
 0x903   :  { %v5263_v35 = vsel %vm5248_vm11, %v5246_v2, %v11563_v23  ;;  %v5264_v20 = vsel %vm5248_vm11, %v5247_v41, %v11564_v42 }
 0x904   :  { %v11582_v51 = vpop.permute.xlu1 %11581  ;;  %v11572_v44 = vpop.permute.xlu0 %11571  ;;  %v5281_v31 = vsel %vm5265_vm12, %v5264_v20, %v11569_v13  ;;  %v5280_v53 = vsel %vm5265_vm12, %v5263_v35, %v11568_v43 }
 0x905   :  { %v11584_v17 = vunpack.i.h.bf16 %v11582_v51  ;;  %v11583_v26 = vunpack.i.l.bf16 %v11582_v51  ;;  %v11574_v47 = vunpack.i.h.bf16 %v11572_v44  ;;  %v11573_v4 = vunpack.i.l.bf16 %v11572_v44 }
 0x907   :  { %v5310_v12 = vsel %vm5299_vm14, %v5293_v39, %v11583_v26  ;;  %v5311_v49 = vsel %vm5299_vm14, %v5294_v7, %v11584_v17  ;;  %v5298_v30 = vsel %vm5282_vm13, %v5281_v31, %v11574_v47  ;;  %v5297_v19 = vsel %vm5282_vm13, %v5280_v53, %v11573_v4  ;;  %v5502_v53 = vld [vmem:[#allocation7 + $0x10] sm:$0xff] }
 0x908   :  { %9269 = vmatprep.mubr.f32.mxu1 %v5310_v12 }
 0x909   :  { %9270 = vmatmul.mubr.f32.gmra.mrb[10].mxu1 %v5311_v49 }
 0x90c   :  { %v11587_v58 = vpop.permute.xlu1 %11586 }
 0x90d   :  { %v11589_v40 = vunpack.i.h.bf16 %v11587_v58  ;;  %v11588_v36 = vunpack.i.l.bf16 %v11587_v58 }
 0x90f   :  { %v5312_v5 = vsel %vm5299_vm14, %v5295_v15, %v11588_v36  ;;  %v5313_v18 = vsel %vm5299_vm14, %v5296_v25, %v11589_v40 }
 0x910   :  { %9272 = vmatprep.mubr.f32.mxu1 %v5312_v5 }
 0x911   :  { %9273 = vmatmul.mubr.f32.gmra.mrb[12].mxu1 %v5313_v18 }
 0x914   :  { %v11592_v52 = vpop.permute.xlu1 %11591 }
 0x915   :  { %v11594_v59 = vunpack.i.h.bf16 %v11592_v52  ;;  %v11593_v63 = vunpack.i.l.bf16 %v11592_v52 }
 0x917   :  { %v5314_v16 = vsel %vm5299_vm14, %v5297_v19, %v11593_v63  ;;  %v5315_v62 = vsel %vm5299_vm14, %v5298_v30, %v11594_v59  ;;  %v5501_v63 = vld [vmem:[#allocation7 + $0x8] sm:$0xff]  ;;  %v5503_v30 = vld [vmem:[#allocation7 + $0x18] sm:$0xff]  ;;  %v5504_v19 = vld [vmem:[#allocation7 + $0x20] sm:$0xff] }
 0x918   :  { %9275 = vmatprep.mubr.f32.mxu1 %v5314_v16  ;;  %v5505_v16 = vld [vmem:[#allocation7 + $0x28] sm:$0xff] }
 0x919   :  { %9276 = vmatmul.mubr.f32.gmra.mrb[14].mxu1 %v5315_v62  ;;  %v5506_v62 = vld [vmem:[#allocation7 + $0x30] sm:$0xff] }
 0x91a   :  { %9310 = vmatprep.mubr.f32.mxu1 %v5500_v33  ;;  %v5507_v33 = vld [vmem:[#allocation7 + $0x38] sm:$0xff] }
 0x9b4   :  { %v9256_v3 = vpop.f32.mrb[0].mxu1 }
 0x9b5   :  { %v5411_v0 = vadd.f32 %v9256_v3, %v14232_v56  ;;  %v5405_v9 = vpop.f32.mrb[1].mxu1  ;;  %v5508_v3 = vld [vmem:[#allocation7 + $0x40] sm:$0xff] }
 0x9b6   :  { %v5406_v37 = vadd.f32 %v14232_v56, %v5405_v9  ;;  %v5511_v9 = vld [vmem:[#allocation7 + $0x58] sm:$0xff] }
 0x9b7   :  { %v5485_v22 = vmax.f32 %v5411_v0, 0.0  ;;  %v5510_v0 = vld [vmem:[#allocation7 + $0x50] sm:$0xff] }
 0x9b8   :  { %v5484_v11 = vmax.f32 %v5406_v37, 0.0  ;;  %v5512_v37 = vld [vmem:[#allocation7 + $0x60] sm:$0xff] }
 0x9ba   :  { %v9679_v61 = vpack.c.bf16 %v5485_v22, %v5484_v11  ;;  %v5513_v22 = vld [vmem:[#allocation7 + $0x68] sm:$0xff]  ;;  %v5514_v11 = vld [vmem:[#allocation7 + $0x70] sm:$0xff] }
 0x9bc   :  { %v9259_v51 = vpop.f32.mrb[2].mxu1  ;;  %9680 = vmatprep.subr.bf16.mxu1 %v9679_v61 }
 0x9bd   :  { %v5421_v38 = vadd.f32 %v9259_v51, %v14232_v56  ;;  %v5415_v17 = vpop.f32.mrb[3].mxu1  ;;  %9682 = vmatpush3.bf16.msra.mxu1 %v9679_v61  ;;  %v5515_v61 = vld [vmem:[#allocation7 + $0x78] sm:$0xff]  ;;  %v5516_v51 = vld [vmem:[#allocation7 + $0x80] sm:$0xff] }
 0x9be   :  { %v5416_v26 = vadd.f32 %v14232_v56, %v5415_v17  ;;  %v5518_v17 = vld [vmem:[#allocation7 + $0x90] sm:$0xff] }
 0x9bf   :  { %v5487_v21 = vmax.f32 %v5421_v38, 0.0  ;;  %v5517_v38 = vld [vmem:[#allocation7 + $0x88] sm:$0xff] }
 0x9c0   :  { %v5486_v7 = vmax.f32 %v5416_v26, 0.0  ;;  %v5519_v26 = vld [vmem:[#allocation7 + $0x98] sm:$0xff] }
 0x9c2   :  { %v9683_v39 = vpack.c.bf16 %v5487_v21, %v5486_v7  ;;  %v5520_v21 = vld [vmem:[#allocation7 + $0xa0] sm:$0xff]  ;;  %v5521_v7 = vld [vmem:[#allocation7 + $0xa8] sm:$0xff] }
 0x9c4   :  { %v9262_v12 = vpop.f32.mrb[4].mxu1  ;;  %9684 = vmatprep.subr.bf16.mxu1 %v9683_v39 }
 0x9c5   :  { %v5431_v49 = vadd.f32 %v9262_v12, %v14232_v56  ;;  %v5425_v8 = vpop.f32.mrb[5].mxu1  ;;  %9686 = vmatpush3.bf16.msra.mxu1 %v9683_v39  ;;  %v5522_v39 = vld [vmem:[#allocation7 + $0xb0] sm:$0xff]  ;;  %v5523_v12 = vld [vmem:[#allocation7 + $0xb8] sm:$0xff] }
 0x9c6   :  { %v5426_v10 = vadd.f32 %v14232_v56, %v5425_v8  ;;  %v5525_v8 = vld [vmem:[#allocation7 + $0xc8] sm:$0xff] }
 0x9c7   :  { %v5489_v34 = vmax.f32 %v5431_v49, 0.0  ;;  %v5524_v49 = vld [vmem:[#allocation7 + $0xc0] sm:$0xff] }
 0x9c8   :  { %v5488_v50 = vmax.f32 %v5426_v10, 0.0  ;;  %v5526_v10 = vld [vmem:[#allocation7 + $0xd0] sm:$0xff] }
 0x9ca   :  { %v9687_v27 = vpack.c.bf16 %v5489_v34, %v5488_v50  ;;  %v5527_v34 = vld [vmem:[#allocation7 + $0xd8] sm:$0xff]  ;;  %v5528_v50 = vld [vmem:[#allocation7 + $0xe0] sm:$0xff] }
 0x9cc   :  { %v9265_v32 = vpop.f32.mrb[6].mxu1  ;;  %9688 = vmatprep.subr.bf16.mxu1 %v9687_v27 }
 0x9cd   :  { %v5441_v60 = vadd.f32 %v9265_v32, %v14232_v56  ;;  %v5435_v55 = vpop.f32.mrb[7].mxu1  ;;  %9690 = vmatpush3.bf16.msra.mxu1 %v9687_v27  ;;  %v5529_v27 = vld [vmem:[#allocation7 + $0xe8] sm:$0xff]  ;;  %v5530_v32 = vld [vmem:[#allocation7 + $0xf0] sm:$0xff] }
 0x9ce   :  { %v5436_v14 = vadd.f32 %v14232_v56, %v5435_v55  ;;  %v5532_v55 = vld [vmem:[#allocation7 + $0x100] sm:$0xff] }
 0x9cf   :  { %v5491_v28 = vmax.f32 %v5441_v60, 0.0  ;;  %v5531_v60 = vld [vmem:[#allocation7 + $0xf8] sm:$0xff] }
 0x9d0   :  { %v5490_v58 = vmax.f32 %v5436_v14, 0.0  ;;  %v5533_v14 = vld [vmem:[#allocation7 + $0x108] sm:$0xff] }
 0x9d2   :  { %v9691_v48 = vpack.c.bf16 %v5491_v28, %v5490_v58  ;;  %v5534_v28 = vld [vmem:[#allocation7 + $0x110] sm:$0xff]  ;;  %v5535_v58 = vld [vmem:[#allocation7 + $0x118] sm:$0xff] }
 0x9d4   :  { %v9268_v29 = vpop.f32.mrb[8].mxu1  ;;  %9692 = vmatprep.subr.bf16.mxu1 %v9691_v48 }
 0x9d5   :  { %v5451_v54 = vadd.f32 %v9268_v29, %v14232_v56  ;;  %v5445_v40 = vpop.f32.mrb[9].mxu1  ;;  %9694 = vmatpush3.bf16.msra.mxu1 %v9691_v48  ;;  %v5536_v48 = vld [vmem:[#allocation7 + $0x120] sm:$0xff]  ;;  %v5537_v29 = vld [vmem:[#allocation7 + $0x128] sm:$0xff] }
 0x9d6   :  { %v5446_v36 = vadd.f32 %v14232_v56, %v5445_v40  ;;  %v5539_v40 = vld [vmem:[#allocation7 + $0x138] sm:$0xff] }
 0x9d7   :  { %v5493_v25 = vmax.f32 %v5451_v54, 0.0  ;;  %v5538_v54 = vld [vmem:[#allocation7 + $0x130] sm:$0xff] }
 0x9d8   :  { %v5492_v42 = vmax.f32 %v5446_v36, 0.0  ;;  %v5540_v36 = vld [vmem:[#allocation7 + $0x140] sm:$0xff] }
 0x9da   :  { %v9695_v23 = vpack.c.bf16 %v5493_v25, %v5492_v42  ;;  %v5541_v25 = vld [vmem:[#allocation7 + $0x148] sm:$0xff]  ;;  %v5542_v42 = vld [vmem:[#allocation7 + $0x150] sm:$0xff] }
 0x9dc   :  { %v9271_v15 = vpop.f32.mrb[10].mxu1  ;;  %9696 = vmatprep.subr.bf16.mxu1 %v9695_v23 }
 0x9dd   :  { %v5461_v6 = vadd.f32 %v9271_v15, %v14232_v56  ;;  %v5455_v1 = vpop.f32.mrb[11].mxu1  ;;  %9698 = vmatpush3.bf16.msra.mxu1 %v9695_v23  ;;  %v5543_v23 = vld [vmem:[#allocation7 + $0x158] sm:$0xff]  ;;  %v5544_v15 = vld [vmem:[#allocation7 + $0x160] sm:$0xff] }
 0x9de   :  { %v5456_v57 = vadd.f32 %v14232_v56, %v5455_v1  ;;  %v5546_v1 = vld [vmem:[#allocation7 + $0x170] sm:$0xff] }
 0x9df   :  { %v5495_v46 = vmax.f32 %v5461_v6, 0.0  ;;  %v5545_v6 = vld [vmem:[#allocation7 + $0x168] sm:$0xff] }
 0x9e0   :  { %v5494_v44 = vmax.f32 %v5456_v57, 0.0  ;;  %v5547_v57 = vld [vmem:[#allocation7 + $0x178] sm:$0xff] }
 0x9e2   :  { %v9699_v5 = vpack.c.bf16 %v5495_v46, %v5494_v44  ;;  %v5548_v46 = vld [vmem:[#allocation7 + $0x180] sm:$0xff]  ;;  %v5549_v44 = vld [vmem:[#allocation7 + $0x188] sm:$0xff] }
 0x9e4   :  { %v9274_v18 = vpop.f32.mrb[12].mxu1  ;;  %9700 = vmatprep.subr.bf16.mxu1 %v9699_v5 }
 0x9e5   :  { %v5471_v24 = vadd.f32 %v9274_v18, %v14232_v56  ;;  %v5465_v45 = vpop.f32.mrb[13].mxu1  ;;  %9702 = vmatpush3.bf16.msra.mxu1 %v9699_v5  ;;  %v5550_v5 = vld [vmem:[#allocation7 + $0x190] sm:$0xff]  ;;  %v5551_v18 = vld [vmem:[#allocation7 + $0x198] sm:$0xff] }
 0x9e6   :  { %v5466_v2 = vadd.f32 %v14232_v56, %v5465_v45  ;;  %v5553_v45 = vld [vmem:[#allocation7 + $0x1a8] sm:$0xff] }
 0x9e7   :  { %v5497_v41 = vmax.f32 %v5471_v24, 0.0  ;;  %v5552_v24 = vld [vmem:[#allocation7 + $0x1a0] sm:$0xff] }
 0x9e8   :  { %v5496_v35 = vmax.f32 %v5466_v2, 0.0  ;;  %v5554_v2 = vld [vmem:[#allocation7 + $0x1b0] sm:$0xff] }
 0x9ea   :  { %v9703_v20 = vpack.c.bf16 %v5497_v41, %v5496_v35  ;;  %v5555_v41 = vld [vmem:[#allocation7 + $0x1b8] sm:$0xff]  ;;  %v5556_v35 = vld [vmem:[#allocation7 + $0x1c0] sm:$0xff] }
 0x9ec   :  { %v9277_v47 = vpop.f32.mrb[14].mxu1  ;;  %9704 = vmatprep.subr.bf16.mxu1 %v9703_v20 }
 0x9ed   :  { %v5481_v4 = vadd.f32 %v9277_v47, %v14232_v56  ;;  %v5475_v13 = vpop.f32.mrb[15].mxu1  ;;  %9706 = vmatpush3.bf16.msra.mxu1 %v9703_v20  ;;  %v5557_v20 = vld [vmem:[#allocation7 + $0x1c8] sm:$0xff]  ;;  %v5558_v47 = vld [vmem:[#allocation7 + $0x1d0] sm:$0xff] }
 0x9ee   :  { %v5476_v43 = vadd.f32 %v14232_v56, %v5475_v13  ;;  %v5509_v56 = vld [vmem:[#allocation7 + $0x48] sm:$0xff]  ;;  %v5560_v13 = vld [vmem:[#allocation7 + $0x1e0] sm:$0xff] }
 0x9ef   :  { %v5499_v52 = vmax.f32 %v5481_v4, 0.0  ;;  %v5559_v4 = vld [vmem:[#allocation7 + $0x1d8] sm:$0xff] }
 0x9f0   :  { %v5498_v31 = vmax.f32 %v5476_v43, 0.0  ;;  %v5561_v43 = vld [vmem:[#allocation7 + $0x1e8] sm:$0xff] }
 0x9f2   :  { %v9707_v59 = vpack.c.bf16 %v5499_v52, %v5498_v31  ;;  %v5562_v52 = vld [vmem:[#allocation7 + $0x1f0] sm:$0xff]  ;;  %v5563_v31 = vld [vmem:[#allocation7 + $0x1f8] sm:$0xff] }
 0x9f4   :  { %9708 = vmatprep.subr.bf16.mxu1 %v9707_v59 }
 0x9f5   :  { %9710 = vmatpush3.bf16.msra.mxu1 %v9707_v59  ;;  %v6205_v59 = vld [vmem:[#allocation9 + $0x80] sm:$0xff] }
 0x9f8   :  { %9311 = vmatmul.mubr.f32.vlgmr.msra.gmra.mrb[16].mxu1 %v5501_v63  ;;  %v6206_v63 = vld [vmem:[#allocation9 + $0x88] sm:$0xff] }
 0x9f9   :  { %9313 = vmatprep.mubr.f32.mxu1 %v5502_v53  ;;  %v6189_v53 = vld [vmem:[#allocation9] sm:$0xff] }
 0x9fc   :  { %9314 = vmatmul.mubr.f32.gmra.mrb[18].mxu1 %v5503_v30  ;;  %v9711_v30 = vpack.c.bf16 %v6206_v63, %v6205_v59 }
 0x9fd   :  { %9316 = vmatprep.mubr.f32.mxu1 %v5504_v19  ;;  %v6190_v19 = vld [vmem:[#allocation9 + $0x8] sm:$0xff] }
 0x9fe   :  { %9712 = vmatprep.subr.bf16.mxu1 %v9711_v30  ;;  %v6219_v30 = vld [vmem:[#allocation9 + $0xf0] sm:$0xff] }
 0xa00   :  { %9317 = vmatmul.mubr.f32.gmra.mrb[20].mxu1 %v5505_v16  ;;  %v9713_v16 = vpack.c.bf16 %v6190_v19, %v6189_v53  ;;  %v6220_v19 = vld [vmem:[#allocation9 + $0xf8] sm:$0xff] }
 0xa01   :  { %9319 = vmatprep.mubr.f32.mxu1 %v5506_v62  ;;  %v6207_v62 = vld [vmem:[#allocation9 + $0x90] sm:$0xff] }
 0xa02   :  { %9714 = vmatpush3.bf16.msra.mxu1 %v9713_v16 }
 0xa04   :  { %9320 = vmatmul.mubr.f32.gmra.mrb[22].mxu1 %v5507_v33  ;;  %v6208_v33 = vld [vmem:[#allocation9 + $0x98] sm:$0xff] }
 0xa05   :  { %9322 = vmatprep.mubr.f32.mxu1 %v5508_v3  ;;  %v6191_v3 = vld [vmem:[#allocation9 + $0x10] sm:$0xff] }
 0xa08   :  { %9323 = vmatmul.mubr.f32.gmra.mrb[24].mxu1 %v5509_v56  ;;  %v9715_v56 = vpack.c.bf16 %v6208_v33, %v6207_v62  ;;  %v9739_v33 = vpack.c.bf16 %v6220_v19, %v6219_v30 }
 0xa09   :  { %9325 = vmatprep.mubr.f32.mxu1 %v5510_v0  ;;  %v6192_v0 = vld [vmem:[#allocation9 + $0x18] sm:$0xff] }
 0xa0a   :  { %9716 = vmatprep.subr.bf16.mxu1 %v9715_v56  ;;  %v6204_v56 = vld [vmem:[#allocation9 + $0x78] sm:$0xff] }
 0xa0c   :  { %9326 = vmatmul.mubr.f32.gmra.mrb[26].mxu1 %v5511_v9  ;;  %v9717_v9 = vpack.c.bf16 %v6192_v0, %v6191_v3  ;;  %v6203_v3 = vld [vmem:[#allocation9 + $0x70] sm:$0xff] }
 0xa0d   :  { %9328 = vmatprep.mubr.f32.mxu1 %v5512_v37  ;;  %v6209_v37 = vld [vmem:[#allocation9 + $0xa0] sm:$0xff] }
 0xa0e   :  { %9718 = vmatpush3.bf16.msra.mxu1 %v9717_v9  ;;  %v9741_v9 = vpack.c.bf16 %v6204_v56, %v6203_v3 }
 0xa10   :  { %9329 = vmatmul.mubr.f32.gmra.mrb[28].mxu1 %v5513_v22  ;;  %v6210_v22 = vld [vmem:[#allocation9 + $0xa8] sm:$0xff] }
 0xa11   :  { %9331 = vmatprep.mubr.f32.mxu1 %v5514_v11  ;;  %v6193_v11 = vld [vmem:[#allocation9 + $0x20] sm:$0xff] }
 0xa14   :  { %9332 = vmatmul.mubr.f32.gmra.mrb[30].mxu1 %v5515_v61  ;;  %v9719_v61 = vpack.c.bf16 %v6210_v22, %v6209_v37 }
 0xa15   :  { %9334 = vmatprep.mubr.f32.mxu1 %v5516_v51  ;;  %v6194_v51 = vld [vmem:[#allocation9 + $0x28] sm:$0xff] }
 0xa16   :  { %9720 = vmatprep.subr.bf16.mxu1 %v9719_v61 }
 0xa18   :  { %9335 = vmatmul.mubr.f32.gmra.mrb[32].mxu1 %v5517_v38  ;;  %v9721_v38 = vpack.c.bf16 %v6194_v51, %v6193_v11 }
 0xa19   :  { %9337 = vmatprep.mubr.f32.mxu1 %v5518_v17 }
 0xa1a   :  { %9722 = vmatpush3.bf16.msra.mxu1 %v9721_v38 }
 0xa1c   :  { %9338 = vmatmul.mubr.f32.gmra.mrb[34].mxu1 %v5519_v26 }
 0xa1d   :  { %9340 = vmatprep.mubr.f32.mxu1 %v5520_v21 }
 0xa20   :  { %9341 = vmatmul.mubr.f32.gmra.mrb[36].mxu1 %v5521_v7 }
 0xa21   :  { %9343 = vmatprep.mubr.f32.mxu1 %v5522_v39 }
 0xa24   :  { %9344 = vmatmul.mubr.f32.gmra.mrb[38].mxu1 %v5523_v12  ;;  %v6211_v12 = vld [vmem:[#allocation9 + $0xb0] sm:$0xff] }
 0xa25   :  { %9346 = vmatprep.mubr.f32.mxu1 %v5524_v49  ;;  %v6212_v49 = vld [vmem:[#allocation9 + $0xb8] sm:$0xff] }
 0xa28   :  { %9347 = vmatmul.mubr.f32.gmra.mrb[40].mxu1 %v5525_v8  ;;  %v6195_v8 = vld [vmem:[#allocation9 + $0x30] sm:$0xff] }
 0xa29   :  { %9349 = vmatprep.mubr.f32.mxu1 %v5526_v10 }
 0xa2c   :  { %9350 = vmatmul.mubr.f32.gmra.mrb[42].mxu1 %v5527_v34  ;;  %v9723_v34 = vpack.c.bf16 %v6212_v49, %v6211_v12 }
 0xa2d   :  { %9352 = vmatprep.mubr.f32.mxu1 %v5528_v50  ;;  %v6196_v50 = vld [vmem:[#allocation9 + $0x38] sm:$0xff] }
 0xa2e   :  { %9724 = vmatprep.subr.bf16.mxu1 %v9723_v34 }
 0xa30   :  { %9353 = vmatmul.mubr.f32.gmra.mrb[44].mxu1 %v5529_v27  ;;  %v6213_v27 = vld [vmem:[#allocation9 + $0xc0] sm:$0xff] }
 0xa31   :  { %9355 = vmatprep.mubr.f32.mxu1 %v5530_v32  ;;  %v6214_v32 = vld [vmem:[#allocation9 + $0xc8] sm:$0xff] }
 0xa34   :  { %9356 = vmatmul.mubr.f32.gmra.mrb[46].mxu1 %v5531_v60  ;;  %v9725_v60 = vpack.c.bf16 %v6196_v50, %v6195_v8 }
 0xa35   :  { %9358 = vmatprep.mubr.f32.mxu1 %v5532_v55  ;;  %v9727_v55 = vpack.c.bf16 %v6214_v32, %v6213_v27 }
 0xa36   :  { %9726 = vmatpush3.bf16.msra.mxu1 %v9725_v60 }
 0xa37   :  { %9728 = vmatprep.subr.bf16.mxu1 %v9727_v55 }
 0xa38   :  { %9359 = vmatmul.mubr.f32.gmra.mrb[48].mxu1 %v5533_v14  ;;  %v6197_v14 = vld [vmem:[#allocation9 + $0x40] sm:$0xff] }
 0xa39   :  { %9361 = vmatprep.mubr.f32.mxu1 %v5534_v28  ;;  %v6198_v28 = vld [vmem:[#allocation9 + $0x48] sm:$0xff] }
 0xa3c   :  { %9362 = vmatmul.mubr.f32.gmra.mrb[50].mxu1 %v5535_v58 }
 0xa3d   :  { %9364 = vmatprep.mubr.f32.mxu1 %v5536_v48  ;;  %v9729_v48 = vpack.c.bf16 %v6198_v28, %v6197_v14 }
 0xa3f   :  { %9730 = vmatpush3.bf16.msra.mxu1 %v9729_v48  ;;  %v6237_v48 = vld [vmem:[#allocation9 + $0x180] sm:$0xff] }
 0xa40   :  { %9365 = vmatmul.mubr.f32.gmra.mrb[52].mxu1 %v5537_v29 }
 0xa41   :  { %9367 = vmatprep.mubr.f32.mxu1 %v5538_v54 }
 0xa44   :  { %9368 = vmatmul.mubr.f32.gmra.mrb[54].mxu1 %v5539_v40 }
 0xa45   :  { %9370 = vmatprep.mubr.f32.mxu1 %v5540_v36 }
 0xa48   :  { %9371 = vmatmul.mubr.f32.gmra.mrb[56].mxu1 %v5541_v25 }
 0xa49   :  { %9373 = vmatprep.mubr.f32.mxu1 %v5542_v42 }
 0xa4c   :  { %9374 = vmatmul.mubr.f32.gmra.mrb[58].mxu1 %v5543_v23 }
 0xa4d   :  { %9376 = vmatprep.mubr.f32.mxu1 %v5544_v15 }
 0xa50   :  { %9377 = vmatmul.mubr.f32.gmra.mrb[60].mxu1 %v5545_v6 }
 0xa51   :  { %9379 = vmatprep.mubr.f32.mxu1 %v5546_v1 }
 0xa54   :  { %9380 = vmatmul.mubr.f32.gmra.mrb[62].mxu1 %v5547_v57 }
 0xa55   :  { %9382 = vmatprep.mubr.f32.mxu1 %v5548_v46 }
 0xa58   :  { %9383 = vmatmul.mubr.f32.gmra.mrb[64].mxu1 %v5549_v44  ;;  %v6215_v44 = vld [vmem:[#allocation9 + $0xd0] sm:$0xff] }
 0xa59   :  { %9385 = vmatprep.mubr.f32.mxu1 %v5550_v5  ;;  %v6216_v5 = vld [vmem:[#allocation9 + $0xd8] sm:$0xff] }
 0xa5c   :  { %9386 = vmatmul.mubr.f32.gmra.mrb[66].mxu1 %v5551_v18 }
 0xa5d   :  { %9388 = vmatprep.mubr.f32.mxu1 %v5552_v24  ;;  %v9731_v24 = vpack.c.bf16 %v6216_v5, %v6215_v44 }
 0xa5f   :  { %9732 = vmatprep.subr.bf16.mxu1 %v9731_v24 }
 0xa60   :  { %9389 = vmatmul.mubr.f32.gmra.mrb[68].mxu1 %v5553_v45  ;;  %v6199_v45 = vld [vmem:[#allocation9 + $0x50] sm:$0xff] }
 0xa61   :  { %9391 = vmatprep.mubr.f32.mxu1 %v5554_v2  ;;  %v6200_v2 = vld [vmem:[#allocation9 + $0x58] sm:$0xff] }
 0xa64   :  { %9392 = vmatmul.mubr.f32.gmra.mrb[70].mxu1 %v5555_v41  ;;  %v9733_v41 = vpack.c.bf16 %v6200_v2, %v6199_v45 }
 0xa65   :  { %9394 = vmatprep.mubr.f32.mxu1 %v5556_v35 }
 0xa66   :  { %9734 = vmatpush3.bf16.msra.mxu1 %v9733_v41 }
 0xa68   :  { %9395 = vmatmul.mubr.f32.gmra.mrb[72].mxu1 %v5557_v20  ;;  %v6217_v20 = vld [vmem:[#allocation9 + $0xe0] sm:$0xff] }
 0xa69   :  { %9397 = vmatprep.mubr.f32.mxu1 %v5558_v47  ;;  %v6218_v47 = vld [vmem:[#allocation9 + $0xe8] sm:$0xff] }
 0xa6c   :  { %9398 = vmatmul.mubr.f32.gmra.mrb[74].mxu1 %v5559_v4 }
 0xa6d   :  { %9400 = vmatprep.mubr.f32.mxu1 %v5560_v13 }
 0xa70   :  { %9401 = vmatmul.mubr.f32.gmra.mrb[76].mxu1 %v5561_v43  ;;  %v9735_v43 = vpack.c.bf16 %v6218_v47, %v6217_v20 }
 0xa71   :  { %9403 = vmatprep.mubr.f32.mxu1 %v5562_v52  ;;  %v6201_v52 = vld [vmem:[#allocation9 + $0x60] sm:$0xff] }
 0xa72   :  { %9736 = vmatprep.subr.bf16.mxu1 %v9735_v43 }
 0xa74   :  { %9404 = vmatmul.mubr.f32.gmra.mrb[78].mxu1 %v5563_v31  ;;  %v6202_v31 = vld [vmem:[#allocation9 + $0x68] sm:$0xff] }
 0xa75   :  { %v9737_v63 = vpack.c.bf16 %v6202_v31, %v6201_v52 }
 0xa77   :  { %9738 = vmatpush3.bf16.msra.mxu1 %v9737_v63 }
 0xa78   :  { %9740 = vmatprep.subr.bf16.mxu1 %v9739_v33 }
 0xa7b   :  { %9742 = vmatpush3.bf16.msra.mxu1 %v9741_v9 }
 0xacb   :  { %v14250_v17 = vpop.f32.mrb[16].mxu1 }
 0xacc   :  { %v14252_v26 = vpop.f32.mrb[17].mxu1 }
 0xacf   :  { %v14254_v21 = vpop.f32.mrb[18].mxu1 }
 0xad0   :  { %v14256_v7 = vpop.f32.mrb[19].mxu1 }
 0xad3   :  { %v14258_v39 = vpop.f32.mrb[20].mxu1 }
 0xad4   :  { %v5650_v10 = vpop.f32.mrb[21].mxu1 }
 0xad7   :  { %v14260_v58 = vpop.f32.mrb[22].mxu1 }
 0xad8   :  { %v14262_v29 = vpop.f32.mrb[23].mxu1 }
 0xadb   :  { %v14264_v54 = vpop.f32.mrb[24].mxu1 }
 0xadc   :  { %v5670_v40 = vpop.f32.mrb[25].mxu1 }
 0xadf   :  { %v14266_v36 = vpop.f32.mrb[26].mxu1 }
 0xae0   :  { %v5680_v25 = vpop.f32.mrb[27].mxu1 }
 0xae3   :  { %v9330_v42 = vpop.f32.mrb[28].mxu1 }
 0xae4   :  { %v5690_v23 = vpop.f32.mrb[29].mxu1 }
 0xae7   :  { %v14268_v15 = vpop.f32.mrb[30].mxu1 }
 0xae8   :  { %v14270_v6 = vpop.f32.mrb[31].mxu1 }
 0xaeb   :  { %v14272_v1 = vpop.f32.mrb[32].mxu1 }
 0xaec   :  { %v14274_v57 = vpop.f32.mrb[33].mxu1 }
 0xaef   :  { %v14276_v46 = vpop.f32.mrb[34].mxu1 }
 0xaf0   :  { %v14278_v18 = vpop.f32.mrb[35].mxu1 }
 0xaf3   :  { %v9342_v35 = vpop.f32.mrb[36].mxu1 }
 0xaf4   :  { %v11610_v4 = vpack.i.bf16 %v14258_v39, %v9342_v35  ;;  %v5730_v13 = vpop.f32.mrb[37].mxu1 }
 0xaf5   :  { %v11595_v59 = vpack.i.bf16 %v5650_v10, %v5730_v13 }
 0xaf7   :  { %11596 = vrot.lane.b32.xlu0 %v11595_v59, %s12214_s4  ;;  %v9345_v53 = vpop.f32.mrb[38].mxu1 }
 0xaf8   :  { %v11635_v16 = vpack.i.bf16 %v14260_v58, %v9345_v53  ;;  %v5740_v62 = vpop.f32.mrb[39].mxu1 }
 0xaf9   :  { %v11625_v0 = vpack.i.bf16 %v14262_v29, %v5740_v62  ;;  %v6238_v29 = vld [vmem:[#allocation9 + $0x188] sm:$0xff] }
 0xafb   :  { %v9348_v37 = vpop.f32.mrb[40].mxu1 }
 0xafc   :  { %v11615_v22 = vpack.i.bf16 %v14264_v54, %v9348_v37  ;;  %v5750_v11 = vpop.f32.mrb[41].mxu1 }
 0xafd   :  { %v11600_v61 = vpack.i.bf16 %v5670_v40, %v5750_v11  ;;  %v9743_v40 = vpack.c.bf16 %v6238_v29, %v6237_v48 }
 0xaff   :  { %11601 = vrot.lane.b32.xlu1 %v11600_v61, %s12232_s16  ;;  %v9351_v51 = vpop.f32.mrb[42].mxu1  ;;  %9744 = vmatprep.subr.bf16.mxu1 %v9743_v40  ;;  %v6239_v40 = vld [vmem:[#allocation9 + $0x190] sm:$0xff] }
 0xb00   :  { %v11640_v38 = vpack.i.bf16 %v14266_v36, %v9351_v51  ;;  %v5760_v39 = vpop.f32.mrb[43].mxu1 }
 0xb01   :  { %v11630_v12 = vpack.i.bf16 %v5680_v25, %v5760_v39 }
 0xb03   :  { %11611 = vrot.lane.b32.xlu1 %v11610_v4, %s12214_s4  ;;  %v9354_v49 = vpop.f32.mrb[44].mxu1 }
 0xb04   :  { %v11620_v8 = vpack.i.bf16 %v9330_v42, %v9354_v49  ;;  %v5770_v10 = vpop.f32.mrb[45].mxu1 }
 0xb05   :  { %v11605_v34 = vpack.i.bf16 %v5690_v23, %v5770_v10 }
 0xb07   :  { %11621 = vrot.lane.b32.xlu1 %v11620_v8, %s12236_s28  ;;  %11606 = vrot.lane.b32.xlu0 %v11605_v34, %s12236_s28  ;;  %v9357_v50 = vpop.f32.mrb[46].mxu1 }
 0xb08   :  { %v11645_v27 = vpack.i.bf16 %v14268_v15, %v9357_v50  ;;  %v5780_v32 = vpop.f32.mrb[47].mxu1  ;;  %v6221_v50 = vld [vmem:[#allocation9 + $0x100] sm:$0xff] }
 0xb09   :  { %v11650_v60 = vpack.i.bf16 %v14270_v6, %v5780_v32 }
 0xb0b   :  { %11631 = vrot.lane.b32.xlu1 %v11630_v12, %s12232_s16  ;;  %11616 = vrot.lane.b32.xlu0 %v11615_v22, %s12232_s16  ;;  %v14294_v55 = vpop.f32.mrb[48].mxu1 }
 0xb0c   :  { %v14296_v14 = vpop.f32.mrb[49].mxu1 }
 0xb0f   :  { %11636 = vrot.lane.b32.xlu1 %v11635_v16, %s12214_s4  ;;  %11626 = vrot.lane.b32.xlu0 %v11625_v0, %s12214_s4  ;;  %v14300_v28 = vpop.f32.mrb[50].mxu1 }
 0xb10   :  { %v14302_v58 = vpop.f32.mrb[51].mxu1 }
 0xb13   :  { %11641 = vrot.lane.b32.xlu0 %v11640_v38, %s12232_s16  ;;  %11646 = vrot.lane.b32.xlu1 %v11645_v27, %s12236_s28  ;;  %v9366_v54 = vpop.f32.mrb[52].mxu1  ;;  %v6222_v27 = vld [vmem:[#allocation9 + $0x108] sm:$0xff] }
 0xb14   :  { %v5810_v36 = vpop.f32.mrb[53].mxu1 }
 0xb17   :  { %11651 = vrot.lane.b32.xlu0 %v11650_v60, %s12236_s28  ;;  %v9369_v25 = vpop.f32.mrb[54].mxu1 }
 0xb18   :  { %v5820_v42 = vpop.f32.mrb[55].mxu1 }
 0xb1b   :  { %v9372_v23 = vpop.f32.mrb[56].mxu1 }
 0xb1c   :  { %v5830_v15 = vpop.f32.mrb[57].mxu1 }
 0xb1f   :  { %v9375_v6 = vpop.f32.mrb[58].mxu1 }
 0xb20   :  { %v5840_v44 = vpop.f32.mrb[59].mxu1 }
 0xb23   :  { %v9378_v5 = vpop.f32.mrb[60].mxu1 }
 0xb24   :  { %v5850_v24 = vpop.f32.mrb[61].mxu1 }
 0xb27   :  { %v9381_v45 = vpop.f32.mrb[62].mxu1 }
 0xb28   :  { %v5860_v2 = vpop.f32.mrb[63].mxu1 }
 0xb2b   :  { %v14307_v41 = vpop.f32.mrb[64].mxu1 }
 0xb2c   :  { %v14309_v35 = vpop.f32.mrb[65].mxu1 }
 0xb2f   :  { %v14311_v20 = vpop.f32.mrb[66].mxu1 }
 0xb30   :  { %v14313_v47 = vpop.f32.mrb[67].mxu1 }
 0xb33   :  { %v9390_v4 = vpop.f32.mrb[68].mxu1 }
 0xb34   :  { %v11655_v13 = vpack.i.bf16 %v9366_v54, %v9390_v4  ;;  %v5890_v43 = vpop.f32.mrb[69].mxu1  ;;  %v9745_v54 = vpack.c.bf16 %v6222_v27, %v6221_v50  ;;  %v6245_v50 = vld [vmem:[#allocation9 + $0x1c0] sm:$0xff]  ;;  %v6246_v27 = vld [vmem:[#allocation9 + $0x1c8] sm:$0xff] }
 0xb35   :  { %v11660_v52 = vpack.i.bf16 %v5810_v36, %v5890_v43  ;;  %v6240_v36 = vld [vmem:[#allocation9 + $0x198] sm:$0xff] }
 0xb36   :  { %11656 = vrot.lane.b32.xlu1 %v11655_v13, %s12214_s4  ;;  %v9747_v4 = vpack.c.bf16 %v6240_v36, %v6239_v40  ;;  %v9759_v40 = vpack.c.bf16 %v6246_v27, %v6245_v50 }
 0xb37   :  { %11661 = vrot.lane.b32.xlu0 %v11660_v52, %s12214_s4  ;;  %v9393_v31 = vpop.f32.mrb[70].mxu1  ;;  %v6224_v52 = vld [vmem:[#allocation9 + $0x118] sm:$0xff] }
 0xb38   :  { %v11695_v59 = vpack.i.bf16 %v9369_v25, %v9393_v31  ;;  %v5900_v63 = vpop.f32.mrb[71].mxu1 }
 0xb39   :  { %v11685_v53 = vpack.i.bf16 %v5820_v42, %v5900_v63  ;;  %v6242_v63 = vld [vmem:[#allocation9 + $0x1a8] sm:$0xff] }
 0xb3b   :  { %v9396_v30 = vpop.f32.mrb[72].mxu1 }
 0xb3c   :  { %v11665_v19 = vpack.i.bf16 %v9372_v23, %v9396_v30  ;;  %v5910_v16 = vpop.f32.mrb[73].mxu1 }
 0xb3d   :  { %v11670_v62 = vpack.i.bf16 %v5830_v15, %v5910_v16 }
 0xb3e   :  { %11666 = vrot.lane.b32.xlu0 %v11665_v19, %s12232_s16 }
 0xb3f   :  { %11671 = vrot.lane.b32.xlu1 %v11670_v62, %s12232_s16  ;;  %v9399_v33 = vpop.f32.mrb[74].mxu1 }
 0xb40   :  { %v11705_v3 = vpack.i.bf16 %v9375_v6, %v9399_v33  ;;  %v5920_v56 = vpop.f32.mrb[75].mxu1 }
 0xb41   :  { %v11690_v0 = vpack.i.bf16 %v5840_v44, %v5920_v56 }
 0xb43   :  { %v9402_v9 = vpop.f32.mrb[76].mxu1 }
 0xb44   :  { %v11675_v37 = vpack.i.bf16 %v9378_v5, %v9402_v9  ;;  %v5930_v22 = vpop.f32.mrb[77].mxu1 }
 0xb45   :  { %v11680_v11 = vpack.i.bf16 %v5850_v24, %v5930_v22 }
 0xb46   :  { %11676 = vrot.lane.b32.xlu1 %v11675_v37, %s12236_s28 }
 0xb47   :  { %11681 = vrot.lane.b32.xlu0 %v11680_v11, %s12236_s28  ;;  %v9405_v61 = vpop.f32.mrb[78].mxu1  ;;  %v6226_v11 = vld [vmem:[#allocation9 + $0x128] sm:$0xff] }
 0xb48   :  { %v11710_v51 = vpack.i.bf16 %v9381_v45, %v9405_v61  ;;  %v5940_v38 = vpop.f32.mrb[79].mxu1  ;;  %v6243_v61 = vld [vmem:[#allocation9 + $0x1b0] sm:$0xff] }
 0xb49   :  { %v11700_v39 = vpack.i.bf16 %v5860_v2, %v5940_v38 }
 0xb4a   :  { %11691 = vrot.lane.b32.xlu1 %v11690_v0, %s12232_s16 }
 0xb4b   :  { %11686 = vrot.lane.b32.xlu0 %v11685_v53, %s12214_s4 }
 0xb4e   :  { %11696 = vrot.lane.b32.xlu1 %v11695_v59, %s12214_s4 }
 0xb4f   :  { %11701 = vrot.lane.b32.xlu0 %v11700_v39, %s12236_s28 }
 0xb52   :  { %11711 = vrot.lane.b32.xlu1 %v11710_v51, %s12236_s28  ;;  %v6244_v51 = vld [vmem:[#allocation9 + $0x1b8] sm:$0xff] }
 0xb53   :  { %11706 = vrot.lane.b32.xlu0 %v11705_v3, %s12232_s16 }
 0xb69   :  { %v11597_v49 = vpop.permute.xlu0 %11596 }
 0xb6a   :  { %v11599_v10 = vunpack.i.h.bf16 %v11597_v49  ;;  %v11598_v34 = vunpack.i.l.bf16 %v11597_v49 }
 0xb6c   :  { %v6141_v25 = vsel %vm5112_vm3, %v14252_v26, %v11599_v10  ;;  %v6153_v15 = vsel %vm5112_vm3, %v14274_v57, %v11598_v34  ;;  %v6223_v26 = vld [vmem:[#allocation9 + $0x110] sm:$0xff]  ;;  %v6241_v57 = vld [vmem:[#allocation9 + $0x1a0] sm:$0xff]  ;;  %v9755_v10 = vpack.c.bf16 %v6244_v51, %v6243_v61  ;;  %v6228_v34 = vld [vmem:[#allocation9 + $0x138] sm:$0xff] }
 0xb6d   :  { %v9749_v3 = vpack.c.bf16 %v6224_v52, %v6223_v26  ;;  %v9751_v22 = vpack.c.bf16 %v6242_v63, %v6241_v57  ;;  %v6231_v63 = vld [vmem:[#allocation9 + $0x150] sm:$0xff]  ;;  %v6236_v61 = vld [vmem:[#allocation9 + $0x178] sm:$0xff] }
 0xb71   :  { %v11602_v12 = vpop.permute.xlu1 %11601 }
 0xb72   :  { %v11604_v32 = vunpack.i.h.bf16 %v11602_v12  ;;  %v11603_v60 = vunpack.i.l.bf16 %v11602_v12  ;;  %v6227_v12 = vld [vmem:[#allocation9 + $0x130] sm:$0xff] }
 0xb74   :  { %v6145_v6 = vsel %vm5180_vm7, %v6141_v25, %v11604_v32  ;;  %v6157_v24 = vsel %vm5180_vm7, %v6153_v15, %v11603_v60 }
 0xb75   :  { %v11612_v8 = vpop.permute.xlu1 %11611 }
 0xb76   :  { %v11614_v44 = vunpack.i.h.bf16 %v11612_v8  ;;  %v11613_v5 = vunpack.i.l.bf16 %v11612_v8 }
 0xb78   :  { %v6142_v53 = vsel %vm5112_vm3, %v14250_v17, %v11614_v44  ;;  %v6154_v16 = vsel %vm5112_vm3, %v14272_v1, %v11613_v5  ;;  %v6225_v17 = vld [vmem:[#allocation9 + $0x120] sm:$0xff]  ;;  %v6230_v44 = vld [vmem:[#allocation9 + $0x148] sm:$0xff] }
 0xb79   :  { %v11622_v48 = vpop.permute.xlu1 %11621  ;;  %v11607_v29 = vpop.permute.xlu0 %11606  ;;  %v9753_v39 = vpack.c.bf16 %v6226_v11, %v6225_v17  ;;  %v6235_v11 = vld [vmem:[#allocation9 + $0x170] sm:$0xff] }
 0xb7a   :  { %v11609_v42 = vunpack.i.h.bf16 %v11607_v29  ;;  %v11608_v23 = vunpack.i.l.bf16 %v11607_v29  ;;  %v11624_v30 = vunpack.i.h.bf16 %v11622_v48  ;;  %v11623_v19 = vunpack.i.l.bf16 %v11622_v48 }
 0xb7b   :  { %v9773_v51 = vpack.c.bf16 %v6236_v61, %v6235_v11  ;;  %v6434_v61 = vld [vmem:[#allocation12] sm:$0xff] }
 0xb7c   :  { %v6149_v45 = vsel %vm5248_vm11, %v6145_v6, %v11609_v42  ;;  %v6161_v2 = vsel %vm5248_vm11, %v6157_v24, %v11608_v23  ;;  %v6229_v6 = vld [vmem:[#allocation9 + $0x140] sm:$0xff] }
 0xb7d   :  { %v14335_v13 = vpop.permute.xlu1 %11631  ;;  %v11617_v43 = vpop.permute.xlu0 %11616  ;;  %6324 = vmatprep.mubr.f32.mxu1 %v6161_v2  ;;  %v6248_v2 = vld [vmem:[#allocation9 + $0x1d8] sm:$0xff] }
 0xb7e   :  { %v11619_v31 = vunpack.i.h.bf16 %v11617_v43  ;;  %v11618_v59 = vunpack.i.l.bf16 %v11617_v43  ;;  %6325 = vmatmul.mubr.f32.vlgmr.msra.gmra.mrb[80].mxu1 %v6149_v45  ;;  %v11634_v36 = vunpack.i.h.bf16 %v14335_v13  ;;  %v11633_v25 = vunpack.i.l.bf16 %v14335_v13 }
 0xb7f   :  { %9746 = vmatpush3.bf16.msra.mxu1 %v9745_v54  ;;  %v9757_v54 = vpack.c.bf16 %v6228_v34, %v6227_v12 }
 0xb80   :  { %v6146_v62 = vsel %vm5180_vm7, %v6142_v53, %v11619_v31  ;;  %v6158_v33 = vsel %vm5180_vm7, %v6154_v16, %v11618_v59  ;;  %9748 = vmatprep.subr.bf16.mxu1 %v9747_v4  ;;  %v6232_v53 = vld [vmem:[#allocation9 + $0x158] sm:$0xff]  ;;  %v6249_v16 = vld [vmem:[#allocation9 + $0x1e0] sm:$0xff] }
 0xb81   :  { %v11637_v56 = vpop.permute.xlu1 %11636  ;;  %v11627_v0 = vpop.permute.xlu0 %11626  ;;  %v6162_v9 = vsel %vm5248_vm11, %v6158_v33, %v11623_v19  ;;  %v6150_v37 = vsel %vm5248_vm11, %v6146_v62, %v11624_v30  ;;  %v6250_v62 = vld [vmem:[#allocation9 + $0x1e8] sm:$0xff]  ;;  %v9765_v33 = vpack.c.bf16 %v6232_v53, %v6231_v63 }
 0xb82   :  { %6329 = vmatprep.mubr.f32.mxu1 %v6162_v9  ;;  %v11629_v1 = vunpack.i.h.bf16 %v11627_v0  ;;  %v11628_v38 = vunpack.i.l.bf16 %v11627_v0  ;;  %v11638_v49 = vunpack.i.l.bf16 %v11637_v56  ;;  %v11639_v42 = vunpack.i.h.bf16 %v11637_v56  ;;  %v6233_v56 = vld [vmem:[#allocation9 + $0x160] sm:$0xff]  ;;  %v6234_v0 = vld [vmem:[#allocation9 + $0x168] sm:$0xff]  ;;  %v6251_v9 = vld [vmem:[#allocation9 + $0x1f0] sm:$0xff] }
 0xb83   :  { %6330 = vmatmul.mubr.f32.gmra.mrb[82].mxu1 %v6150_v37  ;;  %v6252_v37 = vld [vmem:[#allocation9 + $0x1f8] sm:$0xff] }
 0xb84   :  { %9750 = vmatpush3.bf16.msra.mxu1 %v9749_v3  ;;  %v6143_v48 = vsel %vm5112_vm3, %v14256_v7, %v11629_v1  ;;  %v6155_v29 = vsel %vm5112_vm3, %v14278_v18, %v11628_v38  ;;  %v6156_v15 = vsel %vm5112_vm3, %v14276_v46, %v11638_v49  ;;  %v6247_v18 = vld [vmem:[#allocation9 + $0x1d0] sm:$0xff]  ;;  %v9761_v46 = vpack.c.bf16 %v6230_v44, %v6229_v6 }
 0xb85   :  { %v11642_v8 = vpop.permute.xlu0 %11641  ;;  %9752 = vmatprep.subr.bf16.mxu1 %v9751_v22  ;;  %v11647_v60 = vpop.permute.xlu1 %11646  ;;  %v6159_v4 = vsel %vm5180_vm7, %v6155_v29, %v11633_v25  ;;  %v6147_v43 = vsel %vm5180_vm7, %v6143_v48, %v11634_v36  ;;  %v6144_v31 = vsel %vm5112_vm3, %v14254_v21, %v11639_v42  ;;  %v9763_v57 = vpack.c.bf16 %v6248_v2, %v6247_v18 }
 0xb86   :  { %v11643_v32 = vunpack.i.l.bf16 %v11642_v8  ;;  %v11644_v5 = vunpack.i.h.bf16 %v11642_v8  ;;  %v11648_v7 = vunpack.i.l.bf16 %v11647_v60  ;;  %v11649_v59 = vunpack.i.h.bf16 %v11647_v60 }
 0xb87   :  { %v9767_v21 = vpack.c.bf16 %v6250_v62, %v6249_v16  ;;  %v9769_v22 = vpack.c.bf16 %v6234_v0, %v6233_v56  ;;  %v9771_v17 = vpack.c.bf16 %v6252_v37, %v6251_v9 }
 0xb88   :  { %9754 = vmatpush3.bf16.msra.mxu1 %v9753_v39  ;;  %v6160_v13 = vsel %vm5180_vm7, %v6156_v15, %v11643_v32  ;;  %v6148_v30 = vsel %vm5180_vm7, %v6144_v31, %v11644_v5 }
 0xb89   :  { %v11652_v23 = vpop.permute.xlu0 %11651  ;;  %9756 = vmatprep.subr.bf16.mxu1 %v9755_v10  ;;  %v6164_v19 = vsel %vm5248_vm11, %v6160_v13, %v11648_v7  ;;  %v6152_v3 = vsel %vm5248_vm11, %v6148_v30, %v11649_v59 }
 0xb8a   :  { %v11654_v24 = vunpack.i.h.bf16 %v11652_v23  ;;  %v11653_v45 = vunpack.i.l.bf16 %v11652_v23 }
 0xb8c   :  { %v6163_v26 = vsel %vm5248_vm11, %v6159_v4, %v11653_v45  ;;  %v6151_v52 = vsel %vm5248_vm11, %v6147_v43, %v11654_v24  ;;  %9758 = vmatpush3.bf16.msra.mxu1 %v9757_v54 }
 0xb8d   :  { %6334 = vmatprep.mubr.f32.mxu1 %v6163_v26  ;;  %9760 = vmatprep.subr.bf16.mxu1 %v9759_v40 }
 0xb8e   :  { %6335 = vmatmul.mubr.f32.gmra.mrb[84].mxu1 %v6151_v52 }
 0xb8f   :  { %6339 = vmatprep.mubr.f32.mxu1 %v6164_v19 }
 0xb90   :  { %9762 = vmatpush3.bf16.msra.mxu1 %v9761_v46 }
 0xb91   :  { %9764 = vmatprep.subr.bf16.mxu1 %v9763_v57 }
 0xb92   :  { %6340 = vmatmul.mubr.f32.gmra.mrb[86].mxu1 %v6152_v3 }
 0xb94   :  { %9766 = vmatpush3.bf16.msra.mxu1 %v9765_v33 }
 0xb95   :  { %9768 = vmatprep.subr.bf16.mxu1 %v9767_v21 }
 0xb98   :  { %9770 = vmatpush3.bf16.msra.mxu1 %v9769_v22 }
 0xb99   :  { %9772 = vmatprep.subr.bf16.mxu1 %v9771_v17 }
 0xb9c   :  { %9774 = vmatpush3.bf16.msra.mxu1 %v9773_v51 }
 0xba8   :  { %v11657_v1 = vpop.permute.xlu1 %11656 }
 0xba9   :  { %v11662_v38 = vpop.permute.xlu0 %11661  ;;  %v11658_v50 = vunpack.i.l.bf16 %v11657_v1  ;;  %v11659_v25 = vunpack.i.h.bf16 %v11657_v1 }
 0xbaa   :  { %v11664_v12 = vunpack.i.h.bf16 %v11662_v38  ;;  %v11663_v8 = vunpack.i.l.bf16 %v11662_v38 }
 0xbab   :  { %v6166_v4 = vsel %vm5112_vm3, %v14294_v55, %v11659_v25 }
 0xbac   :  { %v6165_v32 = vsel %vm5112_vm3, %v14296_v14, %v11664_v12  ;;  %v6177_v36 = vsel %vm5112_vm3, %v14309_v35, %v11663_v8  ;;  %v6178_v14 = vsel %vm5112_vm3, %v14307_v41, %v11658_v50 }
 0xbb0   :  { %v11667_v49 = vpop.permute.xlu0 %11666 }
 0xbb1   :  { %v11672_v39 = vpop.permute.xlu1 %11671  ;;  %v11668_v60 = vunpack.i.l.bf16 %v11667_v49  ;;  %v11669_v15 = vunpack.i.h.bf16 %v11667_v49 }
 0xbb2   :  { %v11674_v10 = vunpack.i.h.bf16 %v11672_v39  ;;  %v11673_v34 = vunpack.i.l.bf16 %v11672_v39 }
 0xbb3   :  { %v6182_v45 = vsel %vm5180_vm7, %v6178_v14, %v11668_v60  ;;  %v6170_v43 = vsel %vm5180_vm7, %v6166_v4, %v11669_v15 }
 0xbb4   :  { %v6169_v42 = vsel %vm5180_vm7, %v6165_v32, %v11674_v10  ;;  %v6181_v23 = vsel %vm5180_vm7, %v6177_v36, %v11673_v34 }
 0xbb8   :  { %v11677_v27 = vpop.permute.xlu1 %11676 }
 0xbb9   :  { %v11682_v48 = vpop.permute.xlu0 %11681  ;;  %v11678_v29 = vunpack.i.l.bf16 %v11677_v27  ;;  %v11679_v7 = vunpack.i.h.bf16 %v11677_v27  ;;  %v8745_v27 = vld [vmem:[#allocation10] ss:$0 sm:$0xff] }
 0xbba   :  { %v11684_v54 = vunpack.i.h.bf16 %v11682_v48  ;;  %v11683_v40 = vunpack.i.l.bf16 %v11682_v48 }
 0xbbb   :  { %v6186_v2 = vsel %vm5248_vm11, %v6182_v45, %v11678_v29  ;;  %v6174_v59 = vsel %vm5248_vm11, %v6170_v43, %v11679_v7 }
 0xbbc   :  { %v6173_v6 = vsel %vm5248_vm11, %v6169_v42, %v11684_v54  ;;  %v11692_v44 = vpop.permute.xlu1 %11691  ;;  %v6185_v5 = vsel %vm5248_vm11, %v6181_v23, %v11683_v40 }
 0xbbd   :  { %v11687_v24 = vpop.permute.xlu0 %11686  ;;  %6409 = vmatprep.mubr.f32.mxu1 %v6185_v5  ;;  %v11694_v52 = vunpack.i.h.bf16 %v11692_v44  ;;  %v11693_v46 = vunpack.i.l.bf16 %v11692_v44 }
 0xbbe   :  { %v11689_v35 = vunpack.i.h.bf16 %v11687_v24  ;;  %v11688_v18 = vunpack.i.l.bf16 %v11687_v24  ;;  %6410 = vmatmul.mubr.f32.vlgmr.msra.gmra.mrb[88].mxu1 %v6173_v6 }
 0xbbf   :  { %6414 = vmatprep.mubr.f32.mxu1 %v6186_v2 }
 0xbc0   :  { %v6167_v13 = vsel %vm5112_vm3, %v14302_v58, %v11689_v35  ;;  %v11697_v41 = vpop.permute.xlu1 %11696  ;;  %v6179_v26 = vsel %vm5112_vm3, %v14313_v47, %v11688_v18 }
 0xbc1   :  { %v11702_v31 = vpop.permute.xlu0 %11701  ;;  %v11699_v53 = vunpack.i.h.bf16 %v11697_v41  ;;  %v11698_v55 = vunpack.i.l.bf16 %v11697_v41  ;;  %v6183_v30 = vsel %vm5180_vm7, %v6179_v26, %v11693_v46  ;;  %v6171_v19 = vsel %vm5180_vm7, %v6167_v13, %v11694_v52  ;;  %v6435_v52 = vld [vmem:[#allocation12 + $0x8] sm:$0xff]  ;;  %v6436_v46 = vld [vmem:[#allocation12 + $0x10] sm:$0xff] }
 0xbc2   :  { %v11704_v57 = vunpack.i.h.bf16 %v11702_v31  ;;  %v11703_v63 = vunpack.i.l.bf16 %v11702_v31  ;;  %6415 = vmatmul.mubr.f32.gmra.mrb[90].mxu1 %v6174_v59  ;;  %v6437_v31 = vld [vmem:[#allocation12 + $0x18] sm:$0xff]  ;;  %v6438_v59 = vld [vmem:[#allocation12 + $0x20] sm:$0xff] }
 0xbc3   :  { %v6168_v21 = vsel %vm5112_vm3, %v14300_v28, %v11699_v53  ;;  %v6180_v9 = vsel %vm5112_vm3, %v14311_v20, %v11698_v55  ;;  %v6441_v53 = vld [vmem:[#allocation12 + $0x38] sm:$0xff]  ;;  %v6442_v55 = vld [vmem:[#allocation12 + $0x40] sm:$0xff] }
 0xbc4   :  { %v11712_v16 = vpop.permute.xlu1 %11711  ;;  %v6187_v58 = vsel %vm5248_vm11, %v6183_v30, %v11703_v63  ;;  %v6175_v62 = vsel %vm5248_vm11, %v6171_v19, %v11704_v57  ;;  %v6439_v57 = vld [vmem:[#allocation12 + $0x28] sm:$0xff]  ;;  %v6440_v63 = vld [vmem:[#allocation12 + $0x30] sm:$0xff] }
 0xbc5   :  { %v11707_v47 = vpop.permute.xlu0 %11706  ;;  %6419 = vmatprep.mubr.f32.mxu1 %v6187_v58  ;;  %v11714_v56 = vunpack.i.h.bf16 %v11712_v16  ;;  %v11713_v0 = vunpack.i.l.bf16 %v11712_v16  ;;  %v6443_v30 = vld [vmem:[#allocation12 + $0x48] sm:$0xff]  ;;  %v6444_v19 = vld [vmem:[#allocation12 + $0x50] sm:$0xff]  ;;  %v6445_v16 = vld [vmem:[#allocation12 + $0x58] sm:$0xff] }
 0xbc6   :  { %v11709_v33 = vunpack.i.h.bf16 %v11707_v47  ;;  %v11708_v3 = vunpack.i.l.bf16 %v11707_v47  ;;  %6420 = vmatmul.mubr.f32.gmra.mrb[92].mxu1 %v6175_v62  ;;  %v6446_v58 = vld [vmem:[#allocation12 + $0x60] sm:$0xff]  ;;  %v6447_v62 = vld [vmem:[#allocation12 + $0x68] sm:$0xff]  ;;  %v6448_v47 = vld [vmem:[#allocation12 + $0x70] sm:$0xff] }
 0xbc8   :  { %v6172_v37 = vsel %vm5180_vm7, %v6168_v21, %v11709_v33  ;;  %v6184_v22 = vsel %vm5180_vm7, %v6180_v9, %v11708_v3  ;;  %v6449_v33 = vld [vmem:[#allocation12 + $0x78] sm:$0xff]  ;;  %v6699_v3 = vld [vmem:[#allocation13 + $0x80] sm:$0xff]  ;;  %v6700_v21 = vld [vmem:[#allocation13 + $0x88] sm:$0xff] }
 0xbc9   :  { %v6188_v17 = vsel %vm5248_vm11, %v6184_v22, %v11713_v0  ;;  %v6176_v11 = vsel %vm5248_vm11, %v6172_v37, %v11714_v56  ;;  %v6683_v56 = vld [vmem:[#allocation13] sm:$0xff]  ;;  %v9783_v0 = vpack.c.bf16 %v6700_v21, %v6699_v3  ;;  %v6684_v9 = vld [vmem:[#allocation13 + $0x8] sm:$0xff]  ;;  %v6701_v37 = vld [vmem:[#allocation13 + $0x90] sm:$0xff] }
 0xbca   :  { %6424 = vmatprep.mubr.f32.mxu1 %v6188_v17  ;;  %v6702_v22 = vld [vmem:[#allocation13 + $0x98] sm:$0xff]  ;;  %v9785_v17 = vpack.c.bf16 %v6684_v9, %v6683_v56 }
 0xbcb   :  { %6425 = vmatmul.mubr.f32.gmra.mrb[94].mxu1 %v6176_v11  ;;  %v9787_v11 = vpack.c.bf16 %v6702_v22, %v6701_v37 }
 0xbcc   :  { %9414 = vmatprep.mubr.msk.f32.mxu1 %vm5112_vm3, %v6434_v61  ;;  %v6685_v61 = vld [vmem:[#allocation13 + $0x10] sm:$0xff] }
 0xc51   :  { %v8915_v51 = vpop.f32.mrb[80].mxu1 }
 0xc52   :  { %v8916_v28 = vpop.f32.mrb[81].mxu1 }
 0xc53   :  { %v8917_v1 = vadd.f32 %v8916_v28, %v8915_v51  ;;  %v6686_v51 = vld [vmem:[#allocation13 + $0x18] sm:$0xff]  ;;  %v6703_v28 = vld [vmem:[#allocation13 + $0xa0] sm:$0xff] }
 0xc55   :  { %v6327_v48 = vadd.f32 %v8917_v1, %v8745_v27  ;;  %v6704_v1 = vld [vmem:[#allocation13 + $0xa8] sm:$0xff] }
 0xc56   :  { %v8918_v38 = vpop.f32.mrb[82].mxu1 }
 0xc57   :  { %v8919_v39 = vpop.f32.mrb[83].mxu1 }
 0xc58   :  { %v8920_v12 = vadd.f32 %v8919_v39, %v8918_v38  ;;  %v9789_v38 = vpack.c.bf16 %v6686_v51, %v6685_v61  ;;  %v9791_v39 = vpack.c.bf16 %v6704_v1, %v6703_v28  ;;  %v6733_v51 = vld [vmem:[#allocation13 + $0x190] sm:$0xff]  ;;  %v6734_v28 = vld [vmem:[#allocation13 + $0x198] sm:$0xff] }
 0xc5a   :  { %v6332_v25 = vadd.f32 %v8920_v12, %v8745_v27  ;;  %v6687_v12 = vld [vmem:[#allocation13 + $0x20] sm:$0xff] }
 0xc61   :  { %v8921_v20 = vpop.f32.mrb[84].mxu1 }
 0xc62   :  { %v8922_v49 = vpop.f32.mrb[85].mxu1 }
 0xc63   :  { %v8923_v8 = vadd.f32 %v8922_v49, %v8921_v20  ;;  %v6688_v20 = vld [vmem:[#allocation13 + $0x28] sm:$0xff]  ;;  %v6705_v49 = vld [vmem:[#allocation13 + $0xb0] sm:$0xff] }
 0xc65   :  { %v8924_v10 = vpop.f32.mrb[86].mxu1  ;;  %v6337_v44 = vadd.f32 %v8923_v8, %v8745_v27  ;;  %v6706_v8 = vld [vmem:[#allocation13 + $0xb8] sm:$0xff] }
 0xc66   :  { %v8925_v34 = vpop.f32.mrb[87].mxu1 }
 0xc67   :  { %v8926_v50 = vadd.f32 %v8925_v34, %v8924_v10  ;;  %v9793_v10 = vpack.c.bf16 %v6688_v20, %v6687_v12  ;;  %v9795_v34 = vpack.c.bf16 %v6706_v8, %v6705_v49  ;;  %v9819_v49 = vpack.c.bf16 %v6734_v28, %v6733_v51  ;;  %v6717_v8 = vld [vmem:[#allocation13 + $0x110] sm:$0xff] }
 0xc69   :  { %v6342_v2 = vadd.f32 %v8926_v50, %v8745_v27  ;;  %v6689_v50 = vld [vmem:[#allocation13 + $0x30] sm:$0xff]  ;;  %v6690_v27 = vld [vmem:[#allocation13 + $0x38] sm:$0xff] }
 0xc91   :  { %v8959_v32 = vpop.f32.mrb[88].mxu1 }
 0xc92   :  { %v8960_v60 = vpop.f32.mrb[89].mxu1 }
 0xc93   :  { %v8961_v29 = vadd.f32 %v8960_v60, %v8959_v32  ;;  %v6707_v32 = vld [vmem:[#allocation13 + $0xc0] sm:$0xff]  ;;  %v6708_v60 = vld [vmem:[#allocation13 + $0xc8] sm:$0xff] }
 0xc95   :  { %v6412_v54 = vadd.f32 %v8961_v29, %v6327_v48  ;;  %v8962_v40 = vpop.f32.mrb[90].mxu1  ;;  %v9797_v48 = vpack.c.bf16 %v6690_v27, %v6689_v50  ;;  %v9799_v29 = vpack.c.bf16 %v6708_v60, %v6707_v32  ;;  %v6736_v50 = vld [vmem:[#allocation13 + $0x1a8] sm:$0xff]  ;;  %v6719_v60 = vld [vmem:[#allocation13 + $0x120] sm:$0xff] }
 0xc96   :  { %v8963_v36 = vpop.f32.mrb[91].mxu1 }
 0xc97   :  { %v8964_v42 = vadd.f32 %v8963_v36, %v8962_v40  ;;  %v6430_v5 = vmax.f32 %v6412_v54, 0.0  ;;  %v6691_v54 = vld [vmem:[#allocation13 + $0x40] sm:$0xff]  ;;  %v6692_v40 = vld [vmem:[#allocation13 + $0x48] sm:$0xff]  ;;  %v6709_v36 = vld [vmem:[#allocation13 + $0xd0] sm:$0xff] }
 0xc99   :  { %v6417_v23 = vadd.f32 %v8964_v42, %v6332_v25  ;;  %v8965_v15 = vpop.f32.mrb[92].mxu1  ;;  %v6710_v25 = vld [vmem:[#allocation13 + $0xd8] sm:$0xff]  ;;  %v9801_v42 = vpack.c.bf16 %v6692_v40, %v6691_v54  ;;  %v6737_v54 = vld [vmem:[#allocation13 + $0x1b0] sm:$0xff] }
 0xc9a   :  { %v8966_v6 = vpop.f32.mrb[93].mxu1  ;;  %v6738_v40 = vld [vmem:[#allocation13 + $0x1b8] sm:$0xff] }
 0xc9b   :  { %v6431_v14 = vmax.f32 %v6417_v23, 0.0  ;;  %v8967_v7 = vadd.f32 %v8966_v6, %v8965_v15  ;;  %v9803_v23 = vpack.c.bf16 %v6710_v25, %v6709_v36  ;;  %v6693_v15 = vld [vmem:[#allocation13 + $0x50] sm:$0xff]  ;;  %v6694_v6 = vld [vmem:[#allocation13 + $0x58] sm:$0xff] }
 0xc9d   :  { %v6422_v24 = vadd.f32 %v8967_v7, %v6337_v44  ;;  %v9775_v45 = vpack.c.bf16 %v6431_v14, %v6430_v5  ;;  %v6711_v44 = vld [vmem:[#allocation13 + $0xe0] sm:$0xff]  ;;  %v6712_v5 = vld [vmem:[#allocation13 + $0xe8] sm:$0xff]  ;;  %v9805_v14 = vpack.c.bf16 %v6694_v6, %v6693_v15  ;;  %v6721_v15 = vld [vmem:[#allocation13 + $0x130] sm:$0xff] }
 0xc9e   :  { %v8968_v35 = vpop.f32.mrb[94].mxu1  ;;  %v9807_v7 = vpack.c.bf16 %v6712_v5, %v6711_v44  ;;  %v6722_v6 = vld [vmem:[#allocation13 + $0x138] sm:$0xff]  ;;  %v6739_v44 = vld [vmem:[#allocation13 + $0x1c0] sm:$0xff]  ;;  %v6740_v5 = vld [vmem:[#allocation13 + $0x1c8] sm:$0xff] }
 0xc9f   :  { %v8969_v18 = vpop.f32.mrb[95].mxu1  ;;  %9776 = vmatprep.subr.bf16.mxu1 %v9775_v45  ;;  %v6432_v13 = vmax.f32 %v6422_v24, 0.0  ;;  %v6695_v24 = vld [vmem:[#allocation13 + $0x60] sm:$0xff] }
 0xca0   :  { %v8970_v4 = vadd.f32 %v8969_v18, %v8968_v35  ;;  %9778 = vmatpush3.bf16.msra.mxu1 %v9775_v45  ;;  %v6696_v45 = vld [vmem:[#allocation13 + $0x68] sm:$0xff]  ;;  %v6713_v35 = vld [vmem:[#allocation13 + $0xf0] sm:$0xff]  ;;  %v6714_v18 = vld [vmem:[#allocation13 + $0xf8] sm:$0xff] }
 0xca2   :  { %v6427_v43 = vadd.f32 %v8970_v4, %v6342_v2  ;;  %v9809_v2 = vpack.c.bf16 %v6696_v45, %v6695_v24  ;;  %v9811_v4 = vpack.c.bf16 %v6714_v18, %v6713_v35  ;;  %v6723_v24 = vld [vmem:[#allocation13 + $0x140] sm:$0xff]  ;;  %v6724_v45 = vld [vmem:[#allocation13 + $0x148] sm:$0xff]  ;;  %v6741_v35 = vld [vmem:[#allocation13 + $0x1d0] sm:$0xff] }
 0xca3   :  { %v6742_v18 = vld [vmem:[#allocation13 + $0x1d8] sm:$0xff] }
 0xca4   :  { %v6433_v41 = vmax.f32 %v6427_v43, 0.0  ;;  %v6697_v43 = vld [vmem:[#allocation13 + $0x70] sm:$0xff] }
 0xca6   :  { %v9779_v26 = vpack.c.bf16 %v6433_v41, %v6432_v13  ;;  %v6698_v13 = vld [vmem:[#allocation13 + $0x78] sm:$0xff] }
 0xca7   :  { %v9813_v41 = vpack.c.bf16 %v6698_v13, %v6697_v43  ;;  %v6725_v43 = vld [vmem:[#allocation13 + $0x150] sm:$0xff]  ;;  %v6726_v13 = vld [vmem:[#allocation13 + $0x158] sm:$0xff] }
 0xca8   :  { %9780 = vmatprep.subr.bf16.mxu1 %v9779_v26 }
 0xca9   :  { %9782 = vmatpush3.bf16.msra.mxu1 %v9779_v26  ;;  %v6731_v26 = vld [vmem:[#allocation13 + $0x180] sm:$0xff] }
 0xcaa   :  { %9784 = vmatprep.subr.bf16.mxu1 %v9783_v0 }
 0xcac   :  { %9415 = vmatmul.mubr.msk.f32.vlgmr.msra.gmra.mrb[96].mxu1 %vm5112_vm3, %v6435_v52  ;;  %v6732_v52 = vld [vmem:[#allocation13 + $0x188] sm:$0xff] }
 0xcad   :  { %9417 = vmatprep.mubr.msk.f32.mxu1 %vm5112_vm3, %v6436_v46  ;;  %9786 = vmatpush3.bf16.msra.mxu1 %v9785_v17  ;;  %v9815_v46 = vpack.c.bf16 %v6732_v52, %v6731_v26  ;;  %v6715_v17 = vld [vmem:[#allocation13 + $0x100] sm:$0xff]  ;;  %v6744_v26 = vld [vmem:[#allocation13 + $0x1e8] sm:$0xff]  ;;  %v9837_v52 = vpack.c.bf16 %v6726_v13, %v6725_v43  ;;  %v6777_v43 = vld [vmem:[#allocation13 + $0x2f0] sm:$0xff] }
 0xcae   :  { %9788 = vmatprep.subr.bf16.mxu1 %v9787_v11  ;;  %v6716_v11 = vld [vmem:[#allocation13 + $0x108] sm:$0xff]  ;;  %v6778_v13 = vld [vmem:[#allocation13 + $0x2f8] sm:$0xff] }
 0xcb0   :  { %9418 = vmatmul.mubr.msk.f32.gmra.mrb[98].mxu1 %vm5112_vm3, %v6437_v31 }
 0xcb1   :  { %9420 = vmatprep.mubr.msk.f32.mxu1 %vm5112_vm3, %v6438_v59  ;;  %9790 = vmatpush3.bf16.msra.mxu1 %v9789_v38 }
 0xcb2   :  { %9792 = vmatprep.subr.bf16.mxu1 %v9791_v39  ;;  %v9817_v39 = vpack.c.bf16 %v6716_v11, %v6715_v17  ;;  %v6765_v11 = vld [vmem:[#allocation13 + $0x290] sm:$0xff] }
 0xcb4   :  { %9421 = vmatmul.mubr.msk.f32.gmra.mrb[100].mxu1 %vm5112_vm3, %v6439_v57 }
 0xcb5   :  { %9423 = vmatprep.mubr.msk.f32.mxu1 %vm5112_vm3, %v6440_v63  ;;  %9794 = vmatpush3.bf16.msra.mxu1 %v9793_v10  ;;  %v6718_v10 = vld [vmem:[#allocation13 + $0x118] sm:$0xff] }
 0xcb6   :  { %9796 = vmatprep.subr.bf16.mxu1 %v9795_v34  ;;  %v6735_v34 = vld [vmem:[#allocation13 + $0x1a0] sm:$0xff]  ;;  %v9821_v27 = vpack.c.bf16 %v6718_v10, %v6717_v8 }
 0xcb7   :  { %v9823_v32 = vpack.c.bf16 %v6736_v50, %v6735_v34  ;;  %v6751_v50 = vld [vmem:[#allocation13 + $0x220] sm:$0xff] }
 0xcb8   :  { %9424 = vmatmul.mubr.msk.f32.gmra.mrb[102].mxu1 %vm5112_vm3, %v6441_v53 }
 0xcb9   :  { %9426 = vmatprep.mubr.msk.f32.mxu1 %vm5112_vm3, %v6442_v55  ;;  %9798 = vmatpush3.bf16.msra.mxu1 %v9797_v48  ;;  %v6720_v48 = vld [vmem:[#allocation13 + $0x128] sm:$0xff] }
 0xcba   :  { %9800 = vmatprep.subr.bf16.mxu1 %v9799_v29  ;;  %v9825_v25 = vpack.c.bf16 %v6720_v48, %v6719_v60  ;;  %v6770_v60 = vld [vmem:[#allocation13 + $0x2b8] sm:$0xff] }
 0xcbc   :  { %9427 = vmatmul.mubr.msk.f32.gmra.mrb[104].mxu1 %vm5112_vm3, %v6443_v30 }
 0xcbd   :  { %9429 = vmatprep.mubr.msk.f32.mxu1 %vm5112_vm3, %v6444_v19  ;;  %9802 = vmatpush3.bf16.msra.mxu1 %v9801_v42 }
 0xcbe   :  { %9804 = vmatprep.subr.bf16.mxu1 %v9803_v23  ;;  %v9827_v23 = vpack.c.bf16 %v6738_v40, %v6737_v54  ;;  %v6754_v54 = vld [vmem:[#allocation13 + $0x238] sm:$0xff]  ;;  %v6771_v40 = vld [vmem:[#allocation13 + $0x2c0] sm:$0xff] }
 0xcc0   :  { %9430 = vmatmul.mubr.msk.f32.gmra.mrb[106].mxu1 %vm5112_vm3, %v6445_v16 }
 0xcc1   :  { %9432 = vmatprep.mubr.msk.f32.mxu1 %vm5112_vm3, %v6446_v58  ;;  %9806 = vmatpush3.bf16.msra.mxu1 %v9805_v14  ;;  %v9829_v14 = vpack.c.bf16 %v6722_v6, %v6721_v15  ;;  %v6773_v15 = vld [vmem:[#allocation13 + $0x2d0] sm:$0xff]  ;;  %v6774_v6 = vld [vmem:[#allocation13 + $0x2d8] sm:$0xff] }
 0xcc2   :  { %9808 = vmatprep.subr.bf16.mxu1 %v9807_v7  ;;  %v9831_v7 = vpack.c.bf16 %v6740_v5, %v6739_v44  ;;  %v9867_v5 = vpack.c.bf16 %v6774_v6, %v6773_v15  ;;  %v6791_v15 = vld [vmem:[#allocation13 + $0x360] sm:$0xff]  ;;  %v6792_v6 = vld [vmem:[#allocation13 + $0x368] sm:$0xff] }
 0xcc4   :  { %9433 = vmatmul.mubr.msk.f32.gmra.mrb[108].mxu1 %vm5112_vm3, %v6447_v62 }
 0xcc5   :  { %9435 = vmatprep.mubr.msk.f32.mxu1 %vm5112_vm3, %v6448_v47  ;;  %9810 = vmatpush3.bf16.msra.mxu1 %v9809_v2  ;;  %v9833_v2 = vpack.c.bf16 %v6724_v45, %v6723_v24  ;;  %v6775_v24 = vld [vmem:[#allocation13 + $0x2e0] sm:$0xff]  ;;  %v6776_v45 = vld [vmem:[#allocation13 + $0x2e8] sm:$0xff] }
 0xcc6   :  { %9812 = vmatprep.subr.bf16.mxu1 %v9811_v4  ;;  %v9835_v4 = vpack.c.bf16 %v6742_v18, %v6741_v35  ;;  %v9871_v18 = vpack.c.bf16 %v6776_v45, %v6775_v24  ;;  %v6793_v24 = vld [vmem:[#allocation13 + $0x370] sm:$0xff]  ;;  %v6794_v45 = vld [vmem:[#allocation13 + $0x378] sm:$0xff] }
 0xcc8   :  { %9436 = vmatmul.mubr.msk.f32.gmra.mrb[110].mxu1 %vm5112_vm3, %v6449_v33 }
 0xcc9   :  { %9814 = vmatpush3.bf16.msra.mxu1 %v9813_v41  ;;  %v6743_v41 = vld [vmem:[#allocation13 + $0x1e0] sm:$0xff] }
 0xcca   :  { %9816 = vmatprep.subr.bf16.mxu1 %v9815_v46  ;;  %v9839_v46 = vpack.c.bf16 %v6744_v26, %v6743_v41  ;;  %v9875_v26 = vpack.c.bf16 %v6778_v13, %v6777_v43 }
 0xd7f   :  { %v9416_v31 = vpop.f32.mrb[96].mxu1 }
 0xd80   :  { %v6564_v59 = vpop.f32.mrb[97].mxu1 }
 0xd83   :  { %v9419_v57 = vpop.f32.mrb[98].mxu1 }
 0xd84   :  { %v11715_v63 = vpack.i.bf16 %v9416_v31, %v9419_v57  ;;  %v6574_v53 = vpop.f32.mrb[99].mxu1  ;;  %v6727_v31 = vld [vmem:[#allocation13 + $0x160] sm:$0xff]  ;;  %v6745_v57 = vld [vmem:[#allocation13 + $0x1f0] sm:$0xff] }
 0xd86   :  { %11716 = vrot.lane.b32.xlu0 %v11715_v63, %s12232_s16  ;;  %v6746_v63 = vld [vmem:[#allocation13 + $0x1f8] sm:$0xff] }
 0xd87   :  { %v9422_v55 = vpop.f32.mrb[100].mxu1 }
 0xd88   :  { %v14412_v30 = vpop.f32.mrb[101].mxu1 }
 0xd8b   :  { %v9425_v19 = vpop.f32.mrb[102].mxu1 }
 0xd8c   :  { %v11720_v16 = vpack.i.bf16 %v9422_v55, %v9425_v19  ;;  %v6594_v58 = vpop.f32.mrb[103].mxu1  ;;  %v9843_v55 = vpack.c.bf16 %v6746_v63, %v6745_v57  ;;  %v6729_v19 = vld [vmem:[#allocation13 + $0x170] sm:$0xff] }
 0xd8e   :  { %11721 = vrot.lane.b32.xlu1 %v11720_v16, %s12232_s16  ;;  %v6730_v16 = vld [vmem:[#allocation13 + $0x178] sm:$0xff] }
 0xd8f   :  { %v9428_v62 = vpop.f32.mrb[104].mxu1 }
 0xd90   :  { %v14415_v47 = vpop.f32.mrb[105].mxu1 }
 0xd93   :  { %v9431_v33 = vpop.f32.mrb[106].mxu1 }
 0xd94   :  { %v11725_v3 = vpack.i.bf16 %v9428_v62, %v9431_v33  ;;  %v14417_v21 = vpop.f32.mrb[107].mxu1  ;;  %v6764_v62 = vld [vmem:[#allocation13 + $0x288] sm:$0xff] }
 0xd96   :  { %11726 = vrot.lane.b32.xlu0 %v11725_v3, %s12232_s16  ;;  %v9845_v3 = vpack.c.bf16 %v6730_v16, %v6729_v19  ;;  %v6780_v19 = vld [vmem:[#allocation13 + $0x308] sm:$0xff] }
 0xd97   :  { %v9434_v56 = vpop.f32.mrb[108].mxu1 }
 0xd98   :  { %v14420_v0 = vpop.f32.mrb[109].mxu1 }
 0xd9b   :  { %v9437_v9 = vpop.f32.mrb[110].mxu1 }
 0xd9c   :  { %v11730_v37 = vpack.i.bf16 %v9434_v56, %v9437_v9  ;;  %v14422_v22 = vpop.f32.mrb[111].mxu1  ;;  %v6747_v9 = vld [vmem:[#allocation13 + $0x200] sm:$0xff] }
 0xd9e   :  { %11731 = vrot.lane.b32.xlu1 %v11730_v37, %s12232_s16  ;;  %v6748_v37 = vld [vmem:[#allocation13 + $0x208] sm:$0xff] }
 0xd9f   :  { %v9849_v28 = vpack.c.bf16 %v6748_v37, %v6747_v9  ;;  %v6781_v37 = vld [vmem:[#allocation13 + $0x310] sm:$0xff] }
 0xdf8   :  { %v11717_v61 = vpop.permute.xlu0 %11716 }
 0xdf9   :  { %v11719_v1 = vunpack.i.h.bf16 %v11717_v61  ;;  %v11718_v38 = vunpack.i.l.bf16 %v11717_v61  ;;  %v6766_v61 = vld [vmem:[#allocation13 + $0x298] sm:$0xff] }
 0xdfb   :  { %v6675_v12 = vsel %vm5180_vm7, %v6564_v59, %v11719_v1  ;;  %v6676_v20 = vsel %vm5180_vm7, %v6574_v53, %v11718_v38  ;;  %v6728_v59 = vld [vmem:[#allocation13 + $0x168] sm:$0xff]  ;;  %v9851_v1 = vpack.c.bf16 %v6766_v61, %v6765_v11  ;;  %v6749_v38 = vld [vmem:[#allocation13 + $0x210] sm:$0xff]  ;;  %v6799_v61 = vld [vmem:[#allocation13 + $0x3a0] sm:$0xff] }
 0xdfc   :  { %6882 = vmatprep.mubr.f32.mxu1 %v6676_v20  ;;  %v9841_v53 = vpack.c.bf16 %v6728_v59, %v6727_v31  ;;  %v6767_v20 = vld [vmem:[#allocation13 + $0x2a0] sm:$0xff]  ;;  %v6796_v59 = vld [vmem:[#allocation13 + $0x388] sm:$0xff] }
 0xdfd   :  { %6883 = vmatmul.mubr.f32.vlgmr.msra.gmra.mrb[112].mxu1 %v6675_v12  ;;  %v6795_v31 = vld [vmem:[#allocation13 + $0x380] sm:$0xff] }
 0xdfe   :  { %9818 = vmatpush3.bf16.msra.mxu1 %v9817_v39  ;;  %v6750_v39 = vld [vmem:[#allocation13 + $0x218] sm:$0xff] }
 0xdff   :  { %9820 = vmatprep.subr.bf16.mxu1 %v9819_v49  ;;  %v6768_v49 = vld [vmem:[#allocation13 + $0x2a8] sm:$0xff]  ;;  %v9853_v10 = vpack.c.bf16 %v6750_v39, %v6749_v38  ;;  %v6783_v38 = vld [vmem:[#allocation13 + $0x320] sm:$0xff] }
 0xe00   :  { %v14427_v29 = vpop.permute.xlu1 %11721  ;;  %v9855_v34 = vpack.c.bf16 %v6768_v49, %v6767_v20  ;;  %v6784_v39 = vld [vmem:[#allocation13 + $0x328] sm:$0xff]  ;;  %v6802_v20 = vld [vmem:[#allocation13 + $0x3b8] sm:$0xff] }
 0xe01   :  { %v11723_v36 = vunpack.i.l.bf16 %v14427_v29  ;;  %v11724_v17 = vunpack.i.h.bf16 %v14427_v29  ;;  %v9889_v49 = vpack.c.bf16 %v6784_v39, %v6783_v38  ;;  %v7232_v38 = vld [vmem:[#allocation18 + $0x20] sm:$0xff]  ;;  %v7234_v39 = vld [vmem:[#allocation18 + $0x30] sm:$0xff] }
 0xe02   :  { %9822 = vmatpush3.bf16.msra.mxu1 %v9821_v27  ;;  %v6752_v27 = vld [vmem:[#allocation13 + $0x228] sm:$0xff] }
 0xe03   :  { %9824 = vmatprep.subr.bf16.mxu1 %v9823_v32  ;;  %v6678_v42 = vsel %vm5180_vm7, %v6594_v58, %v11723_v36  ;;  %v6763_v58 = vld [vmem:[#allocation13 + $0x280] sm:$0xff]  ;;  %v6677_v12 = vsel %vm5180_vm7, %v14412_v30, %v11724_v17  ;;  %v6769_v32 = vld [vmem:[#allocation13 + $0x2b0] sm:$0xff]  ;;  %v9857_v48 = vpack.c.bf16 %v6752_v27, %v6751_v50  ;;  %v6772_v36 = vld [vmem:[#allocation13 + $0x2c8] sm:$0xff] }
 0xe04   :  { %6952 = vmatprep.mubr.f32.mxu1 %v6678_v42  ;;  %v9847_v56 = vpack.c.bf16 %v6764_v62, %v6763_v58  ;;  %v9859_v29 = vpack.c.bf16 %v6770_v60, %v6769_v32  ;;  %v6753_v30 = vld [vmem:[#allocation13 + $0x230] sm:$0xff]  ;;  %v6755_v42 = vld [vmem:[#allocation13 + $0x240] sm:$0xff]  ;;  %v6798_v62 = vld [vmem:[#allocation13 + $0x398] sm:$0xff] }
 0xe05   :  { %v6797_v58 = vld [vmem:[#allocation13 + $0x390] sm:$0xff]  ;;  %v6782_v17 = vld [vmem:[#allocation13 + $0x318] sm:$0xff]  ;;  %v6804_v50 = vld [vmem:[#allocation13 + $0x3c8] sm:$0xff] }
 0xe06   :  { %9826 = vmatpush3.bf16.msra.mxu1 %v9825_v25  ;;  %v9861_v25 = vpack.c.bf16 %v6754_v54, %v6753_v30  ;;  %v9883_v9 = vpack.c.bf16 %v6798_v62, %v6797_v58  ;;  %v6787_v32 = vld [vmem:[#allocation13 + $0x340] sm:$0xff]  ;;  %v6788_v60 = vld [vmem:[#allocation13 + $0x348] sm:$0xff] }
 0xe07   :  { %9828 = vmatprep.subr.bf16.mxu1 %v9827_v23  ;;  %v6756_v23 = vld [vmem:[#allocation13 + $0x248] sm:$0xff]  ;;  %v9897_v30 = vpack.c.bf16 %v6788_v60, %v6787_v32  ;;  %v7242_v60 = vld [vmem:[#allocation18 + $0x70] sm:$0xff] }
 0xe08   :  { %v14431_v33 = vpop.permute.xlu0 %11726  ;;  %v9865_v44 = vpack.c.bf16 %v6756_v23, %v6755_v42  ;;  %v7229_v62 = vld [vmem:[#allocation18 + $0x8] sm:$0xff]  ;;  %v7240_v32 = vld [vmem:[#allocation18 + $0x60] sm:$0xff] }
 0xe09   :  { %v11728_v51 = vunpack.i.l.bf16 %v14431_v33  ;;  %v11729_v16 = vunpack.i.h.bf16 %v14431_v33  ;;  %v9885_v33 = vpack.c.bf16 %v6782_v17, %v6781_v37  ;;  %v7230_v37 = vld [vmem:[#allocation18 + $0x10] sm:$0xff]  ;;  %v7233_v17 = vld [vmem:[#allocation18 + $0x28] sm:$0xff] }
 0xe0a   :  { %9830 = vmatpush3.bf16.msra.mxu1 %v9829_v14  ;;  %v6757_v14 = vld [vmem:[#allocation13 + $0x250] sm:$0xff] }
 0xe0b   :  { %9832 = vmatprep.subr.bf16.mxu1 %v9831_v7  ;;  %v6680_v8 = vsel %vm5180_vm7, %v14417_v21, %v11728_v51  ;;  %v9863_v21 = vpack.c.bf16 %v6772_v36, %v6771_v40  ;;  %v6758_v7 = vld [vmem:[#allocation13 + $0x258] sm:$0xff]  ;;  %v6679_v11 = vsel %vm5180_vm7, %v14415_v47, %v11729_v16  ;;  %v6800_v51 = vld [vmem:[#allocation13 + $0x3a8] sm:$0xff]  ;;  %v6785_v47 = vld [vmem:[#allocation13 + $0x330] sm:$0xff] }
 0xe0c   :  { %v9869_v35 = vpack.c.bf16 %v6758_v7, %v6757_v14  ;;  %v6789_v40 = vld [vmem:[#allocation13 + $0x350] sm:$0xff]  ;;  %v6790_v36 = vld [vmem:[#allocation13 + $0x358] sm:$0xff]  ;;  %v9905_v14 = vpack.c.bf16 %v6792_v6, %v6791_v15  ;;  %v7248_v15 = vld [vmem:[#allocation18 + $0xa0] sm:$0xff] }
 0xe0d   :  { %v9901_v42 = vpack.c.bf16 %v6790_v36, %v6789_v40  ;;  %v7244_v40 = vld [vmem:[#allocation18 + $0x80] sm:$0xff]  ;;  %v7246_v36 = vld [vmem:[#allocation18 + $0x90] sm:$0xff] }
 0xe0e   :  { %9834 = vmatpush3.bf16.msra.mxu1 %v9833_v2  ;;  %v6759_v2 = vld [vmem:[#allocation13 + $0x260] sm:$0xff]  ;;  %v7250_v6 = vld [vmem:[#allocation18 + $0xb0] sm:$0xff] }
 0xe0f   :  { %9836 = vmatprep.subr.bf16.mxu1 %v9835_v4  ;;  %v6760_v4 = vld [vmem:[#allocation13 + $0x268] sm:$0xff] }
 0xe10   :  { %v9873_v41 = vpack.c.bf16 %v6760_v4, %v6759_v2  ;;  %v14439_v57 = vpop.permute.xlu1 %11731  ;;  %v7099_v4 = vld [vmem:[#allocation16] sm:$0xff] }
 0xe12   :  { %9838 = vmatpush3.bf16.msra.mxu1 %v9837_v52  ;;  %v6761_v52 = vld [vmem:[#allocation13 + $0x270] sm:$0xff] }
 0xe13   :  { %9840 = vmatprep.subr.bf16.mxu1 %v9839_v46  ;;  %v6762_v46 = vld [vmem:[#allocation13 + $0x278] sm:$0xff] }
 0xe14   :  { %v9877_v63 = vpack.c.bf16 %v6762_v46, %v6761_v52 }
 0xe16   :  { %9842 = vmatpush3.bf16.msra.mxu1 %v9841_v53  ;;  %v9879_v53 = vpack.c.bf16 %v6796_v59, %v6795_v31 }
 0xe17   :  { %9844 = vmatprep.subr.bf16.mxu1 %v9843_v55  ;;  %v6779_v55 = vld [vmem:[#allocation13 + $0x300] sm:$0xff] }
 0xe1a   :  { %9846 = vmatpush3.bf16.msra.mxu1 %v9845_v3  ;;  %v11733_v3 = vunpack.i.l.bf16 %v14439_v57 }
 0xe1b   :  { %9848 = vmatprep.subr.bf16.mxu1 %v9847_v56  ;;  %v9881_v56 = vpack.c.bf16 %v6780_v19, %v6779_v55 }
 0xe1d   :  { %6953 = vmatmul.mubr.f32.vlgmr.msra.gmra.mrb[114].mxu1 %v6677_v12  ;;  %v6801_v12 = vld [vmem:[#allocation13 + $0x3b0] sm:$0xff] }
 0xe1e   :  { %9850 = vmatpush3.bf16.msra.mxu1 %v9849_v28  ;;  %7022 = vmatprep.mubr.f32.mxu1 %v6680_v8  ;;  %v6682_v28 = vsel %vm5180_vm7, %v14422_v22, %v11733_v3  ;;  %v9891_v8 = vpack.c.bf16 %v6802_v20, %v6801_v12  ;;  %v7231_v3 = vld [vmem:[#allocation18 + $0x18] sm:$0xff]  ;;  %v7237_v12 = vld [vmem:[#allocation18 + $0x48] sm:$0xff] }
 0xe1f   :  { %9852 = vmatprep.subr.bf16.mxu1 %v9851_v1  ;;  %v9887_v1 = vpack.c.bf16 %v6800_v51, %v6799_v61  ;;  %v9911_v51 = vpack.c.bf16 %v7231_v3, %v7229_v62  ;;  %v7239_v20 = vld [vmem:[#allocation18 + $0x58] sm:$0xff] }
 0xe22   :  { %9854 = vmatpush3.bf16.msra.mxu1 %v9853_v10  ;;  %v6786_v10 = vld [vmem:[#allocation13 + $0x338] sm:$0xff] }
 0xe23   :  { %9856 = vmatprep.subr.bf16.mxu1 %v9855_v34  ;;  %v6803_v34 = vld [vmem:[#allocation13 + $0x3c0] sm:$0xff]  ;;  %v9893_v27 = vpack.c.bf16 %v6786_v10, %v6785_v47  ;;  %v7238_v10 = vld [vmem:[#allocation18 + $0x50] sm:$0xff] }
 0xe24   :  { %v9895_v22 = vpack.c.bf16 %v6804_v50, %v6803_v34  ;;  %v7236_v47 = vld [vmem:[#allocation18 + $0x40] sm:$0xff]  ;;  %v7241_v34 = vld [vmem:[#allocation18 + $0x68] sm:$0xff]  ;;  %v7243_v50 = vld [vmem:[#allocation18 + $0x78] sm:$0xff] }
 0xe26   :  { %9858 = vmatpush3.bf16.msra.mxu1 %v9857_v48  ;;  %v6805_v48 = vld [vmem:[#allocation13 + $0x3d0] sm:$0xff] }
 0xe27   :  { %9860 = vmatprep.subr.bf16.mxu1 %v9859_v29  ;;  %v6806_v29 = vld [vmem:[#allocation13 + $0x3d8] sm:$0xff] }
 0xe28   :  { %v9899_v54 = vpack.c.bf16 %v6806_v29, %v6805_v48  ;;  %v7245_v48 = vld [vmem:[#allocation18 + $0x88] sm:$0xff]  ;;  %v7247_v29 = vld [vmem:[#allocation18 + $0x98] sm:$0xff] }
 0xe2a   :  { %9862 = vmatpush3.bf16.msra.mxu1 %v9861_v25  ;;  %v6807_v25 = vld [vmem:[#allocation13 + $0x3e0] sm:$0xff] }
 0xe2b   :  { %9864 = vmatprep.subr.bf16.mxu1 %v9863_v21  ;;  %v6808_v21 = vld [vmem:[#allocation13 + $0x3e8] sm:$0xff] }
 0xe2c   :  { %v9903_v23 = vpack.c.bf16 %v6808_v21, %v6807_v25  ;;  %v7249_v25 = vld [vmem:[#allocation18 + $0xa8] sm:$0xff]  ;;  %v7251_v21 = vld [vmem:[#allocation18 + $0xb8] sm:$0xff] }
 0xe2e   :  { %9866 = vmatpush3.bf16.msra.mxu1 %v9865_v44  ;;  %v6809_v44 = vld [vmem:[#allocation13 + $0x3f0] sm:$0xff] }
 0xe2f   :  { %9868 = vmatprep.subr.bf16.mxu1 %v9867_v5  ;;  %v6810_v5 = vld [vmem:[#allocation13 + $0x3f8] sm:$0xff] }
 0xe30   :  { %v9907_v7 = vpack.c.bf16 %v6810_v5, %v6809_v44  ;;  %v7253_v44 = vld [vmem:[#allocation18 + $0xc8] sm:$0xff]  ;;  %v7255_v5 = vld [vmem:[#allocation18 + $0xd8] sm:$0xff] }
 0xe32   :  { %9870 = vmatpush3.bf16.msra.mxu1 %v9869_v35  ;;  %v9909_v35 = vpack.c.bf16 %v6794_v45, %v6793_v24  ;;  %v7252_v24 = vld [vmem:[#allocation18 + $0xc0] sm:$0xff]  ;;  %v7254_v45 = vld [vmem:[#allocation18 + $0xd0] sm:$0xff] }
 0xe33   :  { %9872 = vmatprep.subr.bf16.mxu1 %v9871_v18  ;;  %v11734_v18 = vunpack.i.h.bf16 %v14439_v57 }
 0xe35   :  { %v6681_v2 = vsel %vm5180_vm7, %v14420_v0, %v11734_v18  ;;  %v7259_v18 = vld [vmem:[#allocation18 + $0xf8] sm:$0xff] }
 0xe36   :  { %9874 = vmatpush3.bf16.msra.mxu1 %v9873_v41 }
 0xe37   :  { %9876 = vmatprep.subr.bf16.mxu1 %v9875_v26  ;;  %v8762_v26 = vld [vmem:[#allocation15] ss:$0 sm:$0xff] }
 0xe3a   :  { %9878 = vmatpush3.bf16.msra.mxu1 %v9877_v63 }
 0xe3b   :  { %9880 = vmatprep.subr.bf16.mxu1 %v9879_v53 }
 0xe3d   :  { %7023 = vmatmul.mubr.f32.vlgmr.msra.gmra.mrb[116].mxu1 %v6679_v11  ;;  %v7235_v11 = vld [vmem:[#allocation18 + $0x38] sm:$0xff] }
 0xe3e   :  { %9882 = vmatpush3.bf16.msra.mxu1 %v9881_v56  ;;  %7092 = vmatprep.mubr.f32.mxu1 %v6682_v28  ;;  %v7100_v28 = vld [vmem:[#allocation16 + $0x8] sm:$0xff] }
 0xe3f   :  { %9884 = vmatprep.subr.bf16.mxu1 %v9883_v9  ;;  %v7228_v9 = vld [vmem:[#allocation18] sm:$0xff] }
 0xe42   :  { %9886 = vmatpush3.bf16.msra.mxu1 %v9885_v33  ;;  %v9913_v33 = vpack.c.bf16 %v7230_v37, %v7228_v9  ;;  %v7270_v9 = vld [vmem:[#allocation18 + $0x150] sm:$0xff]  ;;  %v7273_v37 = vld [vmem:[#allocation18 + $0x168] sm:$0xff] }
 0xe43   :  { %9888 = vmatprep.subr.bf16.mxu1 %v9887_v1  ;;  %v9915_v1 = vpack.c.bf16 %v7235_v11, %v7233_v17  ;;  %v7275_v17 = vld [vmem:[#allocation18 + $0x178] sm:$0xff] }
 0xe46   :  { %9890 = vmatpush3.bf16.msra.mxu1 %v9889_v49  ;;  %v9917_v49 = vpack.c.bf16 %v7234_v39, %v7232_v38 }
 0xe47   :  { %9892 = vmatprep.subr.bf16.mxu1 %v9891_v8  ;;  %v9919_v8 = vpack.c.bf16 %v7239_v20, %v7237_v12  ;;  %v7276_v12 = vld [vmem:[#allocation18 + $0x180] sm:$0xff]  ;;  %v7278_v20 = vld [vmem:[#allocation18 + $0x190] sm:$0xff] }
 0xe4a   :  { %9894 = vmatpush3.bf16.msra.mxu1 %v9893_v27  ;;  %v9921_v27 = vpack.c.bf16 %v7238_v10, %v7236_v47  ;;  %v9961_v47 = vpack.c.bf16 %v7278_v20, %v7276_v12 }
 0xe4b   :  { %9896 = vmatprep.subr.bf16.mxu1 %v9895_v22  ;;  %v9923_v22 = vpack.c.bf16 %v7243_v50, %v7241_v34  ;;  %v7280_v34 = vld [vmem:[#allocation18 + $0x1a0] sm:$0xff]  ;;  %v7282_v50 = vld [vmem:[#allocation18 + $0x1b0] sm:$0xff] }
 0xe4e   :  { %9898 = vmatpush3.bf16.msra.mxu1 %v9897_v30  ;;  %v9925_v30 = vpack.c.bf16 %v7242_v60, %v7240_v32  ;;  %v9965_v32 = vpack.c.bf16 %v7282_v50, %v7280_v34 }
 0xe4f   :  { %9900 = vmatprep.subr.bf16.mxu1 %v9899_v54  ;;  %v9927_v54 = vpack.c.bf16 %v7247_v29, %v7245_v48  ;;  %v7284_v48 = vld [vmem:[#allocation18 + $0x1c0] sm:$0xff]  ;;  %v7286_v29 = vld [vmem:[#allocation18 + $0x1d0] sm:$0xff] }
 0xe52   :  { %9902 = vmatpush3.bf16.msra.mxu1 %v9901_v42  ;;  %v9929_v42 = vpack.c.bf16 %v7246_v36, %v7244_v40  ;;  %v7291_v40 = vld [vmem:[#allocation18 + $0x1f8] sm:$0xff]  ;;  %v7101_v36 = vld [vmem:[#allocation16 + $0x10] sm:$0xff] }
 0xe53   :  { %9904 = vmatprep.subr.bf16.mxu1 %v9903_v23  ;;  %v9931_v23 = vpack.c.bf16 %v7251_v21, %v7249_v25  ;;  %v7288_v21 = vld [vmem:[#allocation18 + $0x1e0] sm:$0xff] }
 0xe56   :  { %9906 = vmatpush3.bf16.msra.mxu1 %v9905_v14  ;;  %v9933_v14 = vpack.c.bf16 %v7250_v6, %v7248_v15  ;;  %v7293_v6 = vld [vmem:[#allocation18 + $0x208] sm:$0xff] }
 0xe57   :  { %9908 = vmatprep.subr.bf16.mxu1 %v9907_v7  ;;  %v9935_v7 = vpack.c.bf16 %v7255_v5, %v7253_v44  ;;  %v7295_v44 = vld [vmem:[#allocation18 + $0x218] sm:$0xff] }
 0xe58   :  { %v9975_v5 = vpack.c.bf16 %v7295_v44, %v7293_v6  ;;  %v7335_v6 = vld [vmem:[#allocation18 + $0x358] sm:$0xff] }
 0xe5a   :  { %9910 = vmatpush3.bf16.msra.mxu1 %v9909_v35  ;;  %v7257_v35 = vld [vmem:[#allocation18 + $0xe8] sm:$0xff] }
 0xe5d   :  { %7093 = vmatmul.mubr.f32.vlgmr.msra.gmra.mrb[118].mxu1 %v6681_v2  ;;  %v9937_v2 = vpack.c.bf16 %v7254_v45, %v7252_v24  ;;  %v7297_v45 = vld [vmem:[#allocation18 + $0x228] sm:$0xff] }
 0xe5e   :  { %9440 = vmatprep.mubr.msk.f32.mxu1 %vm5061_vm0, %v7099_v4  ;;  %v9939_v4 = vpack.c.bf16 %v7259_v18, %v7257_v35  ;;  %v7299_v35 = vld [vmem:[#allocation18 + $0x238] sm:$0xff] }
 0xed0   :  { %v9023_v43 = vpop.f32.mrb[112].mxu1 }
 0xed1   :  { %v9024_v13 = vpop.f32.mrb[113].mxu1 }
 0xed2   :  { %v9025_v41 = vadd.f32 %v9024_v13, %v9023_v43  ;;  %v7256_v43 = vld [vmem:[#allocation18 + $0xe0] sm:$0xff]  ;;  %v7258_v13 = vld [vmem:[#allocation18 + $0xf0] sm:$0xff] }
 0xed4   :  { %v6885_v31 = vadd.f32 %v9025_v41, %v8762_v26  ;;  %v7261_v41 = vld [vmem:[#allocation18 + $0x108] sm:$0xff]  ;;  %v7263_v26 = vld [vmem:[#allocation18 + $0x118] sm:$0xff] }
 0xef0   :  { %v9058_v52 = vpop.f32.mrb[114].mxu1 }
 0xef1   :  { %v9059_v46 = vpop.f32.mrb[115].mxu1 }
 0xef2   :  { %v9060_v59 = vadd.f32 %v9059_v46, %v9058_v52  ;;  %v9941_v52 = vpack.c.bf16 %v7258_v13, %v7256_v43  ;;  %v9943_v46 = vpack.c.bf16 %v7263_v26, %v7261_v41  ;;  %v9979_v43 = vpack.c.bf16 %v7299_v35, %v7297_v45  ;;  %v7296_v13 = vld [vmem:[#allocation18 + $0x220] sm:$0xff]  ;;  %v7298_v41 = vld [vmem:[#allocation18 + $0x230] sm:$0xff]  ;;  %v7337_v45 = vld [vmem:[#allocation18 + $0x368] sm:$0xff] }
 0xef3   :  { %v7339_v35 = vld [vmem:[#allocation18 + $0x378] sm:$0xff] }
 0xef4   :  { %v6955_v63 = vadd.f32 %v9060_v59, %v6885_v31  ;;  %v7260_v31 = vld [vmem:[#allocation18 + $0x100] sm:$0xff]  ;;  %v7262_v59 = vld [vmem:[#allocation18 + $0x110] sm:$0xff] }
 0xf10   :  { %v9093_v53 = vpop.f32.mrb[116].mxu1 }
 0xf11   :  { %v9094_v55 = vpop.f32.mrb[117].mxu1 }
 0xf12   :  { %v9095_v57 = vadd.f32 %v9094_v55, %v9093_v53  ;;  %v7267_v53 = vld [vmem:[#allocation18 + $0x138] sm:$0xff]  ;;  %v9945_v55 = vpack.c.bf16 %v7262_v59, %v7260_v31  ;;  %v9981_v31 = vpack.c.bf16 %v7298_v41, %v7296_v13  ;;  %v7338_v13 = vld [vmem:[#allocation18 + $0x370] sm:$0xff]  ;;  %v7341_v41 = vld [vmem:[#allocation18 + $0x388] sm:$0xff] }
 0xf14   :  { %v7025_v19 = vadd.f32 %v9095_v57, %v6955_v63  ;;  %v7265_v63 = vld [vmem:[#allocation18 + $0x128] sm:$0xff] }
 0xf15   :  { %v9947_v57 = vpack.c.bf16 %v7267_v53, %v7265_v63  ;;  %v7300_v63 = vld [vmem:[#allocation18 + $0x240] sm:$0xff]  ;;  %v7302_v53 = vld [vmem:[#allocation18 + $0x250] sm:$0xff] }
 0xf30   :  { %v9128_v16 = vpop.f32.mrb[118].mxu1 }
 0xf31   :  { %v9129_v58 = vpop.f32.mrb[119].mxu1 }
 0xf32   :  { %v9130_v0 = vadd.f32 %v9129_v58, %v9128_v16  ;;  %v7266_v16 = vld [vmem:[#allocation18 + $0x130] sm:$0xff]  ;;  %v7269_v58 = vld [vmem:[#allocation18 + $0x148] sm:$0xff] }
 0xf34   :  { %v7095_v56 = vadd.f32 %v9130_v0, %v7025_v19  ;;  %v7264_v19 = vld [vmem:[#allocation18 + $0x120] sm:$0xff]  ;;  %v7271_v0 = vld [vmem:[#allocation18 + $0x158] sm:$0xff] }
 0xf35   :  { %v9949_v62 = vpack.c.bf16 %v7266_v16, %v7264_v19  ;;  %v9951_v3 = vpack.c.bf16 %v7271_v0, %v7269_v58  ;;  %v9985_v19 = vpack.c.bf16 %v7302_v53, %v7300_v63  ;;  %v7304_v58 = vld [vmem:[#allocation18 + $0x260] sm:$0xff]  ;;  %v7306_v0 = vld [vmem:[#allocation18 + $0x270] sm:$0xff]  ;;  %v7345_v63 = vld [vmem:[#allocation18 + $0x3a8] sm:$0xff] }
 0xf36   :  { %v7098_v61 = vmax.f32 %v7095_v56, 0.0  ;;  %v7268_v56 = vld [vmem:[#allocation18 + $0x140] sm:$0xff]  ;;  %v7347_v53 = vld [vmem:[#allocation18 + $0x3b8] sm:$0xff] }
 0xf37   :  { %v9953_v11 = vpack.c.bf16 %v7270_v9, %v7268_v56  ;;  %v9989_v56 = vpack.c.bf16 %v7306_v0, %v7304_v58  ;;  %v7349_v58 = vld [vmem:[#allocation18 + $0x3c8] sm:$0xff]  ;;  %v7351_v0 = vld [vmem:[#allocation18 + $0x3d8] sm:$0xff] }
 0xf38   :  { %9438 = vmatprep.subr.mxu1 %v7098_v61 }
 0xf39   :  { %9439 = vmatpush3.msra.mxu1 %v7098_v61  ;;  %v9955_v61 = vpack.c.bf16 %v7275_v17, %v7273_v37  ;;  %v7308_v37 = vld [vmem:[#allocation18 + $0x280] sm:$0xff]  ;;  %v7310_v17 = vld [vmem:[#allocation18 + $0x290] sm:$0xff] }
 0xf3a   :  { %9441 = vmatmul.mubr.msk.f32.vlgmr.msra.gmra.mrb[120].mxu1 %vm5061_vm0, %v7100_v28  ;;  %9912 = vmatprep.subr.bf16.mxu1 %v9911_v51  ;;  %v7272_v51 = vld [vmem:[#allocation18 + $0x160] sm:$0xff]  ;;  %v7274_v28 = vld [vmem:[#allocation18 + $0x170] sm:$0xff] }
 0xf3b   :  { %9914 = vmatpush1.bf16.msra.mxu1 %v9913_v33  ;;  %v7277_v33 = vld [vmem:[#allocation18 + $0x188] sm:$0xff]  ;;  %v9957_v38 = vpack.c.bf16 %v7274_v28, %v7272_v51  ;;  %9443 = vmatprep.mubr.msk.f32.mxu1 %vm5061_vm0, %v7101_v36  ;;  %v9993_v51 = vpack.c.bf16 %v7310_v17, %v7308_v37  ;;  %v7331_v36 = vld [vmem:[#allocation18 + $0x338] sm:$0xff] }
 0xf3c   :  { %9916 = vmatprep.subr.bf16.mxu1 %v9915_v1  ;;  %v7279_v1 = vld [vmem:[#allocation18 + $0x198] sm:$0xff]  ;;  %v7353_v37 = vld [vmem:[#allocation18 + $0x3e8] sm:$0xff] }
 0xf3d   :  { %v9959_v39 = vpack.c.bf16 %v7279_v1, %v7277_v33  ;;  %v7312_v33 = vld [vmem:[#allocation18 + $0x2a0] sm:$0xff]  ;;  %v7314_v1 = vld [vmem:[#allocation18 + $0x2b0] sm:$0xff]  ;;  %v7355_v17 = vld [vmem:[#allocation18 + $0x3f8] sm:$0xff] }
 0xf3e   :  { %v9997_v12 = vpack.c.bf16 %v7314_v1, %v7312_v33  ;;  %v7357_v33 = vld [vmem:[#allocation18 + $0x408] sm:$0xff]  ;;  %v7359_v1 = vld [vmem:[#allocation18 + $0x418] sm:$0xff] }
 0xf3f   :  { %9918 = vmatpush1.bf16.msra.mxu1 %v9917_v49  ;;  %v7281_v49 = vld [vmem:[#allocation18 + $0x1a8] sm:$0xff] }
 0xf40   :  { %9920 = vmatprep.subr.bf16.mxu1 %v9919_v8  ;;  %v7283_v8 = vld [vmem:[#allocation18 + $0x1b8] sm:$0xff] }
 0xf41   :  { %v9963_v10 = vpack.c.bf16 %v7283_v8, %v7281_v49  ;;  %v7316_v49 = vld [vmem:[#allocation18 + $0x2c0] sm:$0xff]  ;;  %v7318_v8 = vld [vmem:[#allocation18 + $0x2d0] sm:$0xff] }
 0xf42   :  { %v10001_v34 = vpack.c.bf16 %v7318_v8, %v7316_v49  ;;  %v7361_v49 = vld [vmem:[#allocation18 + $0x428] sm:$0xff]  ;;  %v7363_v8 = vld [vmem:[#allocation18 + $0x438] sm:$0xff] }
 0xf43   :  { %9922 = vmatpush1.bf16.msra.mxu1 %v9921_v27  ;;  %v7285_v27 = vld [vmem:[#allocation18 + $0x1c8] sm:$0xff] }
 0xf44   :  { %9924 = vmatprep.subr.bf16.mxu1 %v9923_v22  ;;  %v7287_v22 = vld [vmem:[#allocation18 + $0x1d8] sm:$0xff] }
 0xf45   :  { %v9967_v60 = vpack.c.bf16 %v7287_v22, %v7285_v27  ;;  %v7320_v27 = vld [vmem:[#allocation18 + $0x2e0] sm:$0xff]  ;;  %v7322_v22 = vld [vmem:[#allocation18 + $0x2f0] sm:$0xff] }
 0xf47   :  { %9926 = vmatpush1.bf16.msra.mxu1 %v9925_v30  ;;  %v9969_v30 = vpack.c.bf16 %v7286_v29, %v7284_v48  ;;  %v10005_v48 = vpack.c.bf16 %v7322_v22, %v7320_v27  ;;  %v7362_v27 = vld [vmem:[#allocation18 + $0x430] sm:$0xff] }
 0xf48   :  { %9928 = vmatprep.subr.bf16.mxu1 %v9927_v54  ;;  %v7289_v54 = vld [vmem:[#allocation18 + $0x1e8] sm:$0xff] }
 0xf49   :  { %v9971_v25 = vpack.c.bf16 %v7291_v40, %v7289_v54  ;;  %v7326_v54 = vld [vmem:[#allocation18 + $0x310] sm:$0xff]  ;;  %v7329_v40 = vld [vmem:[#allocation18 + $0x328] sm:$0xff] }
 0xf4b   :  { %9930 = vmatpush1.bf16.msra.mxu1 %v9929_v42  ;;  %v7290_v42 = vld [vmem:[#allocation18 + $0x1f0] sm:$0xff] }
 0xf4c   :  { %9932 = vmatprep.subr.bf16.mxu1 %v9931_v23  ;;  %v7102_v23 = vld [vmem:[#allocation16 + $0x18] sm:$0xff]  ;;  %v9973_v15 = vpack.c.bf16 %v7290_v42, %v7288_v21  ;;  %v10011_v21 = vpack.c.bf16 %v7331_v36, %v7329_v40  ;;  %v7328_v42 = vld [vmem:[#allocation18 + $0x320] sm:$0xff]  ;;  %v7369_v40 = vld [vmem:[#allocation18 + $0x468] sm:$0xff] }
 0xf4d   :  { %9444 = vmatmul.mubr.msk.f32.gmra.mrb[122].mxu1 %vm5061_vm0, %v7102_v23  ;;  %v7330_v23 = vld [vmem:[#allocation18 + $0x330] sm:$0xff]  ;;  %v7371_v36 = vld [vmem:[#allocation18 + $0x478] sm:$0xff]  ;;  %vm8713_vm0 = vcmask 115712  }
 0xf4e   :  { %v10013_v44 = vpack.c.bf16 %v7330_v23, %v7328_v42  ;;  %v7370_v42 = vld [vmem:[#allocation18 + $0x470] sm:$0xff]  ;;  %v7373_v23 = vld [vmem:[#allocation18 + $0x488] sm:$0xff] }
 0xf4f   :  { %9934 = vmatpush1.bf16.msra.mxu1 %v9933_v14  ;;  %v7292_v14 = vld [vmem:[#allocation18 + $0x200] sm:$0xff] }
 0xf50   :  { %9936 = vmatprep.subr.bf16.mxu1 %v9935_v7  ;;  %v7294_v7 = vld [vmem:[#allocation18 + $0x210] sm:$0xff] }
 0xf53   :  { %9938 = vmatpush1.bf16.msra.mxu1 %v9937_v2 }
 0xf54   :  { %9940 = vmatprep.subr.bf16.mxu1 %v9939_v4  ;;  %v9977_v4 = vpack.c.bf16 %v7294_v7, %v7292_v14  ;;  %v7332_v14 = vld [vmem:[#allocation18 + $0x340] sm:$0xff]  ;;  %v7334_v7 = vld [vmem:[#allocation18 + $0x350] sm:$0xff] }
 0xf57   :  { %9942 = vmatpush1.bf16.msra.mxu1 %v9941_v52  ;;  %v7301_v52 = vld [vmem:[#allocation18 + $0x248] sm:$0xff] }
 0xf58   :  { %9944 = vmatprep.subr.bf16.mxu1 %v9943_v46  ;;  %v7303_v46 = vld [vmem:[#allocation18 + $0x258] sm:$0xff] }
 0xf59   :  { %v9983_v59 = vpack.c.bf16 %v7303_v46, %v7301_v52 }
 0xf5b   :  { %9946 = vmatpush1.bf16.msra.mxu1 %v9945_v55  ;;  %v7305_v55 = vld [vmem:[#allocation18 + $0x268] sm:$0xff] }
 0xf5c   :  { %9948 = vmatprep.subr.bf16.mxu1 %v9947_v57  ;;  %v7307_v57 = vld [vmem:[#allocation18 + $0x278] sm:$0xff] }
 0xf5d   :  { %v9987_v16 = vpack.c.bf16 %v7307_v57, %v7305_v55  ;;  %v10027_v57 = vpack.c.bf16 %v7347_v53, %v7345_v63  ;;  %v7382_v63 = vld [vmem:[#allocation18 + $0x4d0] sm:$0xff]  ;;  %v7385_v53 = vld [vmem:[#allocation18 + $0x4e8] sm:$0xff] }
 0xf5f   :  { %9950 = vmatpush1.bf16.msra.mxu1 %v9949_v62  ;;  %v7309_v62 = vld [vmem:[#allocation18 + $0x288] sm:$0xff] }
 0xf60   :  { %9952 = vmatprep.subr.bf16.mxu1 %v9951_v3  ;;  %v7311_v3 = vld [vmem:[#allocation18 + $0x298] sm:$0xff] }
 0xf61   :  { %v9991_v9 = vpack.c.bf16 %v7311_v3, %v7309_v62  ;;  %v10031_v3 = vpack.c.bf16 %v7351_v0, %v7349_v58  ;;  %v7386_v58 = vld [vmem:[#allocation18 + $0x4f0] sm:$0xff]  ;;  %v7389_v0 = vld [vmem:[#allocation18 + $0x508] sm:$0xff] }
 0xf63   :  { %9954 = vmatpush1.bf16.msra.mxu1 %v9953_v11  ;;  %v7313_v11 = vld [vmem:[#allocation18 + $0x2a8] sm:$0xff] }
 0xf64   :  { %9956 = vmatprep.subr.bf16.mxu1 %v9955_v61  ;;  %v7315_v61 = vld [vmem:[#allocation18 + $0x2b8] sm:$0xff] }
 0xf65   :  { %v9995_v28 = vpack.c.bf16 %v7315_v61, %v7313_v11  ;;  %v10035_v61 = vpack.c.bf16 %v7355_v17, %v7353_v37  ;;  %v7390_v37 = vld [vmem:[#allocation18 + $0x510] sm:$0xff]  ;;  %v7393_v17 = vld [vmem:[#allocation18 + $0x528] sm:$0xff] }
 0xf67   :  { %9958 = vmatpush1.bf16.msra.mxu1 %v9957_v38  ;;  %v7317_v38 = vld [vmem:[#allocation18 + $0x2c8] sm:$0xff] }
 0xf68   :  { %9960 = vmatprep.subr.bf16.mxu1 %v9959_v39  ;;  %v7319_v39 = vld [vmem:[#allocation18 + $0x2d8] sm:$0xff] }
 0xf69   :  { %v9999_v20 = vpack.c.bf16 %v7319_v39, %v7317_v38  ;;  %v10039_v39 = vpack.c.bf16 %v7359_v1, %v7357_v33  ;;  %v7394_v33 = vld [vmem:[#allocation18 + $0x530] sm:$0xff]  ;;  %v7397_v1 = vld [vmem:[#allocation18 + $0x548] sm:$0xff] }
 0xf6b   :  { %9962 = vmatpush1.bf16.msra.mxu1 %v9961_v47  ;;  %v7321_v47 = vld [vmem:[#allocation18 + $0x2e8] sm:$0xff] }
 0xf6c   :  { %9964 = vmatprep.subr.bf16.mxu1 %v9963_v10  ;;  %v7323_v10 = vld [vmem:[#allocation18 + $0x2f8] sm:$0xff] }
 0xf6d   :  { %v10003_v50 = vpack.c.bf16 %v7323_v10, %v7321_v47 }
 0xf6f   :  { %9966 = vmatpush1.bf16.msra.mxu1 %v9965_v32  ;;  %v7325_v32 = vld [vmem:[#allocation18 + $0x308] sm:$0xff] }
 0xf70   :  { %9968 = vmatprep.subr.bf16.mxu1 %v9967_v60  ;;  %v7327_v60 = vld [vmem:[#allocation18 + $0x318] sm:$0xff] }
 0xf71   :  { %v10007_v29 = vpack.c.bf16 %v7327_v60, %v7325_v32  ;;  %v7365_v32 = vld [vmem:[#allocation18 + $0x448] sm:$0xff]  ;;  %v7367_v60 = vld [vmem:[#allocation18 + $0x458] sm:$0xff] }
 0xf73   :  { %9970 = vmatpush1.bf16.msra.mxu1 %v9969_v30  ;;  %v7324_v30 = vld [vmem:[#allocation18 + $0x300] sm:$0xff] }
 0xf74   :  { %9972 = vmatprep.subr.bf16.mxu1 %v9971_v25  ;;  %v10009_v25 = vpack.c.bf16 %v7326_v54, %v7324_v30  ;;  %v7364_v30 = vld [vmem:[#allocation18 + $0x440] sm:$0xff]  ;;  %v7366_v54 = vld [vmem:[#allocation18 + $0x450] sm:$0xff] }
 0xf77   :  { %9974 = vmatpush1.bf16.msra.mxu1 %v9973_v15  ;;  %v7333_v15 = vld [vmem:[#allocation18 + $0x348] sm:$0xff] }
 0xf78   :  { %9976 = vmatprep.subr.bf16.mxu1 %v9975_v5  ;;  %v10015_v5 = vpack.c.bf16 %v7335_v6, %v7333_v15  ;;  %v7375_v15 = vld [vmem:[#allocation18 + $0x498] sm:$0xff] }
0x100d   :  { %v14454_v24 = vpop.f32.mrb[120].mxu1 }
0x100e   :  { %v14456_v18 = vpop.f32.mrb[121].mxu1  ;;  %v7208_v22 = vrot.slane %v14454_v24, 2 }
0x100f   :  { %v7201_v2 = vrot.slane %v14456_v18, 2  ;;  %v7205_v26 = vrot.slane %v14456_v18, 6  ;;  %v7203_v10 = vrot.slane %v14456_v18, 4 }
0x1011   :  { %7816 = vmatprep.mubr.f32.mxu1 %v7201_v2  ;;  %v10017_v2 = vpack.c.bf16 %v7334_v7, %v7332_v14  ;;  %v7374_v14 = vld [vmem:[#allocation18 + $0x490] sm:$0xff]  ;;  %v7377_v7 = vld [vmem:[#allocation18 + $0x4a8] sm:$0xff] }
0x1012   :  { %7817 = vmatmul.mubr.f32.vlgmr.msra.gmra.mrb[124].mxu1 %v14456_v18  ;;  %v10049_v18 = vpack.c.bf16 %v7366_v54, %v7364_v30  ;;  %v7406_v30 = vld [vmem:[#allocation18 + $0x590] sm:$0xff]  ;;  %v7409_v54 = vld [vmem:[#allocation18 + $0x5a8] sm:$0xff] }
0x1013   :  { %9978 = vmatpush1.bf16.msra.mxu1 %v9977_v4  ;;  %7887 = vmatprep.mubr.f32.mxu1 %v7205_v26  ;;  %v10019_v4 = vpack.c.bf16 %v7339_v35, %v7337_v45  ;;  %v7343_v26 = vld [vmem:[#allocation18 + $0x398] sm:$0xff] }
0x1014   :  { %9980 = vmatprep.subr.bf16.mxu1 %v9979_v43  ;;  %v7336_v43 = vld [vmem:[#allocation18 + $0x360] sm:$0xff]  ;;  %v10023_v46 = vpack.c.bf16 %v7343_v26, %v7341_v41  ;;  %v7379_v45 = vld [vmem:[#allocation18 + $0x4b8] sm:$0xff] }
0x1015   :  { %v10021_v52 = vpack.c.bf16 %v7338_v13, %v7336_v43  ;;  %v7378_v43 = vld [vmem:[#allocation18 + $0x4b0] sm:$0xff]  ;;  %v7381_v13 = vld [vmem:[#allocation18 + $0x4c8] sm:$0xff]  ;;  %v7383_v41 = vld [vmem:[#allocation18 + $0x4d8] sm:$0xff] }
0x1017   :  { %9982 = vmatpush1.bf16.msra.mxu1 %v9981_v31  ;;  %v7340_v31 = vld [vmem:[#allocation18 + $0x380] sm:$0xff] }
0x1018   :  { %9984 = vmatprep.subr.bf16.mxu1 %v9983_v59  ;;  %v7342_v59 = vld [vmem:[#allocation18 + $0x390] sm:$0xff] }
0x1019   :  { %v10025_v55 = vpack.c.bf16 %v7342_v59, %v7340_v31  ;;  %v10063_v31 = vpack.c.bf16 %v7383_v41, %v7381_v13  ;;  %v7380_v59 = vld [vmem:[#allocation18 + $0x4c0] sm:$0xff]  ;;  %v7423_v13 = vld [vmem:[#allocation18 + $0x618] sm:$0xff] }
0x101b   :  { %9986 = vmatpush1.bf16.msra.mxu1 %v9985_v19  ;;  %v7344_v19 = vld [vmem:[#allocation18 + $0x3a0] sm:$0xff] }
0x101c   :  { %9988 = vmatprep.subr.bf16.mxu1 %v9987_v16  ;;  %v7346_v16 = vld [vmem:[#allocation18 + $0x3b0] sm:$0xff] }
0x101d   :  { %v10029_v62 = vpack.c.bf16 %v7346_v16, %v7344_v19  ;;  %v7384_v16 = vld [vmem:[#allocation18 + $0x4e0] sm:$0xff] }
0x101f   :  { %9990 = vmatpush1.bf16.msra.mxu1 %v9989_v56  ;;  %v7348_v56 = vld [vmem:[#allocation18 + $0x3c0] sm:$0xff] }
0x1020   :  { %9992 = vmatprep.subr.bf16.mxu1 %v9991_v9  ;;  %v7350_v9 = vld [vmem:[#allocation18 + $0x3d0] sm:$0xff]  ;;  %v14463_v26 = vpop.f32.mrb[122].mxu1 }
0x1021   :  { %v10033_v11 = vpack.c.bf16 %v7350_v9, %v7348_v56  ;;  %v7388_v9 = vld [vmem:[#allocation18 + $0x500] sm:$0xff] }
0x1023   :  { %9994 = vmatpush1.bf16.msra.mxu1 %v9993_v51  ;;  %v7352_v51 = vld [vmem:[#allocation18 + $0x3e0] sm:$0xff] }
0x1024   :  { %9996 = vmatprep.subr.bf16.mxu1 %v9995_v28  ;;  %v7354_v28 = vld [vmem:[#allocation18 + $0x3f0] sm:$0xff] }
0x1025   :  { %v10037_v38 = vpack.c.bf16 %v7354_v28, %v7352_v51  ;;  %v7392_v28 = vld [vmem:[#allocation18 + $0x520] sm:$0xff] }
0x1027   :  { %9998 = vmatpush1.bf16.msra.mxu1 %v9997_v12  ;;  %v7356_v12 = vld [vmem:[#allocation18 + $0x400] sm:$0xff] }
0x1028   :  { %10000 = vmatprep.subr.bf16.mxu1 %v9999_v20  ;;  %v7358_v20 = vld [vmem:[#allocation18 + $0x410] sm:$0xff] }
0x1029   :  { %v10041_v47 = vpack.c.bf16 %v7358_v20, %v7356_v12  ;;  %v7396_v20 = vld [vmem:[#allocation18 + $0x540] sm:$0xff] }
0x102b   :  { %10002 = vmatpush1.bf16.msra.mxu1 %v10001_v34  ;;  %v10043_v34 = vpack.c.bf16 %v7363_v8, %v7361_v49  ;;  %v7398_v49 = vld [vmem:[#allocation18 + $0x550] sm:$0xff]  ;;  %v7401_v8 = vld [vmem:[#allocation18 + $0x568] sm:$0xff] }
0x102c   :  { %10004 = vmatprep.subr.bf16.mxu1 %v10003_v50  ;;  %v7360_v50 = vld [vmem:[#allocation18 + $0x420] sm:$0xff] }
0x102f   :  { %10006 = vmatpush1.bf16.msra.mxu1 %v10005_v48  ;;  %v10045_v48 = vpack.c.bf16 %v7362_v27, %v7360_v50  ;;  %v7400_v50 = vld [vmem:[#allocation18 + $0x560] sm:$0xff]  ;;  %v7402_v27 = vld [vmem:[#allocation18 + $0x570] sm:$0xff] }
0x1030   :  { %10008 = vmatprep.subr.bf16.mxu1 %v10007_v29  ;;  %v10047_v29 = vpack.c.bf16 %v7367_v60, %v7365_v32  ;;  %v7407_v32 = vld [vmem:[#allocation18 + $0x598] sm:$0xff]  ;;  %v10085_v60 = vpack.c.bf16 %v7402_v27, %v7400_v50  ;;  %v7440_v50 = vld [vmem:[#allocation18 + $0x6a0] sm:$0xff]  ;;  %v7442_v27 = vld [vmem:[#allocation18 + $0x6b0] sm:$0xff] }
0x1033   :  { %10010 = vmatpush1.bf16.msra.mxu1 %v10009_v25  ;;  %v10051_v25 = vpack.c.bf16 %v7371_v36, %v7369_v40  ;;  %v7411_v40 = vld [vmem:[#allocation18 + $0x5b8] sm:$0xff] }
0x1034   :  { %10012 = vmatprep.subr.bf16.mxu1 %v10011_v21  ;;  %v7368_v21 = vld [vmem:[#allocation18 + $0x460] sm:$0xff] }
0x1035   :  { %v10053_v6 = vpack.c.bf16 %v7370_v42, %v7368_v21  ;;  %v7410_v21 = vld [vmem:[#allocation18 + $0x5b0] sm:$0xff]  ;;  %v7413_v42 = vld [vmem:[#allocation18 + $0x5c8] sm:$0xff] }
0x1037   :  { %10014 = vmatpush1.bf16.msra.mxu1 %v10013_v44  ;;  %v10055_v44 = vpack.c.bf16 %v7375_v15, %v7373_v23  ;;  %v7415_v23 = vld [vmem:[#allocation18 + $0x5d8] sm:$0xff] }
0x1038   :  { %10016 = vmatprep.subr.bf16.mxu1 %v10015_v5  ;;  %v7372_v5 = vld [vmem:[#allocation18 + $0x480] sm:$0xff] }
0x1039   :  { %v10057_v35 = vpack.c.bf16 %v7374_v14, %v7372_v5  ;;  %v7414_v5 = vld [vmem:[#allocation18 + $0x5d0] sm:$0xff]  ;;  %v7417_v14 = vld [vmem:[#allocation18 + $0x5e8] sm:$0xff] }
0x103b   :  { %10018 = vmatpush1.bf16.msra.mxu1 %v10017_v2  ;;  %v10059_v2 = vpack.c.bf16 %v7379_v45, %v7377_v7  ;;  %v7419_v7 = vld [vmem:[#allocation18 + $0x5f8] sm:$0xff] }
0x103c   :  { %10020 = vmatprep.subr.bf16.mxu1 %v10019_v4  ;;  %v7376_v4 = vld [vmem:[#allocation18 + $0x4a0] sm:$0xff] }
0x103f   :  { %10022 = vmatpush1.bf16.msra.mxu1 %v10021_v52  ;;  %v14465_v52 = vpop.f32.mrb[123].mxu1 }
0x1040   :  { %10024 = vmatprep.subr.bf16.mxu1 %v10023_v46  ;;  %v10061_v46 = vpack.c.bf16 %v7378_v43, %v7376_v4  ;;  %v7418_v4 = vld [vmem:[#allocation18 + $0x5f0] sm:$0xff]  ;;  %v7421_v43 = vld [vmem:[#allocation18 + $0x608] sm:$0xff] }
0x1043   :  { %10026 = vmatpush1.bf16.msra.mxu1 %v10025_v55  ;;  %v7387_v55 = vld [vmem:[#allocation18 + $0x4f8] sm:$0xff] }
0x1044   :  { %10028 = vmatprep.subr.bf16.mxu1 %v10027_v57  ;;  %v10065_v57 = vpack.c.bf16 %v7382_v63, %v7380_v59  ;;  %v10067_v19 = vpack.c.bf16 %v7387_v55, %v7385_v53  ;;  %v7422_v59 = vld [vmem:[#allocation18 + $0x610] sm:$0xff]  ;;  %v7425_v63 = vld [vmem:[#allocation18 + $0x628] sm:$0xff]  ;;  %v7427_v53 = vld [vmem:[#allocation18 + $0x638] sm:$0xff] }
0x1047   :  { %10030 = vmatpush1.bf16.msra.mxu1 %v10029_v62  ;;  %v7391_v62 = vld [vmem:[#allocation18 + $0x518] sm:$0xff] }
0x1048   :  { %10032 = vmatprep.subr.bf16.mxu1 %v10031_v3  ;;  %v10069_v3 = vpack.c.bf16 %v7386_v58, %v7384_v16  ;;  %v10071_v56 = vpack.c.bf16 %v7391_v62, %v7389_v0  ;;  %v7426_v16 = vld [vmem:[#allocation18 + $0x630] sm:$0xff]  ;;  %v7212_v58 = vrot.slane %v14454_v24, 6  ;;  %v7429_v0 = vld [vmem:[#allocation18 + $0x648] sm:$0xff]  ;;  %v7431_v62 = vld [vmem:[#allocation18 + $0x658] sm:$0xff] }
0x104b   :  { %10034 = vmatpush1.bf16.msra.mxu1 %v10033_v11  ;;  %v7395_v11 = vld [vmem:[#allocation18 + $0x538] sm:$0xff] }
0x104c   :  { %10036 = vmatprep.subr.bf16.mxu1 %v10035_v61  ;;  %v10073_v61 = vpack.c.bf16 %v7390_v37, %v7388_v9  ;;  %v10075_v51 = vpack.c.bf16 %v7395_v11, %v7393_v17  ;;  %v7428_v9 = vld [vmem:[#allocation18 + $0x640] sm:$0xff]  ;;  %v7430_v37 = vld [vmem:[#allocation18 + $0x650] sm:$0xff]  ;;  %v7433_v17 = vld [vmem:[#allocation18 + $0x668] sm:$0xff] }
0x104d   :  { %v7435_v11 = vld [vmem:[#allocation18 + $0x678] sm:$0xff] }
0x104f   :  { %10038 = vmatpush1.bf16.msra.mxu1 %v10037_v38  ;;  %v7399_v38 = vld [vmem:[#allocation18 + $0x558] sm:$0xff] }
0x1050   :  { %10040 = vmatprep.subr.bf16.mxu1 %v10039_v39  ;;  %v10077_v39 = vpack.c.bf16 %v7394_v33, %v7392_v28  ;;  %v10079_v12 = vpack.c.bf16 %v7399_v38, %v7397_v1  ;;  %v7432_v28 = vld [vmem:[#allocation18 + $0x660] sm:$0xff]  ;;  %v7434_v33 = vld [vmem:[#allocation18 + $0x670] sm:$0xff]  ;;  %v7437_v1 = vld [vmem:[#allocation18 + $0x688] sm:$0xff] }
0x1051   :  { %v7439_v38 = vld [vmem:[#allocation18 + $0x698] sm:$0xff] }
0x1052   :  { %7888 = vmatmul.mubr.f32.vlgmr.msra.gmra.mrb[124].mxu1 %v7203_v10  ;;  %v10081_v10 = vpack.c.bf16 %v7398_v49, %v7396_v20  ;;  %v7436_v20 = vld [vmem:[#allocation18 + $0x680] sm:$0xff]  ;;  %v7438_v49 = vld [vmem:[#allocation18 + $0x690] sm:$0xff] }
0x1053   :  { %10042 = vmatpush1.bf16.msra.mxu1 %v10041_v47  ;;  %7958 = vmatprep.mubr.f32.mxu1 %v7208_v22  ;;  %v7403_v47 = vld [vmem:[#allocation18 + $0x578] sm:$0xff]  ;;  %v7405_v22 = vld [vmem:[#allocation18 + $0x588] sm:$0xff] }
0x1054   :  { %10044 = vmatprep.subr.bf16.mxu1 %v10043_v34  ;;  %v10083_v34 = vpack.c.bf16 %v7403_v47, %v7401_v8  ;;  %v7441_v8 = vld [vmem:[#allocation18 + $0x6a8] sm:$0xff]  ;;  %v7443_v47 = vld [vmem:[#allocation18 + $0x6b8] sm:$0xff] }
0x1057   :  { %10046 = vmatpush1.bf16.msra.mxu1 %v10045_v48  ;;  %v10087_v48 = vpack.c.bf16 %v7407_v32, %v7405_v22  ;;  %v7445_v22 = vld [vmem:[#allocation18 + $0x6c8] sm:$0xff]  ;;  %v7447_v32 = vld [vmem:[#allocation18 + $0x6d8] sm:$0xff] }
0x1058   :  { %10048 = vmatprep.subr.bf16.mxu1 %v10047_v29  ;;  %v7404_v29 = vld [vmem:[#allocation18 + $0x580] sm:$0xff] }
0x1059   :  { %v10089_v36 = vpack.c.bf16 %v7406_v30, %v7404_v29  ;;  %v7444_v29 = vld [vmem:[#allocation18 + $0x6c0] sm:$0xff]  ;;  %v7446_v30 = vld [vmem:[#allocation18 + $0x6d0] sm:$0xff] }
0x105b   :  { %10050 = vmatpush1.bf16.msra.mxu1 %v10049_v18  ;;  %v10091_v18 = vpack.c.bf16 %v7411_v40, %v7409_v54  ;;  %v7449_v54 = vld [vmem:[#allocation18 + $0x6e8] sm:$0xff]  ;;  %v7451_v40 = vld [vmem:[#allocation18 + $0x6f8] sm:$0xff] }
0x105c   :  { %10052 = vmatprep.subr.bf16.mxu1 %v10051_v25  ;;  %v7408_v25 = vld [vmem:[#allocation18 + $0x5a0] sm:$0xff] }
0x105d   :  { %v10093_v15 = vpack.c.bf16 %v7410_v21, %v7408_v25  ;;  %v7448_v25 = vld [vmem:[#allocation18 + $0x6e0] sm:$0xff]  ;;  %v7450_v21 = vld [vmem:[#allocation18 + $0x6f0] sm:$0xff] }
0x105f   :  { %10054 = vmatpush1.bf16.msra.mxu1 %v10053_v6  ;;  %v10095_v6 = vpack.c.bf16 %v7415_v23, %v7413_v42  ;;  %v7453_v42 = vld [vmem:[#allocation18 + $0x708] sm:$0xff]  ;;  %v7455_v23 = vld [vmem:[#allocation18 + $0x718] sm:$0xff] }
0x1060   :  { %10056 = vmatprep.subr.bf16.mxu1 %v10055_v44  ;;  %v7412_v44 = vld [vmem:[#allocation18 + $0x5c0] sm:$0xff] }
0x1061   :  { %v10097_v45 = vpack.c.bf16 %v7414_v5, %v7412_v44  ;;  %v7452_v44 = vld [vmem:[#allocation18 + $0x700] sm:$0xff]  ;;  %v7454_v5 = vld [vmem:[#allocation18 + $0x710] sm:$0xff] }
0x1063   :  { %10058 = vmatpush1.bf16.msra.mxu1 %v10057_v35  ;;  %v10099_v35 = vpack.c.bf16 %v7419_v7, %v7417_v14  ;;  %v7457_v14 = vld [vmem:[#allocation18 + $0x728] sm:$0xff]  ;;  %v7459_v7 = vld [vmem:[#allocation18 + $0x738] sm:$0xff] }
0x1064   :  { %10060 = vmatprep.subr.bf16.mxu1 %v10059_v2  ;;  %v7416_v2 = vld [vmem:[#allocation18 + $0x5e0] sm:$0xff] }
0x1065   :  { %v10101_v41 = vpack.c.bf16 %v7418_v4, %v7416_v2  ;;  %v7456_v2 = vld [vmem:[#allocation18 + $0x720] sm:$0xff]  ;;  %v7458_v4 = vld [vmem:[#allocation18 + $0x730] sm:$0xff] }
0x1067   :  { %10062 = vmatpush1.bf16.msra.mxu1 %v10061_v46  ;;  %v10103_v46 = vpack.c.bf16 %v7423_v13, %v7421_v43  ;;  %v7461_v43 = vld [vmem:[#allocation18 + $0x748] sm:$0xff]  ;;  %v7463_v13 = vld [vmem:[#allocation18 + $0x758] sm:$0xff] }
0x1068   :  { %10064 = vmatprep.subr.bf16.mxu1 %v10063_v31  ;;  %v7420_v31 = vld [vmem:[#allocation18 + $0x600] sm:$0xff] }
0x1069   :  { %v10105_v55 = vpack.c.bf16 %v7422_v59, %v7420_v31  ;;  %v7460_v31 = vld [vmem:[#allocation18 + $0x740] sm:$0xff]  ;;  %v7462_v59 = vld [vmem:[#allocation18 + $0x750] sm:$0xff] }
0x106b   :  { %10066 = vmatpush1.bf16.msra.mxu1 %v10065_v57  ;;  %v10107_v57 = vpack.c.bf16 %v7427_v53, %v7425_v63  ;;  %v7465_v63 = vld [vmem:[#allocation18 + $0x768] sm:$0xff]  ;;  %v7467_v53 = vld [vmem:[#allocation18 + $0x778] sm:$0xff] }
0x106c   :  { %10068 = vmatprep.subr.bf16.mxu1 %v10067_v19  ;;  %v7424_v19 = vld [vmem:[#allocation18 + $0x620] sm:$0xff] }
0x106f   :  { %10070 = vmatpush1.bf16.msra.mxu1 %v10069_v3  ;;  %v10109_v3 = vpack.c.bf16 %v7426_v16, %v7424_v19  ;;  %v7464_v19 = vld [vmem:[#allocation18 + $0x760] sm:$0xff]  ;;  %v7466_v16 = vld [vmem:[#allocation18 + $0x770] sm:$0xff] }
0x1070   :  { %10072 = vmatprep.subr.bf16.mxu1 %v10071_v56  ;;  %v10111_v56 = vpack.c.bf16 %v7431_v62, %v7429_v0  ;;  %v7471_v0 = vld [vmem:[#allocation18 + $0x798] sm:$0xff]  ;;  %v10149_v62 = vpack.c.bf16 %v7466_v16, %v7464_v19  ;;  %v7504_v19 = vld [vmem:[#allocation18 + $0x8a0] sm:$0xff]  ;;  %v7506_v16 = vld [vmem:[#allocation18 + $0x8b0] sm:$0xff] }
0x1073   :  { %10074 = vmatpush1.bf16.msra.mxu1 %v10073_v61  ;;  %v10113_v61 = vpack.c.bf16 %v7430_v37, %v7428_v9  ;;  %v7470_v9 = vld [vmem:[#allocation18 + $0x790] sm:$0xff]  ;;  %v7473_v37 = vld [vmem:[#allocation18 + $0x7a8] sm:$0xff] }
0x1074   :  { %10076 = vmatprep.subr.bf16.mxu1 %v10075_v51  ;;  %v10115_v51 = vpack.c.bf16 %v7435_v11, %v7433_v17  ;;  %v7475_v17 = vld [vmem:[#allocation18 + $0x7b8] sm:$0xff] }
0x1077   :  { %10078 = vmatpush1.bf16.msra.mxu1 %v10077_v39  ;;  %v10117_v39 = vpack.c.bf16 %v7434_v33, %v7432_v28  ;;  %v7474_v28 = vld [vmem:[#allocation18 + $0x7b0] sm:$0xff]  ;;  %v7477_v33 = vld [vmem:[#allocation18 + $0x7c8] sm:$0xff] }
0x1078   :  { %10080 = vmatprep.subr.bf16.mxu1 %v10079_v12  ;;  %v10119_v12 = vpack.c.bf16 %v7439_v38, %v7437_v1  ;;  %v7479_v1 = vld [vmem:[#allocation18 + $0x7d8] sm:$0xff] }
0x107b   :  { %10082 = vmatpush1.bf16.msra.mxu1 %v10081_v10  ;;  %v10121_v10 = vpack.c.bf16 %v7438_v49, %v7436_v20  ;;  %v7478_v20 = vld [vmem:[#allocation18 + $0x7d0] sm:$0xff]  ;;  %v7481_v49 = vld [vmem:[#allocation18 + $0x7e8] sm:$0xff] }
0x107c   :  { %10084 = vmatprep.subr.bf16.mxu1 %v10083_v34  ;;  %v10123_v34 = vpack.c.bf16 %v7443_v47, %v7441_v8  ;;  %v7483_v8 = vld [vmem:[#allocation18 + $0x7f8] sm:$0xff] }
0x107f   :  { %10086 = vmatpush1.bf16.msra.mxu1 %v10085_v60  ;;  %v10125_v60 = vpack.c.bf16 %v7442_v27, %v7440_v50  ;;  %v7482_v50 = vld [vmem:[#allocation18 + $0x7f0] sm:$0xff]  ;;  %v7485_v27 = vld [vmem:[#allocation18 + $0x808] sm:$0xff] }
0x1080   :  { %10088 = vmatprep.subr.bf16.mxu1 %v10087_v48  ;;  %v10127_v48 = vpack.c.bf16 %v7447_v32, %v7445_v22  ;;  %v7487_v22 = vld [vmem:[#allocation18 + $0x818] sm:$0xff] }
0x1083   :  { %10090 = vmatpush1.bf16.msra.mxu1 %v10089_v36  ;;  %v10129_v36 = vpack.c.bf16 %v7446_v30, %v7444_v29  ;;  %v7486_v29 = vld [vmem:[#allocation18 + $0x810] sm:$0xff]  ;;  %v7489_v30 = vld [vmem:[#allocation18 + $0x828] sm:$0xff] }
0x1084   :  { %10092 = vmatprep.subr.bf16.mxu1 %v10091_v18  ;;  %v10131_v18 = vpack.c.bf16 %v7451_v40, %v7449_v54  ;;  %v7491_v54 = vld [vmem:[#allocation18 + $0x838] sm:$0xff] }
0x1087   :  { %10094 = vmatpush1.bf16.msra.mxu1 %v10093_v15  ;;  %v10133_v15 = vpack.c.bf16 %v7450_v21, %v7448_v25  ;;  %v10171_v25 = vpack.c.bf16 %v7491_v54, %v7489_v30  ;;  %v7488_v21 = vld [vmem:[#allocation18 + $0x820] sm:$0xff]  ;;  %v7529_v30 = vld [vmem:[#allocation18 + $0x968] sm:$0xff]  ;;  %v7531_v54 = vld [vmem:[#allocation18 + $0x978] sm:$0xff] }
0x1088   :  { %10096 = vmatprep.subr.bf16.mxu1 %v10095_v6  ;;  %v10135_v6 = vpack.c.bf16 %v7455_v23, %v7453_v42  ;;  %v7490_v42 = vld [vmem:[#allocation18 + $0x830] sm:$0xff]  ;;  %v7493_v23 = vld [vmem:[#allocation18 + $0x848] sm:$0xff] }
0x108b   :  { %10098 = vmatpush1.bf16.msra.mxu1 %v10097_v45  ;;  %v10137_v45 = vpack.c.bf16 %v7454_v5, %v7452_v44  ;;  %v7492_v5 = vld [vmem:[#allocation18 + $0x840] sm:$0xff] }
0x108c   :  { %10100 = vmatprep.subr.bf16.mxu1 %v10099_v35  ;;  %v10139_v35 = vpack.c.bf16 %v7459_v7, %v7457_v14  ;;  %v7494_v14 = vld [vmem:[#allocation18 + $0x850] sm:$0xff]  ;;  %v7497_v7 = vld [vmem:[#allocation18 + $0x868] sm:$0xff] }
0x108f   :  { %10102 = vmatpush1.bf16.msra.mxu1 %v10101_v41  ;;  %v10141_v41 = vpack.c.bf16 %v7458_v4, %v7456_v2  ;;  %v7496_v2 = vld [vmem:[#allocation18 + $0x860] sm:$0xff]  ;;  %v7498_v4 = vld [vmem:[#allocation18 + $0x870] sm:$0xff] }
0x1090   :  { %10104 = vmatprep.subr.bf16.mxu1 %v10103_v46  ;;  %v10143_v46 = vpack.c.bf16 %v7463_v13, %v7461_v43  ;;  %v7501_v43 = vld [vmem:[#allocation18 + $0x888] sm:$0xff]  ;;  %v7503_v13 = vld [vmem:[#allocation18 + $0x898] sm:$0xff] }
0x1092   :  { %7959 = vmatmul.mubr.f32.vlgmr.msra.gmra.mrb[124].mxu1 %v14454_v24 }
0x1093   :  { %10106 = vmatpush1.bf16.msra.mxu1 %v10105_v55  ;;  %8029 = vmatprep.mubr.f32.mxu1 %v7212_v58  ;;  %v10145_v55 = vpack.c.bf16 %v7462_v59, %v7460_v31  ;;  %v7469_v58 = vld [vmem:[#allocation18 + $0x788] sm:$0xff]  ;;  %v7500_v31 = vld [vmem:[#allocation18 + $0x880] sm:$0xff]  ;;  %v7502_v59 = vld [vmem:[#allocation18 + $0x890] sm:$0xff] }
0x1094   :  { %10108 = vmatprep.subr.bf16.mxu1 %v10107_v57  ;;  %v10147_v57 = vpack.c.bf16 %v7467_v53, %v7465_v63  ;;  %v7505_v63 = vld [vmem:[#allocation18 + $0x8a8] sm:$0xff]  ;;  %v7507_v53 = vld [vmem:[#allocation18 + $0x8b8] sm:$0xff] }
0x1097   :  { %10110 = vmatpush1.bf16.msra.mxu1 %v10109_v3  ;;  %v10151_v3 = vpack.c.bf16 %v7471_v0, %v7469_v58  ;;  %v7509_v58 = vld [vmem:[#allocation18 + $0x8c8] sm:$0xff]  ;;  %v7511_v0 = vld [vmem:[#allocation18 + $0x8d8] sm:$0xff] }
0x1098   :  { %10112 = vmatprep.subr.bf16.mxu1 %v10111_v56  ;;  %v7468_v56 = vld [vmem:[#allocation18 + $0x780] sm:$0xff] }
0x1099   :  { %v10153_v11 = vpack.c.bf16 %v7470_v9, %v7468_v56  ;;  %v7508_v56 = vld [vmem:[#allocation18 + $0x8c0] sm:$0xff]  ;;  %v7510_v9 = vld [vmem:[#allocation18 + $0x8d0] sm:$0xff] }
0x109b   :  { %10114 = vmatpush1.bf16.msra.mxu1 %v10113_v61  ;;  %v10155_v61 = vpack.c.bf16 %v7475_v17, %v7473_v37  ;;  %v7513_v37 = vld [vmem:[#allocation18 + $0x8e8] sm:$0xff]  ;;  %v7515_v17 = vld [vmem:[#allocation18 + $0x8f8] sm:$0xff] }
0x109c   :  { %10116 = vmatprep.subr.bf16.mxu1 %v10115_v51  ;;  %v7472_v51 = vld [vmem:[#allocation18 + $0x7a0] sm:$0xff] }
0x109d   :  { %v10157_v38 = vpack.c.bf16 %v7474_v28, %v7472_v51  ;;  %v7512_v51 = vld [vmem:[#allocation18 + $0x8e0] sm:$0xff]  ;;  %v7514_v28 = vld [vmem:[#allocation18 + $0x8f0] sm:$0xff] }
0x109f   :  { %10118 = vmatpush1.bf16.msra.mxu1 %v10117_v39  ;;  %v10159_v39 = vpack.c.bf16 %v7479_v1, %v7477_v33  ;;  %v7517_v33 = vld [vmem:[#allocation18 + $0x908] sm:$0xff]  ;;  %v7519_v1 = vld [vmem:[#allocation18 + $0x918] sm:$0xff] }
0x10a0   :  { %10120 = vmatprep.subr.bf16.mxu1 %v10119_v12  ;;  %v7476_v12 = vld [vmem:[#allocation18 + $0x7c0] sm:$0xff] }
0x10a1   :  { %v10161_v47 = vpack.c.bf16 %v7478_v20, %v7476_v12  ;;  %v7516_v12 = vld [vmem:[#allocation18 + $0x900] sm:$0xff]  ;;  %v7518_v20 = vld [vmem:[#allocation18 + $0x910] sm:$0xff] }
0x10a3   :  { %10122 = vmatpush1.bf16.msra.mxu1 %v10121_v10  ;;  %v10163_v10 = vpack.c.bf16 %v7483_v8, %v7481_v49  ;;  %v7521_v49 = vld [vmem:[#allocation18 + $0x928] sm:$0xff]  ;;  %v7523_v8 = vld [vmem:[#allocation18 + $0x938] sm:$0xff] }
0x10a4   :  { %10124 = vmatprep.subr.bf16.mxu1 %v10123_v34  ;;  %v7480_v34 = vld [vmem:[#allocation18 + $0x7e0] sm:$0xff] }
0x10a5   :  { %v10165_v32 = vpack.c.bf16 %v7482_v50, %v7480_v34  ;;  %v7520_v34 = vld [vmem:[#allocation18 + $0x920] sm:$0xff]  ;;  %v7522_v50 = vld [vmem:[#allocation18 + $0x930] sm:$0xff] }
0x10a7   :  { %10126 = vmatpush1.bf16.msra.mxu1 %v10125_v60  ;;  %v10167_v60 = vpack.c.bf16 %v7487_v22, %v7485_v27  ;;  %v7525_v27 = vld [vmem:[#allocation18 + $0x948] sm:$0xff]  ;;  %v7527_v22 = vld [vmem:[#allocation18 + $0x958] sm:$0xff] }
0x10a8   :  { %10128 = vmatprep.subr.bf16.mxu1 %v10127_v48  ;;  %v7484_v48 = vld [vmem:[#allocation18 + $0x800] sm:$0xff] }
0x10a9   :  { %v10169_v40 = vpack.c.bf16 %v7486_v29, %v7484_v48  ;;  %v7524_v48 = vld [vmem:[#allocation18 + $0x940] sm:$0xff]  ;;  %v7526_v29 = vld [vmem:[#allocation18 + $0x950] sm:$0xff] }
0x10ab   :  { %10130 = vmatpush1.bf16.msra.mxu1 %v10129_v36  ;;  %v7215_v36 = vrot.slane %v14465_v52, 2 }
0x10ac   :  { %10132 = vmatprep.subr.bf16.mxu1 %v10131_v18  ;;  %v7210_v18 = vrot.slane %v14454_v24, 4 }
0x10af   :  { %10134 = vmatpush1.bf16.msra.mxu1 %v10133_v15  ;;  %v7495_v15 = vld [vmem:[#allocation18 + $0x858] sm:$0xff] }
0x10b0   :  { %10136 = vmatprep.subr.bf16.mxu1 %v10135_v6  ;;  %v10173_v6 = vpack.c.bf16 %v7490_v42, %v7488_v21  ;;  %v10175_v44 = vpack.c.bf16 %v7495_v15, %v7493_v23  ;;  %v7533_v21 = vld [vmem:[#allocation18 + $0x988] sm:$0xff]  ;;  %v7535_v42 = vld [vmem:[#allocation18 + $0x998] sm:$0xff] }
0x10b1   :  { %v10215_v15 = vpack.c.bf16 %v7535_v42, %v7533_v21  ;;  %v7575_v21 = vld [vmem:[#allocation18 + $0xad8] sm:$0xff] }
0x10b3   :  { %10138 = vmatpush1.bf16.msra.mxu1 %v10137_v45  ;;  %v7499_v45 = vld [vmem:[#allocation18 + $0x878] sm:$0xff] }
0x10b4   :  { %10140 = vmatprep.subr.bf16.mxu1 %v10139_v35  ;;  %v10177_v35 = vpack.c.bf16 %v7494_v14, %v7492_v5  ;;  %v10179_v24 = vpack.c.bf16 %v7499_v45, %v7497_v7  ;;  %v7537_v5 = vld [vmem:[#allocation18 + $0x9a8] sm:$0xff]  ;;  %v7539_v14 = vld [vmem:[#allocation18 + $0x9b8] sm:$0xff] }
0x10b5   :  { %v10219_v45 = vpack.c.bf16 %v7539_v14, %v7537_v5  ;;  %v7579_v5 = vld [vmem:[#allocation18 + $0xaf8] sm:$0xff] }
0x10b7   :  { %10142 = vmatpush1.bf16.msra.mxu1 %v10141_v41  ;;  %v10181_v41 = vpack.c.bf16 %v7498_v4, %v7496_v2  ;;  %v7541_v2 = vld [vmem:[#allocation18 + $0x9c8] sm:$0xff]  ;;  %v7543_v4 = vld [vmem:[#allocation18 + $0x9d8] sm:$0xff] }
0x10b8   :  { %10144 = vmatprep.subr.bf16.mxu1 %v10143_v46  ;;  %v10183_v46 = vpack.c.bf16 %v7503_v13, %v7501_v43  ;;  %v10223_v13 = vpack.c.bf16 %v7543_v4, %v7541_v2  ;;  %v7583_v2 = vld [vmem:[#allocation18 + $0xb18] sm:$0xff] }
0x10bb   :  { %10146 = vmatpush1.bf16.msra.mxu1 %v10145_v55  ;;  %v10185_v55 = vpack.c.bf16 %v7502_v59, %v7500_v31  ;;  %v7545_v31 = vld [vmem:[#allocation18 + $0x9e8] sm:$0xff]  ;;  %v7547_v59 = vld [vmem:[#allocation18 + $0x9f8] sm:$0xff] }
0x10bc   :  { %10148 = vmatprep.subr.bf16.mxu1 %v10147_v57  ;;  %v10187_v57 = vpack.c.bf16 %v7507_v53, %v7505_v63  ;;  %v10227_v53 = vpack.c.bf16 %v7547_v59, %v7545_v31  ;;  %v7587_v31 = vld [vmem:[#allocation18 + $0xb38] sm:$0xff] }
0x10bf   :  { %10150 = vmatpush1.bf16.msra.mxu1 %v10149_v62  ;;  %v10189_v62 = vpack.c.bf16 %v7506_v16, %v7504_v19  ;;  %v7549_v19 = vld [vmem:[#allocation18 + $0xa08] sm:$0xff]  ;;  %v7551_v16 = vld [vmem:[#allocation18 + $0xa18] sm:$0xff] }
0x10c0   :  { %10152 = vmatprep.subr.bf16.mxu1 %v10151_v3  ;;  %v10191_v3 = vpack.c.bf16 %v7511_v0, %v7509_v58  ;;  %v10231_v0 = vpack.c.bf16 %v7551_v16, %v7549_v19  ;;  %v7591_v19 = vld [vmem:[#allocation18 + $0xb58] sm:$0xff] }
0x10c3   :  { %10154 = vmatpush1.bf16.msra.mxu1 %v10153_v11  ;;  %v10193_v11 = vpack.c.bf16 %v7510_v9, %v7508_v56  ;;  %v7553_v56 = vld [vmem:[#allocation18 + $0xa28] sm:$0xff]  ;;  %v7555_v9 = vld [vmem:[#allocation18 + $0xa38] sm:$0xff] }
0x10c4   :  { %10156 = vmatprep.subr.bf16.mxu1 %v10155_v61  ;;  %v10195_v61 = vpack.c.bf16 %v7515_v17, %v7513_v37  ;;  %v10235_v17 = vpack.c.bf16 %v7555_v9, %v7553_v56  ;;  %v7595_v56 = vld [vmem:[#allocation18 + $0xb78] sm:$0xff] }
0x10c7   :  { %10158 = vmatpush1.bf16.msra.mxu1 %v10157_v38  ;;  %v10197_v38 = vpack.c.bf16 %v7514_v28, %v7512_v51  ;;  %v7219_v51 = vrot.slane %v14465_v52, 6  ;;  %v7557_v28 = vld [vmem:[#allocation18 + $0xa48] sm:$0xff] }
0x10c8   :  { %10160 = vmatprep.subr.bf16.mxu1 %v10159_v39  ;;  %v10199_v39 = vpack.c.bf16 %v7519_v1, %v7517_v33  ;;  %v7559_v33 = vld [vmem:[#allocation18 + $0xa58] sm:$0xff] }
0x10cb   :  { %10162 = vmatpush1.bf16.msra.mxu1 %v10161_v47  ;;  %v10201_v47 = vpack.c.bf16 %v7518_v20, %v7516_v12  ;;  %v7558_v12 = vld [vmem:[#allocation18 + $0xa50] sm:$0xff]  ;;  %v7561_v20 = vld [vmem:[#allocation18 + $0xa68] sm:$0xff] }
0x10cc   :  { %10164 = vmatprep.subr.bf16.mxu1 %v10163_v10  ;;  %v10203_v10 = vpack.c.bf16 %v7523_v8, %v7521_v49  ;;  %v7563_v49 = vld [vmem:[#allocation18 + $0xa78] sm:$0xff] }
0x10cf   :  { %10166 = vmatpush1.bf16.msra.mxu1 %v10165_v32  ;;  %v10205_v32 = vpack.c.bf16 %v7522_v50, %v7520_v34  ;;  %v7562_v34 = vld [vmem:[#allocation18 + $0xa70] sm:$0xff]  ;;  %v7565_v50 = vld [vmem:[#allocation18 + $0xa88] sm:$0xff] }
0x10d0   :  { %10168 = vmatprep.subr.bf16.mxu1 %v10167_v60  ;;  %v10207_v60 = vpack.c.bf16 %v7527_v22, %v7525_v27  ;;  %v7567_v27 = vld [vmem:[#allocation18 + $0xa98] sm:$0xff] }
0x10d2   :  { %8030 = vmatmul.mubr.f32.vlgmr.msra.gmra.mrb[124].mxu1 %v7210_v18  ;;  %v7528_v18 = vld [vmem:[#allocation18 + $0x960] sm:$0xff] }
0x10d3   :  { %10170 = vmatpush1.bf16.msra.mxu1 %v10169_v40  ;;  %8100 = vmatprep.mubr.f32.mxu1 %v7215_v36  ;;  %v10209_v40 = vpack.c.bf16 %v7526_v29, %v7524_v48  ;;  %v10211_v36 = vpack.c.bf16 %v7531_v54, %v7529_v30  ;;  %v7566_v48 = vld [vmem:[#allocation18 + $0xa90] sm:$0xff]  ;;  %v7569_v29 = vld [vmem:[#allocation18 + $0xaa8] sm:$0xff]  ;;  %v7571_v30 = vld [vmem:[#allocation18 + $0xab8] sm:$0xff] }
0x10d4   :  { %10172 = vmatprep.subr.bf16.mxu1 %v10171_v25  ;;  %v7530_v25 = vld [vmem:[#allocation18 + $0x970] sm:$0xff] }
0x10d5   :  { %v10213_v23 = vpack.c.bf16 %v7530_v25, %v7528_v18  ;;  %v7570_v18 = vld [vmem:[#allocation18 + $0xab0] sm:$0xff]  ;;  %v7573_v25 = vld [vmem:[#allocation18 + $0xac8] sm:$0xff] }
0x10d7   :  { %10174 = vmatpush1.bf16.msra.mxu1 %v10173_v6  ;;  %v7532_v6 = vld [vmem:[#allocation18 + $0x980] sm:$0xff] }
0x10d8   :  { %10176 = vmatprep.subr.bf16.mxu1 %v10175_v44  ;;  %v7534_v44 = vld [vmem:[#allocation18 + $0x990] sm:$0xff] }
0x10d9   :  { %v10217_v7 = vpack.c.bf16 %v7534_v44, %v7532_v6  ;;  %v7574_v6 = vld [vmem:[#allocation18 + $0xad0] sm:$0xff]  ;;  %v7577_v44 = vld [vmem:[#allocation18 + $0xae8] sm:$0xff] }
0x10db   :  { %10178 = vmatpush1.bf16.msra.mxu1 %v10177_v35  ;;  %v7536_v35 = vld [vmem:[#allocation18 + $0x9a0] sm:$0xff] }
0x10dc   :  { %10180 = vmatprep.subr.bf16.mxu1 %v10179_v24  ;;  %v7538_v24 = vld [vmem:[#allocation18 + $0x9b0] sm:$0xff] }
0x10dd   :  { %v10221_v43 = vpack.c.bf16 %v7538_v24, %v7536_v35  ;;  %v7578_v35 = vld [vmem:[#allocation18 + $0xaf0] sm:$0xff]  ;;  %v7581_v24 = vld [vmem:[#allocation18 + $0xb08] sm:$0xff] }
0x10df   :  { %10182 = vmatpush1.bf16.msra.mxu1 %v10181_v41  ;;  %v7540_v41 = vld [vmem:[#allocation18 + $0x9c0] sm:$0xff] }
0x10e0   :  { %10184 = vmatprep.subr.bf16.mxu1 %v10183_v46  ;;  %v7542_v46 = vld [vmem:[#allocation18 + $0x9d0] sm:$0xff] }
0x10e1   :  { %v10225_v63 = vpack.c.bf16 %v7542_v46, %v7540_v41  ;;  %v7582_v41 = vld [vmem:[#allocation18 + $0xb10] sm:$0xff]  ;;  %v7585_v46 = vld [vmem:[#allocation18 + $0xb28] sm:$0xff] }
0x10e3   :  { %10186 = vmatpush1.bf16.msra.mxu1 %v10185_v55  ;;  %v7544_v55 = vld [vmem:[#allocation18 + $0x9e0] sm:$0xff] }
0x10e4   :  { %10188 = vmatprep.subr.bf16.mxu1 %v10187_v57  ;;  %v7546_v57 = vld [vmem:[#allocation18 + $0x9f0] sm:$0xff] }
0x10e5   :  { %v10229_v58 = vpack.c.bf16 %v7546_v57, %v7544_v55  ;;  %v7586_v55 = vld [vmem:[#allocation18 + $0xb30] sm:$0xff]  ;;  %v7589_v57 = vld [vmem:[#allocation18 + $0xb48] sm:$0xff] }
0x10e7   :  { %10190 = vmatpush1.bf16.msra.mxu1 %v10189_v62  ;;  %v7548_v62 = vld [vmem:[#allocation18 + $0xa00] sm:$0xff] }
0x10e8   :  { %10192 = vmatprep.subr.bf16.mxu1 %v10191_v3  ;;  %v7550_v3 = vld [vmem:[#allocation18 + $0xa10] sm:$0xff] }
0x10e9   :  { %v10233_v37 = vpack.c.bf16 %v7550_v3, %v7548_v62  ;;  %v7590_v62 = vld [vmem:[#allocation18 + $0xb50] sm:$0xff]  ;;  %v7593_v3 = vld [vmem:[#allocation18 + $0xb68] sm:$0xff] }
0x10eb   :  { %10194 = vmatpush1.bf16.msra.mxu1 %v10193_v11  ;;  %v7552_v11 = vld [vmem:[#allocation18 + $0xa20] sm:$0xff] }
0x10ec   :  { %10196 = vmatprep.subr.bf16.mxu1 %v10195_v61  ;;  %v7554_v61 = vld [vmem:[#allocation18 + $0xa30] sm:$0xff] }
0x10ed   :  { %v10237_v1 = vpack.c.bf16 %v7554_v61, %v7552_v11  ;;  %v7594_v11 = vld [vmem:[#allocation18 + $0xb70] sm:$0xff]  ;;  %v7597_v61 = vld [vmem:[#allocation18 + $0xb88] sm:$0xff] }
0x10ef   :  { %10198 = vmatpush1.bf16.msra.mxu1 %v10197_v38  ;;  %v10239_v38 = vpack.c.bf16 %v7559_v33, %v7557_v28 }
0x10f0   :  { %10200 = vmatprep.subr.bf16.mxu1 %v10199_v39  ;;  %v7556_v39 = vld [vmem:[#allocation18 + $0xa40] sm:$0xff] }
0x10f1   :  { %v10241_v8 = vpack.c.bf16 %v7558_v12, %v7556_v39  ;;  %v7601_v39 = vld [vmem:[#allocation18 + $0xba8] sm:$0xff]  ;;  %v7603_v12 = vld [vmem:[#allocation18 + $0xbb8] sm:$0xff] }
0x10f3   :  { %10202 = vmatpush1.bf16.msra.mxu1 %v10201_v47  ;;  %v10243_v47 = vpack.c.bf16 %v7563_v49, %v7561_v20  ;;  %v10283_v49 = vpack.c.bf16 %v7603_v12, %v7601_v39  ;;  %v7643_v39 = vld [vmem:[#allocation18 + $0xcf8] sm:$0xff] }
0x10f4   :  { %10204 = vmatprep.subr.bf16.mxu1 %v10203_v10  ;;  %v7560_v10 = vld [vmem:[#allocation18 + $0xa60] sm:$0xff] }
0x10f5   :  { %v10245_v22 = vpack.c.bf16 %v7562_v34, %v7560_v10  ;;  %v7605_v10 = vld [vmem:[#allocation18 + $0xbc8] sm:$0xff]  ;;  %v7607_v34 = vld [vmem:[#allocation18 + $0xbd8] sm:$0xff] }
0x10f7   :  { %10206 = vmatpush1.bf16.msra.mxu1 %v10205_v32  ;;  %v10247_v32 = vpack.c.bf16 %v7567_v27, %v7565_v50  ;;  %v10287_v27 = vpack.c.bf16 %v7607_v34, %v7605_v10  ;;  %v7647_v10 = vld [vmem:[#allocation18 + $0xd18] sm:$0xff] }
0x10f8   :  { %10208 = vmatprep.subr.bf16.mxu1 %v10207_v60  ;;  %v7564_v60 = vld [vmem:[#allocation18 + $0xa80] sm:$0xff] }
0x10f9   :  { %v10249_v54 = vpack.c.bf16 %v7566_v48, %v7564_v60  ;;  %v7609_v60 = vld [vmem:[#allocation18 + $0xbe8] sm:$0xff]  ;;  %v7611_v48 = vld [vmem:[#allocation18 + $0xbf8] sm:$0xff] }
0x10fb   :  { %10210 = vmatpush1.bf16.msra.mxu1 %v10209_v40  ;;  %v10251_v40 = vpack.c.bf16 %v7571_v30, %v7569_v29  ;;  %v10291_v30 = vpack.c.bf16 %v7611_v48, %v7609_v60  ;;  %v7651_v60 = vld [vmem:[#allocation18 + $0xd38] sm:$0xff] }
0x10fc   :  { %10212 = vmatprep.subr.bf16.mxu1 %v10211_v36  ;;  %v7568_v36 = vld [vmem:[#allocation18 + $0xaa0] sm:$0xff] }
0x10fd   :  { %v10253_v42 = vpack.c.bf16 %v7570_v18, %v7568_v36  ;;  %v7613_v36 = vld [vmem:[#allocation18 + $0xc08] sm:$0xff]  ;;  %v7615_v18 = vld [vmem:[#allocation18 + $0xc18] sm:$0xff] }
0x10ff   :  { %10214 = vmatpush1.bf16.msra.mxu1 %v10213_v23  ;;  %v10255_v23 = vpack.c.bf16 %v7575_v21, %v7573_v25  ;;  %v10295_v21 = vpack.c.bf16 %v7615_v18, %v7613_v36  ;;  %v7655_v36 = vld [vmem:[#allocation18 + $0xd58] sm:$0xff] }
0x1100   :  { %10216 = vmatprep.subr.bf16.mxu1 %v10215_v15  ;;  %v7572_v15 = vld [vmem:[#allocation18 + $0xac0] sm:$0xff] }
0x1101   :  { %v10257_v14 = vpack.c.bf16 %v7574_v6, %v7572_v15  ;;  %v7617_v15 = vld [vmem:[#allocation18 + $0xc28] sm:$0xff]  ;;  %v7619_v6 = vld [vmem:[#allocation18 + $0xc38] sm:$0xff] }
0x1103   :  { %10218 = vmatpush1.bf16.msra.mxu1 %v10217_v7  ;;  %v10259_v7 = vpack.c.bf16 %v7579_v5, %v7577_v44  ;;  %v7217_v5 = vrot.slane %v14465_v52, 4 }
0x1104   :  { %10220 = vmatprep.subr.bf16.mxu1 %v10219_v45  ;;  %v7576_v45 = vld [vmem:[#allocation18 + $0xae0] sm:$0xff] }
0x1105   :  { %v10261_v4 = vpack.c.bf16 %v7578_v35, %v7576_v45  ;;  %v7618_v45 = vld [vmem:[#allocation18 + $0xc30] sm:$0xff]  ;;  %v7222_v35 = vrot.slane %v14463_v26, 2 }
0x1107   :  { %10222 = vmatpush1.bf16.msra.mxu1 %v10221_v43  ;;  %v10263_v43 = vpack.c.bf16 %v7583_v2, %v7581_v24  ;;  %v7621_v24 = vld [vmem:[#allocation18 + $0xc48] sm:$0xff]  ;;  %v7623_v2 = vld [vmem:[#allocation18 + $0xc58] sm:$0xff] }
0x1108   :  { %10224 = vmatprep.subr.bf16.mxu1 %v10223_v13  ;;  %v7580_v13 = vld [vmem:[#allocation18 + $0xb00] sm:$0xff] }
0x1109   :  { %v10265_v59 = vpack.c.bf16 %v7582_v41, %v7580_v13  ;;  %v7620_v13 = vld [vmem:[#allocation18 + $0xc40] sm:$0xff]  ;;  %v7622_v41 = vld [vmem:[#allocation18 + $0xc50] sm:$0xff] }
0x110b   :  { %10226 = vmatpush1.bf16.msra.mxu1 %v10225_v63  ;;  %v10267_v63 = vpack.c.bf16 %v7587_v31, %v7585_v46  ;;  %v7625_v46 = vld [vmem:[#allocation18 + $0xc68] sm:$0xff]  ;;  %v7627_v31 = vld [vmem:[#allocation18 + $0xc78] sm:$0xff] }
0x110c   :  { %10228 = vmatprep.subr.bf16.mxu1 %v10227_v53  ;;  %v7584_v53 = vld [vmem:[#allocation18 + $0xb20] sm:$0xff] }
0x110d   :  { %v10269_v16 = vpack.c.bf16 %v7586_v55, %v7584_v53  ;;  %v7626_v53 = vld [vmem:[#allocation18 + $0xc70] sm:$0xff]  ;;  %v7629_v55 = vld [vmem:[#allocation18 + $0xc88] sm:$0xff] }
0x110f   :  { %10230 = vmatpush1.bf16.msra.mxu1 %v10229_v58  ;;  %v10271_v58 = vpack.c.bf16 %v7591_v19, %v7589_v57  ;;  %v7631_v57 = vld [vmem:[#allocation18 + $0xc98] sm:$0xff] }
0x1110   :  { %10232 = vmatprep.subr.bf16.mxu1 %v10231_v0  ;;  %v7588_v0 = vld [vmem:[#allocation18 + $0xb40] sm:$0xff] }
0x1111   :  { %v10273_v9 = vpack.c.bf16 %v7590_v62, %v7588_v0  ;;  %v7630_v0 = vld [vmem:[#allocation18 + $0xc90] sm:$0xff]  ;;  %v7633_v62 = vld [vmem:[#allocation18 + $0xca8] sm:$0xff] }
0x1112   :  { %8101 = vmatmul.mubr.f32.vlgmr.msra.gmra.mrb[124].mxu1 %v14465_v52  ;;  %v10305_v52 = vpack.c.bf16 %v7622_v41, %v7620_v13  ;;  %v7667_v13 = vld [vmem:[#allocation18 + $0xdb8] sm:$0xff] }
0x1113   :  { %10234 = vmatpush1.bf16.msra.mxu1 %v10233_v37  ;;  %8171 = vmatprep.mubr.f32.mxu1 %v7219_v51  ;;  %v10275_v37 = vpack.c.bf16 %v7595_v56, %v7593_v3  ;;  %v7599_v51 = vld [vmem:[#allocation18 + $0xb98] sm:$0xff] }
0x1114   :  { %10236 = vmatprep.subr.bf16.mxu1 %v10235_v17  ;;  %v7592_v17 = vld [vmem:[#allocation18 + $0xb60] sm:$0xff]  ;;  %v10279_v33 = vpack.c.bf16 %v7599_v51, %v7597_v61  ;;  %v7635_v3 = vld [vmem:[#allocation18 + $0xcb8] sm:$0xff] }
0x1115   :  { %v10277_v28 = vpack.c.bf16 %v7594_v11, %v7592_v17  ;;  %v7634_v17 = vld [vmem:[#allocation18 + $0xcb0] sm:$0xff]  ;;  %v7637_v11 = vld [vmem:[#allocation18 + $0xcc8] sm:$0xff]  ;;  %v7639_v61 = vld [vmem:[#allocation18 + $0xcd8] sm:$0xff] }
0x1117   :  { %10238 = vmatpush1.bf16.msra.mxu1 %v10237_v1  ;;  %v7596_v1 = vld [vmem:[#allocation18 + $0xb80] sm:$0xff] }
0x1118   :  { %10240 = vmatprep.subr.bf16.mxu1 %v10239_v38  ;;  %v7598_v38 = vld [vmem:[#allocation18 + $0xb90] sm:$0xff] }
0x1119   :  { %v10281_v20 = vpack.c.bf16 %v7598_v38, %v7596_v1  ;;  %v7638_v1 = vld [vmem:[#allocation18 + $0xcd0] sm:$0xff]  ;;  %v7641_v38 = vld [vmem:[#allocation18 + $0xce8] sm:$0xff] }
0x111b   :  { %10242 = vmatpush1.bf16.msra.mxu1 %v10241_v8  ;;  %v7600_v8 = vld [vmem:[#allocation18 + $0xba0] sm:$0xff] }
0x111c   :  { %10244 = vmatprep.subr.bf16.mxu1 %v10243_v47  ;;  %v7602_v47 = vld [vmem:[#allocation18 + $0xbb0] sm:$0xff] }
0x111d   :  { %v10285_v50 = vpack.c.bf16 %v7602_v47, %v7600_v8  ;;  %v7642_v8 = vld [vmem:[#allocation18 + $0xcf0] sm:$0xff]  ;;  %v7645_v47 = vld [vmem:[#allocation18 + $0xd08] sm:$0xff] }
0x111f   :  { %10246 = vmatpush1.bf16.msra.mxu1 %v10245_v22  ;;  %v7604_v22 = vld [vmem:[#allocation18 + $0xbc0] sm:$0xff] }
0x1120   :  { %10248 = vmatprep.subr.bf16.mxu1 %v10247_v32  ;;  %v7606_v32 = vld [vmem:[#allocation18 + $0xbd0] sm:$0xff] }
0x1121   :  { %v10289_v29 = vpack.c.bf16 %v7606_v32, %v7604_v22  ;;  %v7646_v22 = vld [vmem:[#allocation18 + $0xd10] sm:$0xff]  ;;  %v7649_v32 = vld [vmem:[#allocation18 + $0xd28] sm:$0xff] }
0x1123   :  { %10250 = vmatpush1.bf16.msra.mxu1 %v10249_v54  ;;  %v7608_v54 = vld [vmem:[#allocation18 + $0xbe0] sm:$0xff] }
0x1124   :  { %10252 = vmatprep.subr.bf16.mxu1 %v10251_v40  ;;  %v7610_v40 = vld [vmem:[#allocation18 + $0xbf0] sm:$0xff] }
0x1125   :  { %v10293_v25 = vpack.c.bf16 %v7610_v40, %v7608_v54  ;;  %v7650_v54 = vld [vmem:[#allocation18 + $0xd30] sm:$0xff]  ;;  %v7653_v40 = vld [vmem:[#allocation18 + $0xd48] sm:$0xff] }
0x1127   :  { %10254 = vmatpush1.bf16.msra.mxu1 %v10253_v42  ;;  %v7612_v42 = vld [vmem:[#allocation18 + $0xc00] sm:$0xff] }
0x1128   :  { %10256 = vmatprep.subr.bf16.mxu1 %v10255_v23  ;;  %v7614_v23 = vld [vmem:[#allocation18 + $0xc10] sm:$0xff] }
0x1129   :  { %v10297_v44 = vpack.c.bf16 %v7614_v23, %v7612_v42  ;;  %v7654_v42 = vld [vmem:[#allocation18 + $0xd50] sm:$0xff]  ;;  %v7657_v23 = vld [vmem:[#allocation18 + $0xd68] sm:$0xff] }
0x112b   :  { %10258 = vmatpush1.bf16.msra.mxu1 %v10257_v14  ;;  %v10299_v14 = vpack.c.bf16 %v7619_v6, %v7617_v15  ;;  %v7659_v15 = vld [vmem:[#allocation18 + $0xd78] sm:$0xff] }
0x112c   :  { %10260 = vmatprep.subr.bf16.mxu1 %v10259_v7  ;;  %v7616_v7 = vld [vmem:[#allocation18 + $0xc20] sm:$0xff] }
0x112f   :  { %10262 = vmatpush1.bf16.msra.mxu1 %v10261_v4  ;;  %v10301_v4 = vpack.c.bf16 %v7618_v45, %v7616_v7  ;;  %v7661_v7 = vld [vmem:[#allocation18 + $0xd88] sm:$0xff]  ;;  %v7663_v45 = vld [vmem:[#allocation18 + $0xd98] sm:$0xff] }
0x1130   :  { %10264 = vmatprep.subr.bf16.mxu1 %v10263_v43  ;;  %v10303_v43 = vpack.c.bf16 %v7623_v2, %v7621_v24  ;;  %v10343_v24 = vpack.c.bf16 %v7663_v45, %v7661_v7  ;;  %v7660_v2 = vld [vmem:[#allocation18 + $0xd80] sm:$0xff] }
0x1133   :  { %10266 = vmatpush1.bf16.msra.mxu1 %v10265_v59  ;;  %v10307_v59 = vpack.c.bf16 %v7627_v31, %v7625_v46  ;;  %v7664_v31 = vld [vmem:[#allocation18 + $0xda0] sm:$0xff] }
0x1134   :  { %10268 = vmatprep.subr.bf16.mxu1 %v10267_v63  ;;  %v7624_v63 = vld [vmem:[#allocation18 + $0xc60] sm:$0xff] }
0x1135   :  { %v10309_v19 = vpack.c.bf16 %v7626_v53, %v7624_v63  ;;  %v7671_v63 = vld [vmem:[#allocation18 + $0xdd8] sm:$0xff] }
0x1137   :  { %10270 = vmatpush1.bf16.msra.mxu1 %v10269_v16  ;;  %v10311_v16 = vpack.c.bf16 %v7631_v57, %v7629_v55  ;;  %v7668_v57 = vld [vmem:[#allocation18 + $0xdc0] sm:$0xff] }
0x1138   :  { %10272 = vmatprep.subr.bf16.mxu1 %v10271_v58  ;;  %v7628_v58 = vld [vmem:[#allocation18 + $0xc80] sm:$0xff] }
0x1139   :  { %v10313_v56 = vpack.c.bf16 %v7630_v0, %v7628_v58  ;;  %v7675_v58 = vld [vmem:[#allocation18 + $0xdf8] sm:$0xff] }
0x113b   :  { %10274 = vmatpush1.bf16.msra.mxu1 %v10273_v9  ;;  %v10315_v9 = vpack.c.bf16 %v7635_v3, %v7633_v62  ;;  %v7672_v3 = vld [vmem:[#allocation18 + $0xde0] sm:$0xff] }
0x113c   :  { %10276 = vmatprep.subr.bf16.mxu1 %v10275_v37  ;;  %v7632_v37 = vld [vmem:[#allocation18 + $0xca0] sm:$0xff] }
0x113d   :  { %v10317_v51 = vpack.c.bf16 %v7634_v17, %v7632_v37  ;;  %v7679_v37 = vld [vmem:[#allocation18 + $0xe18] sm:$0xff] }
0x113f   :  { %10278 = vmatpush1.bf16.msra.mxu1 %v10277_v28  ;;  %v10319_v28 = vpack.c.bf16 %v7639_v61, %v7637_v11  ;;  %v7676_v61 = vld [vmem:[#allocation18 + $0xe00] sm:$0xff] }
0x1140   :  { %10280 = vmatprep.subr.bf16.mxu1 %v10279_v33  ;;  %v7636_v33 = vld [vmem:[#allocation18 + $0xcc0] sm:$0xff] }
0x1141   :  { %v10321_v12 = vpack.c.bf16 %v7638_v1, %v7636_v33  ;;  %v7683_v33 = vld [vmem:[#allocation18 + $0xe38] sm:$0xff] }
0x1143   :  { %10282 = vmatpush1.bf16.msra.mxu1 %v10281_v20  ;;  %v10323_v20 = vpack.c.bf16 %v7643_v39, %v7641_v38  ;;  %v7680_v39 = vld [vmem:[#allocation18 + $0xe20] sm:$0xff] }
0x1144   :  { %10284 = vmatprep.subr.bf16.mxu1 %v10283_v49  ;;  %v7640_v49 = vld [vmem:[#allocation18 + $0xce0] sm:$0xff] }
0x1145   :  { %v10325_v34 = vpack.c.bf16 %v7642_v8, %v7640_v49  ;;  %v7685_v49 = vld [vmem:[#allocation18 + $0xe48] sm:$0xff]  ;;  %v7687_v8 = vld [vmem:[#allocation18 + $0xe58] sm:$0xff] }
0x1147   :  { %10286 = vmatpush1.bf16.msra.mxu1 %v10285_v50  ;;  %v10327_v50 = vpack.c.bf16 %v7647_v10, %v7645_v47  ;;  %v10367_v10 = vpack.c.bf16 %v7687_v8, %v7685_v49  ;;  %v7724_v8 = vld [vmem:[#allocation18 + $0xf80] sm:$0xff] }
0x1148   :  { %10288 = vmatprep.subr.bf16.mxu1 %v10287_v27  ;;  %v7644_v27 = vld [vmem:[#allocation18 + $0xd00] sm:$0xff] }
0x1149   :  { %v10329_v48 = vpack.c.bf16 %v7646_v22, %v7644_v27  ;;  %v7689_v27 = vld [vmem:[#allocation18 + $0xe68] sm:$0xff]  ;;  %v7691_v22 = vld [vmem:[#allocation18 + $0xe78] sm:$0xff] }
0x114b   :  { %10290 = vmatpush1.bf16.msra.mxu1 %v10289_v29  ;;  %v10331_v29 = vpack.c.bf16 %v7651_v60, %v7649_v32  ;;  %v10371_v60 = vpack.c.bf16 %v7691_v22, %v7689_v27  ;;  %v7728_v22 = vld [vmem:[#allocation18 + $0xfa0] sm:$0xff] }
0x114c   :  { %10292 = vmatprep.subr.bf16.mxu1 %v10291_v30  ;;  %v7648_v30 = vld [vmem:[#allocation18 + $0xd20] sm:$0xff] }
0x114d   :  { %v10333_v18 = vpack.c.bf16 %v7650_v54, %v7648_v30  ;;  %v7693_v30 = vld [vmem:[#allocation18 + $0xe88] sm:$0xff]  ;;  %v7695_v54 = vld [vmem:[#allocation18 + $0xe98] sm:$0xff] }
0x114f   :  { %10294 = vmatpush1.bf16.msra.mxu1 %v10293_v25  ;;  %v10335_v25 = vpack.c.bf16 %v7655_v36, %v7653_v40  ;;  %v10375_v36 = vpack.c.bf16 %v7695_v54, %v7693_v30  ;;  %v7732_v54 = vld [vmem:[#allocation18 + $0xfc0] sm:$0xff] }
0x1150   :  { %10296 = vmatprep.subr.bf16.mxu1 %v10295_v21  ;;  %v7652_v21 = vld [vmem:[#allocation18 + $0xd40] sm:$0xff] }
0x1151   :  { %v10337_v6 = vpack.c.bf16 %v7654_v42, %v7652_v21  ;;  %v7697_v21 = vld [vmem:[#allocation18 + $0xea8] sm:$0xff]  ;;  %v7699_v42 = vld [vmem:[#allocation18 + $0xeb8] sm:$0xff] }
0x1152   :  { %8172 = vmatmul.mubr.f32.vlgmr.msra.gmra.mrb[124].mxu1 %v7217_v5  ;;  %v7656_v5 = vld [vmem:[#allocation18 + $0xd60] sm:$0xff] }
0x1153   :  { %10298 = vmatpush1.bf16.msra.mxu1 %v10297_v44  ;;  %8242 = vmatprep.mubr.f32.mxu1 %v7222_v35  ;;  %v10339_v44 = vpack.c.bf16 %v7659_v15, %v7657_v23  ;;  %v10379_v15 = vpack.c.bf16 %v7699_v42, %v7697_v21  ;;  %v7736_v42 = vld [vmem:[#allocation18 + $0xfe0] sm:$0xff] }
0x1154   :  { %10300 = vmatprep.subr.bf16.mxu1 %v10299_v14  ;;  %v7658_v14 = vld [vmem:[#allocation18 + $0xd70] sm:$0xff] }
0x1155   :  { %v10341_v35 = vpack.c.bf16 %v7658_v14, %v7656_v5  ;;  %v7701_v5 = vld [vmem:[#allocation18 + $0xec8] sm:$0xff]  ;;  %v7703_v14 = vld [vmem:[#allocation18 + $0xed8] sm:$0xff] }
0x1156   :  { %v10383_v45 = vpack.c.bf16 %v7703_v14, %v7701_v5  ;;  %v8322_v14 = vld [vmem:[#allocation21] sm:$0xff] }
0x1157   :  { %10302 = vmatpush1.bf16.msra.mxu1 %v10301_v4  ;;  %v7662_v4 = vld [vmem:[#allocation18 + $0xd90] sm:$0xff] }
0x1158   :  { %10304 = vmatprep.subr.bf16.mxu1 %v10303_v43  ;;  %v7665_v43 = vld [vmem:[#allocation18 + $0xda8] sm:$0xff]  ;;  %v10345_v41 = vpack.c.bf16 %v7662_v4, %v7660_v2  ;;  %v7707_v4 = vld [vmem:[#allocation18 + $0xef8] sm:$0xff] }
0x1159   :  { %v10347_v46 = vpack.c.bf16 %v7667_v13, %v7665_v43  ;;  %v7705_v2 = vld [vmem:[#allocation18 + $0xee8] sm:$0xff] }
0x115a   :  { %v10387_v13 = vpack.c.bf16 %v7707_v4, %v7705_v2  ;;  %v7224_v2 = vrot.slane %v14463_v26, 4 }
0x115b   :  { %10306 = vmatpush1.bf16.msra.mxu1 %v10305_v52  ;;  %v7666_v52 = vld [vmem:[#allocation18 + $0xdb0] sm:$0xff] }
0x115c   :  { %10308 = vmatprep.subr.bf16.mxu1 %v10307_v59  ;;  %v7669_v59 = vld [vmem:[#allocation18 + $0xdc8] sm:$0xff]  ;;  %v10349_v53 = vpack.c.bf16 %v7666_v52, %v7664_v31  ;;  %v7711_v52 = vld [vmem:[#allocation18 + $0xf18] sm:$0xff] }
0x115d   :  { %v10351_v55 = vpack.c.bf16 %v7671_v63, %v7669_v59  ;;  %v7709_v31 = vld [vmem:[#allocation18 + $0xf08] sm:$0xff] }
0x115e   :  { %v10391_v63 = vpack.c.bf16 %v7711_v52, %v7709_v31 }
0x115f   :  { %10310 = vmatpush1.bf16.msra.mxu1 %v10309_v19  ;;  %v7670_v19 = vld [vmem:[#allocation18 + $0xdd0] sm:$0xff] }
0x1160   :  { %10312 = vmatprep.subr.bf16.mxu1 %v10311_v16  ;;  %v7673_v16 = vld [vmem:[#allocation18 + $0xde8] sm:$0xff]  ;;  %v10353_v0 = vpack.c.bf16 %v7670_v19, %v7668_v57  ;;  %v7715_v19 = vld [vmem:[#allocation18 + $0xf38] sm:$0xff] }
0x1161   :  { %v10355_v62 = vpack.c.bf16 %v7675_v58, %v7673_v16  ;;  %v7713_v57 = vld [vmem:[#allocation18 + $0xf28] sm:$0xff] }
0x1162   :  { %v10395_v58 = vpack.c.bf16 %v7715_v19, %v7713_v57 }
0x1163   :  { %10314 = vmatpush1.bf16.msra.mxu1 %v10313_v56  ;;  %v7674_v56 = vld [vmem:[#allocation18 + $0xdf0] sm:$0xff] }
0x1164   :  { %10316 = vmatprep.subr.bf16.mxu1 %v10315_v9  ;;  %v7677_v9 = vld [vmem:[#allocation18 + $0xe08] sm:$0xff]  ;;  %v10357_v17 = vpack.c.bf16 %v7674_v56, %v7672_v3  ;;  %v7719_v56 = vld [vmem:[#allocation18 + $0xf58] sm:$0xff] }
0x1165   :  { %v10359_v11 = vpack.c.bf16 %v7679_v37, %v7677_v9  ;;  %v7717_v3 = vld [vmem:[#allocation18 + $0xf48] sm:$0xff] }
0x1166   :  { %v10399_v37 = vpack.c.bf16 %v7719_v56, %v7717_v3  ;;  %v8330_v56 = vld [vmem:[#allocation21 + $0x40] sm:$0xff] }
0x1167   :  { %10318 = vmatpush1.bf16.msra.mxu1 %v10317_v51  ;;  %v7678_v51 = vld [vmem:[#allocation18 + $0xe10] sm:$0xff] }
0x1168   :  { %10320 = vmatprep.subr.bf16.mxu1 %v10319_v28  ;;  %v7681_v28 = vld [vmem:[#allocation18 + $0xe28] sm:$0xff]  ;;  %v10361_v1 = vpack.c.bf16 %v7678_v51, %v7676_v61  ;;  %v7723_v51 = vld [vmem:[#allocation18 + $0xf78] sm:$0xff] }
0x1169   :  { %v10363_v38 = vpack.c.bf16 %v7683_v33, %v7681_v28  ;;  %v7721_v61 = vld [vmem:[#allocation18 + $0xf68] sm:$0xff] }
0x116a   :  { %v10403_v33 = vpack.c.bf16 %v7723_v51, %v7721_v61  ;;  %v8332_v51 = vld [vmem:[#allocation21 + $0x50] sm:$0xff] }
0x116b   :  { %10322 = vmatpush1.bf16.msra.mxu1 %v10321_v12  ;;  %v7682_v12 = vld [vmem:[#allocation18 + $0xe30] sm:$0xff] }
0x116c   :  { %10324 = vmatprep.subr.bf16.mxu1 %v10323_v20  ;;  %v7226_v20 = vrot.slane %v14463_v26, 6  ;;  %v10365_v47 = vpack.c.bf16 %v7682_v12, %v7680_v39  ;;  %v7725_v39 = vld [vmem:[#allocation18 + $0xf88] sm:$0xff]  ;;  %v7727_v12 = vld [vmem:[#allocation18 + $0xf98] sm:$0xff] }
0x116d   :  { %v10407_v49 = vpack.c.bf16 %v7727_v12, %v7725_v39  ;;  %v8334_v12 = vld [vmem:[#allocation21 + $0x60] sm:$0xff] }
0x116f   :  { %10326 = vmatpush1.bf16.msra.mxu1 %v10325_v34  ;;  %v7684_v34 = vld [vmem:[#allocation18 + $0xe40] sm:$0xff] }
0x1170   :  { %10328 = vmatprep.subr.bf16.mxu1 %v10327_v50  ;;  %v7686_v50 = vld [vmem:[#allocation18 + $0xe50] sm:$0xff] }
0x1171   :  { %v10369_v32 = vpack.c.bf16 %v7686_v50, %v7684_v34  ;;  %v7731_v34 = vld [vmem:[#allocation18 + $0xfb8] sm:$0xff] }
0x1173   :  { %10330 = vmatpush1.bf16.msra.mxu1 %v10329_v48  ;;  %v7688_v48 = vld [vmem:[#allocation18 + $0xe60] sm:$0xff] }
0x1174   :  { %10332 = vmatprep.subr.bf16.mxu1 %v10331_v29  ;;  %v7690_v29 = vld [vmem:[#allocation18 + $0xe70] sm:$0xff] }
0x1175   :  { %v10373_v40 = vpack.c.bf16 %v7690_v29, %v7688_v48  ;;  %v7735_v48 = vld [vmem:[#allocation18 + $0xfd8] sm:$0xff] }
0x1177   :  { %10334 = vmatpush1.bf16.msra.mxu1 %v10333_v18  ;;  %v7692_v18 = vld [vmem:[#allocation18 + $0xe80] sm:$0xff] }
0x1178   :  { %10336 = vmatprep.subr.bf16.mxu1 %v10335_v25  ;;  %v7694_v25 = vld [vmem:[#allocation18 + $0xe90] sm:$0xff] }
0x1179   :  { %v10377_v23 = vpack.c.bf16 %v7694_v25, %v7692_v18  ;;  %v7739_v18 = vld [vmem:[#allocation18 + $0xff8] sm:$0xff] }
0x117b   :  { %10338 = vmatpush1.bf16.msra.mxu1 %v10337_v6  ;;  %v7696_v6 = vld [vmem:[#allocation18 + $0xea0] sm:$0xff] }
0x117c   :  { %10340 = vmatprep.subr.bf16.mxu1 %v10339_v44  ;;  %v7698_v44 = vld [vmem:[#allocation18 + $0xeb0] sm:$0xff] }
0x117d   :  { %v10381_v7 = vpack.c.bf16 %v7698_v44, %v7696_v6  ;;  %v8339_v6 = vld [vmem:[#allocation21 + $0x88] sm:$0xff] }
0x117f   :  { %10342 = vmatpush1.bf16.msra.mxu1 %v10341_v35  ;;  %v7700_v35 = vld [vmem:[#allocation18 + $0xec0] sm:$0xff] }
0x1180   :  { %10344 = vmatprep.subr.bf16.mxu1 %v10343_v24  ;;  %v7702_v24 = vld [vmem:[#allocation18 + $0xed0] sm:$0xff] }
0x1181   :  { %v10385_v43 = vpack.c.bf16 %v7702_v24, %v7700_v35  ;;  %v8341_v35 = vld [vmem:[#allocation21 + $0x98] sm:$0xff] }
0x1183   :  { %10346 = vmatpush1.bf16.msra.mxu1 %v10345_v41  ;;  %v7704_v41 = vld [vmem:[#allocation18 + $0xee0] sm:$0xff] }
0x1184   :  { %10348 = vmatprep.subr.bf16.mxu1 %v10347_v46  ;;  %v7706_v46 = vld [vmem:[#allocation18 + $0xef0] sm:$0xff] }
0x1185   :  { %v10389_v59 = vpack.c.bf16 %v7706_v46, %v7704_v41  ;;  %v8342_v41 = vld [vmem:[#allocation21 + $0xa0] sm:$0xff]  ;;  %v8343_v46 = vld [vmem:[#allocation21 + $0xa8] sm:$0xff] }
0x1186   :  { %v10431_v52 = vpack.c.bf16 %v8343_v46, %v8342_v41  ;;  %v8441_v41 = vld [vmem:[#allocation24 + $0x48] sm:$0xff] }
0x1187   :  { %10350 = vmatpush1.bf16.msra.mxu1 %v10349_v53  ;;  %v7708_v53 = vld [vmem:[#allocation18 + $0xf00] sm:$0xff] }
0x1188   :  { %10352 = vmatprep.subr.bf16.mxu1 %v10351_v55  ;;  %v7710_v55 = vld [vmem:[#allocation18 + $0xf10] sm:$0xff] }
0x1189   :  { %v10393_v16 = vpack.c.bf16 %v7710_v55, %v7708_v53  ;;  %v8344_v53 = vld [vmem:[#allocation21 + $0xb0] sm:$0xff]  ;;  %v8345_v55 = vld [vmem:[#allocation21 + $0xb8] sm:$0xff] }
0x118a   :  { %v10435_v19 = vpack.c.bf16 %v8345_v55, %v8344_v53  ;;  %v8445_v53 = vld [vmem:[#allocation24 + $0x68] sm:$0xff] }
0x118b   :  { %10354 = vmatpush1.bf16.msra.mxu1 %v10353_v0  ;;  %v7712_v0 = vld [vmem:[#allocation18 + $0xf20] sm:$0xff] }
0x118c   :  { %10356 = vmatprep.subr.bf16.mxu1 %v10355_v62  ;;  %v7714_v62 = vld [vmem:[#allocation18 + $0xf30] sm:$0xff] }
0x118d   :  { %v10397_v9 = vpack.c.bf16 %v7714_v62, %v7712_v0  ;;  %v8347_v0 = vld [vmem:[#allocation21 + $0xc8] sm:$0xff] }
0x118f   :  { %10358 = vmatpush1.bf16.msra.mxu1 %v10357_v17  ;;  %v7716_v17 = vld [vmem:[#allocation18 + $0xf40] sm:$0xff] }
0x1190   :  { %10360 = vmatprep.subr.bf16.mxu1 %v10359_v11  ;;  %v7718_v11 = vld [vmem:[#allocation18 + $0xf50] sm:$0xff] }
0x1191   :  { %v10401_v28 = vpack.c.bf16 %v7718_v11, %v7716_v17  ;;  %v8349_v17 = vld [vmem:[#allocation21 + $0xd8] sm:$0xff] }
0x1192   :  { %8243 = vmatmul.mubr.f32.vlgmr.msra.gmra.mrb[124].mxu1 %v14463_v26  ;;  %v8328_v26 = vld [vmem:[#allocation21 + $0x30] sm:$0xff] }
0x1193   :  { %10362 = vmatpush1.bf16.msra.mxu1 %v10361_v1  ;;  %8313 = vmatprep.mubr.f32.mxu1 %v7226_v20  ;;  %v7720_v1 = vld [vmem:[#allocation18 + $0xf60] sm:$0xff] }
0x1194   :  { %10364 = vmatprep.subr.bf16.mxu1 %v10363_v38  ;;  %v7722_v38 = vld [vmem:[#allocation18 + $0xf70] sm:$0xff] }
0x1195   :  { %v10405_v20 = vpack.c.bf16 %v7722_v38, %v7720_v1  ;;  %v8351_v1 = vld [vmem:[#allocation21 + $0xe8] sm:$0xff] }
0x1197   :  { %10366 = vmatpush1.bf16.msra.mxu1 %v10365_v47  ;;  %v7726_v47 = vld [vmem:[#allocation18 + $0xf90] sm:$0xff] }
0x1198   :  { %10368 = vmatprep.subr.bf16.mxu1 %v10367_v10  ;;  %v7729_v10 = vld [vmem:[#allocation18 + $0xfa8] sm:$0xff]  ;;  %v10409_v50 = vpack.c.bf16 %v7726_v47, %v7724_v8  ;;  %v8352_v8 = vld [vmem:[#allocation21 + $0xf0] sm:$0xff]  ;;  %v8353_v47 = vld [vmem:[#allocation21 + $0xf8] sm:$0xff] }
0x1199   :  { %v10411_v27 = vpack.c.bf16 %v7731_v34, %v7729_v10  ;;  %v10451_v10 = vpack.c.bf16 %v8353_v47, %v8352_v8  ;;  %v8336_v34 = vld [vmem:[#allocation21 + $0x70] sm:$0xff] }
0x119a   :  { %v8535_v8 = vld [vmem:[#allocation27 + $0x48] sm:$0xff] }
0x119b   :  { %10370 = vmatpush1.bf16.msra.mxu1 %v10369_v32  ;;  %v7730_v32 = vld [vmem:[#allocation18 + $0xfb0] sm:$0xff] }
0x119c   :  { %10372 = vmatprep.subr.bf16.mxu1 %v10371_v60  ;;  %v7733_v60 = vld [vmem:[#allocation18 + $0xfc8] sm:$0xff]  ;;  %v10413_v29 = vpack.c.bf16 %v7730_v32, %v7728_v22  ;;  %v14716_v22 = vmov 0.0|0.0   ;;  %v7742_v32 = vlaneseq }
0x119d   :  { %v10415_v30 = vpack.c.bf16 %v7735_v48, %v7733_v60 }
0x119e   :  { %v7743_v60 = vshrl.u32 %v7742_v32, 7  ;;  %v8539_v32 = vld [vmem:[#allocation27 + $0x68] sm:$0xff] }
0x119f   :  { %10374 = vmatpush1.bf16.msra.mxu1 %v10373_v40  ;;  %v7734_v40 = vld [vmem:[#allocation18 + $0xfd0] sm:$0xff] }
0x11a0   :  { %10376 = vmatprep.subr.bf16.mxu1 %v10375_v36  ;;  %v7737_v36 = vld [vmem:[#allocation18 + $0xfe8] sm:$0xff]  ;;  %v10417_v25 = vpack.c.bf16 %v7734_v40, %v7732_v54  ;;  %v7744_v48 = vsub.s32 0, %v7743_v60 }
0x11a1   :  { %v10419_v21 = vpack.c.bf16 %v7739_v18, %v7737_v36 }
0x11a3   :  { %10378 = vmatpush1.bf16.msra.mxu1 %v10377_v23  ;;  %v7738_v23 = vld [vmem:[#allocation18 + $0xff0] sm:$0xff] }
0x11a4   :  { %10380 = vmatprep.subr.bf16.mxu1 %v10379_v15  ;;  %v8338_v15 = vld [vmem:[#allocation21 + $0x80] sm:$0xff]  ;;  %v10421_v44 = vpack.c.bf16 %v7738_v23, %v7736_v42  ;;  %v8433_v42 = vld [vmem:[#allocation24 + $0x8] sm:$0xff] }
0x11a5   :  { %v10423_v5 = vpack.c.bf16 %v8339_v6, %v8338_v15 }
0x11a7   :  { %10382 = vmatpush1.bf16.msra.mxu1 %v10381_v7  ;;  %v8323_v7 = vld [vmem:[#allocation21 + $0x8] sm:$0xff] }
0x11a8   :  { %10384 = vmatprep.subr.bf16.mxu1 %v10383_v45  ;;  %v8340_v45 = vld [vmem:[#allocation21 + $0x90] sm:$0xff]  ;;  %v10425_v24 = vpack.c.bf16 %v8323_v7, %v8322_v14  ;;  %v8435_v14 = vld [vmem:[#allocation24 + $0x18] sm:$0xff] }
0x11a9   :  { %v10427_v4 = vpack.c.bf16 %v8341_v35, %v8340_v45  ;;  %v8436_v45 = vld [vmem:[#allocation24 + $0x20] sm:$0xff]  ;;  %v8437_v35 = vld [vmem:[#allocation24 + $0x28] sm:$0xff] }
0x11ab   :  { %10386 = vmatpush1.bf16.msra.mxu1 %v10385_v43  ;;  %v8324_v43 = vld [vmem:[#allocation21 + $0x10] sm:$0xff] }
0x11ac   :  { %10388 = vmatprep.subr.bf16.mxu1 %v10387_v13  ;;  %v8325_v13 = vld [vmem:[#allocation21 + $0x18] sm:$0xff] }
0x11ad   :  { %v10429_v31 = vpack.c.bf16 %v8325_v13, %v8324_v43  ;;  %v8440_v13 = vld [vmem:[#allocation24 + $0x40] sm:$0xff] }
0x11ae   :  { %v10468_v46 = vpack.c.bf16 %v8441_v41, %v8440_v13  ;;  %v8630_v13 = vld [vmem:[#allocation30 + $0x50] sm:$0xff]  ;;  %v8631_v41 = vld [vmem:[#allocation30 + $0x58] sm:$0xff] }
0x11af   :  { %10390 = vmatpush1.bf16.msra.mxu1 %v10389_v59  ;;  %v8326_v59 = vld [vmem:[#allocation21 + $0x20] sm:$0xff] }
0x11b0   :  { %10392 = vmatprep.subr.bf16.mxu1 %v10391_v63  ;;  %v8327_v63 = vld [vmem:[#allocation21 + $0x28] sm:$0xff] }
0x11b1   :  { %v10433_v57 = vpack.c.bf16 %v8327_v63, %v8326_v59  ;;  %v8444_v63 = vld [vmem:[#allocation24 + $0x60] sm:$0xff] }
0x11b2   :  { %v10474_v55 = vpack.c.bf16 %v8445_v53, %v8444_v63  ;;  %v8634_v63 = vld [vmem:[#allocation30 + $0x70] sm:$0xff]  ;;  %v8635_v53 = vld [vmem:[#allocation30 + $0x78] sm:$0xff] }
0x11b3   :  { %10394 = vmatpush1.bf16.msra.mxu1 %v10393_v16  ;;  %v8329_v16 = vld [vmem:[#allocation21 + $0x38] sm:$0xff] }
0x11b4   :  { %10396 = vmatprep.subr.bf16.mxu1 %v10395_v58  ;;  %v8346_v58 = vld [vmem:[#allocation21 + $0xc0] sm:$0xff]  ;;  %v10437_v62 = vpack.c.bf16 %v8329_v16, %v8328_v26  ;;  %v12241_v16 = vmov 0.0  }
0x11b5   :  { %v10439_v3 = vpack.c.bf16 %v8347_v0, %v8346_v58  ;;  %v8767_v0 = vld [vmem:[#allocation22] ss:$0 sm:$0xff] }
0x11b7   :  { %10398 = vmatpush1.bf16.msra.mxu1 %v10397_v9  ;;  %v8331_v9 = vld [vmem:[#allocation21 + $0x48] sm:$0xff] }
0x11b8   :  { %10400 = vmatprep.subr.bf16.mxu1 %v10399_v37  ;;  %v8348_v37 = vld [vmem:[#allocation21 + $0xd0] sm:$0xff]  ;;  %v10441_v11 = vpack.c.bf16 %v8331_v9, %v8330_v56  ;;  %v8526_v56 = vld [vmem:[#allocation27] sm:$0xff] }
0x11b9   :  { %v10443_v61 = vpack.c.bf16 %v8349_v17, %v8348_v37  ;;  %v8527_v9 = vld [vmem:[#allocation27 + $0x8] sm:$0xff] }
0x11ba   :  { %v10480_v17 = vpack.c.bf16 %v8527_v9, %v8526_v56 }
0x11bb   :  { %10402 = vmatpush1.bf16.msra.mxu1 %v10401_v28  ;;  %v8333_v28 = vld [vmem:[#allocation21 + $0x58] sm:$0xff] }
0x11bc   :  { %10404 = vmatprep.subr.bf16.mxu1 %v10403_v33  ;;  %v8350_v33 = vld [vmem:[#allocation21 + $0xe0] sm:$0xff]  ;;  %v10445_v38 = vpack.c.bf16 %v8333_v28, %v8332_v51 }
0x11bd   :  { %v10447_v39 = vpack.c.bf16 %v8351_v1, %v8350_v33  ;;  %v8529_v51 = vld [vmem:[#allocation27 + $0x18] sm:$0xff]  ;;  %v8530_v33 = vld [vmem:[#allocation27 + $0x20] sm:$0xff]  ;;  %v8531_v1 = vld [vmem:[#allocation27 + $0x28] sm:$0xff] }
0x11bf   :  { %10406 = vmatpush1.bf16.msra.mxu1 %v10405_v20  ;;  %v8335_v20 = vld [vmem:[#allocation21 + $0x68] sm:$0xff] }
0x11c0   :  { %10408 = vmatprep.subr.bf16.mxu1 %v10407_v49  ;;  %v10449_v49 = vpack.c.bf16 %v8335_v20, %v8334_v12  ;;  %v8533_v12 = vld [vmem:[#allocation27 + $0x38] sm:$0xff] }
0x11c3   :  { %10410 = vmatpush1.bf16.msra.mxu1 %v10409_v50  ;;  %v8337_v50 = vld [vmem:[#allocation21 + $0x78] sm:$0xff] }
0x11c4   :  { %10412 = vmatprep.subr.bf16.mxu1 %v10411_v27  ;;  %v10453_v27 = vpack.c.bf16 %v8337_v50, %v8336_v34  ;;  %v8537_v34 = vld [vmem:[#allocation27 + $0x58] sm:$0xff] }
0x11c7   :  { %10414 = vmatpush1.bf16.msra.mxu1 %v10413_v29  ;;  %v7740_v29 = vld [vmem:[#allocation19] sm:$0x3] }
0x11c8   :  { %10416 = vmatprep.subr.bf16.mxu1 %v10415_v30  ;;  %v7748_v30 = vsub.s32 1, %v7743_v60  ;;  %v7745_v54 = vrot.slane %v7740_v29, %v7744_v48  ;;  %v8540_v48 = vld [vmem:[#allocation27 + $0x70] sm:$0xff] }
0x11ca   :  { %v7749_v40 = vrot.slane %v7740_v29, %v7748_v30  ;;  %v8541_v29 = vld [vmem:[#allocation27 + $0x78] sm:$0xff] }
0x11cb   :  { %10418 = vmatpush1.bf16.msra.mxu1 %v10417_v25  ;;  %v10501_v30 = vpack.c.bf16 %v8541_v29, %v8540_v48 }
0x11cc   :  { %10420 = vmatprep.subr.bf16.mxu1 %v10419_v21  ;;  %v8432_v21 = vld [vmem:[#allocation24] sm:$0xff] }
0x11cd   :  { %v10456_v6 = vpack.c.bf16 %v8433_v42, %v8432_v21 }
0x11cf   :  { %10422 = vmatpush1.bf16.msra.mxu1 %v10421_v44 }
0x11d0   :  { %10424 = vmatprep.subr.bf16.mxu1 %v10423_v5  ;;  %v8434_v5 = vld [vmem:[#allocation24 + $0x10] sm:$0xff] }
0x11d1   :  { %v10459_v7 = vpack.c.bf16 %v8435_v14, %v8434_v5  ;;  %v8624_v5 = vld [vmem:[#allocation30 + $0x20] sm:$0xff]  ;;  %v8625_v14 = vld [vmem:[#allocation30 + $0x28] sm:$0xff] }
0x11d2   :  { %8314 = vmatmul.mubr.f32.vlgmr.msra.gmra.mrb[124].mxu1 %v7224_v2  ;;  %v8438_v2 = vld [vmem:[#allocation24 + $0x30] sm:$0xff] }
0x11d3   :  { %10426 = vmatpush3.bf16.msra.mxu1 %v10425_v24  ;;  %v10462_v24 = vpack.c.bf16 %v8437_v35, %v8436_v45  ;;  %v8626_v45 = vld [vmem:[#allocation30 + $0x30] sm:$0xff]  ;;  %v8627_v35 = vld [vmem:[#allocation30 + $0x38] sm:$0xff] }
0x11d4   :  { %10428 = vmatprep.subr.bf16.mxu1 %v10427_v4  ;;  %v8439_v4 = vld [vmem:[#allocation24 + $0x38] sm:$0xff] }
0x11d5   :  { %v10465_v43 = vpack.c.bf16 %v8439_v4, %v8438_v2  ;;  %v8628_v2 = vld [vmem:[#allocation30 + $0x40] sm:$0xff]  ;;  %v8629_v4 = vld [vmem:[#allocation30 + $0x48] sm:$0xff] }
0x11d7   :  { %10430 = vmatpush3.bf16.msra.mxu1 %v10429_v31  ;;  %v8442_v31 = vld [vmem:[#allocation24 + $0x50] sm:$0xff] }
0x11d8   :  { %10432 = vmatprep.subr.bf16.mxu1 %v10431_v52  ;;  %v8443_v52 = vld [vmem:[#allocation24 + $0x58] sm:$0xff] }
0x11d9   :  { %v10471_v59 = vpack.c.bf16 %v8443_v52, %v8442_v31  ;;  %v8632_v31 = vld [vmem:[#allocation30 + $0x60] sm:$0xff]  ;;  %v8633_v52 = vld [vmem:[#allocation30 + $0x68] sm:$0xff] }
0x11db   :  { %10434 = vmatpush3.bf16.msra.mxu1 %v10433_v57  ;;  %v8446_v57 = vld [vmem:[#allocation24 + $0x70] sm:$0xff] }
0x11dc   :  { %10436 = vmatprep.subr.bf16.mxu1 %v10435_v19  ;;  %v8447_v19 = vld [vmem:[#allocation24 + $0x78] sm:$0xff] }
0x11dd   :  { %v10477_v26 = vpack.c.bf16 %v8447_v19, %v8446_v57  ;;  %v8769_v57 = vld [vmem:[#allocation28] ss:$0 sm:$0xff] }
0x11df   :  { %10438 = vmatpush3.bf16.msra.mxu1 %v10437_v62 }
0x11e0   :  { %10440 = vmatprep.subr.bf16.mxu1 %v10439_v3 }
0x11e3   :  { %10442 = vmatpush3.bf16.msra.mxu1 %v10441_v11 }
0x11e4   :  { %10444 = vmatprep.subr.bf16.mxu1 %v10443_v61  ;;  %v8528_v61 = vld [vmem:[#allocation27 + $0x10] sm:$0xff] }
0x11e5   :  { %v10483_v28 = vpack.c.bf16 %v8529_v51, %v8528_v61 }
0x11e7   :  { %10446 = vmatpush3.bf16.msra.mxu1 %v10445_v38  ;;  %v10486_v38 = vpack.c.bf16 %v8531_v1, %v8530_v33 }
0x11e8   :  { %10448 = vmatprep.subr.bf16.mxu1 %v10447_v39  ;;  %v8532_v39 = vld [vmem:[#allocation27 + $0x30] sm:$0xff] }
0x11e9   :  { %v10489_v20 = vpack.c.bf16 %v8533_v12, %v8532_v39 }
0x11eb   :  { %10450 = vmatpush3.bf16.msra.mxu1 %v10449_v49  ;;  %v8534_v49 = vld [vmem:[#allocation27 + $0x40] sm:$0xff] }
0x11ec   :  { %10452 = vmatprep.subr.bf16.mxu1 %v10451_v10  ;;  %v10492_v47 = vpack.c.bf16 %v8535_v8, %v8534_v49  ;;  %v8536_v10 = vld [vmem:[#allocation27 + $0x50] sm:$0xff] }
0x11ed   :  { %v10495_v50 = vpack.c.bf16 %v8537_v34, %v8536_v10 }
0x11ef   :  { %10454 = vmatpush3.bf16.msra.mxu1 %v10453_v27  ;;  %v8538_v27 = vld [vmem:[#allocation27 + $0x60] sm:$0xff] }
0x11f0   :  { %10455 = vmatprep.subr.bf16.mxu1 %v14716_v22  ;;  %v10498_v60 = vpack.c.bf16 %v8539_v32, %v8538_v27 }
0x12a5   :  { %v8315_v36 = vpop.f32.mrb[124].mxu1 }
0x12a6   :  { %v10692_v18 = vadd.f32 %v8315_v36, %v7745_v54  ;;  %v8317_v25 = vpop.f32.mrb[125].mxu1  ;;  %v8768_v54 = vld [vmem:[#allocation25] ss:$0 sm:$0xff]  ;;  %v8621_v36 = vld [vmem:[#allocation30 + $0x8] sm:$0xff] }
0x12a7   :  { %v10693_v23 = vadd.f32 %v8317_v25, %v7749_v40  ;;  %v8620_v40 = vld [vmem:[#allocation30] sm:$0xff] }
0x12a8   :  { %v8320_v44 = vmax.f32 %v10692_v18, 0.0  ;;  %v10504_v42 = vpack.c.bf16 %v8621_v36, %v8620_v40 }
0x12a9   :  { %v8321_v15 = vmax.f32 %v10693_v23, 0.0 }
0x12ab   :  { %8425 = vmatprep.mubr.f32.mxu1 %v8321_v15  ;;  %v8622_v15 = vld [vmem:[#allocation30 + $0x10] sm:$0xff] }
0x12ac   :  { %8426 = vmatmul.mubr.f32.vlgmr.msra.gmra.mrb[126].mxu1 %v8320_v44 }
0x12ad   :  { %10457 = vmatpush3.bf16.msra.mxu1 %v10456_v6  ;;  %9478 = vmatprep.mubr.msk.f32.mxu1 %vm12240_vm15, %v12241_v16  ;;  %v8623_v6 = vld [vmem:[#allocation30 + $0x18] sm:$0xff] }
0x12ae   :  { %10458 = vmatprep.subr.bf16.mxu1 %v14716_v22  ;;  %v10507_v44 = vpack.c.bf16 %v8623_v6, %v8622_v15 }
0x12b1   :  { %10460 = vmatpush3.bf16.msra.mxu1 %v10459_v7  ;;  %v10510_v7 = vpack.c.bf16 %v8625_v14, %v8624_v5 }
0x12b2   :  { %10461 = vmatprep.subr.bf16.mxu1 %v14716_v22 }
0x12b5   :  { %10463 = vmatpush3.bf16.msra.mxu1 %v10462_v24  ;;  %v10513_v24 = vpack.c.bf16 %v8627_v35, %v8626_v45 }
0x12b6   :  { %10464 = vmatprep.subr.bf16.mxu1 %v14716_v22 }
0x12b9   :  { %10466 = vmatpush3.bf16.msra.mxu1 %v10465_v43  ;;  %v10516_v43 = vpack.c.bf16 %v8629_v4, %v8628_v2 }
0x12ba   :  { %10467 = vmatprep.subr.bf16.mxu1 %v14716_v22 }
0x12bd   :  { %10469 = vmatpush3.bf16.msra.mxu1 %v10468_v46  ;;  %v10519_v46 = vpack.c.bf16 %v8631_v41, %v8630_v13 }
0x12be   :  { %10470 = vmatprep.subr.bf16.mxu1 %v14716_v22 }
0x12c1   :  { %10472 = vmatpush3.bf16.msra.mxu1 %v10471_v59  ;;  %v10522_v59 = vpack.c.bf16 %v8633_v52, %v8632_v31 }
0x12c2   :  { %10473 = vmatprep.subr.bf16.mxu1 %v14716_v22 }
0x12c5   :  { %10475 = vmatpush3.bf16.msra.mxu1 %v10474_v55  ;;  %v10525_v55 = vpack.c.bf16 %v8635_v53, %v8634_v63 }
0x12c6   :  { %10476 = vmatprep.subr.bf16.mxu1 %v14716_v22 }
0x12c9   :  { %10478 = vmatpush3.bf16.msra.mxu1 %v10477_v26 }
0x12ca   :  { %10479 = vmatprep.subr.bf16.mxu1 %v14716_v22 }
0x137f   :  { %v9168_v58 = vpop.f32.mrb[126].mxu1 }
0x1380   :  { %v9169_v62 = vpop.f32.mrb[127].mxu1 }
0x1381   :  { %v9170_v3 = vadd.f32 %v9169_v62, %v9168_v58 }
0x1383   :  { %v8428_v37 = vadd.f32 %v9170_v3, %v8767_v0  ;;  %v8770_v0 = vld [vmem:[#allocation31] ss:$0 sm:$0xff] }
0x1385   :  { %v8431_v11 = vmax.f32 %v8428_v37, 0.0 }
0x1387   :  { %9479 = vmatmul.mubr.f32.vlgmr.msra.gmra.mrb[128].mxu1 %v8431_v11 }
0x1388   :  { %10481 = vmatpush3.bf16.msra.mxu1 %v10480_v17  ;;  %9513 = vmatprep.mubr.msk.f32.mxu1 %vm12240_vm15, %v12241_v16 }
0x1389   :  { %10482 = vmatprep.subr.bf16.mxu1 %v14716_v22 }
0x138c   :  { %10484 = vmatpush3.bf16.msra.mxu1 %v10483_v28 }
0x138d   :  { %10485 = vmatprep.subr.bf16.mxu1 %v14716_v22 }
0x1390   :  { %10487 = vmatpush3.bf16.msra.mxu1 %v10486_v38 }
0x1391   :  { %10488 = vmatprep.subr.bf16.mxu1 %v14716_v22 }
0x1394   :  { %10490 = vmatpush3.bf16.msra.mxu1 %v10489_v20 }
0x1395   :  { %10491 = vmatprep.subr.bf16.mxu1 %v14716_v22 }
0x1398   :  { %10493 = vmatpush3.bf16.msra.mxu1 %v10492_v47 }
0x1399   :  { %10494 = vmatprep.subr.bf16.mxu1 %v14716_v22 }
0x139c   :  { %10496 = vmatpush3.bf16.msra.mxu1 %v10495_v50 }
0x139d   :  { %10497 = vmatprep.subr.bf16.mxu1 %v14716_v22 }
0x13a0   :  { %10499 = vmatpush3.bf16.msra.mxu1 %v10498_v60 }
0x13a1   :  { %10500 = vmatprep.subr.bf16.mxu1 %v14716_v22 }
0x13a4   :  { %10502 = vmatpush3.bf16.msra.mxu1 %v10501_v30 }
0x13a5   :  { %10503 = vmatprep.subr.bf16.mxu1 %v14716_v22 }
0x145a   :  { %v8521_v18 = vpop.f32.mrb[128].mxu1 }
0x145b   :  { %v8522_v25 = vadd.f32 %v8768_v54, %v8521_v18  ;;  %v9480_v21 = vpop.f32.mrb[129].mxu1 }
0x145d   :  { %v8525_v23 = vmax.f32 %v8522_v25, 0.0 }
0x145f   :  { %9514 = vmatmul.mubr.f32.vlgmr.msra.gmra.mrb[130].mxu1 %v8525_v23 }
0x1460   :  { %10505 = vmatpush3.bf16.msra.mxu1 %v10504_v42  ;;  %9548 = vmatprep.mubr.msk.f32.mxu1 %vm12240_vm15, %v12241_v16 }
0x1461   :  { %10506 = vmatprep.subr.bf16.mxu1 %v14716_v22 }
0x1464   :  { %10508 = vmatpush3.bf16.msra.mxu1 %v10507_v44 }
0x1465   :  { %10509 = vmatprep.subr.bf16.mxu1 %v14716_v22 }
0x1468   :  { %10511 = vmatpush3.bf16.msra.mxu1 %v10510_v7 }
0x1469   :  { %10512 = vmatprep.subr.bf16.mxu1 %v14716_v22 }
0x146c   :  { %10514 = vmatpush3.bf16.msra.mxu1 %v10513_v24 }
0x146d   :  { %10515 = vmatprep.subr.bf16.mxu1 %v14716_v22 }
0x1470   :  { %10517 = vmatpush3.bf16.msra.mxu1 %v10516_v43 }
0x1471   :  { %10518 = vmatprep.subr.bf16.mxu1 %v14716_v22 }
0x1474   :  { %10520 = vmatpush3.bf16.msra.mxu1 %v10519_v46 }
0x1475   :  { %10521 = vmatprep.subr.bf16.mxu1 %v14716_v22 }
0x1478   :  { %10523 = vmatpush3.bf16.msra.mxu1 %v10522_v59 }
0x1479   :  { %10524 = vmatprep.subr.bf16.mxu1 %v14716_v22 }
0x147c   :  { %10526 = vmatpush3.bf16.msra.mxu1 %v10525_v55 }
0x1532   :  { %v8615_v19 = vpop.f32.mrb[130].mxu1 }
0x1533   :  { %v8616_v26 = vadd.f32 %v8769_v57, %v8615_v19  ;;  %v9515_v16 = vpop.f32.mrb[131].mxu1 }
0x1535   :  { %v8619_v58 = vmax.f32 %v8616_v26, 0.0 }
0x1537   :  { %9549 = vmatmul.mubr.f32.vlgmr.msra.gmra.mrb[132].mxu1 %v8619_v58 }
0x160a   :  { %v8709_v62 = vpop.f32.mrb[132].mxu1 }
0x160b   :  { %v8710_v3 = vadd.f32 %v8770_v0, %v8709_v62  ;;  %v9550_v56 = vpop.f32.mrb[133].mxu1 }
0x160d   :  { %v8714_v9 = vsel %vm8713_vm0, %v8710_v3, -inf }
0x160e   :  { %8715 = vmax.xlane.f32.xlu0 %v8714_v9 }
0x169b   :  { %v8716_v37 = vpop.xlane.xlu0 %8715 }
0x169c   :  { %v8717_v17 = vsub.f32 %v8710_v3, %v8716_v37 }
0x169e   :  { %v8718_v22 = vmul.f32 1.442695, %v8717_v17 }
0x16a0   :  { %11735 = vpow2.f32 %v8718_v22 }
0x16aa   :  { %v11736_v11 = vpop.eup %11735 }
0x16ab   :  { %v8720_v61 = vsel %vm8713_vm0, %v11736_v11, 0.0 }
0x16ac   :  { %8721 = vadd.xlane.f32.xlu1 %v8720_v61 }
0x1739   :  { %v8722_v51 = vpop.xlane.xlu1 %8721 }
0x173a   :  { %11737 = vrcp.f32 %v8722_v51 }
0x1744   :  { %v11738_v28 = vpop.eup %11737 }
0x1745   :  { %v8724_v33 = vmul.f32 %v11738_v28, %v11736_v11 }
0x1747   :  { %v8726_v1 = vsel %vm8725_vm1, %v8724_v33, %v8710_v3 }
0x1748   :  { %8728 = vst.msk [vmem:[%s14717_s20] sm:$0x3] %vm8727_vm2, %v8726_v1 }
0x1749   :  { %8733 = vsyncpa [#allocation3], 1 }
0x174a   :  { %8734 = vsyncpa [#allocation5], 1 }
0x174b   :  { %8735 = vsyncpa [#allocation8], 1 }
0x174c   :  { %8736 = vsyncpa [#allocation11], 1 }
0x174d   :  { %8737 = vsyncpa [#allocation14], 1 }
0x174e   :  { %8738 = vsyncpa [#allocation17], 1 }
0x174f   :  { %8739 = vsyncpa [#allocation20], 1 }
0x1750   :  { %8740 = vsyncpa [#allocation23], 1 }
0x1751   :  { %8741 = vsyncpa [#allocation26], 1 }
0x1752   :  { %8742 = vsyncpa [#allocation29], 1 }
0x1753   :  { %8743 = vsyncpa [#allocation32], 1 }

</bundles_post_ra>
